<compile_context>
chip_gen: v7x
topology: tpu7x:2x2x1
jax: 0.10.0
libtpu: 0.0.40
codegen_flags: <defaults>
</compile_context>

<pallas_src>
from functools import partial

import numpy as np
import jax
import jax.numpy as jnp
from jax import lax
from jax.experimental import pallas as pl
from jax.experimental.pallas import tpu as pltpu


def _nearest_32(n):
    return ((n + 31) // 32) * 32


# --------------------------------------------------------------------------------------
# Pallas kernel: fused QKV -> rotary -> in-place KV-cache row update -> GQA attention -> WO
# --------------------------------------------------------------------------------------
def _mistral_attn_kernel(scalar_ref,                      # SMEM (2,) int32: [pos, layer_slice]
                         x_ref,                           # VMEM (B, hidden) f32
                         wqkv_ref,                        # VMEM (hidden, (H+2G)*D) bf16
                         rot_ref,                         # VMEM (D, D) bf16
                         wo_ref,                          # VMEM (H*D, hidden) bf16
                         kc_in, vc_in,                    # HBM  (G, S, B, D) f32 (aliased)
                         out_ref,                         # VMEM (B, hidden) f32
                         kc_out, vc_out,                  # HBM  (G, S, B, D) f32 (aliased to inputs)
                         k_vmem, v_vmem,                  # VMEM (G, S, B, D) f32 scratch
                         q_scr,                           # VMEM (B, H, D) f32 scratch
                         knew, vnew,                      # VMEM (G, 1, B, D) f32 scratch
                         dense,                           # VMEM (B, H*D) f32 scratch
                         sem,                             # DMA semaphores (4,)
                         *, n_heads, n_kv_heads, head_dim):
    H, G, D = n_heads, n_kv_heads, head_dim
    rep = H // G
    B = x_ref.shape[0]
    S = k_vmem.shape[1]
    scale = float(D) ** -0.5

    pos = scalar_ref[0]
    layer_slice = scalar_ref[1]

    # 1) start pulling the KV cache HBM -> VMEM (overlaps with the QKV/rotary compute).
    # TODO(synk): at production kv_seq_len, tile the S axis (online softmax, double-buffered
    #             DMAs) instead of one full-cache read; toy S=64 fits a single block.
    k_rd = pltpu.make_async_copy(kc_in, k_vmem, sem.at[0])
    v_rd = pltpu.make_async_copy(vc_in, v_vmem, sem.at[1])
    k_rd.start()
    v_rd.start()

    # 2) fused QKV projection on the MXU (bf16 x bf16 -> f32 accumulate).
    xqkv = jnp.dot(x_ref[...].astype(jnp.bfloat16), wqkv_ref[...],
                   preferred_element_type=jnp.float32)            # (B, (H+2G)*D)
    rot = rot_ref[...].astype(jnp.float32)                        # (D, D)

    # 3) rotary on Q and K; stage Q per head into (B, H, D) and the new K/V rows into
    #    (G, 1, B, D) staging buffers for the cache-row write DMA.
    # TODO(synk): at production H, batch the rotary as one (B*H, D) @ (D, D) matmul (or
    #             rotate-half via pltpu.roll) instead of H+G small matmuls.
    for h in range(H):
        q_h = jnp.dot(xqkv[:, h * D:(h + 1) * D], rot,
                      preferred_element_type=jnp.float32)         # (B, D)
        q_scr[:, h:h + 1, :] = q_h[:, None, :]
    for g in range(G):
        k_g = jnp.dot(xqkv[:, (H + g) * D:(H + g + 1) * D], rot,
                      preferred_element_type=jnp.float32)         # (B, D), rotary on K
        v_g = xqkv[:, (H + G + g) * D:(H + G + g + 1) * D]        # (B, D), V is not rotated
        knew[g, 0, :, :] = k_g
        vnew[g, 0, :, :] = v_g

    # 4) wait for the cache read and patch the current row in the VMEM copy so attention
    #    sees the freshly written token.
    k_rd.wait()
    v_rd.wait()
    k_vmem[:, pl.ds(pos, 1), :, :] = knew[...]
    v_vmem[:, pl.ds(pos, 1), :, :] = vnew[...]

    # 5) in-place cache update: DMA only the new row at `pos` back to HBM.  The cache is
    #    aliased input->output so the rest of it is never touched or copied.
    # TODO(synk): real sliding-window decode needs circular indexing (pos % sliding_window);
    #             the TT module also writes at current_pos directly, which we mirror.
    k_wr = pltpu.make_async_copy(knew, kc_out.at[:, pl.ds(pos, 1), :, :], sem.at[2])
    v_wr = pltpu.make_async_copy(vnew, vc_out.at[:, pl.ds(pos, 1), :, :], sem.at[3])
    k_wr.start()
    v_wr.start()

    # 6) GQA attention.  Masking positions >= layer_slice with a large negative constant is
    #    equivalent to the original slice-to-layer_slice-then-softmax.
    kv_idx = lax.broadcasted_iota(jnp.int32, (1, S), 1)
    valid = kv_idx < layer_slice
    neg_big = -1e30

    for g in range(G):                       # outer loop over kv-groups (keys/vals read once)
        for b in range(B):                   # batch is tiny in decode -> plain 2-D MXU matmuls
            q_bg = q_scr[b, g * rep:(g + 1) * rep, :]             # (rep, D)
            k_bg = k_vmem[g, :, b:b + 1, :][:, 0, :]              # (S, D)
            v_bg = v_vmem[g, :, b:b + 1, :][:, 0, :]              # (S, D)

            # scores = Q_g @ K_g^T on the MXU
            s_bg = lax.dot_general(q_bg, k_bg, (((1,), (1,)), ((), ())),
                                   preferred_element_type=jnp.float32) * scale    # (rep, S)
            s_bg = jnp.where(valid, s_bg, neg_big)

            m = jnp.max(s_bg, axis=-1, keepdims=True)
            p = jnp.exp(s_bg - m)
            p = p * pl.reciprocal(jnp.sum(p, axis=-1, keepdims=True), approx=True)

            # context = P @ V_g on the MXU
            ctx = jnp.dot(p, v_bg, preferred_element_type=jnp.float32)            # (rep, D)

            for r in range(rep):
                h = g * rep + r
                dense[b:b + 1, h * D:(h + 1) * D] = ctx[r:r + 1, :]

    # 7) concatenate_heads + WO as a single (B, H*D) @ (H*D, hidden) MXU matmul.
    out_ref[...] = jnp.dot(dense[...].astype(jnp.bfloat16), wo_ref[...],
                           preferred_element_type=jnp.float32)

    # 8) the cache-row writeback must land before the kernel exits.
    k_wr.wait()
    v_wr.wait()


@partial(jax.jit, static_argnames=("n_heads", "n_kv_heads", "head_dim"),
         donate_argnums=(5, 6))
def mistral_attention_step(scalars, x2d, wqkv, rot, wo, kcache, vcache,
                           *, n_heads, n_kv_heads, head_dim):
    B, hidden = x2d.shape
    kernel = partial(_mistral_attn_kernel,
                     n_heads=n_heads, n_kv_heads=n_kv_heads, head_dim=head_dim)

    out_shapes = (
        jax.ShapeDtypeStruct((B, hidden), jnp.float32),
        jax.ShapeDtypeStruct(kcache.shape, kcache.dtype),
        jax.ShapeDtypeStruct(vcache.shape, vcache.dtype),
    )

    return pl.pallas_call(
        kernel,
        out_shape=out_shapes,
        grid=(1,),
        in_specs=[
            pl.BlockSpec(memory_space=pltpu.MemorySpace.SMEM),   # [pos, layer_slice]
            pl.BlockSpec(x2d.shape, lambda i: (0, 0)),
            pl.BlockSpec(wqkv.shape, lambda i: (0, 0)),
            pl.BlockSpec(rot.shape, lambda i: (0, 0)),
            pl.BlockSpec(wo.shape, lambda i: (0, 0)),
            pl.BlockSpec(memory_space=pl.ANY),                   # K cache, stays in HBM
            pl.BlockSpec(memory_space=pl.ANY),                   # V cache, stays in HBM
        ],
        out_specs=[
            pl.BlockSpec((B, hidden), lambda i: (0, 0)),
            pl.BlockSpec(memory_space=pl.ANY),                   # K cache (aliased, in-place)
            pl.BlockSpec(memory_space=pl.ANY),                   # V cache (aliased, in-place)
        ],
        scratch_shapes=[
            pltpu.VMEM(kcache.shape, kcache.dtype),              # k_vmem
            pltpu.VMEM(vcache.shape, vcache.dtype),              # v_vmem
            pltpu.VMEM((B, n_heads, head_dim), jnp.float32),     # q_scr
            pltpu.VMEM((n_kv_heads, 1, B, head_dim), jnp.float32),  # knew
            pltpu.VMEM((n_kv_heads, 1, B, head_dim), jnp.float32),  # vnew
            pltpu.VMEM((B, n_heads * head_dim), jnp.float32),    # dense (concat heads)
            pltpu.SemaphoreType.DMA((4,)),
        ],
        input_output_aliases={5: 1, 6: 2},                       # cache updated in place
        compiler_params=pltpu.CompilerParams(
            dimension_semantics=("arbitrary",)),
        # TODO(synk): on v7x, shard batch/kv-groups over a "parallel" grid axis for 2 TCs.
    )(scalars, x2d, wqkv, rot, wo, kcache, vcache)


# --------------------------------------------------------------------------------------
# Module wrapper (mirrors TtMistralAttention, single device, synthetic weights)
# --------------------------------------------------------------------------------------
def _make_rot_mats(n_pos, D):
    # rotate-half style rotary embedding expressed as a (D, D) matrix per position (x @ R)
    mats = np.zeros((n_pos, D, D), dtype=np.float32)
    half = D // 2
    inv_freq = 1.0 / (10000.0 ** (np.arange(half, dtype=np.float32) / half))
    for p in range(n_pos):
        theta = p * inv_freq
        c, s = np.cos(theta), np.sin(theta)
        for i in range(half):
            mats[p, i, i] = c[i]
            mats[p, half + i, half + i] = c[i]
            mats[p, i, half + i] = s[i]
            mats[p, half + i, i] = -s[i]
    return jnp.asarray(mats)


class TtMistralAttentionPallas:
    def __init__(self, key, *, dim=512, n_heads=4, n_kv_heads=2,
                 max_batch_size=4, kv_seq_len=64, sliding_window=64,
                 max_seq_len=64, start_pos=0):
        self.hidden_size = dim
        self.n_heads = n_heads
        self.n_kv_heads = n_kv_heads
        self.head_dim = dim // n_heads
        self.max_batch_size = max_batch_size
        self.kv_seq_len = kv_seq_len
        self.sliding_window = sliding_window
        self.start_pos = start_pos
        D = self.head_dim

        k1, k2, k3, k4 = jax.random.split(key, 4)
        # torch nn.Linear weights are (out_features, in_features); module stores them transposed.
        wq = jax.random.normal(k1, (n_heads * D, dim), jnp.float32) * 0.02
        wk = jax.random.normal(k2, (n_kv_heads * D, dim), jnp.float32) * 0.02
        wv = jax.random.normal(k3, (n_kv_heads * D, dim), jnp.float32) * 0.02
        wo = jax.random.normal(k4, (dim, n_heads * D), jnp.float32) * 0.02
        self.wqkv = jnp.concatenate([wq.T, wk.T, wv.T], axis=-1).astype(jnp.bfloat16)
        self.wo = wo.T.astype(jnp.bfloat16)                      # (H*D, dim)
        self.rot_mat = _make_rot_mats(max_seq_len, D).astype(jnp.bfloat16)

        # KV cache lives in HBM with layout (G, S, B, D) so the per-token row update is a
        # DMA on a non-minor dimension; corresponds to the module's (B, G, S, D) transposed.
        # TODO(synk): use bf16 cache at production sizes (kept f32 here for the toy check).
        self.kcache = jnp.zeros((n_kv_heads, kv_seq_len, max_batch_size, D), jnp.float32)
        self.vcache = jnp.zeros_like(self.kcache)

    def forward(self, xs, current_pos):
        # xs: (seq_len=1, 1, batch, hidden)
        self.start_pos += 1
        # padded_layer_past_len is subsumed by the in-kernel mask at `layer_slice`
        _ = min(_nearest_32(self.start_pos), self.sliding_window)
        layer_slice = min(self.start_pos + 1, self.sliding_window)

        x2d = xs.reshape(self.max_batch_size, self.hidden_size)
        scalars = jnp.array([current_pos, layer_slice], dtype=jnp.int32)
        out2d, self.kcache, self.vcache = mistral_attention_step(
            scalars, x2d, self.wqkv, self.rot_mat[current_pos], self.wo,
            self.kcache, self.vcache,
            n_heads=self.n_heads, n_kv_heads=self.n_kv_heads, head_dim=self.head_dim)
        # single-device: return list with one tensor (mirrors dense_outputs)
        return [out2d.reshape(1, 1, self.max_batch_size, self.hidden_size)]


# --------------------------------------------------------------------------------------
# Pure-JAX reference (conventional (B, G, S, D) cache layout) for correctness check
# --------------------------------------------------------------------------------------
def reference_step(x2d, wqkv, rot, wo, kcache, vcache, pos, layer_slice, H, G, D):
    B = x2d.shape[0]
    xqkv = jnp.dot(x2d.astype(jnp.bfloat16), wqkv, preferred_element_type=jnp.float32)
    rot_f = rot.astype(jnp.float32)
    q = xqkv[:, :H * D].reshape(B, H, D)
    k = xqkv[:, H * D:(H + G) * D].reshape(B, G, D)
    v = xqkv[:, (H + G) * D:].reshape(B, G, D)
    q = jnp.einsum('bhd,de->bhe', q, rot_f)
    k = jnp.einsum('bgd,de->bge', k, rot_f)
    kcache = kcache.at[:, :, pos, :].set(k)
    vcache = vcache.at[:, :, pos, :].set(v)
    rep = H // G
    keys = jnp.repeat(kcache, rep, axis=1)
    vals = jnp.repeat(vcache, rep, axis=1)
    scores = jnp.einsum('bhd,bhsd->bhs', q, keys) * (D ** -0.5)
    S = kcache.shape[2]
    mask = jnp.arange(S) < layer_slice
    scores = jnp.where(mask[None, None, :], scores, -1e30)
    p = jax.nn.softmax(scores, axis=-1)
    ctx = jnp.einsum('bhs,bhsd->bhd', p, vals).reshape(B, H * D)
    out = jnp.dot(ctx.astype(jnp.bfloat16), wo, preferred_element_type=jnp.float32)
    return out, kcache, vcache


if __name__ == "__main__":
    key = jax.random.PRNGKey(0)
    B, dim, H, G, S = 4, 512, 4, 2, 64
    attn = TtMistralAttentionPallas(key, dim=dim, n_heads=H, n_kv_heads=G,
                                    max_batch_size=B, kv_seq_len=S,
                                    sliding_window=S, max_seq_len=S, start_pos=0)
    D = attn.head_dim

    ref_k = jnp.zeros((B, G, S, D), jnp.float32)
    ref_v = jnp.zeros_like(ref_k)
    xkey = jax.random.PRNGKey(1)
    max_err = 0.0
    out = None
    for pos in range(6):  # several decode steps to exercise the in-place KV cache path
        xkey, sk = jax.random.split(xkey)
        x = jax.random.normal(sk, (1, 1, B, dim), dtype=jnp.float32)
        out = attn.forward(x, pos)[0]
        layer_slice = min(attn.start_pos + 1, attn.sliding_window)  # same value forward() used
        ref_out, ref_k, ref_v = reference_step(
            x.reshape(B, dim), attn.wqkv, attn.rot_mat[pos], attn.wo,
            ref_k, ref_v, pos, layer_slice, H, G, D)
        err = float(jnp.max(jnp.abs(out.reshape(B, dim) - ref_out)))
        max_err = max(max_err, err)

    # validate the in-place cache updates too (kernel layout (G,S,B,D) -> module (B,G,S,D))
    k_err = float(jnp.max(jnp.abs(jnp.transpose(attn.kcache, (2, 0, 1, 3)) - ref_k)))
    v_err = float(jnp.max(jnp.abs(jnp.transpose(attn.vcache, (2, 0, 1, 3)) - ref_v)))

    jax.block_until_ready(out)
    assert out.shape == (1, 1, B, dim)
    assert max_err < 2e-2, f"output mismatch vs reference, max abs err = {max_err}"
    assert max(k_err, v_err) < 1e-2, f"KV-cache mismatch vs reference: {k_err}, {v_err}"
    print("KERNEL_OK")
</pallas_src>

<mosaic_0001>
module attributes {stable_mosaic.version = 11 : i64} {
  func.func @_mistral_attn_kernel(%arg0: i32, %arg1: memref<2xi32, #tpu.memory_space<smem>>, %arg2: memref<4x512xf32, #tpu.memory_space<vmem>>, %arg3: memref<512x1024xbf16, #tpu.memory_space<vmem>>, %arg4: memref<128x128xbf16, #tpu.memory_space<vmem>>, %arg5: memref<512x512xbf16, #tpu.memory_space<vmem>>, %arg6: memref<2x64x4x128xf32, #tpu.memory_space<any>>, %arg7: memref<2x64x4x128xf32, #tpu.memory_space<any>>, %arg8: memref<4x512xf32, #tpu.memory_space<vmem>>, %arg9: memref<2x64x4x128xf32, #tpu.memory_space<any>>, %arg10: memref<2x64x4x128xf32, #tpu.memory_space<any>>, %arg11: memref<2x64x4x128xf32, #tpu.memory_space<vmem>>, %arg12: memref<2x64x4x128xf32, #tpu.memory_space<vmem>>, %arg13: memref<4x4x128xf32, #tpu.memory_space<vmem>>, %arg14: memref<2x1x4x128xf32, #tpu.memory_space<vmem>>, %arg15: memref<2x1x4x128xf32, #tpu.memory_space<vmem>>, %arg16: memref<4x512xf32, #tpu.memory_space<vmem>>, %arg17: memref<4x!tpu.dma_semaphore, #tpu.memory_space<semaphore_mem>>) attributes {dimension_semantics = [#tpu.dimension_semantics<arbitrary>], iteration_bounds = array<i64: 1>, scalar_prefetch = 0 : i64, scratch_operands = 7 : i64, tpu.core_type = #tpu.core_type<tc>, window_params = [{transform_indices = @transform_0, window_bounds = array<i64: 2>}, {pipeline_mode = #tpu.pipeline_mode<synchronous>, transform_indices = @transform_1, window_bounds = array<i64: 4, 512>}, {pipeline_mode = #tpu.pipeline_mode<synchronous>, transform_indices = @transform_2, window_bounds = array<i64: 512, 1024>}, {pipeline_mode = #tpu.pipeline_mode<synchronous>, transform_indices = @transform_3, window_bounds = array<i64: 128, 128>}, {pipeline_mode = #tpu.pipeline_mode<synchronous>, transform_indices = @transform_4, window_bounds = array<i64: 512, 512>}, {}, {}, {pipeline_mode = #tpu.pipeline_mode<synchronous>, transform_indices = @transform_7, window_bounds = array<i64: 4, 512>}, {}, {}]} {
    %c0 = arith.constant 0 : index
    %0 = memref.load %arg1[%c0] : memref<2xi32, #tpu.memory_space<smem>>
    %c1 = arith.constant 1 : index
    %1 = memref.load %arg1[%c1] : memref<2xi32, #tpu.memory_space<smem>>
    %c0_i32 = arith.constant 0 : i32
    %2 = tpu.memref_slice %arg17[%c0_i32] : memref<4x!tpu.dma_semaphore, #tpu.memory_space<semaphore_mem>> -> memref<1x!tpu.dma_semaphore, #tpu.memory_space<semaphore_mem>>
    %3 = tpu.memref_squeeze %2 : memref<1x!tpu.dma_semaphore, #tpu.memory_space<semaphore_mem>> -> memref<!tpu.dma_semaphore, #tpu.memory_space<semaphore_mem>>
    tpu.enqueue_dma source(%arg6 : memref<2x64x4x128xf32, #tpu.memory_space<any>>) target(%arg11 : memref<2x64x4x128xf32, #tpu.memory_space<vmem>>) target_semaphore(%3 : memref<!tpu.dma_semaphore, #tpu.memory_space<semaphore_mem>>)
    %c1_i32 = arith.constant 1 : i32
    %4 = tpu.memref_slice %arg17[%c1_i32] : memref<4x!tpu.dma_semaphore, #tpu.memory_space<semaphore_mem>> -> memref<1x!tpu.dma_semaphore, #tpu.memory_space<semaphore_mem>>
    %5 = tpu.memref_squeeze %4 : memref<1x!tpu.dma_semaphore, #tpu.memory_space<semaphore_mem>> -> memref<!tpu.dma_semaphore, #tpu.memory_space<semaphore_mem>>
    tpu.enqueue_dma source(%arg7 : memref<2x64x4x128xf32, #tpu.memory_space<any>>) target(%arg12 : memref<2x64x4x128xf32, #tpu.memory_space<vmem>>) target_semaphore(%5 : memref<!tpu.dma_semaphore, #tpu.memory_space<semaphore_mem>>)
    %c0_0 = arith.constant 0 : index
    %c0_1 = arith.constant 0 : index
    %6 = vector.load %arg2[%c0_0, %c0_1] : memref<4x512xf32, #tpu.memory_space<vmem>>, vector<4x512xf32>
    %7 = arith.truncf %6 : vector<4x512xf32> to vector<4x512xbf16>
    %c0_2 = arith.constant 0 : index
    %c0_3 = arith.constant 0 : index
    %8 = vector.load %arg3[%c0_2, %c0_3] : memref<512x1024xbf16, #tpu.memory_space<vmem>>, vector<512x1024xbf16>
    %cst = arith.constant dense<0.000000e+00> : vector<4x1024xf32>
    %9 = tpu.matmul %7, %8, %cst {dimension_numbers = #tpu.dot_dimension_numbers<[1], [0], [0], [1], [0, 0, 1, 1], [], []>} : vector<4x512xbf16>, vector<512x1024xbf16>, vector<4x1024xf32> -> vector<4x1024xf32>
    %c0_4 = arith.constant 0 : index
    %c0_5 = arith.constant 0 : index
    %10 = vector.load %arg4[%c0_4, %c0_5] : memref<128x128xbf16, #tpu.memory_space<vmem>>, vector<128x128xbf16>
    %11 = arith.extf %10 : vector<128x128xbf16> to vector<128x128xf32>
    %12 = vector.extract_strided_slice %9 {offsets = [0, 0], sizes = [4, 128], strides = [1, 1]} : vector<4x1024xf32> to vector<4x128xf32>
    %cst_6 = arith.constant dense<0.000000e+00> : vector<4x128xf32>
    %13 = tpu.matmul %12, %11, %cst_6 {dimension_numbers = #tpu.dot_dimension_numbers<[1], [0], [0], [1], [0, 0, 1, 1], [], []>} : vector<4x128xf32>, vector<128x128xf32>, vector<4x128xf32> -> vector<4x128xf32>
    %14 = vector.shape_cast %13 : vector<4x128xf32> to vector<4x1x128xf32>
    %c0_7 = arith.constant 0 : index
    %c0_8 = arith.constant 0 : index
    %c0_9 = arith.constant 0 : index
    %15 = vector.load %arg13[%c0_7, %c0_8, %c0_9] : memref<4x4x128xf32, #tpu.memory_space<vmem>>, vector<4x1x128xf32>
    tpu.vector_store %arg13[%c0_7, %c0_8, %c0_9], %14 {strides = array<i32>} : memref<4x4x128xf32, #tpu.memory_space<vmem>>, vector<4x1x128xf32>,
    %16 = vector.extract_strided_slice %9 {offsets = [0, 128], sizes = [4, 128], strides = [1, 1]} : vector<4x1024xf32> to vector<4x128xf32>
    %cst_10 = arith.constant dense<0.000000e+00> : vector<4x128xf32>
    %17 = tpu.matmul %16, %11, %cst_10 {dimension_numbers = #tpu.dot_dimension_numbers<[1], [0], [0], [1], [0, 0, 1, 1], [], []>} : vector<4x128xf32>, vector<128x128xf32>, vector<4x128xf32> -> vector<4x128xf32>
    %18 = vector.shape_cast %17 : vector<4x128xf32> to vector<4x1x128xf32>
    %c0_11 = arith.constant 0 : index
    %c1_12 = arith.constant 1 : index
    %c0_13 = arith.constant 0 : index
    %19 = vector.load %arg13[%c0_11, %c1_12, %c0_13] : memref<4x4x128xf32, #tpu.memory_space<vmem>>, vector<4x1x128xf32>
    tpu.vector_store %arg13[%c0_11, %c1_12, %c0_13], %18 {strides = array<i32>} : memref<4x4x128xf32, #tpu.memory_space<vmem>>, vector<4x1x128xf32>,
    %20 = vector.extract_strided_slice %9 {offsets = [0, 256], sizes = [4, 128], strides = [1, 1]} : vector<4x1024xf32> to vector<4x128xf32>
    %cst_14 = arith.constant dense<0.000000e+00> : vector<4x128xf32>
    %21 = tpu.matmul %20, %11, %cst_14 {dimension_numbers = #tpu.dot_dimension_numbers<[1], [0], [0], [1], [0, 0, 1, 1], [], []>} : vector<4x128xf32>, vector<128x128xf32>, vector<4x128xf32> -> vector<4x128xf32>
    %22 = vector.shape_cast %21 : vector<4x128xf32> to vector<4x1x128xf32>
    %c0_15 = arith.constant 0 : index
    %c2 = arith.constant 2 : index
    %c0_16 = arith.constant 0 : index
    %23 = vector.load %arg13[%c0_15, %c2, %c0_16] : memref<4x4x128xf32, #tpu.memory_space<vmem>>, vector<4x1x128xf32>
    tpu.vector_store %arg13[%c0_15, %c2, %c0_16], %22 {strides = array<i32>} : memref<4x4x128xf32, #tpu.memory_space<vmem>>, vector<4x1x128xf32>,
    %24 = vector.extract_strided_slice %9 {offsets = [0, 384], sizes = [4, 128], strides = [1, 1]} : vector<4x1024xf32> to vector<4x128xf32>
    %cst_17 = arith.constant dense<0.000000e+00> : vector<4x128xf32>
    %25 = tpu.matmul %24, %11, %cst_17 {dimension_numbers = #tpu.dot_dimension_numbers<[1], [0], [0], [1], [0, 0, 1, 1], [], []>} : vector<4x128xf32>, vector<128x128xf32>, vector<4x128xf32> -> vector<4x128xf32>
    %26 = vector.shape_cast %25 : vector<4x128xf32> to vector<4x1x128xf32>
    %c0_18 = arith.constant 0 : index
    %c3 = arith.constant 3 : index
    %c0_19 = arith.constant 0 : index
    %27 = vector.load %arg13[%c0_18, %c3, %c0_19] : memref<4x4x128xf32, #tpu.memory_space<vmem>>, vector<4x1x128xf32>
    tpu.vector_store %arg13[%c0_18, %c3, %c0_19], %26 {strides = array<i32>} : memref<4x4x128xf32, #tpu.memory_space<vmem>>, vector<4x1x128xf32>,
    %28 = vector.extract_strided_slice %9 {offsets = [0, 512], sizes = [4, 128], strides = [1, 1]} : vector<4x1024xf32> to vector<4x128xf32>
    %cst_20 = arith.constant dense<0.000000e+00> : vector<4x128xf32>
    %29 = tpu.matmul %28, %11, %cst_20 {dimension_numbers = #tpu.dot_dimension_numbers<[1], [0], [0], [1], [0, 0, 1, 1], [], []>} : vector<4x128xf32>, vector<128x128xf32>, vector<4x128xf32> -> vector<4x128xf32>
    %30 = vector.extract_strided_slice %9 {offsets = [0, 768], sizes = [4, 128], strides = [1, 1]} : vector<4x1024xf32> to vector<4x128xf32>
    %c0_21 = arith.constant 0 : index
    %c0_22 = arith.constant 0 : index
    %c0_23 = arith.constant 0 : index
    %c0_24 = arith.constant 0 : index
    %31 = vector.load %arg14[%c0_21, %c0_22, %c0_23, %c0_24] : memref<2x1x4x128xf32, #tpu.memory_space<vmem>>, vector<1x1x4x128xf32>
    %32 = vector.shape_cast %31 : vector<1x1x4x128xf32> to vector<4x128xf32>
    %33 = vector.shape_cast %29 : vector<4x128xf32> to vector<1x1x4x128xf32>
    tpu.vector_store %arg14[%c0_21, %c0_22, %c0_23, %c0_24], %33 {strides = array<i32>} : memref<2x1x4x128xf32, #tpu.memory_space<vmem>>, vector<1x1x4x128xf32>,
    %c0_25 = arith.constant 0 : index
    %c0_26 = arith.constant 0 : index
    %c0_27 = arith.constant 0 : index
    %c0_28 = arith.constant 0 : index
    %34 = vector.load %arg15[%c0_25, %c0_26, %c0_27, %c0_28] : memref<2x1x4x128xf32, #tpu.memory_space<vmem>>, vector<1x1x4x128xf32>
    %35 = vector.shape_cast %34 : vector<1x1x4x128xf32> to vector<4x128xf32>
    %36 = vector.shape_cast %30 : vector<4x128xf32> to vector<1x1x4x128xf32>
    tpu.vector_store %arg15[%c0_25, %c0_26, %c0_27, %c0_28], %36 {strides = array<i32>} : memref<2x1x4x128xf32, #tpu.memory_space<vmem>>, vector<1x1x4x128xf32>,
    %37 = vector.extract_strided_slice %9 {offsets = [0, 640], sizes = [4, 128], strides = [1, 1]} : vector<4x1024xf32> to vector<4x128xf32>
    %cst_29 = arith.constant dense<0.000000e+00> : vector<4x128xf32>
    %38 = tpu.matmul %37, %11, %cst_29 {dimension_numbers = #tpu.dot_dimension_numbers<[1], [0], [0], [1], [0, 0, 1, 1], [], []>} : vector<4x128xf32>, vector<128x128xf32>, vector<4x128xf32> -> vector<4x128xf32>
    %39 = vector.extract_strided_slice %9 {offsets = [0, 896], sizes = [4, 128], strides = [1, 1]} : vector<4x1024xf32> to vector<4x128xf32>
    %c1_30 = arith.constant 1 : index
    %c0_31 = arith.constant 0 : index
    %c0_32 = arith.constant 0 : index
    %c0_33 = arith.constant 0 : index
    %40 = vector.load %arg14[%c1_30, %c0_31, %c0_32, %c0_33] : memref<2x1x4x128xf32, #tpu.memory_space<vmem>>, vector<1x1x4x128xf32>
    %41 = vector.shape_cast %40 : vector<1x1x4x128xf32> to vector<4x128xf32>
    %42 = vector.shape_cast %38 : vector<4x128xf32> to vector<1x1x4x128xf32>
    tpu.vector_store %arg14[%c1_30, %c0_31, %c0_32, %c0_33], %42 {strides = array<i32>} : memref<2x1x4x128xf32, #tpu.memory_space<vmem>>, vector<1x1x4x128xf32>,
    %c1_34 = arith.constant 1 : index
    %c0_35 = arith.constant 0 : index
    %c0_36 = arith.constant 0 : index
    %c0_37 = arith.constant 0 : index
    %43 = vector.load %arg15[%c1_34, %c0_35, %c0_36, %c0_37] : memref<2x1x4x128xf32, #tpu.memory_space<vmem>>, vector<1x1x4x128xf32>
    %44 = vector.shape_cast %43 : vector<1x1x4x128xf32> to vector<4x128xf32>
    %45 = vector.shape_cast %39 : vector<4x128xf32> to vector<1x1x4x128xf32>
    tpu.vector_store %arg15[%c1_34, %c0_35, %c0_36, %c0_37], %45 {strides = array<i32>} : memref<2x1x4x128xf32, #tpu.memory_space<vmem>>, vector<1x1x4x128xf32>,
    %c0_i32_38 = arith.constant 0 : i32
    %46 = tpu.memref_slice %arg17[%c0_i32_38] : memref<4x!tpu.dma_semaphore, #tpu.memory_space<semaphore_mem>> -> memref<1x!tpu.dma_semaphore, #tpu.memory_space<semaphore_mem>>
    %47 = tpu.memref_squeeze %46 : memref<1x!tpu.dma_semaphore, #tpu.memory_space<semaphore_mem>> -> memref<!tpu.dma_semaphore, #tpu.memory_space<semaphore_mem>>
    tpu.wait_dma2 semaphore(%47 : memref<!tpu.dma_semaphore, #tpu.memory_space<semaphore_mem>>) src(%arg6 : memref<2x64x4x128xf32, #tpu.memory_space<any>>) dst(%arg11 : memref<2x64x4x128xf32, #tpu.memory_space<vmem>>)
    %c1_i32_39 = arith.constant 1 : i32
    %48 = tpu.memref_slice %arg17[%c1_i32_39] : memref<4x!tpu.dma_semaphore, #tpu.memory_space<semaphore_mem>> -> memref<1x!tpu.dma_semaphore, #tpu.memory_space<semaphore_mem>>
    %49 = tpu.memref_squeeze %48 : memref<1x!tpu.dma_semaphore, #tpu.memory_space<semaphore_mem>> -> memref<!tpu.dma_semaphore, #tpu.memory_space<semaphore_mem>>
    tpu.wait_dma2 semaphore(%49 : memref<!tpu.dma_semaphore, #tpu.memory_space<semaphore_mem>>) src(%arg7 : memref<2x64x4x128xf32, #tpu.memory_space<any>>) dst(%arg12 : memref<2x64x4x128xf32, #tpu.memory_space<vmem>>)
    %c0_40 = arith.constant 0 : index
    %c0_41 = arith.constant 0 : index
    %c0_42 = arith.constant 0 : index
    %c0_43 = arith.constant 0 : index
    %50 = vector.load %arg14[%c0_40, %c0_41, %c0_42, %c0_43] : memref<2x1x4x128xf32, #tpu.memory_space<vmem>>, vector<2x1x4x128xf32>
    %c0_44 = arith.constant 0 : index
    %51 = arith.index_cast %0 : i32 to index
    %c0_45 = arith.constant 0 : index
    %c0_46 = arith.constant 0 : index
    %52 = vector.load %arg11[%c0_44, %51, %c0_45, %c0_46] : memref<2x64x4x128xf32, #tpu.memory_space<vmem>>, vector<2x1x4x128xf32>
    tpu.vector_store %arg11[%c0_44, %51, %c0_45, %c0_46], %50 {strides = array<i32>} : memref<2x64x4x128xf32, #tpu.memory_space<vmem>>, vector<2x1x4x128xf32>,
    %c0_47 = arith.constant 0 : index
    %c0_48 = arith.constant 0 : index
    %c0_49 = arith.constant 0 : index
    %c0_50 = arith.constant 0 : index
    %53 = vector.load %arg15[%c0_47, %c0_48, %c0_49, %c0_50] : memref<2x1x4x128xf32, #tpu.memory_space<vmem>>, vector<2x1x4x128xf32>
    %c0_51 = arith.constant 0 : index
    %54 = arith.index_cast %0 : i32 to index
    %c0_52 = arith.constant 0 : index
    %c0_53 = arith.constant 0 : index
    %55 = vector.load %arg12[%c0_51, %54, %c0_52, %c0_53] : memref<2x64x4x128xf32, #tpu.memory_space<vmem>>, vector<2x1x4x128xf32>
    tpu.vector_store %arg12[%c0_51, %54, %c0_52, %c0_53], %53 {strides = array<i32>} : memref<2x64x4x128xf32, #tpu.memory_space<vmem>>, vector<2x1x4x128xf32>,
    %c2_i32 = arith.constant 2 : i32
    %c0_i32_54 = arith.constant 0 : i32
    %c0_i32_55 = arith.constant 0 : i32
    %c0_i32_56 = arith.constant 0 : i32
    %56 = tpu.memref_slice %arg9[%c0_i32_54, %0, %c0_i32_55, %c0_i32_56] : memref<2x64x4x128xf32, #tpu.memory_space<any>> -> memref<2x1x4x128xf32, #tpu.memory_space<any>>
    %57 = tpu.memref_slice %arg17[%c2_i32] : memref<4x!tpu.dma_semaphore, #tpu.memory_space<semaphore_mem>> -> memref<1x!tpu.dma_semaphore, #tpu.memory_space<semaphore_mem>>
    %58 = tpu.memref_squeeze %57 : memref<1x!tpu.dma_semaphore, #tpu.memory_space<semaphore_mem>> -> memref<!tpu.dma_semaphore, #tpu.memory_space<semaphore_mem>>
    tpu.enqueue_dma source(%arg14 : memref<2x1x4x128xf32, #tpu.memory_space<vmem>>) target(%56 : memref<2x1x4x128xf32, #tpu.memory_space<any>>) target_semaphore(%58 : memref<!tpu.dma_semaphore, #tpu.memory_space<semaphore_mem>>)
    %c3_i32 = arith.constant 3 : i32
    %c0_i32_57 = arith.constant 0 : i32
    %c0_i32_58 = arith.constant 0 : i32
    %c0_i32_59 = arith.constant 0 : i32
    %59 = tpu.memref_slice %arg10[%c0_i32_57, %0, %c0_i32_58, %c0_i32_59] : memref<2x64x4x128xf32, #tpu.memory_space<any>> -> memref<2x1x4x128xf32, #tpu.memory_space<any>>
    %60 = tpu.memref_slice %arg17[%c3_i32] : memref<4x!tpu.dma_semaphore, #tpu.memory_space<semaphore_mem>> -> memref<1x!tpu.dma_semaphore, #tpu.memory_space<semaphore_mem>>
    %61 = tpu.memref_squeeze %60 : memref<1x!tpu.dma_semaphore, #tpu.memory_space<semaphore_mem>> -> memref<!tpu.dma_semaphore, #tpu.memory_space<semaphore_mem>>
    tpu.enqueue_dma source(%arg15 : memref<2x1x4x128xf32, #tpu.memory_space<vmem>>) target(%59 : memref<2x1x4x128xf32, #tpu.memory_space<any>>) target_semaphore(%61 : memref<!tpu.dma_semaphore, #tpu.memory_space<semaphore_mem>>)
    %62 = tpu.iota {dimensions = array<i32: 1>} : vector<1x64xi32>
    %63 = vector.broadcast %1 : i32 to vector<1x64xi32>
    %64 = arith.cmpi slt, %62, %63 : vector<1x64xi32>
    %c0_60 = arith.constant 0 : index
    %c0_61 = arith.constant 0 : index
    %c0_62 = arith.constant 0 : index
    %65 = vector.load %arg13[%c0_60, %c0_61, %c0_62] : memref<4x4x128xf32, #tpu.memory_space<vmem>>, vector<1x2x128xf32>
    %66 = vector.shape_cast %65 : vector<1x2x128xf32> to vector<2x128xf32>
    %c0_63 = arith.constant 0 : index
    %c0_64 = arith.constant 0 : index
    %c0_65 = arith.constant 0 : index
    %c0_66 = arith.constant 0 : index
    %67 = vector.load %arg11[%c0_63, %c0_64, %c0_65, %c0_66] : memref<2x64x4x128xf32, #tpu.memory_space<vmem>>, vector<1x64x1x128xf32>
    %68 = vector.shape_cast %67 : vector<1x64x1x128xf32> to vector<64x1x128xf32>
    %69 = vector.shape_cast %68 : vector<64x1x128xf32> to vector<64x128xf32>
    %c0_67 = arith.constant 0 : index
    %c0_68 = arith.constant 0 : index
    %c0_69 = arith.constant 0 : index
    %c0_70 = arith.constant 0 : index
    %70 = vector.load %arg12[%c0_67, %c0_68, %c0_69, %c0_70] : memref<2x64x4x128xf32, #tpu.memory_space<vmem>>, vector<1x64x1x128xf32>
    %71 = vector.shape_cast %70 : vector<1x64x1x128xf32> to vector<64x1x128xf32>
    %72 = vector.shape_cast %71 : vector<64x1x128xf32> to vector<64x128xf32>
    %cst_71 = arith.constant dense<0.000000e+00> : vector<2x64xf32>
    %73 = tpu.matmul %66, %69, %cst_71 {dimension_numbers = #tpu.dot_dimension_numbers<[1], [1], [0], [0], [0, 0, 1, 0], [], []>} : vector<2x128xf32>, vector<64x128xf32>, vector<2x64xf32> -> vector<2x64xf32>
    %cst_72 = arith.constant 0.0883883461 : f32
    %74 = vector.broadcast %cst_72 : f32 to vector<2x64xf32>
    %75 = arith.mulf %73, %74 : vector<2x64xf32>
    %cst_73 = arith.constant -1.000000e+30 : f32
    %76 = vector.shape_cast %64 : vector<1x64xi1> to vector<1x64xi1>
    %77 = vector.broadcast %76 : vector<1x64xi1> to vector<2x64xi1>
    %78 = vector.broadcast %cst_73 : f32 to vector<2x64xf32>
    %79 = arith.select %77, %75, %78 : vector<2x64xi1>, vector<2x64xf32>
    %cst_74 = arith.constant dense<0xFF800000> : vector<2xf32>
    %80 = vector.multi_reduction <maximumf>, %79, %cst_74 [1] : vector<2x64xf32> to vector<2xf32>
    %81 = vector.shape_cast %80 : vector<2xf32> to vector<2x1xf32>
    %82 = vector.broadcast %81 : vector<2x1xf32> to vector<2x64xf32>
    %83 = arith.subf %79, %82 : vector<2x64xf32>
    %84 = math.exp %83 : vector<2x64xf32>
    %cst_75 = arith.constant dense<0.000000e+00> : vector<2xf32>
    %85 = vector.multi_reduction <add>, %84, %cst_75 [1] : vector<2x64xf32> to vector<2xf32>
    %86 = vector.shape_cast %85 : vector<2xf32> to vector<2x1xf32>
    %87 = tpu.reciprocal %86 {approx = true} : vector<2x1xf32> -> vector<2x1xf32>
    %88 = vector.broadcast %87 : vector<2x1xf32> to vector<2x64xf32>
    %89 = arith.mulf %84, %88 : vector<2x64xf32>
    %cst_76 = arith.constant dense<0.000000e+00> : vector<2x128xf32>
    %90 = tpu.matmul %89, %72, %cst_76 {dimension_numbers = #tpu.dot_dimension_numbers<[1], [0], [0], [1], [0, 0, 1, 1], [], []>} : vector<2x64xf32>, vector<64x128xf32>, vector<2x128xf32> -> vector<2x128xf32>
    %91 = vector.extract_strided_slice %90 {offsets = [0, 0], sizes = [1, 128], strides = [1, 1]} : vector<2x128xf32> to vector<1x128xf32>
    %c0_77 = arith.constant 0 : index
    %c0_78 = arith.constant 0 : index
    %92 = vector.load %arg16[%c0_77, %c0_78] : memref<4x512xf32, #tpu.memory_space<vmem>>, vector<1x128xf32>
    tpu.vector_store %arg16[%c0_77, %c0_78], %91 {strides = array<i32>} : memref<4x512xf32, #tpu.memory_space<vmem>>, vector<1x128xf32>,
    %93 = vector.extract_strided_slice %90 {offsets = [1, 0], sizes = [1, 128], strides = [1, 1]} : vector<2x128xf32> to vector<1x128xf32>
    %c0_79 = arith.constant 0 : index
    %c128 = arith.constant 128 : index
    %94 = vector.load %arg16[%c0_79, %c128] : memref<4x512xf32, #tpu.memory_space<vmem>>, vector<1x128xf32>
    tpu.vector_store %arg16[%c0_79, %c128], %93 {strides = array<i32>} : memref<4x512xf32, #tpu.memory_space<vmem>>, vector<1x128xf32>,
    %c1_80 = arith.constant 1 : index
    %c0_81 = arith.constant 0 : index
    %c0_82 = arith.constant 0 : index
    %95 = vector.load %arg13[%c1_80, %c0_81, %c0_82] : memref<4x4x128xf32, #tpu.memory_space<vmem>>, vector<1x2x128xf32>
    %96 = vector.shape_cast %95 : vector<1x2x128xf32> to vector<2x128xf32>
    %c0_83 = arith.constant 0 : index
    %c0_84 = arith.constant 0 : index
    %c1_85 = arith.constant 1 : index
    %c0_86 = arith.constant 0 : index
    %97 = vector.load %arg11[%c0_83, %c0_84, %c1_85, %c0_86] : memref<2x64x4x128xf32, #tpu.memory_space<vmem>>, vector<1x64x1x128xf32>
    %98 = vector.shape_cast %97 : vector<1x64x1x128xf32> to vector<64x1x128xf32>
    %99 = vector.shape_cast %98 : vector<64x1x128xf32> to vector<64x128xf32>
    %c0_87 = arith.constant 0 : index
    %c0_88 = arith.constant 0 : index
    %c1_89 = arith.constant 1 : index
    %c0_90 = arith.constant 0 : index
    %100 = vector.load %arg12[%c0_87, %c0_88, %c1_89, %c0_90] : memref<2x64x4x128xf32, #tpu.memory_space<vmem>>, vector<1x64x1x128xf32>
    %101 = vector.shape_cast %100 : vector<1x64x1x128xf32> to vector<64x1x128xf32>
    %102 = vector.shape_cast %101 : vector<64x1x128xf32> to vector<64x128xf32>
    %cst_91 = arith.constant dense<0.000000e+00> : vector<2x64xf32>
    %103 = tpu.matmul %96, %99, %cst_91 {dimension_numbers = #tpu.dot_dimension_numbers<[1], [1], [0], [0], [0, 0, 1, 0], [], []>} : vector<2x128xf32>, vector<64x128xf32>, vector<2x64xf32> -> vector<2x64xf32>
    %cst_92 = arith.constant 0.0883883461 : f32
    %104 = vector.broadcast %cst_92 : f32 to vector<2x64xf32>
    %105 = arith.mulf %103, %104 : vector<2x64xf32>
    %cst_93 = arith.constant -1.000000e+30 : f32
    %106 = vector.shape_cast %64 : vector<1x64xi1> to vector<1x64xi1>
    %107 = vector.broadcast %106 : vector<1x64xi1> to vector<2x64xi1>
    %108 = vector.broadcast %cst_93 : f32 to vector<2x64xf32>
    %109 = arith.select %107, %105, %108 : vector<2x64xi1>, vector<2x64xf32>
    %cst_94 = arith.constant dense<0xFF800000> : vector<2xf32>
    %110 = vector.multi_reduction <maximumf>, %109, %cst_94 [1] : vector<2x64xf32> to vector<2xf32>
    %111 = vector.shape_cast %110 : vector<2xf32> to vector<2x1xf32>
    %112 = vector.broadcast %111 : vector<2x1xf32> to vector<2x64xf32>
    %113 = arith.subf %109, %112 : vector<2x64xf32>
    %114 = math.exp %113 : vector<2x64xf32>
    %cst_95 = arith.constant dense<0.000000e+00> : vector<2xf32>
    %115 = vector.multi_reduction <add>, %114, %cst_95 [1] : vector<2x64xf32> to vector<2xf32>
    %116 = vector.shape_cast %115 : vector<2xf32> to vector<2x1xf32>
    %117 = tpu.reciprocal %116 {approx = true} : vector<2x1xf32> -> vector<2x1xf32>
    %118 = vector.broadcast %117 : vector<2x1xf32> to vector<2x64xf32>
    %119 = arith.mulf %114, %118 : vector<2x64xf32>
    %cst_96 = arith.constant dense<0.000000e+00> : vector<2x128xf32>
    %120 = tpu.matmul %119, %102, %cst_96 {dimension_numbers = #tpu.dot_dimension_numbers<[1], [0], [0], [1], [0, 0, 1, 1], [], []>} : vector<2x64xf32>, vector<64x128xf32>, vector<2x128xf32> -> vector<2x128xf32>
    %121 = vector.extract_strided_slice %120 {offsets = [0, 0], sizes = [1, 128], strides = [1, 1]} : vector<2x128xf32> to vector<1x128xf32>
    %c1_97 = arith.constant 1 : index
    %c0_98 = arith.constant 0 : index
    %122 = vector.load %arg16[%c1_97, %c0_98] : memref<4x512xf32, #tpu.memory_space<vmem>>, vector<1x128xf32>
    tpu.vector_store %arg16[%c1_97, %c0_98], %121 {strides = array<i32>} : memref<4x512xf32, #tpu.memory_space<vmem>>, vector<1x128xf32>,
    %123 = vector.extract_strided_slice %120 {offsets = [1, 0], sizes = [1, 128], strides = [1, 1]} : vector<2x128xf32> to vector<1x128xf32>
    %c1_99 = arith.constant 1 : index
    %c128_100 = arith.constant 128 : index
    %124 = vector.load %arg16[%c1_99, %c128_100] : memref<4x512xf32, #tpu.memory_space<vmem>>, vector<1x128xf32>
    tpu.vector_store %arg16[%c1_99, %c128_100], %123 {strides = array<i32>} : memref<4x512xf32, #tpu.memory_space<vmem>>, vector<1x128xf32>,
    %c2_101 = arith.constant 2 : index
    %c0_102 = arith.constant 0 : index
    %c0_103 = arith.constant 0 : index
    %125 = vector.load %arg13[%c2_101, %c0_102, %c0_103] : memref<4x4x128xf32, #tpu.memory_space<vmem>>, vector<1x2x128xf32>
    %126 = vector.shape_cast %125 : vector<1x2x128xf32> to vector<2x128xf32>
    %c0_104 = arith.constant 0 : index
    %c0_105 = arith.constant 0 : index
    %c2_106 = arith.constant 2 : index
    %c0_107 = arith.constant 0 : index
    %127 = vector.load %arg11[%c0_104, %c0_105, %c2_106, %c0_107] : memref<2x64x4x128xf32, #tpu.memory_space<vmem>>, vector<1x64x1x128xf32>
    %128 = vector.shape_cast %127 : vector<1x64x1x128xf32> to vector<64x1x128xf32>
    %129 = vector.shape_cast %128 : vector<64x1x128xf32> to vector<64x128xf32>
    %c0_108 = arith.constant 0 : index
    %c0_109 = arith.constant 0 : index
    %c2_110 = arith.constant 2 : index
    %c0_111 = arith.constant 0 : index
    %130 = vector.load %arg12[%c0_108, %c0_109, %c2_110, %c0_111] : memref<2x64x4x128xf32, #tpu.memory_space<vmem>>, vector<1x64x1x128xf32>
    %131 = vector.shape_cast %130 : vector<1x64x1x128xf32> to vector<64x1x128xf32>
    %132 = vector.shape_cast %131 : vector<64x1x128xf32> to vector<64x128xf32>
    %cst_112 = arith.constant dense<0.000000e+00> : vector<2x64xf32>
    %133 = tpu.matmul %126, %129, %cst_112 {dimension_numbers = #tpu.dot_dimension_numbers<[1], [1], [0], [0], [0, 0, 1, 0], [], []>} : vector<2x128xf32>, vector<64x128xf32>, vector<2x64xf32> -> vector<2x64xf32>
    %cst_113 = arith.constant 0.0883883461 : f32
    %134 = vector.broadcast %cst_113 : f32 to vector<2x64xf32>
    %135 = arith.mulf %133, %134 : vector<2x64xf32>
    %cst_114 = arith.constant -1.000000e+30 : f32
    %136 = vector.shape_cast %64 : vector<1x64xi1> to vector<1x64xi1>
    %137 = vector.broadcast %136 : vector<1x64xi1> to vector<2x64xi1>
    %138 = vector.broadcast %cst_114 : f32 to vector<2x64xf32>
    %139 = arith.select %137, %135, %138 : vector<2x64xi1>, vector<2x64xf32>
    %cst_115 = arith.constant dense<0xFF800000> : vector<2xf32>
    %140 = vector.multi_reduction <maximumf>, %139, %cst_115 [1] : vector<2x64xf32> to vector<2xf32>
    %141 = vector.shape_cast %140 : vector<2xf32> to vector<2x1xf32>
    %142 = vector.broadcast %141 : vector<2x1xf32> to vector<2x64xf32>
    %143 = arith.subf %139, %142 : vector<2x64xf32>
    %144 = math.exp %143 : vector<2x64xf32>
    %cst_116 = arith.constant dense<0.000000e+00> : vector<2xf32>
    %145 = vector.multi_reduction <add>, %144, %cst_116 [1] : vector<2x64xf32> to vector<2xf32>
    %146 = vector.shape_cast %145 : vector<2xf32> to vector<2x1xf32>
    %147 = tpu.reciprocal %146 {approx = true} : vector<2x1xf32> -> vector<2x1xf32>
    %148 = vector.broadcast %147 : vector<2x1xf32> to vector<2x64xf32>
    %149 = arith.mulf %144, %148 : vector<2x64xf32>
    %cst_117 = arith.constant dense<0.000000e+00> : vector<2x128xf32>
    %150 = tpu.matmul %149, %132, %cst_117 {dimension_numbers = #tpu.dot_dimension_numbers<[1], [0], [0], [1], [0, 0, 1, 1], [], []>} : vector<2x64xf32>, vector<64x128xf32>, vector<2x128xf32> -> vector<2x128xf32>
    %151 = vector.extract_strided_slice %150 {offsets = [0, 0], sizes = [1, 128], strides = [1, 1]} : vector<2x128xf32> to vector<1x128xf32>
    %c2_118 = arith.constant 2 : index
    %c0_119 = arith.constant 0 : index
    %152 = vector.load %arg16[%c2_118, %c0_119] : memref<4x512xf32, #tpu.memory_space<vmem>>, vector<1x128xf32>
    tpu.vector_store %arg16[%c2_118, %c0_119], %151 {strides = array<i32>} : memref<4x512xf32, #tpu.memory_space<vmem>>, vector<1x128xf32>,
    %153 = vector.extract_strided_slice %150 {offsets = [1, 0], sizes = [1, 128], strides = [1, 1]} : vector<2x128xf32> to vector<1x128xf32>
    %c2_120 = arith.constant 2 : index
    %c128_121 = arith.constant 128 : index
    %154 = vector.load %arg16[%c2_120, %c128_121] : memref<4x512xf32, #tpu.memory_space<vmem>>, vector<1x128xf32>
    tpu.vector_store %arg16[%c2_120, %c128_121], %153 {strides = array<i32>} : memref<4x512xf32, #tpu.memory_space<vmem>>, vector<1x128xf32>,
    %c3_122 = arith.constant 3 : index
    %c0_123 = arith.constant 0 : index
    %c0_124 = arith.constant 0 : index
    %155 = vector.load %arg13[%c3_122, %c0_123, %c0_124] : memref<4x4x128xf32, #tpu.memory_space<vmem>>, vector<1x2x128xf32>
    %156 = vector.shape_cast %155 : vector<1x2x128xf32> to vector<2x128xf32>
    %c0_125 = arith.constant 0 : index
    %c0_126 = arith.constant 0 : index
    %c3_127 = arith.constant 3 : index
    %c0_128 = arith.constant 0 : index
    %157 = vector.load %arg11[%c0_125, %c0_126, %c3_127, %c0_128] : memref<2x64x4x128xf32, #tpu.memory_space<vmem>>, vector<1x64x1x128xf32>
    %158 = vector.shape_cast %157 : vector<1x64x1x128xf32> to vector<64x1x128xf32>
    %159 = vector.shape_cast %158 : vector<64x1x128xf32> to vector<64x128xf32>
    %c0_129 = arith.constant 0 : index
    %c0_130 = arith.constant 0 : index
    %c3_131 = arith.constant 3 : index
    %c0_132 = arith.constant 0 : index
    %160 = vector.load %arg12[%c0_129, %c0_130, %c3_131, %c0_132] : memref<2x64x4x128xf32, #tpu.memory_space<vmem>>, vector<1x64x1x128xf32>
    %161 = vector.shape_cast %160 : vector<1x64x1x128xf32> to vector<64x1x128xf32>
    %162 = vector.shape_cast %161 : vector<64x1x128xf32> to vector<64x128xf32>
    %cst_133 = arith.constant dense<0.000000e+00> : vector<2x64xf32>
    %163 = tpu.matmul %156, %159, %cst_133 {dimension_numbers = #tpu.dot_dimension_numbers<[1], [1], [0], [0], [0, 0, 1, 0], [], []>} : vector<2x128xf32>, vector<64x128xf32>, vector<2x64xf32> -> vector<2x64xf32>
    %cst_134 = arith.constant 0.0883883461 : f32
    %164 = vector.broadcast %cst_134 : f32 to vector<2x64xf32>
    %165 = arith.mulf %163, %164 : vector<2x64xf32>
    %cst_135 = arith.constant -1.000000e+30 : f32
    %166 = vector.shape_cast %64 : vector<1x64xi1> to vector<1x64xi1>
    %167 = vector.broadcast %166 : vector<1x64xi1> to vector<2x64xi1>
    %168 = vector.broadcast %cst_135 : f32 to vector<2x64xf32>
    %169 = arith.select %167, %165, %168 : vector<2x64xi1>, vector<2x64xf32>
    %cst_136 = arith.constant dense<0xFF800000> : vector<2xf32>
    %170 = vector.multi_reduction <maximumf>, %169, %cst_136 [1] : vector<2x64xf32> to vector<2xf32>
    %171 = vector.shape_cast %170 : vector<2xf32> to vector<2x1xf32>
    %172 = vector.broadcast %171 : vector<2x1xf32> to vector<2x64xf32>
    %173 = arith.subf %169, %172 : vector<2x64xf32>
    %174 = math.exp %173 : vector<2x64xf32>
    %cst_137 = arith.constant dense<0.000000e+00> : vector<2xf32>
    %175 = vector.multi_reduction <add>, %174, %cst_137 [1] : vector<2x64xf32> to vector<2xf32>
    %176 = vector.shape_cast %175 : vector<2xf32> to vector<2x1xf32>
    %177 = tpu.reciprocal %176 {approx = true} : vector<2x1xf32> -> vector<2x1xf32>
    %178 = vector.broadcast %177 : vector<2x1xf32> to vector<2x64xf32>
    %179 = arith.mulf %174, %178 : vector<2x64xf32>
    %cst_138 = arith.constant dense<0.000000e+00> : vector<2x128xf32>
    %180 = tpu.matmul %179, %162, %cst_138 {dimension_numbers = #tpu.dot_dimension_numbers<[1], [0], [0], [1], [0, 0, 1, 1], [], []>} : vector<2x64xf32>, vector<64x128xf32>, vector<2x128xf32> -> vector<2x128xf32>
    %181 = vector.extract_strided_slice %180 {offsets = [0, 0], sizes = [1, 128], strides = [1, 1]} : vector<2x128xf32> to vector<1x128xf32>
    %c3_139 = arith.constant 3 : index
    %c0_140 = arith.constant 0 : index
    %182 = vector.load %arg16[%c3_139, %c0_140] : memref<4x512xf32, #tpu.memory_space<vmem>>, vector<1x128xf32>
    tpu.vector_store %arg16[%c3_139, %c0_140], %181 {strides = array<i32>} : memref<4x512xf32, #tpu.memory_space<vmem>>, vector<1x128xf32>,
    %183 = vector.extract_strided_slice %180 {offsets = [1, 0], sizes = [1, 128], strides = [1, 1]} : vector<2x128xf32> to vector<1x128xf32>
    %c3_141 = arith.constant 3 : index
    %c128_142 = arith.constant 128 : index
    %184 = vector.load %arg16[%c3_141, %c128_142] : memref<4x512xf32, #tpu.memory_space<vmem>>, vector<1x128xf32>
    tpu.vector_store %arg16[%c3_141, %c128_142], %183 {strides = array<i32>} : memref<4x512xf32, #tpu.memory_space<vmem>>, vector<1x128xf32>,
    %c0_143 = arith.constant 0 : index
    %c2_144 = arith.constant 2 : index
    %c0_145 = arith.constant 0 : index
    %185 = vector.load %arg13[%c0_143, %c2_144, %c0_145] : memref<4x4x128xf32, #tpu.memory_space<vmem>>, vector<1x2x128xf32>
    %186 = vector.shape_cast %185 : vector<1x2x128xf32> to vector<2x128xf32>
    %c1_146 = arith.constant 1 : index
    %c0_147 = arith.constant 0 : index
    %c0_148 = arith.constant 0 : index
    %c0_149 = arith.constant 0 : index
    %187 = vector.load %arg11[%c1_146, %c0_147, %c0_148, %c0_149] : memref<2x64x4x128xf32, #tpu.memory_space<vmem>>, vector<1x64x1x128xf32>
    %188 = vector.shape_cast %187 : vector<1x64x1x128xf32> to vector<64x1x128xf32>
    %189 = vector.shape_cast %188 : vector<64x1x128xf32> to vector<64x128xf32>
    %c1_150 = arith.constant 1 : index
    %c0_151 = arith.constant 0 : index
    %c0_152 = arith.constant 0 : index
    %c0_153 = arith.constant 0 : index
    %190 = vector.load %arg12[%c1_150, %c0_151, %c0_152, %c0_153] : memref<2x64x4x128xf32, #tpu.memory_space<vmem>>, vector<1x64x1x128xf32>
    %191 = vector.shape_cast %190 : vector<1x64x1x128xf32> to vector<64x1x128xf32>
    %192 = vector.shape_cast %191 : vector<64x1x128xf32> to vector<64x128xf32>
    %cst_154 = arith.constant dense<0.000000e+00> : vector<2x64xf32>
    %193 = tpu.matmul %186, %189, %cst_154 {dimension_numbers = #tpu.dot_dimension_numbers<[1], [1], [0], [0], [0, 0, 1, 0], [], []>} : vector<2x128xf32>, vector<64x128xf32>, vector<2x64xf32> -> vector<2x64xf32>
    %cst_155 = arith.constant 0.0883883461 : f32
    %194 = vector.broadcast %cst_155 : f32 to vector<2x64xf32>
    %195 = arith.mulf %193, %194 : vector<2x64xf32>
    %cst_156 = arith.constant -1.000000e+30 : f32
    %196 = vector.shape_cast %64 : vector<1x64xi1> to vector<1x64xi1>
    %197 = vector.broadcast %196 : vector<1x64xi1> to vector<2x64xi1>
    %198 = vector.broadcast %cst_156 : f32 to vector<2x64xf32>
    %199 = arith.select %197, %195, %198 : vector<2x64xi1>, vector<2x64xf32>
    %cst_157 = arith.constant dense<0xFF800000> : vector<2xf32>
    %200 = vector.multi_reduction <maximumf>, %199, %cst_157 [1] : vector<2x64xf32> to vector<2xf32>
    %201 = vector.shape_cast %200 : vector<2xf32> to vector<2x1xf32>
    %202 = vector.broadcast %201 : vector<2x1xf32> to vector<2x64xf32>
    %203 = arith.subf %199, %202 : vector<2x64xf32>
    %204 = math.exp %203 : vector<2x64xf32>
    %cst_158 = arith.constant dense<0.000000e+00> : vector<2xf32>
    %205 = vector.multi_reduction <add>, %204, %cst_158 [1] : vector<2x64xf32> to vector<2xf32>
    %206 = vector.shape_cast %205 : vector<2xf32> to vector<2x1xf32>
    %207 = tpu.reciprocal %206 {approx = true} : vector<2x1xf32> -> vector<2x1xf32>
    %208 = vector.broadcast %207 : vector<2x1xf32> to vector<2x64xf32>
    %209 = arith.mulf %204, %208 : vector<2x64xf32>
    %cst_159 = arith.constant dense<0.000000e+00> : vector<2x128xf32>
    %210 = tpu.matmul %209, %192, %cst_159 {dimension_numbers = #tpu.dot_dimension_numbers<[1], [0], [0], [1], [0, 0, 1, 1], [], []>} : vector<2x64xf32>, vector<64x128xf32>, vector<2x128xf32> -> vector<2x128xf32>
    %211 = vector.extract_strided_slice %210 {offsets = [0, 0], sizes = [1, 128], strides = [1, 1]} : vector<2x128xf32> to vector<1x128xf32>
    %c0_160 = arith.constant 0 : index
    %c256 = arith.constant 256 : index
    %212 = vector.load %arg16[%c0_160, %c256] : memref<4x512xf32, #tpu.memory_space<vmem>>, vector<1x128xf32>
    tpu.vector_store %arg16[%c0_160, %c256], %211 {strides = array<i32>} : memref<4x512xf32, #tpu.memory_space<vmem>>, vector<1x128xf32>,
    %213 = vector.extract_strided_slice %210 {offsets = [1, 0], sizes = [1, 128], strides = [1, 1]} : vector<2x128xf32> to vector<1x128xf32>
    %c0_161 = arith.constant 0 : index
    %c384 = arith.constant 384 : index
    %214 = vector.load %arg16[%c0_161, %c384] : memref<4x512xf32, #tpu.memory_space<vmem>>, vector<1x128xf32>
    tpu.vector_store %arg16[%c0_161, %c384], %213 {strides = array<i32>} : memref<4x512xf32, #tpu.memory_space<vmem>>, vector<1x128xf32>,
    %c1_162 = arith.constant 1 : index
    %c2_163 = arith.constant 2 : index
    %c0_164 = arith.constant 0 : index
    %215 = vector.load %arg13[%c1_162, %c2_163, %c0_164] : memref<4x4x128xf32, #tpu.memory_space<vmem>>, vector<1x2x128xf32>
    %216 = vector.shape_cast %215 : vector<1x2x128xf32> to vector<2x128xf32>
    %c1_165 = arith.constant 1 : index
    %c0_166 = arith.constant 0 : index
    %c1_167 = arith.constant 1 : index
    %c0_168 = arith.constant 0 : index
    %217 = vector.load %arg11[%c1_165, %c0_166, %c1_167, %c0_168] : memref<2x64x4x128xf32, #tpu.memory_space<vmem>>, vector<1x64x1x128xf32>
    %218 = vector.shape_cast %217 : vector<1x64x1x128xf32> to vector<64x1x128xf32>
    %219 = vector.shape_cast %218 : vector<64x1x128xf32> to vector<64x128xf32>
    %c1_169 = arith.constant 1 : index
    %c0_170 = arith.constant 0 : index
    %c1_171 = arith.constant 1 : index
    %c0_172 = arith.constant 0 : index
    %220 = vector.load %arg12[%c1_169, %c0_170, %c1_171, %c0_172] : memref<2x64x4x128xf32, #tpu.memory_space<vmem>>, vector<1x64x1x128xf32>
    %221 = vector.shape_cast %220 : vector<1x64x1x128xf32> to vector<64x1x128xf32>
    %222 = vector.shape_cast %221 : vector<64x1x128xf32> to vector<64x128xf32>
    %cst_173 = arith.constant dense<0.000000e+00> : vector<2x64xf32>
    %223 = tpu.matmul %216, %219, %cst_173 {dimension_numbers = #tpu.dot_dimension_numbers<[1], [1], [0], [0], [0, 0, 1, 0], [], []>} : vector<2x128xf32>, vector<64x128xf32>, vector<2x64xf32> -> vector<2x64xf32>
    %cst_174 = arith.constant 0.0883883461 : f32
    %224 = vector.broadcast %cst_174 : f32 to vector<2x64xf32>
    %225 = arith.mulf %223, %224 : vector<2x64xf32>
    %cst_175 = arith.constant -1.000000e+30 : f32
    %226 = vector.shape_cast %64 : vector<1x64xi1> to vector<1x64xi1>
    %227 = vector.broadcast %226 : vector<1x64xi1> to vector<2x64xi1>
    %228 = vector.broadcast %cst_175 : f32 to vector<2x64xf32>
    %229 = arith.select %227, %225, %228 : vector<2x64xi1>, vector<2x64xf32>
    %cst_176 = arith.constant dense<0xFF800000> : vector<2xf32>
    %230 = vector.multi_reduction <maximumf>, %229, %cst_176 [1] : vector<2x64xf32> to vector<2xf32>
    %231 = vector.shape_cast %230 : vector<2xf32> to vector<2x1xf32>
    %232 = vector.broadcast %231 : vector<2x1xf32> to vector<2x64xf32>
    %233 = arith.subf %229, %232 : vector<2x64xf32>
    %234 = math.exp %233 : vector<2x64xf32>
    %cst_177 = arith.constant dense<0.000000e+00> : vector<2xf32>
    %235 = vector.multi_reduction <add>, %234, %cst_177 [1] : vector<2x64xf32> to vector<2xf32>
    %236 = vector.shape_cast %235 : vector<2xf32> to vector<2x1xf32>
    %237 = tpu.reciprocal %236 {approx = true} : vector<2x1xf32> -> vector<2x1xf32>
    %238 = vector.broadcast %237 : vector<2x1xf32> to vector<2x64xf32>
    %239 = arith.mulf %234, %238 : vector<2x64xf32>
    %cst_178 = arith.constant dense<0.000000e+00> : vector<2x128xf32>
    %240 = tpu.matmul %239, %222, %cst_178 {dimension_numbers = #tpu.dot_dimension_numbers<[1], [0], [0], [1], [0, 0, 1, 1], [], []>} : vector<2x64xf32>, vector<64x128xf32>, vector<2x128xf32> -> vector<2x128xf32>
    %241 = vector.extract_strided_slice %240 {offsets = [0, 0], sizes = [1, 128], strides = [1, 1]} : vector<2x128xf32> to vector<1x128xf32>
    %c1_179 = arith.constant 1 : index
    %c256_180 = arith.constant 256 : index
    %242 = vector.load %arg16[%c1_179, %c256_180] : memref<4x512xf32, #tpu.memory_space<vmem>>, vector<1x128xf32>
    tpu.vector_store %arg16[%c1_179, %c256_180], %241 {strides = array<i32>} : memref<4x512xf32, #tpu.memory_space<vmem>>, vector<1x128xf32>,
    %243 = vector.extract_strided_slice %240 {offsets = [1, 0], sizes = [1, 128], strides = [1, 1]} : vector<2x128xf32> to vector<1x128xf32>
    %c1_181 = arith.constant 1 : index
    %c384_182 = arith.constant 384 : index
    %244 = vector.load %arg16[%c1_181, %c384_182] : memref<4x512xf32, #tpu.memory_space<vmem>>, vector<1x128xf32>
    tpu.vector_store %arg16[%c1_181, %c384_182], %243 {strides = array<i32>} : memref<4x512xf32, #tpu.memory_space<vmem>>, vector<1x128xf32>,
    %c2_183 = arith.constant 2 : index
    %c2_184 = arith.constant 2 : index
    %c0_185 = arith.constant 0 : index
    %245 = vector.load %arg13[%c2_183, %c2_184, %c0_185] : memref<4x4x128xf32, #tpu.memory_space<vmem>>, vector<1x2x128xf32>
    %246 = vector.shape_cast %245 : vector<1x2x128xf32> to vector<2x128xf32>
    %c1_186 = arith.constant 1 : index
    %c0_187 = arith.constant 0 : index
    %c2_188 = arith.constant 2 : index
    %c0_189 = arith.constant 0 : index
    %247 = vector.load %arg11[%c1_186, %c0_187, %c2_188, %c0_189] : memref<2x64x4x128xf32, #tpu.memory_space<vmem>>, vector<1x64x1x128xf32>
    %248 = vector.shape_cast %247 : vector<1x64x1x128xf32> to vector<64x1x128xf32>
    %249 = vector.shape_cast %248 : vector<64x1x128xf32> to vector<64x128xf32>
    %c1_190 = arith.constant 1 : index
    %c0_191 = arith.constant 0 : index
    %c2_192 = arith.constant 2 : index
    %c0_193 = arith.constant 0 : index
    %250 = vector.load %arg12[%c1_190, %c0_191, %c2_192, %c0_193] : memref<2x64x4x128xf32, #tpu.memory_space<vmem>>, vector<1x64x1x128xf32>
    %251 = vector.shape_cast %250 : vector<1x64x1x128xf32> to vector<64x1x128xf32>
    %252 = vector.shape_cast %251 : vector<64x1x128xf32> to vector<64x128xf32>
    %cst_194 = arith.constant dense<0.000000e+00> : vector<2x64xf32>
    %253 = tpu.matmul %246, %249, %cst_194 {dimension_numbers = #tpu.dot_dimension_numbers<[1], [1], [0], [0], [0, 0, 1, 0], [], []>} : vector<2x128xf32>, vector<64x128xf32>, vector<2x64xf32> -> vector<2x64xf32>
    %cst_195 = arith.constant 0.0883883461 : f32
    %254 = vector.broadcast %cst_195 : f32 to vector<2x64xf32>
    %255 = arith.mulf %253, %254 : vector<2x64xf32>
    %cst_196 = arith.constant -1.000000e+30 : f32
    %256 = vector.shape_cast %64 : vector<1x64xi1> to vector<1x64xi1>
    %257 = vector.broadcast %256 : vector<1x64xi1> to vector<2x64xi1>
    %258 = vector.broadcast %cst_196 : f32 to vector<2x64xf32>
    %259 = arith.select %257, %255, %258 : vector<2x64xi1>, vector<2x64xf32>
    %cst_197 = arith.constant dense<0xFF800000> : vector<2xf32>
    %260 = vector.multi_reduction <maximumf>, %259, %cst_197 [1] : vector<2x64xf32> to vector<2xf32>
    %261 = vector.shape_cast %260 : vector<2xf32> to vector<2x1xf32>
    %262 = vector.broadcast %261 : vector<2x1xf32> to vector<2x64xf32>
    %263 = arith.subf %259, %262 : vector<2x64xf32>
    %264 = math.exp %263 : vector<2x64xf32>
    %cst_198 = arith.constant dense<0.000000e+00> : vector<2xf32>
    %265 = vector.multi_reduction <add>, %264, %cst_198 [1] : vector<2x64xf32> to vector<2xf32>
    %266 = vector.shape_cast %265 : vector<2xf32> to vector<2x1xf32>
    %267 = tpu.reciprocal %266 {approx = true} : vector<2x1xf32> -> vector<2x1xf32>
    %268 = vector.broadcast %267 : vector<2x1xf32> to vector<2x64xf32>
    %269 = arith.mulf %264, %268 : vector<2x64xf32>
    %cst_199 = arith.constant dense<0.000000e+00> : vector<2x128xf32>
    %270 = tpu.matmul %269, %252, %cst_199 {dimension_numbers = #tpu.dot_dimension_numbers<[1], [0], [0], [1], [0, 0, 1, 1], [], []>} : vector<2x64xf32>, vector<64x128xf32>, vector<2x128xf32> -> vector<2x128xf32>
    %271 = vector.extract_strided_slice %270 {offsets = [0, 0], sizes = [1, 128], strides = [1, 1]} : vector<2x128xf32> to vector<1x128xf32>
    %c2_200 = arith.constant 2 : index
    %c256_201 = arith.constant 256 : index
    %272 = vector.load %arg16[%c2_200, %c256_201] : memref<4x512xf32, #tpu.memory_space<vmem>>, vector<1x128xf32>
    tpu.vector_store %arg16[%c2_200, %c256_201], %271 {strides = array<i32>} : memref<4x512xf32, #tpu.memory_space<vmem>>, vector<1x128xf32>,
    %273 = vector.extract_strided_slice %270 {offsets = [1, 0], sizes = [1, 128], strides = [1, 1]} : vector<2x128xf32> to vector<1x128xf32>
    %c2_202 = arith.constant 2 : index
    %c384_203 = arith.constant 384 : index
    %274 = vector.load %arg16[%c2_202, %c384_203] : memref<4x512xf32, #tpu.memory_space<vmem>>, vector<1x128xf32>
    tpu.vector_store %arg16[%c2_202, %c384_203], %273 {strides = array<i32>} : memref<4x512xf32, #tpu.memory_space<vmem>>, vector<1x128xf32>,
    %c3_204 = arith.constant 3 : index
    %c2_205 = arith.constant 2 : index
    %c0_206 = arith.constant 0 : index
    %275 = vector.load %arg13[%c3_204, %c2_205, %c0_206] : memref<4x4x128xf32, #tpu.memory_space<vmem>>, vector<1x2x128xf32>
    %276 = vector.shape_cast %275 : vector<1x2x128xf32> to vector<2x128xf32>
    %c1_207 = arith.constant 1 : index
    %c0_208 = arith.constant 0 : index
    %c3_209 = arith.constant 3 : index
    %c0_210 = arith.constant 0 : index
    %277 = vector.load %arg11[%c1_207, %c0_208, %c3_209, %c0_210] : memref<2x64x4x128xf32, #tpu.memory_space<vmem>>, vector<1x64x1x128xf32>
    %278 = vector.shape_cast %277 : vector<1x64x1x128xf32> to vector<64x1x128xf32>
    %279 = vector.shape_cast %278 : vector<64x1x128xf32> to vector<64x128xf32>
    %c1_211 = arith.constant 1 : index
    %c0_212 = arith.constant 0 : index
    %c3_213 = arith.constant 3 : index
    %c0_214 = arith.constant 0 : index
    %280 = vector.load %arg12[%c1_211, %c0_212, %c3_213, %c0_214] : memref<2x64x4x128xf32, #tpu.memory_space<vmem>>, vector<1x64x1x128xf32>
    %281 = vector.shape_cast %280 : vector<1x64x1x128xf32> to vector<64x1x128xf32>
    %282 = vector.shape_cast %281 : vector<64x1x128xf32> to vector<64x128xf32>
    %cst_215 = arith.constant dense<0.000000e+00> : vector<2x64xf32>
    %283 = tpu.matmul %276, %279, %cst_215 {dimension_numbers = #tpu.dot_dimension_numbers<[1], [1], [0], [0], [0, 0, 1, 0], [], []>} : vector<2x128xf32>, vector<64x128xf32>, vector<2x64xf32> -> vector<2x64xf32>
    %cst_216 = arith.constant 0.0883883461 : f32
    %284 = vector.broadcast %cst_216 : f32 to vector<2x64xf32>
    %285 = arith.mulf %283, %284 : vector<2x64xf32>
    %cst_217 = arith.constant -1.000000e+30 : f32
    %286 = vector.shape_cast %64 : vector<1x64xi1> to vector<1x64xi1>
    %287 = vector.broadcast %286 : vector<1x64xi1> to vector<2x64xi1>
    %288 = vector.broadcast %cst_217 : f32 to vector<2x64xf32>
    %289 = arith.select %287, %285, %288 : vector<2x64xi1>, vector<2x64xf32>
    %cst_218 = arith.constant dense<0xFF800000> : vector<2xf32>
    %290 = vector.multi_reduction <maximumf>, %289, %cst_218 [1] : vector<2x64xf32> to vector<2xf32>
    %291 = vector.shape_cast %290 : vector<2xf32> to vector<2x1xf32>
    %292 = vector.broadcast %291 : vector<2x1xf32> to vector<2x64xf32>
    %293 = arith.subf %289, %292 : vector<2x64xf32>
    %294 = math.exp %293 : vector<2x64xf32>
    %cst_219 = arith.constant dense<0.000000e+00> : vector<2xf32>
    %295 = vector.multi_reduction <add>, %294, %cst_219 [1] : vector<2x64xf32> to vector<2xf32>
    %296 = vector.shape_cast %295 : vector<2xf32> to vector<2x1xf32>
    %297 = tpu.reciprocal %296 {approx = true} : vector<2x1xf32> -> vector<2x1xf32>
    %298 = vector.broadcast %297 : vector<2x1xf32> to vector<2x64xf32>
    %299 = arith.mulf %294, %298 : vector<2x64xf32>
    %cst_220 = arith.constant dense<0.000000e+00> : vector<2x128xf32>
    %300 = tpu.matmul %299, %282, %cst_220 {dimension_numbers = #tpu.dot_dimension_numbers<[1], [0], [0], [1], [0, 0, 1, 1], [], []>} : vector<2x64xf32>, vector<64x128xf32>, vector<2x128xf32> -> vector<2x128xf32>
    %301 = vector.extract_strided_slice %300 {offsets = [0, 0], sizes = [1, 128], strides = [1, 1]} : vector<2x128xf32> to vector<1x128xf32>
    %c3_221 = arith.constant 3 : index
    %c256_222 = arith.constant 256 : index
    %302 = vector.load %arg16[%c3_221, %c256_222] : memref<4x512xf32, #tpu.memory_space<vmem>>, vector<1x128xf32>
    tpu.vector_store %arg16[%c3_221, %c256_222], %301 {strides = array<i32>} : memref<4x512xf32, #tpu.memory_space<vmem>>, vector<1x128xf32>,
    %303 = vector.extract_strided_slice %300 {offsets = [1, 0], sizes = [1, 128], strides = [1, 1]} : vector<2x128xf32> to vector<1x128xf32>
    %c3_223 = arith.constant 3 : index
    %c384_224 = arith.constant 384 : index
    %304 = vector.load %arg16[%c3_223, %c384_224] : memref<4x512xf32, #tpu.memory_space<vmem>>, vector<1x128xf32>
    tpu.vector_store %arg16[%c3_223, %c384_224], %303 {strides = array<i32>} : memref<4x512xf32, #tpu.memory_space<vmem>>, vector<1x128xf32>,
    %c0_225 = arith.constant 0 : index
    %c0_226 = arith.constant 0 : index
    %305 = vector.load %arg16[%c0_225, %c0_226] : memref<4x512xf32, #tpu.memory_space<vmem>>, vector<4x512xf32>
    %306 = arith.truncf %305 : vector<4x512xf32> to vector<4x512xbf16>
    %c0_227 = arith.constant 0 : index
    %c0_228 = arith.constant 0 : index
    %307 = vector.load %arg5[%c0_227, %c0_228] : memref<512x512xbf16, #tpu.memory_space<vmem>>, vector<512x512xbf16>
    %cst_229 = arith.constant dense<0.000000e+00> : vector<4x512xf32>
    %308 = tpu.matmul %306, %307, %cst_229 {dimension_numbers = #tpu.dot_dimension_numbers<[1], [0], [0], [1], [0, 0, 1, 1], [], []>} : vector<4x512xbf16>, vector<512x512xbf16>, vector<4x512xf32> -> vector<4x512xf32>
    %c0_230 = arith.constant 0 : index
    %c0_231 = arith.constant 0 : index
    %309 = vector.load %arg8[%c0_230, %c0_231] : memref<4x512xf32, #tpu.memory_space<vmem>>, vector<4x512xf32>
    tpu.vector_store %arg8[%c0_230, %c0_231], %308 {strides = array<i32>} : memref<4x512xf32, #tpu.memory_space<vmem>>, vector<4x512xf32>,
    %c2_i32_232 = arith.constant 2 : i32
    %c0_i32_233 = arith.constant 0 : i32
    %c0_i32_234 = arith.constant 0 : i32
    %c0_i32_235 = arith.constant 0 : i32
    %310 = tpu.memref_slice %arg9[%c0_i32_233, %0, %c0_i32_234, %c0_i32_235] : memref<2x64x4x128xf32, #tpu.memory_space<any>> -> memref<2x1x4x128xf32, #tpu.memory_space<any>>
    %311 = tpu.memref_slice %arg17[%c2_i32_232] : memref<4x!tpu.dma_semaphore, #tpu.memory_space<semaphore_mem>> -> memref<1x!tpu.dma_semaphore, #tpu.memory_space<semaphore_mem>>
    %312 = tpu.memref_squeeze %311 : memref<1x!tpu.dma_semaphore, #tpu.memory_space<semaphore_mem>> -> memref<!tpu.dma_semaphore, #tpu.memory_space<semaphore_mem>>
    tpu.wait_dma2 semaphore(%312 : memref<!tpu.dma_semaphore, #tpu.memory_space<semaphore_mem>>) src(%arg14 : memref<2x1x4x128xf32, #tpu.memory_space<vmem>>) dst(%310 : memref<2x1x4x128xf32, #tpu.memory_space<any>>)
    %c3_i32_236 = arith.constant 3 : i32
    %c0_i32_237 = arith.constant 0 : i32
    %c0_i32_238 = arith.constant 0 : i32
    %c0_i32_239 = arith.constant 0 : i32
    %313 = tpu.memref_slice %arg10[%c0_i32_237, %0, %c0_i32_238, %c0_i32_239] : memref<2x64x4x128xf32, #tpu.memory_space<any>> -> memref<2x1x4x128xf32, #tpu.memory_space<any>>
    %314 = tpu.memref_slice %arg17[%c3_i32_236] : memref<4x!tpu.dma_semaphore, #tpu.memory_space<semaphore_mem>> -> memref<1x!tpu.dma_semaphore, #tpu.memory_space<semaphore_mem>>
    %315 = tpu.memref_squeeze %314 : memref<1x!tpu.dma_semaphore, #tpu.memory_space<semaphore_mem>> -> memref<!tpu.dma_semaphore, #tpu.memory_space<semaphore_mem>>
    tpu.wait_dma2 semaphore(%315 : memref<!tpu.dma_semaphore, #tpu.memory_space<semaphore_mem>>) src(%arg15 : memref<2x1x4x128xf32, #tpu.memory_space<vmem>>) dst(%313 : memref<2x1x4x128xf32, #tpu.memory_space<any>>)
    return
  }
  func.func @transform_0(%arg0: i32) -> i32 {
    %c0_i32 = arith.constant 0 : i32
    %c0_i32_0 = arith.constant 0 : i32
    return %c0_i32 : i32
  }
  func.func @transform_1(%arg0: i32) -> (i32, i32) {
    %c0_i32 = arith.constant 0 : i32
    %c0_i32_0 = arith.constant 0 : i32
    %c0_i32_1 = arith.constant 0 : i32
    return %c0_i32, %c0_i32_0 : i32, i32
  }
  func.func @transform_2(%arg0: i32) -> (i32, i32) {
    %c0_i32 = arith.constant 0 : i32
    %c0_i32_0 = arith.constant 0 : i32
    %c0_i32_1 = arith.constant 0 : i32
    return %c0_i32, %c0_i32_0 : i32, i32
  }
  func.func @transform_3(%arg0: i32) -> (i32, i32) {
    %c0_i32 = arith.constant 0 : i32
    %c0_i32_0 = arith.constant 0 : i32
    %c0_i32_1 = arith.constant 0 : i32
    return %c0_i32, %c0_i32_0 : i32, i32
  }
  func.func @transform_4(%arg0: i32) -> (i32, i32) {
    %c0_i32 = arith.constant 0 : i32
    %c0_i32_0 = arith.constant 0 : i32
    %c0_i32_1 = arith.constant 0 : i32
    return %c0_i32, %c0_i32_0 : i32, i32
  }
  func.func @transform_7(%arg0: i32) -> (i32, i32) {
    %c0_i32 = arith.constant 0 : i32
    %c0_i32_0 = arith.constant 0 : i32
    %c0_i32_1 = arith.constant 0 : i32
    return %c0_i32, %c0_i32_0 : i32, i32
  }
}

</mosaic_0001>

<bundles_post_ra>
// kernel: mistral_attention_step.1
= control target key start
LH: loop header
LB: loop body
LE: loop exit
PB: predicated region body
PF: predicated region fallthrough
CT: control target
= control target key end

     0   :  { %15 = vsyncpa [#allocation12], 0  ;;  %s12473_s0 = inlined_call_operand.hbm [shape: s32[2], index: 0, kind: input, shape index: {}]   ;;  %s12474_s1 = inlined_call_operand.hbm [shape: f32[4,512], index: 1, kind: input, shape index: {}]   ;;  %s12475_s2 = inlined_call_operand.hbm [shape: bf16[512,1024], index: 2, kind: input, shape index: {}]   ;;  %s12476_s3 = inlined_call_operand.hbm [shape: bf16[128,128], index: 3, kind: input, shape index: {}]   ;;  %s12477_s4 = inlined_call_operand.hbm [shape: bf16[512,512], index: 4, kind: input, shape index: {}]   ;;  %s12478_s5 = inlined_call_operand.hbm [shape: f32[2,64,4,128], index: 5, kind: input, shape index: {}, may-alias: {5,8}]   ;;  %s12479_s6 = inlined_call_operand.hbm [shape: f32[2,64,4,128], index: 6, kind: input, shape index: {}, may-alias: {6,9}]   ;;  %s12480_s7 = inlined_call_operand.hbm [shape: f32[4,512], index: 7, kind: output, shape index: {0}]   ;;  %s12481_s8 = inlined_call_operand.hbm [shape: f32[2,64,4,128], index: 8, kind: output, shape index: {1}, may-alias: {5,8}]   ;;  %s12482_s9 = inlined_call_operand.hbm [shape: f32[2,64,4,128], index: 9, kind: output, shape index: {2}, may-alias: {6,9}]  }
   0x1   :  { %16 = vsyncpa [#allocation10], 0 }
   0x2   :  { %17 = vsyncpa [#allocation15], 0 }
   0x3   :  { %18 = vsyncpa [#allocation18], 0 }
   0x4   :  { %19 = vsyncpa [#allocation11], 0  ;;  %s10977_s30 = smov [#allocation14]   ;;  %s10747_s13 = scalar_lea.hbm %s12475_s2, 32768 }
   0x5   :  { %s43_s10 = sshll.u32 %s10977_s30, 4  ;;  %p10748_p0 = scmp.ne.s32.totalorder %s12475_s2, %s10747_s13  ;;  %s44_s10 = int_to_ptr.vmem [resolvable:$true] %s43_s10 }
   0x6   :  { %p10751_p1 = scmp.lt.u32.totalorder %s10747_s13, %s12475_s2 }
   0x8   :  { %p10753_p2 = pnand %p10751_p1, %p10748_p0 }
   0xa   :  { %10756 = shalt.err (!%p10753_p2)
}
   0xb   :  { %s10757_s18 = scalar_lea.vmem %s44_s10, 32768  ;;  %p10762_p4 = scmp.lt.s32.totalorder %s44_s10, %s44_s10 }
   0xc   :  { %p10758_p3 = scmp.ne.s32.totalorder %s44_s10, %s10757_s18  ;;  %p10763_p5 = scmp.lt.s32.totalorder %s10757_s18, %s10757_s18 }
   0xe   :  { %p10764_p6 = por %p10763_p5, %p10762_p4 }
  0x10   :  { %p10765_p7 = pnand %p10764_p6, %p10758_p3 }
  0x12   :  { %10768 = shalt.err (!%p10765_p7)
}
  0x13   :  { %s10978_s19 = smov 512   ;;  %s10979_s20 = smov 32  }
  0x14   :  { %49 = dma.hbm_to_vmem [thread:$0]  %s12475_s2, 32768, %s44_s10, [#allocation15], %s10978_s19, %s10978_s19, %s10979_s20  }
  0x15   :  { %s10769_s25 = scalar_lea.hbm %s12473_s0, 16 }
  0x16   :  { %p10770_p8 = scmp.ne.s32.totalorder %s12473_s0, %s10769_s25  ;;  %p10773_p9 = scmp.lt.u32.totalorder %s10769_s25, %s12473_s0 }
  0x18   :  { %p10775_p10 = pnand %p10773_p9, %p10770_p8 }
  0x1a   :  { %10778 = shalt.err (!%p10775_p10)
}
  0x1b   :  { %s10980_s30 = smov [#allocation9]   ;;  %s10981_s2 = smov [#allocation13]  }
  0x1c   :  { %27 = dma.hbm_to_smem %s12473_s0, 16, %s10980_s30, [#allocation12]  }
  0x1d   :  { %s34_s10 = sshll.u32 %s10981_s2, 4  ;;  %s10982_s13 = smov [#allocation16]   ;;  %s35_s10 = int_to_ptr.vmem [resolvable:$true] %s34_s10 }
  0x1e   :  { %s55_s14 = sshll.u32 %s10982_s13, 4  ;;  %s10779_s17 = scalar_lea.hbm %s12474_s1, 256  ;;  %s11072_s14 = int_to_ptr.vmem [resolvable:$true] %s55_s14 }
  0x1f   :  { %p10780_p11 = scmp.ne.s32.totalorder %s12474_s1, %s10779_s17  ;;  %p10783_p12 = scmp.lt.u32.totalorder %s10779_s17, %s12474_s1 }
  0x21   :  { %p10785_p13 = pnand %p10783_p12, %p10780_p11 }
  0x23   :  { %10788 = shalt.err (!%p10785_p13)
}
  0x24   :  { %s10789_s0 = scalar_lea.vmem %s35_s10, 256  ;;  %p10794_p1 = scmp.lt.s32.totalorder %s35_s10, %s35_s10 }
  0x25   :  { %p10790_p0 = scmp.ne.s32.totalorder %s35_s10, %s10789_s0  ;;  %p10795_p2 = scmp.lt.s32.totalorder %s10789_s0, %s10789_s0 }
  0x27   :  { %p10796_p3 = por %p10795_p2, %p10794_p1 }
  0x29   :  { %p10797_p4 = pnand %p10796_p3, %p10790_p0 }
  0x2b   :  { %10800 = shalt.err (!%p10797_p4)
}
  0x2c   :  { %37 = dma.hbm_to_vmem [thread:$0]  %s12474_s1, 256, %s35_s10, [#allocation10]  }
  0x2d   :  { %s10801_s26 = scalar_lea.hbm %s12476_s3, 1024 }
  0x2e   :  { %p10802_p5 = scmp.ne.s32.totalorder %s12476_s3, %s10801_s26  ;;  %p10805_p6 = scmp.lt.u32.totalorder %s10801_s26, %s12476_s3 }
  0x30   :  { %p10807_p7 = pnand %p10805_p6, %p10802_p5 }
  0x32   :  { %10810 = shalt.err (!%p10807_p7)
}
  0x33   :  { %s10811_s11 = scalar_lea.vmem %s11072_s14, 1024  ;;  %p10816_p9 = scmp.lt.s32.totalorder %s11072_s14, %s11072_s14 }
  0x34   :  { %p10812_p8 = scmp.ne.s32.totalorder %s11072_s14, %s10811_s11  ;;  %p10817_p10 = scmp.lt.s32.totalorder %s10811_s11, %s10811_s11 }
  0x36   :  { %p10818_p11 = por %p10817_p10, %p10816_p9 }
  0x38   :  { %p10819_p12 = pnand %p10818_p11, %p10812_p8 }
  0x3a   :  { %10822 = shalt.err (!%p10819_p12)
}
  0x3b   :  { %s10983_s1 = smov 64   ;;  %s10984_s12 = smov 4  }
  0x3c   :  { %61 = dma.hbm_to_vmem [thread:$0]  %s12476_s3, 1024, %s11072_s14, [#allocation15], %s10983_s1, %s10983_s1, %s10984_s12  }
  0x3d   :  { %s10985_s13 = smov [#allocation17]   ;;  %s10823_s18 = scalar_lea.hbm %s12477_s4, 16384 }
  0x3e   :  { %s67_s15 = sshll.u32 %s10985_s13, 4  ;;  %p10824_p13 = scmp.ne.s32.totalorder %s12477_s4, %s10823_s18  ;;  %s68_s15 = int_to_ptr.vmem [resolvable:$true] %s67_s15 }
  0x3f   :  { %p10827_p0 = scmp.lt.u32.totalorder %s10823_s18, %s12477_s4 }
  0x41   :  { %p10829_p1 = pnand %p10827_p0, %p10824_p13 }
  0x43   :  { %10832 = shalt.err (!%p10829_p1)
}
  0x44   :  { %s10833_s22 = scalar_lea.vmem %s68_s15, 16384  ;;  %p10838_p3 = scmp.lt.s32.totalorder %s68_s15, %s68_s15 }
  0x45   :  { %p10834_p2 = scmp.ne.s32.totalorder %s68_s15, %s10833_s22  ;;  %p10839_p4 = scmp.lt.s32.totalorder %s10833_s22, %s10833_s22 }
  0x47   :  { %p10840_p5 = por %p10839_p4, %p10838_p3 }
  0x49   :  { %p10841_p6 = pnand %p10840_p5, %p10834_p2 }
  0x4b   :  { %10844 = shalt.err (!%p10841_p6)
}
  0x4c   :  { %s10986_s3 = smov 256   ;;  %s10987_s14 = smov 16  }
  0x4d   :  { %73 = dma.hbm_to_vmem [thread:$0]  %s12477_s4, 16384, %s68_s15, [#allocation18], %s10986_s3, %s10986_s3, %s10987_s14  }
  0x4e   :  { %10959 = dma.done.wait [#allocation12], 16  }
  0x4f   :  { %10960 = vsyncadd [#allocation12], 4294967280 }
  0x50   :  { %10961 = dma.done.wait [#allocation10], 256  }
  0x51   :  { %10962 = vsyncadd [#allocation10], 4294967040 }
  0x52   :  { %10963 = dma.done.wait [#allocation15], 33792  }
  0x53   :  { %10964 = vsyncadd [#allocation15], 4294933504 }
  0x54   :  { %10965 = dma.done.wait [#allocation18], 16384  }
  0x55   :  { %10966 = vsyncadd [#allocation18], 4294950912 }
  0x56   :  { %89 = sfence }
  0x57   :  { %v127_v0 = vld [vmem:[#allocation14] sm:$0xff]  ;;  %v128_v11 = vld [vmem:[#allocation14 + $0x8] sm:$0xff]  ;;  %v11118_v39 = vld [vmem:[#allocation13] sm:$0xff]  ;;  %vm10989_vm0 = vmmov 0   ;;  %s10992_s4 = smov [#allocation2]   ;;  %s10993_s26 = smov [#allocation3]  }
  0x58   :  { %v131_v1 = vld [vmem:[#allocation14 + $0x20] sm:$0xff]  ;;  %v132_v12 = vld [vmem:[#allocation14 + $0x28] sm:$0xff]  ;;  %v119_v42 = vcombine.high %v11118_v39, %v11118_v39  ;;  %s99_s25 = sshll.u32 %s10992_s4, 4  ;;  %s111_s27 = sshll.u32 %s10993_s26, 4  ;;  %s100_s25 = int_to_ptr.vmem [resolvable:$true] %s99_s25  ;;  %s112_s27 = int_to_ptr.vmem [resolvable:$true] %s111_s27 }
  0x59   :  { %v135_v2 = vld [vmem:[#allocation14 + $0x40] sm:$0xff]  ;;  %v8923_v3 = vcombine.high %v127_v0, %v131_v1  ;;  %v8922_v4 = vcombine.low %v127_v0, %v131_v1  ;;  %v8925_v15 = vcombine.high %v128_v11, %v132_v12  ;;  %v8924_v16 = vcombine.low %v128_v11, %v132_v12  ;;  %v136_v17 = vld [vmem:[#allocation14 + $0x48] sm:$0xff]  ;;  %s11282_s28 = sld [smem:[#allocation9]]  ;;  %s11284_s29 = sld [smem:[#allocation9 + $0x1]] }
  0x5a   :  { %v139_v5 = vld [vmem:[#allocation14 + $0x60] sm:$0xff]  ;;  %v140_v18 = vld [vmem:[#allocation14 + $0x68] sm:$0xff]  ;;  %v11122_v48 = vpack.c.bf16 %v119_v42, %v119_v42  ;;  %s10845_s2 = scalar_lea.hbm %s12478_s5, 8192 }
  0x5b   :  { %v8931_v6 = vcombine.high %v135_v2, %v139_v5  ;;  %v143_v7 = vld [vmem:[#allocation14 + $0x80] sm:$0xff]  ;;  %1663 = vmatprep.subr.bf16.mxu0 %v8923_v3  ;;  %v8930_v9 = vcombine.low %v135_v2, %v139_v5  ;;  %1745 = vmatprep.subr.bf16.mxu1 %v8925_v15  ;;  %v8933_v20 = vcombine.high %v136_v17, %v140_v18  ;;  %v144_v21 = vld [vmem:[#allocation14 + $0x88] sm:$0xff]  ;;  %p10846_p7 = scmp.ne.s32.totalorder %s12478_s5, %s10845_s2  ;;  %p10849_p8 = scmp.lt.u32.totalorder %s10845_s2, %s12478_s5 }
  0x5c   :  { %v147_v8 = vld [vmem:[#allocation14 + $0xa0] sm:$0xff]  ;;  %1664 = vmatpush1.bf16.msra.mxu0 %v8922_v4  ;;  %v148_v22 = vld [vmem:[#allocation14 + $0xa8] sm:$0xff]  ;;  %1746 = vmatpush1.bf16.msra.mxu1 %v8924_v16  ;;  %v8932_v24 = vcombine.low %v136_v17, %v140_v18 }
  0x5d   :  { %1665 = vmatprep.subr.bf16.mxu0 %v8931_v6  ;;  %v8939_v10 = vcombine.high %v143_v7, %v147_v8  ;;  %v151_v13 = vld [vmem:[#allocation14 + $0xc0] sm:$0xff]  ;;  %v8938_v19 = vcombine.low %v143_v7, %v147_v8  ;;  %1747 = vmatprep.subr.bf16.mxu1 %v8933_v20  ;;  %v8941_v27 = vcombine.high %v144_v21, %v148_v22  ;;  %v152_v28 = vld [vmem:[#allocation14 + $0xc8] sm:$0xff]  ;;  %p10851_p9 = pnand %p10849_p8, %p10846_p7 }
  0x5e   :  { %v155_v14 = vld [vmem:[#allocation14 + $0xe0] sm:$0xff]  ;;  %v156_v29 = vld [vmem:[#allocation14 + $0xe8] sm:$0xff]  ;;  %v8940_v32 = vcombine.low %v144_v21, %v148_v22  ;;  %1695 = vmatprep.mubr.bf16.mxu0 %v11122_v48  ;;  %1777 = vmatprep.mubr.bf16.mxu1 %v11122_v48 }
  0x5f   :  { %v8947_v23 = vcombine.high %v151_v13, %v155_v14  ;;  %v159_v25 = vld [vmem:[#allocation14 + $0x100] sm:$0xff]  ;;  %v8946_v30 = vcombine.low %v151_v13, %v155_v14  ;;  %v8949_v35 = vcombine.high %v152_v28, %v156_v29  ;;  %v160_v36 = vld [vmem:[#allocation14 + $0x108] sm:$0xff]  ;;  %v8948_v41 = vcombine.low %v152_v28, %v156_v29 }
  0x60   :  { %1666 = vmatpush1.bf16.msra.mxu0 %v8930_v9  ;;  %v163_v26 = vld [vmem:[#allocation14 + $0x120] sm:$0xff]  ;;  %1748 = vmatpush1.bf16.msra.mxu1 %v8932_v24  ;;  %v164_v37 = vld [vmem:[#allocation14 + $0x128] sm:$0xff] }
  0x61   :  { %1667 = vmatprep.subr.bf16.mxu0 %v8939_v10  ;;  %v8955_v31 = vcombine.high %v159_v25, %v163_v26  ;;  %v167_v33 = vld [vmem:[#allocation14 + $0x140] sm:$0xff]  ;;  %1749 = vmatprep.subr.bf16.mxu1 %v8941_v27  ;;  %v8954_v38 = vcombine.low %v159_v25, %v163_v26  ;;  %v8957_v45 = vcombine.high %v160_v36, %v164_v37  ;;  %v168_v46 = vld [vmem:[#allocation14 + $0x148] sm:$0xff] }
  0x62   :  { %v171_v34 = vld [vmem:[#allocation14 + $0x160] sm:$0xff]  ;;  %v172_v47 = vld [vmem:[#allocation14 + $0x168] sm:$0xff]  ;;  %v8956_v51 = vcombine.low %v160_v36, %v164_v37 }
  0x63   :  { %v8963_v40 = vcombine.high %v167_v33, %v171_v34  ;;  %v175_v43 = vld [vmem:[#allocation14 + $0x180] sm:$0xff]  ;;  %v8962_v49 = vcombine.low %v167_v33, %v171_v34  ;;  %v8965_v54 = vcombine.high %v168_v46, %v172_v47  ;;  %v176_v55 = vld [vmem:[#allocation14 + $0x188] sm:$0xff]  ;;  %v8964_v59 = vcombine.low %v168_v46, %v172_v47 }
  0x64   :  { %1668 = vmatpush1.bf16.msra.mxu0 %v8938_v19  ;;  %1750 = vmatpush1.bf16.msra.mxu1 %v8940_v32  ;;  %v179_v44 = vld [vmem:[#allocation14 + $0x1a0] sm:$0xff]  ;;  %v180_v56 = vld [vmem:[#allocation14 + $0x1a8] sm:$0xff] }
  0x65   :  { %1669 = vmatprep.subr.bf16.mxu0 %v8947_v23  ;;  %1751 = vmatprep.subr.bf16.mxu1 %v8949_v35  ;;  %v8971_v50 = vcombine.high %v175_v43, %v179_v44  ;;  %v183_v52 = vld [vmem:[#allocation14 + $0x1c0] sm:$0xff]  ;;  %v8970_v57 = vcombine.low %v175_v43, %v179_v44  ;;  %v8973_v62 = vcombine.high %v176_v55, %v180_v56  ;;  %v184_v63 = vld [vmem:[#allocation14 + $0x1c8] sm:$0xff] }
  0x66   :  { %v187_v53 = vld [vmem:[#allocation14 + $0x1e0] sm:$0xff]  ;;  %v188_v0 = vld [vmem:[#allocation14 + $0x1e8] sm:$0xff]  ;;  %v8972_v3 = vcombine.low %v176_v55, %v180_v56 }
  0x67   :  { %v8979_v58 = vcombine.high %v183_v52, %v187_v53  ;;  %v191_v60 = vld [vmem:[#allocation14 + $0x200] sm:$0xff]  ;;  %v8978_v1 = vcombine.low %v183_v52, %v187_v53  ;;  %v8981_v6 = vcombine.high %v184_v63, %v188_v0  ;;  %v192_v7 = vld [vmem:[#allocation14 + $0x208] sm:$0xff]  ;;  %v8980_v11 = vcombine.low %v184_v63, %v188_v0 }
  0x68   :  { %1670 = vmatpush1.bf16.msra.mxu0 %v8946_v30  ;;  %1752 = vmatpush1.bf16.msra.mxu1 %v8948_v41  ;;  %v195_v61 = vld [vmem:[#allocation14 + $0x220] sm:$0xff]  ;;  %v196_v8 = vld [vmem:[#allocation14 + $0x228] sm:$0xff] }
  0x69   :  { %1671 = vmatprep.subr.bf16.mxu0 %v8955_v31  ;;  %1753 = vmatprep.subr.bf16.mxu1 %v8957_v45  ;;  %v8987_v2 = vcombine.high %v191_v60, %v195_v61  ;;  %v199_v4 = vld [vmem:[#allocation14 + $0x240] sm:$0xff]  ;;  %v8986_v9 = vcombine.low %v191_v60, %v195_v61  ;;  %v8989_v14 = vcombine.high %v192_v7, %v196_v8  ;;  %v200_v15 = vld [vmem:[#allocation14 + $0x248] sm:$0xff] }
  0x6a   :  { %v203_v5 = vld [vmem:[#allocation14 + $0x260] sm:$0xff]  ;;  %v204_v16 = vld [vmem:[#allocation14 + $0x268] sm:$0xff]  ;;  %v8988_v19 = vcombine.low %v192_v7, %v196_v8 }
  0x6b   :  { %v8995_v10 = vcombine.high %v199_v4, %v203_v5  ;;  %v207_v12 = vld [vmem:[#allocation14 + $0x280] sm:$0xff]  ;;  %v8994_v17 = vcombine.low %v199_v4, %v203_v5  ;;  %v8997_v22 = vcombine.high %v200_v15, %v204_v16  ;;  %v208_v23 = vld [vmem:[#allocation14 + $0x288] sm:$0xff]  ;;  %v8996_v27 = vcombine.low %v200_v15, %v204_v16 }
  0x6c   :  { %1672 = vmatpush1.bf16.msra.mxu0 %v8954_v38  ;;  %1754 = vmatpush1.bf16.msra.mxu1 %v8956_v51  ;;  %v211_v13 = vld [vmem:[#allocation14 + $0x2a0] sm:$0xff]  ;;  %v212_v24 = vld [vmem:[#allocation14 + $0x2a8] sm:$0xff] }
  0x6d   :  { %1673 = vmatprep.subr.bf16.mxu0 %v8963_v40  ;;  %1755 = vmatprep.subr.bf16.mxu1 %v8965_v54  ;;  %v9003_v18 = vcombine.high %v207_v12, %v211_v13  ;;  %v215_v20 = vld [vmem:[#allocation14 + $0x2c0] sm:$0xff]  ;;  %v9002_v25 = vcombine.low %v207_v12, %v211_v13  ;;  %v9005_v30 = vcombine.high %v208_v23, %v212_v24  ;;  %v216_v31 = vld [vmem:[#allocation14 + $0x2c8] sm:$0xff] }
  0x6e   :  { %v219_v21 = vld [vmem:[#allocation14 + $0x2e0] sm:$0xff]  ;;  %v220_v32 = vld [vmem:[#allocation14 + $0x2e8] sm:$0xff]  ;;  %v9004_v35 = vcombine.low %v208_v23, %v212_v24 }
  0x6f   :  { %v9011_v26 = vcombine.high %v215_v20, %v219_v21  ;;  %v223_v28 = vld [vmem:[#allocation14 + $0x300] sm:$0xff]  ;;  %v9010_v33 = vcombine.low %v215_v20, %v219_v21  ;;  %v9013_v38 = vcombine.high %v216_v31, %v220_v32  ;;  %v224_v40 = vld [vmem:[#allocation14 + $0x308] sm:$0xff]  ;;  %v9012_v44 = vcombine.low %v216_v31, %v220_v32 }
  0x70   :  { %1674 = vmatpush1.bf16.msra.mxu0 %v8962_v49  ;;  %1756 = vmatpush1.bf16.msra.mxu1 %v8964_v59  ;;  %v227_v29 = vld [vmem:[#allocation14 + $0x320] sm:$0xff]  ;;  %v228_v41 = vld [vmem:[#allocation14 + $0x328] sm:$0xff] }
  0x71   :  { %1675 = vmatprep.subr.bf16.mxu0 %v8971_v50  ;;  %1757 = vmatprep.subr.bf16.mxu1 %v8973_v62  ;;  %v9019_v34 = vcombine.high %v223_v28, %v227_v29  ;;  %v231_v36 = vld [vmem:[#allocation14 + $0x340] sm:$0xff]  ;;  %v9018_v42 = vcombine.low %v223_v28, %v227_v29  ;;  %v9021_v47 = vcombine.high %v224_v40, %v228_v41  ;;  %v232_v49 = vld [vmem:[#allocation14 + $0x348] sm:$0xff]  ;;  %v11126_v62 = vld [vmem:[#allocation13 + $0x8] sm:$0xff] }
  0x72   :  { %v235_v37 = vld [vmem:[#allocation14 + $0x360] sm:$0xff]  ;;  %v236_v50 = vld [vmem:[#allocation14 + $0x368] sm:$0xff]  ;;  %v9020_v53 = vcombine.low %v224_v40, %v228_v41  ;;  %v120_v5 = vcombine.high %v11126_v62, %v11126_v62 }
  0x73   :  { %v9027_v43 = vcombine.high %v231_v36, %v235_v37  ;;  %v239_v45 = vld [vmem:[#allocation14 + $0x380] sm:$0xff]  ;;  %v9026_v51 = vcombine.low %v231_v36, %v235_v37  ;;  %v9029_v56 = vcombine.high %v232_v49, %v236_v50  ;;  %v9028_v61 = vcombine.low %v232_v49, %v236_v50  ;;  %v256_v12 = vld [vmem:[#allocation14 + $0x408] sm:$0xff] }
  0x74   :  { %1676 = vmatpush1.bf16.msra.mxu0 %v8970_v57  ;;  %1758 = vmatpush1.bf16.msra.mxu1 %v8972_v3  ;;  %v243_v46 = vld [vmem:[#allocation14 + $0x3a0] sm:$0xff]  ;;  %v240_v57 = vld [vmem:[#allocation14 + $0x388] sm:$0xff]  ;;  %v11134_v15 = vpack.c.bf16 %v120_v5, %v120_v5 }
  0x75   :  { %1677 = vmatprep.subr.bf16.mxu0 %v8979_v58  ;;  %1759 = vmatprep.subr.bf16.mxu1 %v8981_v6  ;;  %v9035_v52 = vcombine.high %v239_v45, %v243_v46  ;;  %v247_v54 = vld [vmem:[#allocation14 + $0x3c0] sm:$0xff]  ;;  %v244_v58 = vld [vmem:[#allocation14 + $0x3a8] sm:$0xff]  ;;  %v9034_v59 = vcombine.low %v239_v45, %v243_v46 }
  0x76   :  { %v251_v55 = vld [vmem:[#allocation14 + $0x3e0] sm:$0xff]  ;;  %v252_v3 = vld [vmem:[#allocation14 + $0x3e8] sm:$0xff]  ;;  %v9036_v7 = vcombine.low %v240_v57, %v244_v58 }
  0x77   :  { %v9043_v60 = vcombine.high %v247_v54, %v251_v55  ;;  %v255_v63 = vld [vmem:[#allocation14 + $0x400] sm:$0xff]  ;;  %v9042_v4 = vcombine.low %v247_v54, %v251_v55  ;;  %v260_v13 = vld [vmem:[#allocation14 + $0x428] sm:$0xff] }
  0x78   :  { %1678 = vmatpush1.bf16.msra.mxu0 %v8978_v1  ;;  %1760 = vmatpush1.bf16.msra.mxu1 %v8980_v11  ;;  %v259_v0 = vld [vmem:[#allocation14 + $0x420] sm:$0xff]  ;;  %v9037_v1 = vcombine.high %v240_v57, %v244_v58  ;;  %v11132_v11 = vpack.c.bf16 %v11118_v39, %v11118_v39  ;;  %v9053_v20 = vcombine.high %v256_v12, %v260_v13  ;;  %v264_v21 = vld [vmem:[#allocation14 + $0x448] sm:$0xff] }
  0x79   :  { %1679 = vmatprep.subr.bf16.mxu0 %v8987_v2  ;;  %1761 = vmatprep.subr.bf16.mxu1 %v8989_v14  ;;  %v248_v2 = vld [vmem:[#allocation14 + $0x3c8] sm:$0xff]  ;;  %v9051_v6 = vcombine.high %v255_v63, %v259_v0  ;;  %v263_v8 = vld [vmem:[#allocation14 + $0x440] sm:$0xff]  ;;  %v9050_v14 = vcombine.low %v255_v63, %v259_v0  ;;  %v9052_v24 = vcombine.low %v256_v12, %v260_v13 }
  0x7a   :  { %v272_v28 = vld [vmem:[#allocation14 + $0x488] sm:$0xff]  ;;  %v323_v5 = vld [vmem:[#allocation14 + $0x620] sm:$0xff] }
  0x7b   :  { %v276_v29 = vld [vmem:[#allocation14 + $0x4a8] sm:$0xff]  ;;  %v327_v13 = vld [vmem:[#allocation14 + $0x640] sm:$0xff] }
  0x7c   :  { %1680 = vmatpush1.bf16.msra.mxu0 %v8986_v9  ;;  %1762 = vmatpush1.bf16.msra.mxu1 %v8988_v19  ;;  %v267_v9 = vld [vmem:[#allocation14 + $0x460] sm:$0xff]  ;;  %v280_v36 = vld [vmem:[#allocation14 + $0x4c8] sm:$0xff]  ;;  %v9068_v41 = vcombine.low %v272_v28, %v276_v29 }
  0x7d   :  { %1681 = vmatprep.subr.bf16.mxu0 %v8995_v10  ;;  %1763 = vmatprep.subr.bf16.mxu1 %v8997_v22  ;;  %v9045_v10 = vcombine.high %v248_v2, %v252_v3  ;;  %v9059_v16 = vcombine.high %v263_v8, %v267_v9  ;;  %v275_v19 = vld [vmem:[#allocation14 + $0x4a0] sm:$0xff]  ;;  %v268_v22 = vld [vmem:[#allocation14 + $0x468] sm:$0xff]  ;;  %v9058_v39 = vcombine.low %v263_v8, %v267_v9 }
  0x7e   :  { %v9060_v32 = vcombine.low %v264_v21, %v268_v22  ;;  %v284_v37 = vld [vmem:[#allocation14 + $0x4e8] sm:$0xff] }
  0x7f   :  { %v288_v45 = vld [vmem:[#allocation14 + $0x508] sm:$0xff]  ;;  %v9076_v50 = vcombine.low %v280_v36, %v284_v37 }
  0x80   :  { %1682 = vmatpush1.bf16.msra.mxu0 %v8994_v17  ;;  %1764 = vmatpush1.bf16.msra.mxu1 %v8996_v27  ;;  %v9044_v17 = vcombine.low %v248_v2, %v252_v3  ;;  %v9061_v27 = vcombine.high %v264_v21, %v268_v22  ;;  %v292_v46 = vld [vmem:[#allocation14 + $0x528] sm:$0xff]  ;;  %v335_v22 = vld [vmem:[#allocation14 + $0x680] sm:$0xff] }
  0x81   :  { %1683 = vmatprep.subr.bf16.mxu0 %v9003_v18  ;;  %1765 = vmatprep.subr.bf16.mxu1 %v9005_v30  ;;  %v271_v18 = vld [vmem:[#allocation14 + $0x480] sm:$0xff]  ;;  %v296_v54 = vld [vmem:[#allocation14 + $0x548] sm:$0xff]  ;;  %v9084_v58 = vcombine.low %v288_v45, %v292_v46 }
  0x82   :  { %v9067_v23 = vcombine.high %v271_v18, %v275_v19  ;;  %v9066_v30 = vcombine.low %v271_v18, %v275_v19  ;;  %v300_v55 = vld [vmem:[#allocation14 + $0x568] sm:$0xff] }
  0x83   :  { %v304_v63 = vld [vmem:[#allocation14 + $0x588] sm:$0xff]  ;;  %v9092_v3 = vcombine.low %v296_v54, %v300_v55 }
  0x84   :  { %1684 = vmatpush1.bf16.msra.mxu0 %v9002_v25  ;;  %1766 = vmatpush1.bf16.msra.mxu1 %v9004_v35  ;;  %v279_v25 = vld [vmem:[#allocation14 + $0x4c0] sm:$0xff]  ;;  %v9069_v35 = vcombine.high %v272_v28, %v276_v29  ;;  %v308_v0 = vld [vmem:[#allocation14 + $0x5a8] sm:$0xff] }
  0x85   :  { %1685 = vmatprep.subr.bf16.mxu0 %v9011_v26  ;;  %1767 = vmatprep.subr.bf16.mxu1 %v9013_v38  ;;  %v283_v26 = vld [vmem:[#allocation14 + $0x4e0] sm:$0xff]  ;;  %v316_v8 = vld [vmem:[#allocation14 + $0x5e8] sm:$0xff]  ;;  %v9100_v12 = vcombine.low %v304_v63, %v308_v0 }
  0x86   :  { %v9075_v31 = vcombine.high %v279_v25, %v283_v26  ;;  %v9074_v38 = vcombine.low %v279_v25, %v283_v26  ;;  %v324_v18 = vld [vmem:[#allocation14 + $0x628] sm:$0xff]  ;;  %v343_v29 = vld [vmem:[#allocation14 + $0x6c0] sm:$0xff] }
  0x87   :  { %v332_v25 = vld [vmem:[#allocation14 + $0x668] sm:$0xff] }
  0x88   :  { %1686 = vmatpush1.bf16.msra.mxu0 %v9010_v33  ;;  %1768 = vmatpush1.bf16.msra.mxu1 %v9012_v44  ;;  %v287_v33 = vld [vmem:[#allocation14 + $0x500] sm:$0xff]  ;;  %v9077_v44 = vcombine.high %v280_v36, %v284_v37 }
  0x89   :  { %1687 = vmatprep.subr.bf16.mxu0 %v9019_v34  ;;  %1769 = vmatprep.subr.bf16.mxu1 %v9021_v47  ;;  %v291_v34 = vld [vmem:[#allocation14 + $0x520] sm:$0xff] }
  0x8a   :  { %v9083_v40 = vcombine.high %v287_v33, %v291_v34  ;;  %v9082_v47 = vcombine.low %v287_v33, %v291_v34  ;;  %v340_v33 = vld [vmem:[#allocation14 + $0x6a8] sm:$0xff]  ;;  %v351_v37 = vld [vmem:[#allocation14 + $0x700] sm:$0xff] }
  0x8c   :  { %1688 = vmatpush1.bf16.msra.mxu0 %v9018_v42  ;;  %1770 = vmatpush1.bf16.msra.mxu1 %v9020_v53  ;;  %v295_v42 = vld [vmem:[#allocation14 + $0x540] sm:$0xff]  ;;  %v9085_v53 = vcombine.high %v288_v45, %v292_v46 }
  0x8d   :  { %1689 = vmatprep.subr.bf16.mxu0 %v9027_v43  ;;  %1771 = vmatprep.subr.bf16.mxu1 %v9029_v56  ;;  %v299_v43 = vld [vmem:[#allocation14 + $0x560] sm:$0xff] }
  0x8e   :  { %v9091_v49 = vcombine.high %v295_v42, %v299_v43  ;;  %v9090_v56 = vcombine.low %v295_v42, %v299_v43  ;;  %v348_v42 = vld [vmem:[#allocation14 + $0x6e8] sm:$0xff]  ;;  %v359_v46 = vld [vmem:[#allocation14 + $0x740] sm:$0xff] }
  0x90   :  { %1690 = vmatpush1.bf16.msra.mxu0 %v9026_v51  ;;  %1772 = vmatpush1.bf16.msra.mxu1 %v9028_v61  ;;  %v303_v51 = vld [vmem:[#allocation14 + $0x580] sm:$0xff]  ;;  %v9093_v61 = vcombine.high %v296_v54, %v300_v55 }
  0x91   :  { %1691 = vmatprep.subr.bf16.mxu0 %v9035_v52  ;;  %1773 = vmatprep.subr.bf16.mxu1 %v9037_v1  ;;  %v307_v52 = vld [vmem:[#allocation14 + $0x5a0] sm:$0xff] }
  0x92   :  { %v9099_v57 = vcombine.high %v303_v51, %v307_v52  ;;  %v9098_v1 = vcombine.low %v303_v51, %v307_v52  ;;  %v356_v51 = vld [vmem:[#allocation14 + $0x728] sm:$0xff]  ;;  %v367_v55 = vld [vmem:[#allocation14 + $0x780] sm:$0xff] }
  0x94   :  { %1692 = vmatpush1.bf16.msra.mxu0 %v9034_v59  ;;  %1774 = vmatpush1.bf16.msra.mxu1 %v9036_v7  ;;  %v311_v59 = vld [vmem:[#allocation14 + $0x5c0] sm:$0xff]  ;;  %v312_v7 = vld [vmem:[#allocation14 + $0x5c8] sm:$0xff] }
  0x95   :  { %1693 = vmatprep.subr.bf16.mxu0 %v9043_v60  ;;  %1775 = vmatprep.subr.bf16.mxu1 %v9045_v10  ;;  %v315_v60 = vld [vmem:[#allocation14 + $0x5e0] sm:$0xff]  ;;  %v9108_v21 = vcombine.low %v312_v7, %v316_v8 }
  0x96   :  { %v9107_v2 = vcombine.high %v311_v59, %v315_v60  ;;  %v9106_v9 = vcombine.low %v311_v59, %v315_v60  ;;  %v364_v59 = vld [vmem:[#allocation14 + $0x768] sm:$0xff] }
  0x98   :  { %1694 = vmatpush1.bf16.msra.mxu0 %v9042_v4  ;;  %1776 = vmatpush1.bf16.msra.mxu1 %v9044_v17  ;;  %v319_v4 = vld [vmem:[#allocation14 + $0x600] sm:$0xff]  ;;  %v320_v17 = vld [vmem:[#allocation14 + $0x608] sm:$0xff] }
  0x99   :  { %1704 = vmatprep.subr.bf16.mxu0 %v9051_v6  ;;  %1786 = vmatprep.subr.bf16.mxu1 %v9053_v20  ;;  %v9101_v6 = vcombine.high %v304_v63, %v308_v0  ;;  %v9115_v10 = vcombine.high %v319_v4, %v323_v5  ;;  %v9114_v19 = vcombine.low %v319_v4, %v323_v5  ;;  %v375_v0 = vld [vmem:[#allocation14 + $0x7c0] sm:$0xff]  ;;  %v372_v4 = vld [vmem:[#allocation14 + $0x7a8] sm:$0xff] }
  0x9a   :  { %v9116_v28 = vcombine.low %v320_v17, %v324_v18 }
  0x9b   :  { %1696 = vmatmul.mubr.bf16.vlgmr.msra.gmra.mrb[0].mxu0 %v11132_v11  ;;  %1778 = vmatmul.mubr.bf16.vlgmr.msra.gmra.mrb[0].mxu1 %v11132_v11 }
  0x9c   :  { %1705 = vmatpush1.bf16.msra.mxu0 %v9050_v14  ;;  %1736 = vmatprep.mubr.bf16.mxu0 %v11134_v15  ;;  %v331_v14 = vld [vmem:[#allocation14 + $0x660] sm:$0xff] }
  0x9d   :  { %1706 = vmatprep.subr.bf16.mxu0 %v9059_v16  ;;  %1787 = vmatpush1.bf16.msra.mxu1 %v9052_v24  ;;  %v9109_v16 = vcombine.high %v312_v7, %v316_v8  ;;  %v9123_v20 = vcombine.high %v327_v13, %v331_v14  ;;  %v328_v24 = vld [vmem:[#allocation14 + $0x648] sm:$0xff]  ;;  %v9122_v26 = vcombine.low %v327_v13, %v331_v14  ;;  %v129_v8 = vld [vmem:[#allocation14 + $0x10] sm:$0xff] }
  0x9e   :  { %1788 = vmatprep.subr.bf16.mxu1 %v9061_v27  ;;  %1818 = vmatprep.mubr.bf16.mxu1 %v11134_v15  ;;  %v9124_v36 = vcombine.low %v328_v24, %v332_v25  ;;  %v380_v13 = vld [vmem:[#allocation14 + $0x7e8] sm:$0xff] }
  0xa0   :  { %1707 = vmatpush1.bf16.msra.mxu0 %v9058_v39  ;;  %v339_v39 = vld [vmem:[#allocation14 + $0x6a0] sm:$0xff] }
  0xa1   :  { %1708 = vmatprep.subr.bf16.mxu0 %v9067_v23  ;;  %1789 = vmatpush1.bf16.msra.mxu1 %v9060_v32  ;;  %v9117_v23 = vcombine.high %v320_v17, %v324_v18  ;;  %v9131_v27 = vcombine.high %v335_v22, %v339_v39  ;;  %v336_v32 = vld [vmem:[#allocation14 + $0x688] sm:$0xff]  ;;  %v9130_v34 = vcombine.low %v335_v22, %v339_v39  ;;  %v137_v18 = vld [vmem:[#allocation14 + $0x50] sm:$0xff]  ;;  %v130_v22 = vld [vmem:[#allocation14 + $0x18] sm:$0xff] }
  0xa2   :  { %1790 = vmatprep.subr.bf16.mxu1 %v9069_v35  ;;  %v9132_v45 = vcombine.low %v336_v32, %v340_v33  ;;  %v134_v39 = vld [vmem:[#allocation14 + $0x38] sm:$0xff] }
  0xa4   :  { %1709 = vmatpush1.bf16.msra.mxu0 %v9066_v30  ;;  %v347_v30 = vld [vmem:[#allocation14 + $0x6e0] sm:$0xff] }
  0xa5   :  { %1710 = vmatprep.subr.bf16.mxu0 %v9075_v31  ;;  %1791 = vmatpush1.bf16.msra.mxu1 %v9068_v41  ;;  %v9125_v31 = vcombine.high %v328_v24, %v332_v25  ;;  %v9139_v35 = vcombine.high %v343_v29, %v347_v30  ;;  %v344_v41 = vld [vmem:[#allocation14 + $0x6c8] sm:$0xff]  ;;  %v9138_v43 = vcombine.low %v343_v29, %v347_v30  ;;  %v138_v29 = vld [vmem:[#allocation14 + $0x58] sm:$0xff] }
  0xa6   :  { %1792 = vmatprep.subr.bf16.mxu1 %v9077_v44  ;;  %v9140_v54 = vcombine.low %v344_v41, %v348_v42  ;;  %v142_v30 = vld [vmem:[#allocation14 + $0x78] sm:$0xff] }
  0xa8   :  { %1711 = vmatpush1.bf16.msra.mxu0 %v9074_v38  ;;  %v355_v38 = vld [vmem:[#allocation14 + $0x720] sm:$0xff] }
  0xa9   :  { %1712 = vmatprep.subr.bf16.mxu0 %v9083_v40  ;;  %1793 = vmatpush1.bf16.msra.mxu1 %v9076_v50  ;;  %v9133_v40 = vcombine.high %v336_v32, %v340_v33  ;;  %v9147_v44 = vcombine.high %v351_v37, %v355_v38  ;;  %v352_v50 = vld [vmem:[#allocation14 + $0x708] sm:$0xff]  ;;  %v9146_v52 = vcombine.low %v351_v37, %v355_v38  ;;  %v153_v33 = vld [vmem:[#allocation14 + $0xd0] sm:$0xff]  ;;  %v150_v37 = vld [vmem:[#allocation14 + $0xb8] sm:$0xff] }
  0xaa   :  { %1794 = vmatprep.subr.bf16.mxu1 %v9085_v53  ;;  %v9148_v63 = vcombine.low %v352_v50, %v356_v51  ;;  %v8928_v32 = vcombine.low %v130_v22, %v134_v39 }
  0xac   :  { %1713 = vmatpush1.bf16.msra.mxu0 %v9082_v47  ;;  %v363_v47 = vld [vmem:[#allocation14 + $0x760] sm:$0xff] }
  0xad   :  { %1714 = vmatprep.subr.bf16.mxu0 %v9091_v49  ;;  %1795 = vmatpush1.bf16.msra.mxu1 %v9084_v58  ;;  %v9141_v49 = vcombine.high %v344_v41, %v348_v42  ;;  %v9155_v53 = vcombine.high %v359_v46, %v363_v47  ;;  %v360_v58 = vld [vmem:[#allocation14 + $0x748] sm:$0xff]  ;;  %v9154_v60 = vcombine.low %v359_v46, %v363_v47  ;;  %v161_v42 = vld [vmem:[#allocation14 + $0x110] sm:$0xff]  ;;  %v158_v46 = vld [vmem:[#allocation14 + $0xf8] sm:$0xff] }
  0xae   :  { %1796 = vmatprep.subr.bf16.mxu1 %v9093_v61  ;;  %v9156_v7 = vcombine.low %v360_v58, %v364_v59  ;;  %v8936_v41 = vcombine.low %v138_v29, %v142_v30 }
  0xb0   :  { %1715 = vmatpush1.bf16.msra.mxu0 %v9090_v56  ;;  %v371_v56 = vld [vmem:[#allocation14 + $0x7a0] sm:$0xff] }
  0xb1   :  { %1716 = vmatprep.subr.bf16.mxu0 %v9099_v57  ;;  %1797 = vmatpush1.bf16.msra.mxu1 %v9092_v3  ;;  %v9149_v57 = vcombine.high %v352_v50, %v356_v51  ;;  %v9163_v61 = vcombine.high %v367_v55, %v371_v56  ;;  %v368_v3 = vld [vmem:[#allocation14 + $0x788] sm:$0xff]  ;;  %v9162_v5 = vcombine.low %v367_v55, %v371_v56  ;;  %v169_v51 = vld [vmem:[#allocation14 + $0x150] sm:$0xff]  ;;  %v166_v55 = vld [vmem:[#allocation14 + $0x138] sm:$0xff] }
  0xb2   :  { %1798 = vmatprep.subr.bf16.mxu1 %v9101_v6  ;;  %v9164_v17 = vcombine.low %v368_v3, %v372_v4 }
  0xb4   :  { %1717 = vmatpush1.bf16.msra.mxu0 %v9098_v1  ;;  %v379_v1 = vld [vmem:[#allocation14 + $0x7e0] sm:$0xff] }
  0xb5   :  { %1718 = vmatprep.subr.bf16.mxu0 %v9107_v2  ;;  %1799 = vmatpush1.bf16.msra.mxu1 %v9100_v12  ;;  %v9157_v2 = vcombine.high %v360_v58, %v364_v59  ;;  %v9171_v6 = vcombine.high %v375_v0, %v379_v1  ;;  %v376_v12 = vld [vmem:[#allocation14 + $0x7c8] sm:$0xff]  ;;  %v9170_v14 = vcombine.low %v375_v0, %v379_v1  ;;  %v177_v58 = vld [vmem:[#allocation14 + $0x190] sm:$0xff] }
  0xb6   :  { %1800 = vmatprep.subr.bf16.mxu1 %v9109_v16  ;;  %v9172_v25 = vcombine.low %v376_v12, %v380_v13  ;;  %v181_v59 = vld [vmem:[#allocation14 + $0x1b0] sm:$0xff] }
  0xb7   :  { %v8975_v1 = vcombine.high %v177_v58, %v181_v59 }
  0xb8   :  { %1719 = vmatpush1.bf16.msra.mxu0 %v9106_v9  ;;  %v133_v9 = vld [vmem:[#allocation14 + $0x30] sm:$0xff] }
  0xb9   :  { %1720 = vmatprep.subr.bf16.mxu0 %v9115_v10  ;;  %1801 = vmatpush1.bf16.msra.mxu1 %v9108_v21  ;;  %v9165_v10 = vcombine.high %v368_v3, %v372_v4  ;;  %v8927_v16 = vcombine.high %v129_v8, %v133_v9  ;;  %v11142_v21 = vpack.c.bf16 %v11126_v62, %v11126_v62  ;;  %v185_v3 = vld [vmem:[#allocation14 + $0x1d0] sm:$0xff] }
  0xba   :  { %1802 = vmatprep.subr.bf16.mxu1 %v9117_v23  ;;  %v8926_v23 = vcombine.low %v129_v8, %v133_v9  ;;  %v189_v4 = vld [vmem:[#allocation14 + $0x1f0] sm:$0xff]  ;;  %v8974_v8 = vcombine.low %v177_v58, %v181_v59 }
  0xbb   :  { %v8983_v9 = vcombine.high %v185_v3, %v189_v4 }
  0xbc   :  { %1721 = vmatpush1.bf16.msra.mxu0 %v9114_v19  ;;  %v141_v19 = vld [vmem:[#allocation14 + $0x70] sm:$0xff] }
  0xbd   :  { %1722 = vmatprep.subr.bf16.mxu0 %v9123_v20  ;;  %1803 = vmatpush1.bf16.msra.mxu1 %v9116_v28  ;;  %v9173_v20 = vcombine.high %v376_v12, %v380_v13  ;;  %v8935_v24 = vcombine.high %v137_v18, %v141_v19  ;;  %v8929_v28 = vcombine.high %v130_v22, %v134_v39  ;;  %v193_v12 = vld [vmem:[#allocation14 + $0x210] sm:$0xff] }
  0xbe   :  { %1804 = vmatprep.subr.bf16.mxu1 %v9125_v31  ;;  %v8934_v31 = vcombine.low %v137_v18, %v141_v19  ;;  %v197_v13 = vld [vmem:[#allocation14 + $0x230] sm:$0xff]  ;;  %v8982_v18 = vcombine.low %v185_v3, %v189_v4 }
  0xbf   :  { %v8991_v19 = vcombine.high %v193_v12, %v197_v13  ;;  %v201_v22 = vld [vmem:[#allocation14 + $0x250] sm:$0xff] }
  0xc0   :  { %1723 = vmatpush1.bf16.msra.mxu0 %v9122_v26  ;;  %v145_v26 = vld [vmem:[#allocation14 + $0x90] sm:$0xff] }
  0xc1   :  { %1724 = vmatprep.subr.bf16.mxu0 %v9131_v27  ;;  %1805 = vmatpush1.bf16.msra.mxu1 %v9124_v36  ;;  %v149_v27 = vld [vmem:[#allocation14 + $0xb0] sm:$0xff]  ;;  %v146_v36 = vld [vmem:[#allocation14 + $0x98] sm:$0xff] }
  0xc2   :  { %1806 = vmatprep.subr.bf16.mxu1 %v9133_v40  ;;  %v8943_v62 = vcombine.high %v145_v26, %v149_v27  ;;  %v8942_v38 = vcombine.low %v145_v26, %v149_v27  ;;  %v8944_v50 = vcombine.low %v146_v36, %v150_v37  ;;  %v205_v39 = vld [vmem:[#allocation14 + $0x270] sm:$0xff]  ;;  %v8990_v26 = vcombine.low %v193_v12, %v197_v13 }
  0xc3   :  { %v8999_v27 = vcombine.high %v201_v22, %v205_v39 }
  0xc4   :  { %1725 = vmatpush1.bf16.msra.mxu0 %v9130_v34  ;;  %v157_v34 = vld [vmem:[#allocation14 + $0xf0] sm:$0xff] }
  0xc5   :  { %1726 = vmatprep.subr.bf16.mxu0 %v9139_v35  ;;  %1807 = vmatpush1.bf16.msra.mxu1 %v9132_v45  ;;  %v8937_v35 = vcombine.high %v138_v29, %v142_v30  ;;  %v8951_v40 = vcombine.high %v153_v33, %v157_v34  ;;  %v154_v45 = vld [vmem:[#allocation14 + $0xd8] sm:$0xff]  ;;  %v8950_v47 = vcombine.low %v153_v33, %v157_v34  ;;  %v209_v29 = vld [vmem:[#allocation14 + $0x290] sm:$0xff] }
  0xc6   :  { %1808 = vmatprep.subr.bf16.mxu1 %v9141_v49  ;;  %v213_v30 = vld [vmem:[#allocation14 + $0x2b0] sm:$0xff]  ;;  %v8998_v33 = vcombine.low %v201_v22, %v205_v39 }
  0xc7   :  { %v9007_v34 = vcombine.high %v209_v29, %v213_v30 }
  0xc8   :  { %1727 = vmatpush1.bf16.msra.mxu0 %v9138_v43  ;;  %v165_v43 = vld [vmem:[#allocation14 + $0x130] sm:$0xff] }
  0xc9   :  { %1728 = vmatprep.subr.bf16.mxu0 %v9147_v44  ;;  %1809 = vmatpush1.bf16.msra.mxu1 %v9140_v54  ;;  %v8945_v44 = vcombine.high %v146_v36, %v150_v37  ;;  %v8959_v49 = vcombine.high %v161_v42, %v165_v43  ;;  %v162_v54 = vld [vmem:[#allocation14 + $0x118] sm:$0xff]  ;;  %v8958_v56 = vcombine.low %v161_v42, %v165_v43  ;;  %v217_v36 = vld [vmem:[#allocation14 + $0x2d0] sm:$0xff] }
  0xca   :  { %1810 = vmatprep.subr.bf16.mxu1 %v9149_v57  ;;  %v221_v37 = vld [vmem:[#allocation14 + $0x2f0] sm:$0xff]  ;;  %v9006_v42 = vcombine.low %v209_v29, %v213_v30 }
  0xcb   :  { %v9015_v43 = vcombine.high %v217_v36, %v221_v37 }
  0xcc   :  { %1729 = vmatpush1.bf16.msra.mxu0 %v9146_v52  ;;  %v173_v52 = vld [vmem:[#allocation14 + $0x170] sm:$0xff] }
  0xcd   :  { %1730 = vmatprep.subr.bf16.mxu0 %v9155_v53  ;;  %1811 = vmatpush1.bf16.msra.mxu1 %v9148_v63  ;;  %v8953_v53 = vcombine.high %v154_v45, %v158_v46  ;;  %v8967_v57 = vcombine.high %v169_v51, %v173_v52  ;;  %v174_v63 = vld [vmem:[#allocation14 + $0x178] sm:$0xff]  ;;  %v8966_v0 = vcombine.low %v169_v51, %v173_v52 }
  0xce   :  { %1812 = vmatprep.subr.bf16.mxu1 %v9157_v2  ;;  %v8960_v2 = vcombine.low %v162_v54, %v166_v55  ;;  %v9014_v51 = vcombine.low %v217_v36, %v221_v37 }
  0xd0   :  { %1731 = vmatpush1.bf16.msra.mxu0 %v9154_v60  ;;  %v8961_v60 = vcombine.high %v162_v54, %v166_v55  ;;  %v233_v54 = vld [vmem:[#allocation14 + $0x350] sm:$0xff] }
  0xd1   :  { %1732 = vmatprep.subr.bf16.mxu0 %v9163_v61  ;;  %1813 = vmatpush1.bf16.msra.mxu1 %v9156_v7  ;;  %v170_v61 = vld [vmem:[#allocation14 + $0x158] sm:$0xff]  ;;  %v237_v55 = vld [vmem:[#allocation14 + $0x370] sm:$0xff] }
  0xd2   :  { %1814 = vmatprep.subr.bf16.mxu1 %v9165_v10  ;;  %v182_v7 = vld [vmem:[#allocation14 + $0x1b8] sm:$0xff]  ;;  %v8968_v10 = vcombine.low %v170_v61, %v174_v63  ;;  %v9031_v59 = vcombine.high %v233_v54, %v237_v55  ;;  %v9030_v3 = vcombine.low %v233_v54, %v237_v55 }
  0xd4   :  { %1733 = vmatpush1.bf16.msra.mxu0 %v9162_v5  ;;  %v8969_v5 = vcombine.high %v170_v61, %v174_v63  ;;  %v241_v61 = vld [vmem:[#allocation14 + $0x390] sm:$0xff] }
  0xd5   :  { %1734 = vmatprep.subr.bf16.mxu0 %v9171_v6  ;;  %1815 = vmatpush1.bf16.msra.mxu1 %v9164_v17  ;;  %v178_v6 = vld [vmem:[#allocation14 + $0x198] sm:$0xff]  ;;  %v245_v63 = vld [vmem:[#allocation14 + $0x3b0] sm:$0xff] }
  0xd6   :  { %1816 = vmatprep.subr.bf16.mxu1 %v9173_v20  ;;  %v190_v17 = vld [vmem:[#allocation14 + $0x1f8] sm:$0xff]  ;;  %v8976_v20 = vcombine.low %v178_v6, %v182_v7  ;;  %v9039_v4 = vcombine.high %v241_v61, %v245_v63  ;;  %v9038_v12 = vcombine.low %v241_v61, %v245_v63  ;;  %v305_v63 = vld [vmem:[#allocation14 + $0x590] sm:$0xff] }
  0xd8   :  { %1735 = vmatpush1.bf16.msra.mxu0 %v9170_v14  ;;  %v8977_v14 = vcombine.high %v178_v6, %v182_v7  ;;  %v249_v6 = vld [vmem:[#allocation14 + $0x3d0] sm:$0xff] }
  0xd9   :  { %1827 = vmatprep.subr.bf16.mxu0 %v8927_v16  ;;  %1817 = vmatpush1.bf16.msra.mxu1 %v9172_v25  ;;  %v186_v16 = vld [vmem:[#allocation14 + $0x1d8] sm:$0xff]  ;;  %v253_v7 = vld [vmem:[#allocation14 + $0x3f0] sm:$0xff] }
  0xda   :  { %1909 = vmatprep.subr.bf16.mxu1 %v8929_v28  ;;  %v198_v25 = vld [vmem:[#allocation14 + $0x238] sm:$0xff]  ;;  %v8984_v28 = vcombine.low %v186_v16, %v190_v17  ;;  %v9047_v13 = vcombine.high %v249_v6, %v253_v7  ;;  %v9046_v22 = vcombine.low %v249_v6, %v253_v7  ;;  %v313_v7 = vld [vmem:[#allocation14 + $0x5d0] sm:$0xff] }
  0xdb   :  { %1737 = vmatmul.mubr.bf16.vlgmr.msra.gmra.mrb[0].mxu0 %v11142_v21 }
  0xdc   :  { %1828 = vmatpush1.bf16.msra.mxu0 %v8926_v23  ;;  %1859 = vmatprep.mubr.bf16.mxu0 %v11122_v48  ;;  %v8985_v23 = vcombine.high %v186_v16, %v190_v17  ;;  %v257_v16 = vld [vmem:[#allocation14 + $0x410] sm:$0xff] }
  0xdd   :  { %1829 = vmatprep.subr.bf16.mxu0 %v8935_v24  ;;  %1819 = vmatmul.mubr.bf16.vlgmr.msra.gmra.mrb[0].mxu1 %v11142_v21  ;;  %v194_v24 = vld [vmem:[#allocation14 + $0x218] sm:$0xff]  ;;  %v261_v17 = vld [vmem:[#allocation14 + $0x430] sm:$0xff] }
  0xde   :  { %1910 = vmatpush1.bf16.msra.mxu1 %v8928_v32  ;;  %1941 = vmatprep.mubr.bf16.mxu1 %v11122_v48  ;;  %v8952_v48 = vcombine.low %v154_v45, %v158_v46  ;;  %v206_v32 = vld [vmem:[#allocation14 + $0x278] sm:$0xff]  ;;  %v225_v45 = vld [vmem:[#allocation14 + $0x310] sm:$0xff]  ;;  %v9055_v39 = vcombine.high %v257_v16, %v261_v17  ;;  %v9054_v29 = vcombine.low %v257_v16, %v261_v17 }
  0xdf   :  { %1911 = vmatprep.subr.bf16.mxu1 %v8937_v35  ;;  %v8992_v35 = vcombine.low %v194_v24, %v198_v25  ;;  %v229_v46 = vld [vmem:[#allocation14 + $0x330] sm:$0xff] }
  0xe0   :  { %1830 = vmatpush1.bf16.msra.mxu0 %v8934_v31  ;;  %v8993_v31 = vcombine.high %v194_v24, %v198_v25  ;;  %v9023_v52 = vcombine.high %v225_v45, %v229_v46  ;;  %v9022_v58 = vcombine.low %v225_v45, %v229_v46  ;;  %v265_v24 = vld [vmem:[#allocation14 + $0x450] sm:$0xff] }
  0xe1   :  { %1831 = vmatprep.subr.bf16.mxu0 %v8943_v62  ;;  %v202_v62 = vld [vmem:[#allocation14 + $0x258] sm:$0xff]  ;;  %v269_v25 = vld [vmem:[#allocation14 + $0x470] sm:$0xff] }
  0xe2   :  { %1912 = vmatpush1.bf16.msra.mxu1 %v8936_v41  ;;  %v214_v41 = vld [vmem:[#allocation14 + $0x2b8] sm:$0xff]  ;;  %v9063_v30 = vcombine.high %v265_v24, %v269_v25  ;;  %v9062_v36 = vcombine.low %v265_v24, %v269_v25  ;;  %v321_v17 = vld [vmem:[#allocation14 + $0x610] sm:$0xff] }
  0xe3   :  { %1913 = vmatprep.subr.bf16.mxu1 %v8945_v44  ;;  %v9000_v44 = vcombine.low %v202_v62, %v206_v32  ;;  %v329_v25 = vld [vmem:[#allocation14 + $0x650] sm:$0xff] }
  0xe4   :  { %1832 = vmatpush1.bf16.msra.mxu0 %v8942_v38  ;;  %v9001_v38 = vcombine.high %v202_v62, %v206_v32  ;;  %v273_v62 = vld [vmem:[#allocation14 + $0x490] sm:$0xff] }
  0xe5   :  { %1833 = vmatprep.subr.bf16.mxu0 %v8951_v40  ;;  %v210_v40 = vld [vmem:[#allocation14 + $0x298] sm:$0xff]  ;;  %v277_v32 = vld [vmem:[#allocation14 + $0x4b0] sm:$0xff] }
  0xe6   :  { %1914 = vmatpush1.bf16.msra.mxu1 %v8944_v50  ;;  %v222_v50 = vld [vmem:[#allocation14 + $0x2f8] sm:$0xff]  ;;  %v9071_v37 = vcombine.high %v273_v62, %v277_v32  ;;  %v9070_v45 = vcombine.low %v273_v62, %v277_v32  ;;  %v337_v32 = vld [vmem:[#allocation14 + $0x690] sm:$0xff] }
  0xe7   :  { %1915 = vmatprep.subr.bf16.mxu1 %v8953_v53  ;;  %v9008_v53 = vcombine.low %v210_v40, %v214_v41 }
  0xe8   :  { %1834 = vmatpush1.bf16.msra.mxu0 %v8950_v47  ;;  %v9009_v47 = vcombine.high %v210_v40, %v214_v41  ;;  %v281_v40 = vld [vmem:[#allocation14 + $0x4d0] sm:$0xff] }
  0xe9   :  { %1835 = vmatprep.subr.bf16.mxu0 %v8959_v49  ;;  %v218_v49 = vld [vmem:[#allocation14 + $0x2d8] sm:$0xff]  ;;  %v285_v41 = vld [vmem:[#allocation14 + $0x4f0] sm:$0xff] }
  0xea   :  { %1916 = vmatpush1.bf16.msra.mxu1 %v8952_v48  ;;  %v230_v48 = vld [vmem:[#allocation14 + $0x338] sm:$0xff]  ;;  %v9079_v46 = vcombine.high %v281_v40, %v285_v41  ;;  %v9078_v54 = vcombine.low %v281_v40, %v285_v41  ;;  %v345_v41 = vld [vmem:[#allocation14 + $0x6d0] sm:$0xff] }
  0xeb   :  { %1917 = vmatprep.subr.bf16.mxu1 %v8961_v60  ;;  %v9016_v60 = vcombine.low %v218_v49, %v222_v50 }
  0xec   :  { %1836 = vmatpush1.bf16.msra.mxu0 %v8958_v56  ;;  %v9017_v56 = vcombine.high %v218_v49, %v222_v50  ;;  %v289_v49 = vld [vmem:[#allocation14 + $0x510] sm:$0xff] }
  0xed   :  { %1837 = vmatprep.subr.bf16.mxu0 %v8967_v57  ;;  %v226_v57 = vld [vmem:[#allocation14 + $0x318] sm:$0xff]  ;;  %v293_v50 = vld [vmem:[#allocation14 + $0x530] sm:$0xff] }
  0xee   :  { %1918 = vmatpush1.bf16.msra.mxu1 %v8960_v2  ;;  %v238_v2 = vld [vmem:[#allocation14 + $0x378] sm:$0xff]  ;;  %v9087_v55 = vcombine.high %v289_v49, %v293_v50 }
  0xef   :  { %1919 = vmatprep.subr.bf16.mxu1 %v8969_v5  ;;  %v9024_v5 = vcombine.low %v226_v57, %v230_v48 }
  0xf0   :  { %1838 = vmatpush1.bf16.msra.mxu0 %v8966_v0  ;;  %v9025_v0 = vcombine.high %v226_v57, %v230_v48  ;;  %v297_v57 = vld [vmem:[#allocation14 + $0x550] sm:$0xff] }
  0xf1   :  { %1839 = vmatprep.subr.bf16.mxu0 %v8975_v1  ;;  %v234_v1 = vld [vmem:[#allocation14 + $0x358] sm:$0xff] }
  0xf2   :  { %1920 = vmatpush1.bf16.msra.mxu1 %v8968_v10  ;;  %v246_v10 = vld [vmem:[#allocation14 + $0x3b8] sm:$0xff] }
  0xf3   :  { %1921 = vmatprep.subr.bf16.mxu1 %v8977_v14  ;;  %v9032_v14 = vcombine.low %v234_v1, %v238_v2 }
  0xf4   :  { %1840 = vmatpush1.bf16.msra.mxu0 %v8974_v8  ;;  %v9033_v8 = vcombine.high %v234_v1, %v238_v2  ;;  %v298_v2 = vld [vmem:[#allocation14 + $0x558] sm:$0xff] }
  0xf5   :  { %1841 = vmatprep.subr.bf16.mxu0 %v8983_v9  ;;  %v242_v9 = vld [vmem:[#allocation14 + $0x398] sm:$0xff] }
  0xf6   :  { %1922 = vmatpush1.bf16.msra.mxu1 %v8976_v20  ;;  %v254_v20 = vld [vmem:[#allocation14 + $0x3f8] sm:$0xff] }
  0xf7   :  { %1923 = vmatprep.subr.bf16.mxu1 %v8985_v23  ;;  %v9040_v23 = vcombine.low %v242_v9, %v246_v10 }
  0xf8   :  { %1842 = vmatpush1.bf16.msra.mxu0 %v8982_v18  ;;  %v9041_v18 = vcombine.high %v242_v9, %v246_v10  ;;  %v306_v10 = vld [vmem:[#allocation14 + $0x598] sm:$0xff] }
  0xf9   :  { %1843 = vmatprep.subr.bf16.mxu0 %v8991_v19  ;;  %v250_v19 = vld [vmem:[#allocation14 + $0x3d8] sm:$0xff] }
  0xfa   :  { %1924 = vmatpush1.bf16.msra.mxu1 %v8984_v28  ;;  %v262_v28 = vld [vmem:[#allocation14 + $0x438] sm:$0xff] }
  0xfb   :  { %1925 = vmatprep.subr.bf16.mxu1 %v8993_v31  ;;  %v9048_v31 = vcombine.low %v250_v19, %v254_v20 }
  0xfc   :  { %1844 = vmatpush1.bf16.msra.mxu0 %v8990_v26  ;;  %v9049_v26 = vcombine.high %v250_v19, %v254_v20  ;;  %v314_v20 = vld [vmem:[#allocation14 + $0x5d8] sm:$0xff] }
  0xfd   :  { %1845 = vmatprep.subr.bf16.mxu0 %v8999_v27  ;;  %v258_v27 = vld [vmem:[#allocation14 + $0x418] sm:$0xff] }
  0xfe   :  { %1926 = vmatpush1.bf16.msra.mxu1 %v8992_v35  ;;  %v270_v35 = vld [vmem:[#allocation14 + $0x478] sm:$0xff] }
  0xff   :  { %1927 = vmatprep.subr.bf16.mxu1 %v9001_v38  ;;  %v9056_v38 = vcombine.low %v258_v27, %v262_v28 }
 0x100   :  { %1846 = vmatpush1.bf16.msra.mxu0 %v8998_v33  ;;  %v9057_v33 = vcombine.high %v258_v27, %v262_v28  ;;  %v322_v28 = vld [vmem:[#allocation14 + $0x618] sm:$0xff] }
 0x101   :  { %1847 = vmatprep.subr.bf16.mxu0 %v9007_v34  ;;  %v266_v34 = vld [vmem:[#allocation14 + $0x458] sm:$0xff] }
 0x102   :  { %1928 = vmatpush1.bf16.msra.mxu1 %v9000_v44  ;;  %v278_v44 = vld [vmem:[#allocation14 + $0x4b8] sm:$0xff] }
 0x103   :  { %1929 = vmatprep.subr.bf16.mxu1 %v9009_v47  ;;  %v9064_v47 = vcombine.low %v266_v34, %v270_v35 }
 0x104   :  { %1848 = vmatpush1.bf16.msra.mxu0 %v9006_v42  ;;  %v9065_v42 = vcombine.high %v266_v34, %v270_v35  ;;  %v330_v35 = vld [vmem:[#allocation14 + $0x658] sm:$0xff] }
 0x105   :  { %1849 = vmatprep.subr.bf16.mxu0 %v9015_v43  ;;  %v274_v43 = vld [vmem:[#allocation14 + $0x498] sm:$0xff] }
 0x106   :  { %1930 = vmatpush1.bf16.msra.mxu1 %v9008_v53  ;;  %v286_v53 = vld [vmem:[#allocation14 + $0x4f8] sm:$0xff] }
 0x107   :  { %1931 = vmatprep.subr.bf16.mxu1 %v9017_v56  ;;  %v9072_v56 = vcombine.low %v274_v43, %v278_v44 }
 0x108   :  { %1850 = vmatpush1.bf16.msra.mxu0 %v9014_v51  ;;  %v9073_v51 = vcombine.high %v274_v43, %v278_v44  ;;  %v338_v44 = vld [vmem:[#allocation14 + $0x698] sm:$0xff] }
 0x109   :  { %1851 = vmatprep.subr.bf16.mxu0 %v9023_v52  ;;  %v282_v52 = vld [vmem:[#allocation14 + $0x4d8] sm:$0xff] }
 0x10a   :  { %1932 = vmatpush1.bf16.msra.mxu1 %v9016_v60  ;;  %v9081_v48 = vcombine.high %v282_v52, %v286_v53  ;;  %v9086_v60 = vcombine.low %v289_v49, %v293_v50  ;;  %v353_v50 = vld [vmem:[#allocation14 + $0x710] sm:$0xff] }
 0x10b   :  { %1933 = vmatprep.subr.bf16.mxu1 %v9025_v0  ;;  %v309_v0 = vld [vmem:[#allocation14 + $0x5b0] sm:$0xff] }
 0x10c   :  { %1852 = vmatpush1.bf16.msra.mxu0 %v9022_v58  ;;  %v290_v58 = vld [vmem:[#allocation14 + $0x518] sm:$0xff] }
 0x10d   :  { %1853 = vmatprep.subr.bf16.mxu0 %v9031_v59  ;;  %v294_v59 = vld [vmem:[#allocation14 + $0x538] sm:$0xff] }
 0x10e   :  { %1934 = vmatpush1.bf16.msra.mxu1 %v9024_v5  ;;  %v9089_v1 = vcombine.high %v290_v58, %v294_v59  ;;  %v9103_v5 = vcombine.high %v305_v63, %v309_v0  ;;  %v9088_v6 = vcombine.low %v290_v58, %v294_v59  ;;  %v354_v59 = vld [vmem:[#allocation14 + $0x718] sm:$0xff] }
 0x10f   :  { %1935 = vmatprep.subr.bf16.mxu1 %v9033_v8  ;;  %v317_v8 = vld [vmem:[#allocation14 + $0x5f0] sm:$0xff] }
 0x110   :  { %1854 = vmatpush1.bf16.msra.mxu0 %v9030_v3  ;;  %v302_v3 = vld [vmem:[#allocation14 + $0x578] sm:$0xff] }
 0x111   :  { %1855 = vmatprep.subr.bf16.mxu0 %v9039_v4  ;;  %v9097_v9 = vcombine.high %v298_v2, %v302_v3  ;;  %v9096_v16 = vcombine.low %v298_v2, %v302_v3  ;;  %v362_v3 = vld [vmem:[#allocation14 + $0x758] sm:$0xff] }
 0x112   :  { %1936 = vmatpush1.bf16.msra.mxu1 %v9032_v14  ;;  %v9111_v14 = vcombine.high %v313_v7, %v317_v8 }
 0x113   :  { %1937 = vmatprep.subr.bf16.mxu1 %v9041_v18  ;;  %v325_v18 = vld [vmem:[#allocation14 + $0x630] sm:$0xff] }
 0x114   :  { %1856 = vmatpush1.bf16.msra.mxu0 %v9038_v12  ;;  %v310_v12 = vld [vmem:[#allocation14 + $0x5b8] sm:$0xff] }
 0x115   :  { %1857 = vmatprep.subr.bf16.mxu0 %v9047_v13  ;;  %v9102_v13 = vcombine.low %v305_v63, %v309_v0  ;;  %v9105_v19 = vcombine.high %v306_v10, %v310_v12  ;;  %v9104_v24 = vcombine.low %v306_v10, %v310_v12  ;;  %v369_v0 = vld [vmem:[#allocation14 + $0x790] sm:$0xff]  ;;  %v370_v12 = vld [vmem:[#allocation14 + $0x798] sm:$0xff] }
 0x116   :  { %1938 = vmatpush1.bf16.msra.mxu1 %v9040_v23  ;;  %v9119_v23 = vcombine.high %v321_v17, %v325_v18 }
 0x117   :  { %1939 = vmatprep.subr.bf16.mxu1 %v9049_v26  ;;  %v333_v26 = vld [vmem:[#allocation14 + $0x670] sm:$0xff] }
 0x118   :  { %1858 = vmatpush1.bf16.msra.mxu0 %v9046_v22  ;;  %v318_v22 = vld [vmem:[#allocation14 + $0x5f8] sm:$0xff] }
 0x119   :  { %1868 = vmatprep.subr.bf16.mxu0 %v9055_v39  ;;  %v9110_v39 = vcombine.low %v313_v7, %v317_v8  ;;  %v9113_v27 = vcombine.high %v314_v20, %v318_v22  ;;  %v9112_v62 = vcombine.low %v314_v20, %v318_v22  ;;  %v377_v8 = vld [vmem:[#allocation14 + $0x7d0] sm:$0xff]  ;;  %v382_v20 = vld [vmem:[#allocation14 + $0x7f8] sm:$0xff] }
 0x11a   :  { %1940 = vmatpush1.bf16.msra.mxu1 %v9048_v31  ;;  %v9127_v31 = vcombine.high %v329_v25, %v333_v26 }
 0x11b   :  { %1860 = vmatmul.mubr.bf16.vlgmr.msra.gmra.mrb[4].mxu0 %v11132_v11  ;;  %1950 = vmatprep.subr.bf16.mxu1 %v9057_v33  ;;  %v341_v33 = vld [vmem:[#allocation14 + $0x6b0] sm:$0xff] }
 0x11c   :  { %1869 = vmatpush1.bf16.msra.mxu0 %v9054_v29  ;;  %1900 = vmatprep.mubr.bf16.mxu0 %v11134_v15  ;;  %v326_v29 = vld [vmem:[#allocation14 + $0x638] sm:$0xff] }
 0x11d   :  { %1870 = vmatprep.subr.bf16.mxu0 %v9063_v30  ;;  %1942 = vmatmul.mubr.bf16.vlgmr.msra.gmra.mrb[4].mxu1 %v11132_v11  ;;  %v301_v11 = vld [vmem:[#allocation14 + $0x570] sm:$0xff]  ;;  %v9118_v30 = vcombine.low %v321_v17, %v325_v18  ;;  %v9121_v34 = vcombine.high %v322_v28, %v326_v29  ;;  %v9120_v40 = vcombine.low %v322_v28, %v326_v29  ;;  %v11160_v28 = vld [vmem:[#allocation16 + $0x8] sm:$0xff]  }
 0x11e   :  { %1951 = vmatpush1.bf16.msra.mxu1 %v9056_v38  ;;  %1982 = vmatprep.mubr.bf16.mxu1 %v11134_v15  ;;  %v9095_v61 = vcombine.high %v297_v57, %v301_v11  ;;  %v9080_v15 = vcombine.low %v282_v52, %v286_v53  ;;  %v9094_v4 = vcombine.low %v297_v57, %v301_v11  ;;  %v346_v53 = vld [vmem:[#allocation14 + $0x6d8] sm:$0xff]  ;;  %v361_v11 = vld [vmem:[#allocation14 + $0x750] sm:$0xff] }
 0x11f   :  { %1952 = vmatprep.subr.bf16.mxu1 %v9065_v42  ;;  %v9135_v38 = vcombine.high %v337_v32, %v341_v33  ;;  %v349_v42 = vld [vmem:[#allocation14 + $0x6f0] sm:$0xff] }
 0x120   :  { %1871 = vmatpush1.bf16.msra.mxu0 %v9062_v36  ;;  %v334_v36 = vld [vmem:[#allocation14 + $0x678] sm:$0xff]  ;;  %v11167_v29 = vld [vmem:[#allocation16 + $0x10] sm:$0xff]  }
 0x121   :  { %1872 = vmatprep.subr.bf16.mxu0 %v9071_v37  ;;  %v9126_v37 = vcombine.low %v329_v25, %v333_v26  ;;  %v9129_v43 = vcombine.high %v330_v35, %v334_v36  ;;  %v9128_v49 = vcombine.low %v330_v35, %v334_v36  ;;  %v10988_v25 = vmov 0.0|0.0   ;;  %v11153_v26 = vld [vmem:[#allocation16] sm:$0xff]  }
 0x122   :  { %1953 = vmatpush1.bf16.msra.mxu1 %v9064_v47  ;;  %v9143_v47 = vcombine.high %v345_v41, %v349_v42 }
 0x123   :  { %1954 = vmatprep.subr.bf16.mxu1 %v9073_v51  ;;  %v357_v51 = vld [vmem:[#allocation14 + $0x730] sm:$0xff] }
 0x124   :  { %1873 = vmatpush1.bf16.msra.mxu0 %v9070_v45  ;;  %v342_v45 = vld [vmem:[#allocation14 + $0x6b8] sm:$0xff] }
 0x125   :  { %1874 = vmatprep.subr.bf16.mxu0 %v9079_v46  ;;  %v9134_v46 = vcombine.low %v337_v32, %v341_v33  ;;  %v9137_v52 = vcombine.high %v338_v44, %v342_v45  ;;  %v9136_v57 = vcombine.low %v338_v44, %v342_v45  ;;  %v11199_v32 = vld [vmem:[#allocation16 + $0x38] sm:$0xff]  }
 0x126   :  { %1955 = vmatpush1.bf16.msra.mxu1 %v9072_v56  ;;  %v9151_v56 = vcombine.high %v353_v50, %v357_v51 }
 0x127   :  { %1956 = vmatprep.subr.bf16.mxu1 %v9081_v48  ;;  %v365_v48 = vld [vmem:[#allocation14 + $0x770] sm:$0xff] }
 0x128   :  { %1875 = vmatpush1.bf16.msra.mxu0 %v9078_v54  ;;  %v350_v54 = vld [vmem:[#allocation14 + $0x6f8] sm:$0xff] }
 0x129   :  { %1876 = vmatprep.subr.bf16.mxu0 %v9087_v55  ;;  %v9142_v55 = vcombine.low %v345_v41, %v349_v42  ;;  %v9145_v58 = vcombine.high %v346_v53, %v350_v54  ;;  %v9144_v63 = vcombine.low %v346_v53, %v350_v54  ;;  %v2097_v53 = vlaneseq }
 0x12a   :  { %1957 = vmatpush1.bf16.msra.mxu1 %v9080_v15  ;;  %v9159_v15 = vcombine.high %v361_v11, %v365_v48 }
 0x12b   :  { %1958 = vmatprep.subr.bf16.mxu1 %v9089_v1  ;;  %v373_v1 = vld [vmem:[#allocation14 + $0x7b0] sm:$0xff] }
 0x12c   :  { %1877 = vmatpush1.bf16.msra.mxu0 %v9086_v60  ;;  %v358_v60 = vld [vmem:[#allocation14 + $0x738] sm:$0xff] }
 0x12d   :  { %1878 = vmatprep.subr.bf16.mxu0 %v9095_v61  ;;  %v9150_v61 = vcombine.low %v353_v50, %v357_v51  ;;  %v9153_v2 = vcombine.high %v354_v59, %v358_v60  ;;  %v9152_v7 = vcombine.low %v354_v59, %v358_v60  ;;  %v10991_v51 = vmov 1966171168  }
 0x12e   :  { %1959 = vmatpush1.bf16.msra.mxu1 %v9088_v6  ;;  %v9167_v6 = vcombine.high %v369_v0, %v373_v1 }
 0x12f   :  { %1960 = vmatprep.subr.bf16.mxu1 %v9097_v9  ;;  %v381_v9 = vld [vmem:[#allocation14 + $0x7f0] sm:$0xff] }
 0x130   :  { %1879 = vmatpush1.bf16.msra.mxu0 %v9094_v4  ;;  %v366_v4 = vld [vmem:[#allocation14 + $0x778] sm:$0xff]  ;;  %v9174_v22 = vcombine.low %v377_v8, %v381_v9 }
 0x131   :  { %1880 = vmatprep.subr.bf16.mxu0 %v9103_v5  ;;  %v9158_v5 = vcombine.low %v361_v11, %v365_v48  ;;  %v9161_v10 = vcombine.high %v362_v3, %v366_v4  ;;  %v9160_v17 = vcombine.low %v362_v3, %v366_v4 }
 0x132   :  { %1961 = vmatpush1.bf16.msra.mxu1 %v9096_v16  ;;  %v9175_v16 = vcombine.high %v377_v8, %v381_v9 }
 0x133   :  { %1962 = vmatprep.subr.bf16.mxu1 %v9105_v19  ;;  %v378_v19 = vld [vmem:[#allocation14 + $0x7d8] sm:$0xff] }
 0x134   :  { %1881 = vmatpush1.bf16.msra.mxu0 %v9102_v13  ;;  %v374_v13 = vld [vmem:[#allocation14 + $0x7b8] sm:$0xff] }
 0x135   :  { %1882 = vmatprep.subr.bf16.mxu0 %v9111_v14  ;;  %v9166_v14 = vcombine.low %v369_v0, %v373_v1  ;;  %v9169_v18 = vcombine.high %v370_v12, %v374_v13 }
 0x136   :  { %1963 = vmatpush1.bf16.msra.mxu1 %v9104_v24  ;;  %v9176_v24 = vcombine.low %v378_v19, %v382_v20 }
 0x137   :  { %1964 = vmatprep.subr.bf16.mxu1 %v9113_v27  ;;  %v10990_v27 = vmov 0.0  }
 0x138   :  { %1883 = vmatpush1.bf16.msra.mxu0 %v9110_v39  ;;  %v9168_v39 = vcombine.low %v370_v12, %v374_v13 }
 0x139   :  { %1884 = vmatprep.subr.bf16.mxu0 %v9119_v23  ;;  %v9177_v23 = vcombine.high %v378_v19, %v382_v20 }
 0x13a   :  { %1965 = vmatpush1.bf16.msra.mxu1 %v9112_v62  ;;  %v11193_v62 = vld [vmem:[#allocation16 + $0x30] sm:$0xff]  }
 0x13b   :  { %1966 = vmatprep.subr.bf16.mxu1 %v9121_v34 }
 0x13c   :  { %1885 = vmatpush1.bf16.msra.mxu0 %v9118_v30  ;;  %v11181_v30 = vld [vmem:[#allocation16 + $0x20] sm:$0xff]  }
 0x13d   :  { %1886 = vmatprep.subr.bf16.mxu0 %v9127_v31  ;;  %v11187_v31 = vld [vmem:[#allocation16 + $0x28] sm:$0xff]  }
 0x13e   :  { %1967 = vmatpush1.bf16.msra.mxu1 %v9120_v40 }
 0x13f   :  { %1968 = vmatprep.subr.bf16.mxu1 %v9129_v43 }
 0x140   :  { %1887 = vmatpush1.bf16.msra.mxu0 %v9126_v37 }
 0x141   :  { %1888 = vmatprep.subr.bf16.mxu0 %v9135_v38 }
 0x142   :  { %1969 = vmatpush1.bf16.msra.mxu1 %v9128_v49 }
 0x143   :  { %1970 = vmatprep.subr.bf16.mxu1 %v9137_v52  ;;  %v2095_v52 = vunpack.c.l.s4 %v10991_v51 }
 0x144   :  { %1889 = vmatpush1.bf16.msra.mxu0 %v9134_v46 }
 0x145   :  { %1890 = vmatprep.subr.bf16.mxu0 %v9143_v47  ;;  %v2096_v54 = vunpack.c.0.s8 %v2095_v52 }
 0x146   :  { %1971 = vmatpush1.bf16.msra.mxu1 %v9136_v57 }
 0x147   :  { %1972 = vmatprep.subr.bf16.mxu1 %v9145_v58 }
 0x148   :  { %1891 = vmatpush1.bf16.msra.mxu0 %v9142_v55  ;;  %v2098_v55 = vshrl.u32 %v2097_v53, 7 }
 0x149   :  { %1892 = vmatprep.subr.bf16.mxu0 %v9151_v56 }
 0x14a   :  { %1973 = vmatpush1.bf16.msra.mxu1 %v9144_v63  ;;  %v11279_v56 = vsub.s32 %v2096_v54, %v2098_v55 }
 0x14b   :  { %1974 = vmatprep.subr.bf16.mxu1 %v9153_v2 }
 0x14c   :  { %1893 = vmatpush1.bf16.msra.mxu0 %v9150_v61 }
 0x14d   :  { %1894 = vmatprep.subr.bf16.mxu0 %v9159_v15 }
 0x14e   :  { %1975 = vmatpush1.bf16.msra.mxu1 %v9152_v7 }
 0x14f   :  { %1976 = vmatprep.subr.bf16.mxu1 %v9161_v10 }
 0x150   :  { %1895 = vmatpush1.bf16.msra.mxu0 %v9158_v5 }
 0x151   :  { %1896 = vmatprep.subr.bf16.mxu0 %v9167_v6 }
 0x152   :  { %1977 = vmatpush1.bf16.msra.mxu1 %v9160_v17 }
 0x153   :  { %1978 = vmatprep.subr.bf16.mxu1 %v9169_v18 }
 0x154   :  { %1897 = vmatpush1.bf16.msra.mxu0 %v9166_v14 }
 0x155   :  { %1898 = vmatprep.subr.bf16.mxu0 %v9175_v16 }
 0x156   :  { %1979 = vmatpush1.bf16.msra.mxu1 %v9168_v39 }
 0x157   :  { %1980 = vmatprep.subr.bf16.mxu1 %v9177_v23 }
 0x158   :  { %1899 = vmatpush1.bf16.msra.mxu0 %v9174_v22 }
 0x159   :  { %10138 = vmatprep.subr.bf16.mxu0 %v10988_v25 }
 0x15a   :  { %1981 = vmatpush1.bf16.msra.mxu1 %v9176_v24 }
 0x15b   :  { %1901 = vmatmul.mubr.bf16.vlgmr.msra.gmra.mrb[4].mxu0 %v11142_v21  ;;  %10162 = vmatprep.subr.bf16.mxu1 %v10988_v25 }
 0x15c   :  { %10140 = vmatpush3.bf16.msra.mxu0 %v11153_v26  ;;  %9656 = vmatprep.mubr.msk.f32.mxu0 %vm10989_vm0, %v10990_v27 }
 0x15d   :  { %10141 = vmatprep.subr.bf16.mxu0 %v10988_v25  ;;  %1983 = vmatmul.mubr.bf16.vlgmr.msra.gmra.mrb[4].mxu1 %v11142_v21  ;;  %v11175_v21 = vld [vmem:[#allocation16 + $0x18] sm:$0xff]  }
 0x15e   :  { %10164 = vmatpush3.bf16.msra.mxu1 %v11153_v26  ;;  %9691 = vmatprep.mubr.msk.f32.mxu1 %vm10989_vm0, %v10990_v27 }
 0x15f   :  { %10165 = vmatprep.subr.bf16.mxu1 %v10988_v25 }
 0x160   :  { %10143 = vmatpush3.bf16.msra.mxu0 %v11160_v28 }
 0x161   :  { %10144 = vmatprep.subr.bf16.mxu0 %v10988_v25 }
 0x162   :  { %10167 = vmatpush3.bf16.msra.mxu1 %v11160_v28 }
 0x163   :  { %10168 = vmatprep.subr.bf16.mxu1 %v10988_v25 }
 0x164   :  { %10146 = vmatpush3.bf16.msra.mxu0 %v11167_v29 }
 0x165   :  { %10147 = vmatprep.subr.bf16.mxu0 %v10988_v25 }
 0x166   :  { %10170 = vmatpush3.bf16.msra.mxu1 %v11167_v29 }
 0x167   :  { %10171 = vmatprep.subr.bf16.mxu1 %v10988_v25 }
 0x168   :  { %10149 = vmatpush3.bf16.msra.mxu0 %v11175_v21 }
 0x169   :  { %10150 = vmatprep.subr.bf16.mxu0 %v10988_v25 }
 0x16a   :  { %10173 = vmatpush3.bf16.msra.mxu1 %v11175_v21 }
 0x16b   :  { %10174 = vmatprep.subr.bf16.mxu1 %v10988_v25 }
 0x16c   :  { %10152 = vmatpush3.bf16.msra.mxu0 %v11181_v30 }
 0x16d   :  { %10153 = vmatprep.subr.bf16.mxu0 %v10988_v25 }
 0x16e   :  { %10176 = vmatpush3.bf16.msra.mxu1 %v11181_v30 }
 0x16f   :  { %10177 = vmatprep.subr.bf16.mxu1 %v10988_v25 }
 0x170   :  { %10155 = vmatpush3.bf16.msra.mxu0 %v11187_v31 }
 0x171   :  { %10156 = vmatprep.subr.bf16.mxu0 %v10988_v25 }
 0x172   :  { %10179 = vmatpush3.bf16.msra.mxu1 %v11187_v31 }
 0x173   :  { %10180 = vmatprep.subr.bf16.mxu1 %v10988_v25 }
 0x174   :  { %10158 = vmatpush3.bf16.msra.mxu0 %v11193_v62 }
 0x175   :  { %10159 = vmatprep.subr.bf16.mxu0 %v10988_v25 }
 0x176   :  { %10182 = vmatpush3.bf16.msra.mxu1 %v11193_v62 }
 0x177   :  { %10183 = vmatprep.subr.bf16.mxu1 %v10988_v25 }
 0x178   :  { %10161 = vmatpush3.bf16.msra.mxu0 %v11199_v32 }
 0x179   :  { %10186 = vmatprep.subr.bf16.mxu0 %v10988_v25 }
 0x17a   :  { %10185 = vmatpush3.bf16.msra.mxu1 %v11199_v32 }
 0x17b   :  { %10210 = vmatprep.subr.bf16.mxu1 %v10988_v25 }
 0x1ae   :  { %v1738_v33 = vpop.f32.mrb[0].mxu0 }
 0x1af   :  { %v1740_v34 = vpop.f32.mrb[1].mxu0  ;;  %9657 = vmatmul.mubr.f32.vlgmr.msra.gmra.mrb[8].mxu0 %v1738_v33 }
 0x1b0   :  { %v1742_v35 = vpop.f32.mrb[2].mxu0  ;;  %9692 = vmatmul.mubr.f32.vlgmr.msra.gmra.mrb[8].mxu1 %v1740_v34  ;;  %10188 = vmatpush3.bf16.msra.mxu0 %v11153_v26  ;;  %v1820_v37 = vpop.f32.mrb[0].mxu1 }
 0x1b1   :  { %v1743_v36 = vpop.f32.mrb[3].mxu0  ;;  %10212 = vmatpush3.bf16.msra.mxu1 %v11153_v26  ;;  %10189 = vmatprep.subr.bf16.mxu0 %v10988_v25  ;;  %v1822_v38 = vpop.f32.mrb[1].mxu1 }
 0x1b2   :  { %10213 = vmatprep.subr.bf16.mxu1 %v10988_v25  ;;  %9726 = vmatprep.mubr.msk.f32.mxu0 %vm10989_vm0, %v10990_v27  ;;  %v1824_v40 = vpop.f32.mrb[2].mxu1 }
 0x1b3   :  { %9761 = vmatprep.mubr.msk.f32.mxu1 %vm10989_vm0, %v10990_v27  ;;  %v1825_v41 = vpop.f32.mrb[3].mxu1 }
 0x1b4   :  { %10191 = vmatpush3.bf16.msra.mxu0 %v11160_v28 }
 0x1b5   :  { %10215 = vmatpush3.bf16.msra.mxu1 %v11160_v28  ;;  %10192 = vmatprep.subr.bf16.mxu0 %v10988_v25 }
 0x1b6   :  { %10216 = vmatprep.subr.bf16.mxu1 %v10988_v25 }
 0x1b8   :  { %10194 = vmatpush3.bf16.msra.mxu0 %v11167_v29 }
 0x1b9   :  { %10218 = vmatpush3.bf16.msra.mxu1 %v11167_v29  ;;  %10195 = vmatprep.subr.bf16.mxu0 %v10988_v25 }
 0x1ba   :  { %10219 = vmatprep.subr.bf16.mxu1 %v10988_v25 }
 0x1bc   :  { %10197 = vmatpush3.bf16.msra.mxu0 %v11175_v21 }
 0x1bd   :  { %10221 = vmatpush3.bf16.msra.mxu1 %v11175_v21  ;;  %10198 = vmatprep.subr.bf16.mxu0 %v10988_v25 }
 0x1be   :  { %10222 = vmatprep.subr.bf16.mxu1 %v10988_v25 }
 0x1c0   :  { %10200 = vmatpush3.bf16.msra.mxu0 %v11181_v30 }
 0x1c1   :  { %10224 = vmatpush3.bf16.msra.mxu1 %v11181_v30  ;;  %10201 = vmatprep.subr.bf16.mxu0 %v10988_v25 }
 0x1c2   :  { %10225 = vmatprep.subr.bf16.mxu1 %v10988_v25 }
 0x1c4   :  { %10203 = vmatpush3.bf16.msra.mxu0 %v11187_v31 }
 0x1c5   :  { %10227 = vmatpush3.bf16.msra.mxu1 %v11187_v31  ;;  %10204 = vmatprep.subr.bf16.mxu0 %v10988_v25 }
 0x1c6   :  { %10228 = vmatprep.subr.bf16.mxu1 %v10988_v25 }
 0x1c8   :  { %10206 = vmatpush3.bf16.msra.mxu0 %v11193_v62 }
 0x1c9   :  { %10230 = vmatpush3.bf16.msra.mxu1 %v11193_v62  ;;  %10207 = vmatprep.subr.bf16.mxu0 %v10988_v25 }
 0x1ca   :  { %10231 = vmatprep.subr.bf16.mxu1 %v10988_v25 }
 0x1cc   :  { %10209 = vmatpush3.bf16.msra.mxu0 %v11199_v32 }
 0x1cd   :  { %10233 = vmatpush3.bf16.msra.mxu1 %v11199_v32  ;;  %10234 = vmatprep.subr.bf16.mxu0 %v10988_v25 }
 0x1ce   :  { %10258 = vmatprep.subr.bf16.mxu1 %v10988_v25 }
 0x1cf   :  { %9727 = vmatmul.mubr.f32.vlgmr.msra.gmra.mrb[10].mxu0 %v1820_v37 }
 0x1d0   :  { %9762 = vmatmul.mubr.f32.vlgmr.msra.gmra.mrb[10].mxu1 %v1822_v38  ;;  %10236 = vmatpush3.bf16.msra.mxu0 %v11153_v26 }
 0x1d1   :  { %10260 = vmatpush3.bf16.msra.mxu1 %v11153_v26  ;;  %10237 = vmatprep.subr.bf16.mxu0 %v10988_v25 }
 0x1d2   :  { %10261 = vmatprep.subr.bf16.mxu1 %v10988_v25  ;;  %9796 = vmatprep.mubr.msk.f32.mxu0 %vm10989_vm0, %v10990_v27 }
 0x1d3   :  { %9831 = vmatprep.mubr.msk.f32.mxu1 %vm10989_vm0, %v10990_v27 }
 0x1d4   :  { %10239 = vmatpush3.bf16.msra.mxu0 %v11160_v28 }
 0x1d5   :  { %10263 = vmatpush3.bf16.msra.mxu1 %v11160_v28  ;;  %10240 = vmatprep.subr.bf16.mxu0 %v10988_v25 }
 0x1d6   :  { %10264 = vmatprep.subr.bf16.mxu1 %v10988_v25 }
 0x1d8   :  { %10242 = vmatpush3.bf16.msra.mxu0 %v11167_v29 }
 0x1d9   :  { %10266 = vmatpush3.bf16.msra.mxu1 %v11167_v29  ;;  %10243 = vmatprep.subr.bf16.mxu0 %v10988_v25 }
 0x1da   :  { %10267 = vmatprep.subr.bf16.mxu1 %v10988_v25 }
 0x1dc   :  { %10245 = vmatpush3.bf16.msra.mxu0 %v11175_v21 }
 0x1dd   :  { %10269 = vmatpush3.bf16.msra.mxu1 %v11175_v21  ;;  %10246 = vmatprep.subr.bf16.mxu0 %v10988_v25 }
 0x1de   :  { %10270 = vmatprep.subr.bf16.mxu1 %v10988_v25 }
 0x1e0   :  { %10248 = vmatpush3.bf16.msra.mxu0 %v11181_v30 }
 0x1e1   :  { %10272 = vmatpush3.bf16.msra.mxu1 %v11181_v30  ;;  %10249 = vmatprep.subr.bf16.mxu0 %v10988_v25 }
 0x1e2   :  { %10273 = vmatprep.subr.bf16.mxu1 %v10988_v25 }
 0x1e4   :  { %10251 = vmatpush3.bf16.msra.mxu0 %v11187_v31 }
 0x1e5   :  { %10275 = vmatpush3.bf16.msra.mxu1 %v11187_v31  ;;  %10252 = vmatprep.subr.bf16.mxu0 %v10988_v25 }
 0x1e6   :  { %10276 = vmatprep.subr.bf16.mxu1 %v10988_v25 }
 0x1e8   :  { %10254 = vmatpush3.bf16.msra.mxu0 %v11193_v62 }
 0x1e9   :  { %10278 = vmatpush3.bf16.msra.mxu1 %v11193_v62  ;;  %10255 = vmatprep.subr.bf16.mxu0 %v10988_v25 }
 0x1ea   :  { %10279 = vmatprep.subr.bf16.mxu1 %v10988_v25 }
 0x1ec   :  { %10257 = vmatpush3.bf16.msra.mxu0 %v11199_v32 }
 0x1ed   :  { %10281 = vmatpush3.bf16.msra.mxu1 %v11199_v32 }
 0x22e   :  { %v1902_v42 = vpop.f32.mrb[4].mxu0 }
 0x22f   :  { %v1904_v43 = vpop.f32.mrb[5].mxu0  ;;  %9797 = vmatmul.mubr.f32.vlgmr.msra.gmra.mrb[12].mxu0 %v1902_v42 }
 0x230   :  { %v1906_v44 = vpop.f32.mrb[6].mxu0  ;;  %9832 = vmatmul.mubr.f32.vlgmr.msra.gmra.mrb[12].mxu1 %v1904_v43  ;;  %v1984_v46 = vpop.f32.mrb[4].mxu1 }
 0x231   :  { %v1907_v45 = vpop.f32.mrb[7].mxu0  ;;  %2506 = vst [vmem:[#allocation6] sm:$0xf] %v1984_v46  ;;  %v1986_v47 = vpop.f32.mrb[5].mxu1 }
 0x232   :  { %2580 = vst [vmem:[#allocation6 + $0x4] sm:$0xf] %v1986_v47  ;;  %v1988_v49 = vpop.f32.mrb[6].mxu1 }
 0x233   :  { %v1989_v50 = vpop.f32.mrb[7].mxu1 }
 0x282   :  { %v2089_v57 = vpop.f32.mrb[8].mxu0 }
 0x283   :  { %v2100_v11 = vrot.slane %v2089_v57, %v11279_v56  ;;  %v9658_v48 = vpop.f32.mrb[9].mxu0  ;;  %v2192_v58 = vpop.f32.mrb[8].mxu1 }
 0x284   :  { %v2203_v59 = vrot.slane %v2192_v58, %v11279_v56  ;;  %v9693_v60 = vpop.f32.mrb[9].mxu1 }
 0x285   :  { %10854 = shalt.err (!%p10851_p9)  }
 0x286   :  { %s10855_s17 = scalar_lea.vmem %s100_s25, 8192  ;;  %p10860_p11 = scmp.lt.s32.totalorder %s100_s25, %s100_s25 }
 0x287   :  { %p10856_p10 = scmp.ne.s32.totalorder %s100_s25, %s10855_s17  ;;  %p10861_p12 = scmp.lt.s32.totalorder %s10855_s17, %s10855_s17 }
 0x289   :  { %p10862_p13 = por %p10861_p12, %p10860_p11 }
 0x28b   :  { %p10863_p0 = pnand %p10862_p13, %p10856_p10 }
 0x28d   :  { %10866 = shalt.err (!%p10863_p0)  }
 0x28e   :  { %102 = dma.hbm_to_vmem [thread:$0]  %s12478_s5, 8192, %s100_s25, [#allocation8]  ;;  %v2101_v61 = vcombine.high %v2100_v11, %v2100_v11  ;;  %v2108_v15 = vrot.slane %v2100_v11, %v11279_v56  ;;  %9178 = vst.sshfl [vmem:[#allocation4] sm:$0x1 pattern:$0x73625140] %v2100_v11  ;;  %v2204_v63 = vcombine.high %v2203_v59, %v2203_v59  ;;  %v2211_v0 = vrot.slane %v2203_v59, %v11279_v56 }
 0x28f   :  { %9180 = vst.sshfl [vmem:[#allocation4 + $0x1] sm:$0x1 pattern:$0x73625140] %v2203_v59  ;;  %s10867_s0 = scalar_lea.hbm %s12479_s6, 8192 }
 0x290   :  { %p10868_p1 = scmp.ne.s32.totalorder %s12479_s6, %s10867_s0  ;;  %p10871_p2 = scmp.lt.u32.totalorder %s10867_s0, %s12479_s6 }
 0x292   :  { %p10873_p3 = pnand %p10871_p2, %p10868_p1 }
 0x294   :  { %10876 = shalt.err (!%p10873_p3)  }
 0x295   :  { %s10877_s5 = scalar_lea.vmem %s112_s27, 8192  ;;  %p10882_p5 = scmp.lt.s32.totalorder %s112_s27, %s112_s27 }
 0x296   :  { %p10878_p4 = scmp.ne.s32.totalorder %s112_s27, %s10877_s5  ;;  %p10883_p6 = scmp.lt.s32.totalorder %s10877_s5, %s10877_s5 }
 0x298   :  { %p10884_p7 = por %p10883_p6, %p10882_p5 }
 0x29a   :  { %p10885_p8 = pnand %p10884_p7, %p10878_p4 }
 0x29c   :  { %10888 = shalt.err (!%p10885_p8)  }
 0x29d   :  { %114 = dma.hbm_to_vmem [thread:$0]  %s12479_s6, 8192, %s112_s27, [#allocation8 + $0x1]  ;;  %v2115_v1 = vrot.slane %v2101_v61, %v11279_v56  ;;  %v2116_v2 = vcombine.high %v2108_v15, %v2108_v15  ;;  %9179 = vst.sshfl [vmem:[#allocation4 + $0x4] sm:$0x1 pattern:$0x73625140] %v2101_v61  ;;  %v2218_v3 = vrot.slane %v2204_v63, %v11279_v56  ;;  %v2219_v4 = vcombine.high %v2211_v0, %v2211_v0 }
 0x29e   :  { %9181 = vst.sshfl [vmem:[#allocation4 + $0x5] sm:$0x1 pattern:$0x73625140] %v2204_v63 }
 0x29f   :  { %v2117_v5 = vcombine.high %v2115_v1, %v2115_v1  ;;  %2124 = vst [vmem:[#allocation4 + $0x8] sm:$0x1] %v2116_v2  ;;  %v2220_v6 = vcombine.high %v2218_v3, %v2218_v3  ;;  %2227 = vst [vmem:[#allocation4 + $0x9] sm:$0x1] %v2219_v4 }
 0x2a1   :  { %2125 = vst [vmem:[#allocation4 + $0xc] sm:$0x1] %v2117_v5  ;;  %2228 = vst [vmem:[#allocation4 + $0xd] sm:$0x1] %v2220_v6 }
 0x2a2   :  { %v2295_v7 = vpop.f32.mrb[10].mxu0 }
 0x2a3   :  { %v2306_v8 = vrot.slane %v2295_v7, %v11279_v56  ;;  %v2398_v9 = vpop.f32.mrb[10].mxu1  ;;  %v9728_v10 = vpop.f32.mrb[11].mxu0 }
 0x2a4   :  { %v2409_v12 = vrot.slane %v2398_v9, %v11279_v56  ;;  %v9763_v13 = vpop.f32.mrb[11].mxu1 }
 0x2a5   :  { %v2307_v14 = vcombine.high %v2306_v8, %v2306_v8  ;;  %v2314_v16 = vrot.slane %v2306_v8, %v11279_v56  ;;  %9182 = vst.sshfl [vmem:[#allocation4 + $0x2] sm:$0x1 pattern:$0x73625140] %v2306_v8 }
 0x2a6   :  { %v2410_v17 = vcombine.high %v2409_v12, %v2409_v12  ;;  %v2417_v18 = vrot.slane %v2409_v12, %v11279_v56  ;;  %9184 = vst.sshfl [vmem:[#allocation4 + $0x3] sm:$0x1 pattern:$0x73625140] %v2409_v12 }
 0x2a7   :  { %v2321_v19 = vrot.slane %v2307_v14, %v11279_v56  ;;  %v2322_v20 = vcombine.high %v2314_v16, %v2314_v16  ;;  %9183 = vst.sshfl [vmem:[#allocation4 + $0x6] sm:$0x1 pattern:$0x73625140] %v2307_v14 }
 0x2a8   :  { %v2424_v22 = vrot.slane %v2410_v17, %v11279_v56  ;;  %v2425_v39 = vcombine.high %v2417_v18, %v2417_v18  ;;  %9185 = vst.sshfl [vmem:[#allocation4 + $0x7] sm:$0x1 pattern:$0x73625140] %v2410_v17 }
 0x2a9   :  { %v2323_v23 = vcombine.high %v2321_v19, %v2321_v19  ;;  %2330 = vst [vmem:[#allocation4 + $0xa] sm:$0x1] %v2322_v20 }
 0x2aa   :  { %v2426_v24 = vcombine.high %v2424_v22, %v2424_v22  ;;  %2433 = vst [vmem:[#allocation4 + $0xb] sm:$0x1] %v2425_v39 }
 0x2ab   :  { %2331 = vst [vmem:[#allocation4 + $0xe] sm:$0x1] %v2323_v23 }
 0x2ac   :  { %2434 = vst [vmem:[#allocation4 + $0xf] sm:$0x1] %v2426_v24 }
 0x302   :  { %v2501_v26 = vpop.f32.mrb[12].mxu0 }
 0x303   :  { %2505 = vst [vmem:[#allocation5] sm:$0xf] %v2501_v26  ;;  %v9798_v28 = vpop.f32.mrb[13].mxu0  ;;  %v2573_v29 = vpop.f32.mrb[12].mxu1 }
 0x304   :  { %2578 = vst [vmem:[#allocation5 + $0x4] sm:$0xf] %v2573_v29  ;;  %v9833_v21 = vpop.f32.mrb[13].mxu1 }
 0x305   :  { %10967 = dma.done.wait [#allocation8], 8192 }
 0x306   :  { %10968 = vsyncadd [#allocation8], 4294959104 }
 0x307   :  { %10969 = dma.done.wait [#allocation8 + $0x1], 8192 }
 0x308   :  { %10970 = vsyncadd [#allocation8 + $0x1], 4294959104  ;;  %10282 = vmatprep.subr.bf16.mxu0 %v10988_v25  ;;  %9850 = vmatprep.mubr.msk.f32.mxu0 %vm10989_vm0, %v10990_v27  ;;  %s9186_s6 = sshll.u32 %s11282_s28, 2  ;;  %vm2813_vm1 = vcmask 1041409   ;;  %vm2816_vm2 = vcmask 1042434   ;;  %vm2819_vm3 = vcmask 1043459  }
 0x309   :  { %10294 = vmatprep.subr.bf16.mxu1 %v10988_v25  ;;  %9869 = vmatprep.mubr.msk.f32.mxu1 %vm10989_vm0, %v10990_v27  ;;  %s2591_s25 = scalar_lea.vmem [#allocation2], %s9186_s6  ;;  %vm2822_vm4 = vcmask 1044484   ;;  %vm2825_vm5 = vcmask 1045509   ;;  %vm2828_vm6 = vcmask 1046534   ;;  %vm2831_vm7 = vcmask 1047559   ;;  %s2596_s26 = scalar_lea.vmem [#allocation3], %s9186_s6 }
 0x30a   :  { %v2588_v30 = vld [vmem:[#allocation5] sm:$0xf]  ;;  %vm3013_vm9 = vcmask 517120   ;;  %vm3209_vm10 = vcmask 523264   ;;  %s9337_s27 = sshll.u32 %s11282_s28, 6 }
 0x30b   :  { %v2589_v31 = vld [vmem:[#allocation5 + $0x4] sm:$0xf]  ;;  %2592 = vst [vmem:[%s2591_s25] sm:$0xf] %v2588_v30  ;;  %s2600_s10 = scalar_lea.hbm %s12481_s8, %s9337_s27 }
 0x30c   :  { %2593 = vst [vmem:[%s2591_s25 + $0x100] sm:$0xf] %v2589_v31 }
 0x313   :  { %v2621_v62 = vld [vmem:[#allocation2 + $0x4] sm:$0x1]  ;;  %v2622_v32 = vld [vmem:[#allocation2 + $0x8] sm:$0x1]  ;;  %v2623_v33 = vld [vmem:[#allocation2 + $0xc] sm:$0x1] }
 0x314   :  { %v2620_v34 = vld [vmem:[#allocation2] sm:$0x1]  ;;  %v2624_v35 = vld [vmem:[#allocation2 + $0x10] sm:$0x1]  ;;  %v2625_v36 = vld [vmem:[#allocation2 + $0x14] sm:$0x1] }
 0x315   :  { %v2626_v37 = vld [vmem:[#allocation2 + $0x18] sm:$0x1]  ;;  %v2627_v38 = vld [vmem:[#allocation2 + $0x1c] sm:$0x1]  ;;  %v2628_v40 = vld [vmem:[#allocation2 + $0x20] sm:$0x1] }
 0x316   :  { %v2629_v41 = vld [vmem:[#allocation2 + $0x24] sm:$0x1]  ;;  %v2630_v42 = vld [vmem:[#allocation2 + $0x28] sm:$0x1]  ;;  %v2631_v43 = vld [vmem:[#allocation2 + $0x2c] sm:$0x1] }
 0x317   :  { %v2632_v44 = vld [vmem:[#allocation2 + $0x30] sm:$0x1]  ;;  %v2633_v45 = vld [vmem:[#allocation2 + $0x34] sm:$0x1]  ;;  %v2634_v46 = vld [vmem:[#allocation2 + $0x38] sm:$0x1] }
 0x318   :  { %v2812_v47 = vrot.slane %v2621_v62, 7  ;;  %v2815_v49 = vrot.slane %v2622_v32, 6  ;;  %v2818_v50 = vrot.slane %v2623_v33, 5  ;;  %v2635_v51 = vld [vmem:[#allocation2 + $0x3c] sm:$0x1]  ;;  %v2821_v52 = vrot.slane %v2624_v35, 4 }
 0x319   :  { %v2824_v54 = vrot.slane %v2625_v36, 3  ;;  %v2827_v55 = vrot.slane %v2626_v37, 2  ;;  %v2833_v56 = vrot.slane %v2629_v41, 7  ;;  %v2835_v11 = vrot.slane %v2630_v42, 6  ;;  %v2637_v59 = vld [vmem:[#allocation2 + $0x44] sm:$0x1] }
 0x31a   :  { %v2814_v57 = vsel %vm2813_vm1, %v2812_v47, %v2620_v34  ;;  %v2837_v48 = vrot.slane %v2631_v43, 5  ;;  %v2839_v58 = vrot.slane %v2632_v44, 4  ;;  %v2830_v61 = vrot.slane %v2627_v38, 1  ;;  %v2636_v0 = vld [vmem:[#allocation2 + $0x40] sm:$0x1] }
 0x31b   :  { %v2817_v60 = vsel %vm2816_vm2, %v2815_v49, %v2814_v57  ;;  %v2834_v15 = vsel %vm2813_vm1, %v2833_v56, %v2628_v40  ;;  %v2841_v63 = vrot.slane %v2633_v45, 3  ;;  %v2843_v3 = vrot.slane %v2634_v46, 2  ;;  %v2638_v4 = vld [vmem:[#allocation2 + $0x48] sm:$0x1]  ;;  %v2639_v5 = vld [vmem:[#allocation2 + $0x4c] sm:$0x1] }
 0x31c   :  { %v2820_v1 = vsel %vm2819_vm3, %v2818_v50, %v2817_v60  ;;  %v2836_v2 = vsel %vm2816_vm2, %v2835_v11, %v2834_v15  ;;  %v2847_v6 = vrot.slane %v2637_v59, 7  ;;  %v2845_v9 = vrot.slane %v2635_v51, 1  ;;  %v2640_v10 = vld [vmem:[#allocation2 + $0x50] sm:$0x1]  ;;  %v2641_v12 = vld [vmem:[#allocation2 + $0x54] sm:$0x1] }
 0x31d   :  { %v2823_v7 = vsel %vm2822_vm4, %v2821_v52, %v2820_v1  ;;  %v2838_v8 = vsel %vm2819_vm3, %v2837_v48, %v2836_v2  ;;  %v2642_v16 = vld [vmem:[#allocation2 + $0x58] sm:$0x1]  ;;  %v2643_v17 = vld [vmem:[#allocation2 + $0x5c] sm:$0x1]  ;;  %v2645_v18 = vld [vmem:[#allocation2 + $0x64] sm:$0x1] }
 0x31e   :  { %v2826_v13 = vsel %vm2825_vm5, %v2824_v54, %v2823_v7  ;;  %v2840_v14 = vsel %vm2822_vm4, %v2839_v58, %v2838_v8  ;;  %v2644_v22 = vld [vmem:[#allocation2 + $0x60] sm:$0x1]  ;;  %v2646_v39 = vld [vmem:[#allocation2 + $0x68] sm:$0x1]  ;;  %v2647_v23 = vld [vmem:[#allocation2 + $0x6c] sm:$0x1]  ;;  %v2848_v26 = vsel %vm2813_vm1, %v2847_v6, %v2636_v0 }
 0x31f   :  { %v2829_v19 = vsel %vm2828_vm6, %v2827_v55, %v2826_v13  ;;  %v2842_v20 = vsel %vm2825_vm5, %v2841_v63, %v2840_v14  ;;  %v2648_v24 = vld [vmem:[#allocation2 + $0x70] sm:$0x1]  ;;  %v2649_v21 = vld [vmem:[#allocation2 + $0x74] sm:$0x1]  ;;  %v2650_v30 = vld [vmem:[#allocation2 + $0x78] sm:$0x1] }
 0x320   :  { %v2832_v28 = vsel %vm2831_vm7, %v2830_v61, %v2829_v19  ;;  %v2844_v29 = vsel %vm2828_vm6, %v2843_v3, %v2842_v20  ;;  %v2849_v31 = vrot.slane %v2638_v4, 6  ;;  %v2851_v62 = vrot.slane %v2639_v5, 5  ;;  %v2651_v33 = vld [vmem:[#allocation2 + $0x7c] sm:$0x1]  ;;  %v2652_v42 = vld [vmem:[#allocation2 + $0x80] sm:$0x1] }
 0x321   :  { %v2846_v32 = vsel %vm2831_vm7, %v2845_v9, %v2844_v29  ;;  %v2853_v34 = vrot.slane %v2640_v10, 4  ;;  %v2855_v35 = vrot.slane %v2641_v12, 3  ;;  %v2857_v36 = vrot.slane %v2642_v16, 2  ;;  %v2653_v43 = vld [vmem:[#allocation2 + $0x84] sm:$0x1] }
 0x322   :  { %v10283_v37 = vpack.c.bf16 %v2846_v32, %v2832_v28  ;;  %v2850_v38 = vsel %vm2816_vm2, %v2849_v31, %v2848_v26  ;;  %v2859_v40 = vrot.slane %v2643_v17, 1  ;;  %v2861_v41 = vrot.slane %v2645_v18, 7  ;;  %v2654_v49 = vld [vmem:[#allocation2 + $0x88] sm:$0x1]  ;;  %v2655_v54 = vld [vmem:[#allocation2 + $0x8c] sm:$0x1] }
 0x323   :  { %v2852_v44 = vsel %vm2819_vm3, %v2851_v62, %v2850_v38  ;;  %v2863_v45 = vrot.slane %v2646_v39, 6  ;;  %v2865_v46 = vrot.slane %v2647_v23, 5  ;;  %v2867_v47 = vrot.slane %v2648_v24, 4  ;;  %v2656_v55 = vld [vmem:[#allocation2 + $0x90] sm:$0x1] }
 0x324   :  { %10284 = vmatpush3.bf16.xpose.msra.mxu0 %v10283_v37  ;;  %v2854_v50 = vsel %vm2822_vm4, %v2853_v34, %v2852_v44  ;;  %v2862_v51 = vsel %vm2813_vm1, %v2861_v41, %v2644_v22  ;;  %v2869_v52 = vrot.slane %v2649_v21, 3  ;;  %v2871_v11 = vrot.slane %v2650_v30, 2  ;;  %v2657_v48 = vld [vmem:[#allocation2 + $0x94] sm:$0x1]  ;;  %v2658_v58 = vld [vmem:[#allocation2 + $0x98] sm:$0x1] }
 0x325   :  { %10285 = vmatprep.subr.bf16.mxu0 %v10988_v25  ;;  %v2856_v56 = vsel %vm2825_vm5, %v2855_v35, %v2854_v50  ;;  %v2864_v57 = vsel %vm2816_vm2, %v2863_v45, %v2862_v51  ;;  %v2875_v59 = vrot.slane %v2653_v43, 7  ;;  %v2873_v15 = vrot.slane %v2651_v33, 1  ;;  %v2659_v63 = vld [vmem:[#allocation2 + $0x9c] sm:$0x1]  ;;  %v2661_v0 = vld [vmem:[#allocation2 + $0xa4] sm:$0x1] }
 0x326   :  { %v2858_v60 = vsel %vm2828_vm6, %v2857_v36, %v2856_v56  ;;  %v2866_v61 = vsel %vm2819_vm3, %v2865_v46, %v2864_v57  ;;  %v2660_v3 = vld [vmem:[#allocation2 + $0xa0] sm:$0x1]  ;;  %v2662_v4 = vld [vmem:[#allocation2 + $0xa8] sm:$0x1]  ;;  %v2663_v5 = vld [vmem:[#allocation2 + $0xac] sm:$0x1] }
 0x327   :  { %v2860_v1 = vsel %vm2831_vm7, %v2859_v40, %v2858_v60  ;;  %v2868_v2 = vsel %vm2822_vm4, %v2867_v47, %v2866_v61  ;;  %v2664_v6 = vld [vmem:[#allocation2 + $0xb0] sm:$0x1]  ;;  %v2876_v7 = vsel %vm2813_vm1, %v2875_v59, %v2652_v42  ;;  %v2665_v9 = vld [vmem:[#allocation2 + $0xb4] sm:$0x1]  ;;  %v2877_v10 = vrot.slane %v2654_v49, 6 }
 0x328   :  { %v2870_v8 = vsel %vm2825_vm5, %v2869_v52, %v2868_v2  ;;  %v2879_v12 = vrot.slane %v2655_v54, 5  ;;  %v2881_v13 = vrot.slane %v2656_v55, 4  ;;  %v2666_v16 = vld [vmem:[#allocation2 + $0xb8] sm:$0x1]  ;;  %v2883_v17 = vrot.slane %v2657_v48, 3 }
 0x329   :  { %v2872_v14 = vsel %vm2828_vm6, %v2871_v11, %v2870_v8  ;;  %v2885_v18 = vrot.slane %v2658_v58, 2  ;;  %v2887_v19 = vrot.slane %v2659_v63, 1  ;;  %v2667_v22 = vld [vmem:[#allocation2 + $0xbc] sm:$0x1]  ;;  %v2878_v39 = vsel %vm2816_vm2, %v2877_v10, %v2876_v7  ;;  %v2669_v26 = vld [vmem:[#allocation2 + $0xc4] sm:$0x1] }
 0x32a   :  { %v2874_v20 = vsel %vm2831_vm7, %v2873_v15, %v2872_v14  ;;  %v2889_v23 = vrot.slane %v2661_v0, 7  ;;  %v2891_v24 = vrot.slane %v2662_v4, 6  ;;  %v2880_v29 = vsel %vm2819_vm3, %v2879_v12, %v2878_v39  ;;  %v2668_v31 = vld [vmem:[#allocation2 + $0xc0] sm:$0x1]  ;;  %v2670_v62 = vld [vmem:[#allocation2 + $0xc8] sm:$0x1] }
 0x32b   :  { %v10286_v28 = vpack.c.bf16 %v2874_v20, %v2860_v1  ;;  %v2893_v21 = vrot.slane %v2663_v5, 5  ;;  %v2895_v30 = vrot.slane %v2664_v6, 4  ;;  %v2882_v32 = vsel %vm2822_vm4, %v2881_v13, %v2880_v29  ;;  %v2671_v35 = vld [vmem:[#allocation2 + $0xcc] sm:$0x1]  ;;  %v2672_v36 = vld [vmem:[#allocation2 + $0xd0] sm:$0x1] }
 0x32c   :  { %v2890_v33 = vsel %vm2813_vm1, %v2889_v23, %v2660_v3  ;;  %v2897_v34 = vrot.slane %v2665_v9, 3  ;;  %v2884_v37 = vsel %vm2825_vm5, %v2883_v17, %v2882_v32  ;;  %v2899_v40 = vrot.slane %v2666_v16, 2  ;;  %v2673_v41 = vld [vmem:[#allocation2 + $0xd4] sm:$0x1]  ;;  %v2674_v42 = vld [vmem:[#allocation2 + $0xd8] sm:$0x1] }
 0x32d   :  { %10287 = vmatpush3.bf16.xpose.msra.mxu0 %v10286_v28  ;;  %v2892_v38 = vsel %vm2816_vm2, %v2891_v24, %v2890_v33  ;;  %v2903_v43 = vrot.slane %v2669_v26, 7  ;;  %v2886_v44 = vsel %vm2828_vm6, %v2885_v18, %v2884_v37  ;;  %v2901_v46 = vrot.slane %v2667_v22, 1  ;;  %v2677_v47 = vld [vmem:[#allocation2 + $0xe4] sm:$0x1]  ;;  %v2678_v49 = vld [vmem:[#allocation2 + $0xe8] sm:$0x1] }
 0x32e   :  { %10288 = vmatprep.subr.bf16.mxu0 %v10988_v25  ;;  %v2894_v45 = vsel %vm2819_vm3, %v2893_v21, %v2892_v38  ;;  %v2888_v50 = vsel %vm2831_vm7, %v2887_v19, %v2886_v44  ;;  %v2675_v52 = vld [vmem:[#allocation2 + $0xdc] sm:$0x1]  ;;  %v2676_v54 = vld [vmem:[#allocation2 + $0xe0] sm:$0x1]  ;;  %v2679_v55 = vld [vmem:[#allocation2 + $0xec] sm:$0x1] }
 0x32f   :  { %v2896_v51 = vsel %vm2822_vm4, %v2895_v30, %v2894_v45  ;;  %v2680_v56 = vld [vmem:[#allocation2 + $0xf0] sm:$0x1]  ;;  %v2681_v57 = vld [vmem:[#allocation2 + $0xf4] sm:$0x1]  ;;  %v2904_v11 = vsel %vm2813_vm1, %v2903_v43, %v2668_v31  ;;  %v2682_v58 = vld [vmem:[#allocation2 + $0xf8] sm:$0x1]  ;;  %v2617_v31 = vstv %s11284_s29 }
 0x330   :  { %v2898_v48 = vsel %vm2825_vm5, %v2897_v34, %v2896_v51  ;;  %v2905_v59 = vrot.slane %v2670_v62, 6  ;;  %v2907_v60 = vrot.slane %v2671_v35, 5  ;;  %v2909_v61 = vrot.slane %v2672_v36, 4  ;;  %v2683_v63 = vld [vmem:[#allocation2 + $0xfc] sm:$0x1]  ;;  %s10994_s29 = smov [#allocation5]  }
 0x331   :  { %v2900_v15 = vsel %vm2828_vm6, %v2899_v40, %v2898_v48  ;;  %v2911_v0 = vrot.slane %v2673_v41, 3  ;;  %v2913_v1 = vrot.slane %v2674_v42, 2  ;;  %v2917_v4 = vrot.slane %v2677_v47, 7  ;;  %v2619_v21 = vld [vmem:[#allocation4] sm:$0x3]  ;;  %s2603_s30 = sshll.u32 %s10994_s29, 4  ;;  %s2604_s30 = int_to_ptr.vmem [resolvable:$true] %s2603_s30 }
 0x332   :  { %v2902_v2 = vsel %vm2831_vm7, %v2901_v46, %v2900_v15  ;;  %v2906_v3 = vsel %vm2816_vm2, %v2905_v59, %v2904_v11  ;;  %v2919_v5 = vrot.slane %v2678_v49, 6  ;;  %v2921_v8 = vrot.slane %v2679_v55, 5  ;;  %v2594_v37 = vld [vmem:[#allocation6] sm:$0xf]  ;;  %v2595_v38 = vld [vmem:[#allocation6 + $0x4] sm:$0xf]  ;;  %p10894_p10 = scmp.lt.s32.totalorder %s2604_s30, %s2604_s30 }
 0x333   :  { %v10289_v6 = vpack.c.bf16 %v2902_v2, %v2888_v50  ;;  %v2908_v7 = vsel %vm2819_vm3, %v2907_v60, %v2906_v3  ;;  %v2923_v9 = vrot.slane %v2680_v56, 4  ;;  %v2915_v12 = vrot.slane %v2675_v52, 1  ;;  %2597 = vst [vmem:[%s2596_s26] sm:$0xf] %v2594_v37  ;;  %2598 = vst [vmem:[%s2596_s26 + $0x100] sm:$0xf] %v2595_v38  ;;  %s10889_s13 = scalar_lea.vmem %s2604_s30, 128 }
 0x334   :  { %v2910_v10 = vsel %vm2822_vm4, %v2909_v61, %v2908_v7  ;;  %v2918_v13 = vsel %vm2813_vm1, %v2917_v4, %v2676_v54  ;;  %v2925_v14 = vrot.slane %v2681_v57, 3  ;;  %v2927_v18 = vrot.slane %v2682_v58, 2  ;;  %p10890_p9 = scmp.ne.s32.totalorder %s2604_s30, %s10889_s13  ;;  %p10895_p11 = scmp.lt.s32.totalorder %s10889_s13, %s10889_s13 }
 0x335   :  { %10290 = vmatpush3.bf16.xpose.msra.mxu0 %v10289_v6  ;;  %v2912_v16 = vsel %vm2825_vm5, %v2911_v0, %v2910_v10  ;;  %v2920_v17 = vsel %vm2816_vm2, %v2919_v5, %v2918_v13  ;;  %v2929_v22 = vrot.slane %v2683_v63, 1  ;;  %v2616_v30 = vand.u32 127, %v2097_v53 }
 0x336   :  { %10291 = vmatprep.subr.bf16.mxu0 %v10988_v25  ;;  %v2914_v19 = vsel %vm2828_vm6, %v2913_v1, %v2912_v16  ;;  %v2922_v20 = vsel %vm2819_vm3, %v2921_v8, %v2920_v17  ;;  %p10896_p12 = por %p10895_p11, %p10894_p10 }
 0x337   :  { %v2924_v39 = vsel %vm2822_vm4, %v2923_v9, %v2922_v20  ;;  %v2916_v23 = vsel %vm2831_vm7, %v2915_v12, %v2914_v19  ;;  %vm11394_vm8 = vcmp.lt.s32.totalorder %v2616_v30, %v2617_v31 }
 0x338   :  { %v2926_v24 = vsel %vm2825_vm5, %v2925_v14, %v2924_v39  ;;  %p10897_p13 = pnand %p10896_p12, %p10890_p9 }
 0x339   :  { %v2928_v26 = vsel %vm2828_vm6, %v2927_v18, %v2926_v24 }
 0x33a   :  { %v2930_v28 = vsel %vm2831_vm7, %v2929_v22, %v2928_v26  ;;  %v2685_v53 = vld [vmem:[#allocation3 + $0x4] sm:$0x1]  ;;  %v2686_v40 = vld [vmem:[#allocation3 + $0x8] sm:$0x1]  ;;  %v2687_v41 = vld [vmem:[#allocation3 + $0xc] sm:$0x1] }
 0x33b   :  { %v10292_v29 = vpack.c.bf16 %v2930_v28, %v2916_v23  ;;  %v2684_v42 = vld [vmem:[#allocation3] sm:$0x1]  ;;  %v2688_v43 = vld [vmem:[#allocation3 + $0x10] sm:$0x1]  ;;  %v2689_v44 = vld [vmem:[#allocation3 + $0x14] sm:$0x1] }
 0x33c   :  { %v2690_v45 = vld [vmem:[#allocation3 + $0x18] sm:$0x1]  ;;  %v2691_v46 = vld [vmem:[#allocation3 + $0x1c] sm:$0x1]  ;;  %v2692_v47 = vld [vmem:[#allocation3 + $0x20] sm:$0x1] }
 0x33d   :  { %10293 = vmatpush3.bf16.xpose.msra.mxu0 %v10292_v29  ;;  %v2693_v49 = vld [vmem:[#allocation3 + $0x24] sm:$0x1]  ;;  %v2694_v50 = vld [vmem:[#allocation3 + $0x28] sm:$0x1]  ;;  %v2695_v51 = vld [vmem:[#allocation3 + $0x2c] sm:$0x1] }
 0x33e   :  { %10318 = vmatprep.subr.bf16.mxu0 %v10988_v25  ;;  %v2696_v52 = vld [vmem:[#allocation3 + $0x30] sm:$0x1]  ;;  %v2697_v54 = vld [vmem:[#allocation3 + $0x34] sm:$0x1]  ;;  %v2698_v55 = vld [vmem:[#allocation3 + $0x38] sm:$0x1] }
 0x33f   :  { %v3089_v56 = vrot.slane %v2685_v53, 7  ;;  %v3091_v57 = vrot.slane %v2686_v40, 6  ;;  %v3093_v11 = vrot.slane %v2687_v41, 5  ;;  %v2699_v48 = vld [vmem:[#allocation3 + $0x3c] sm:$0x1]  ;;  %v3095_v58 = vrot.slane %v2688_v43, 4 }
 0x340   :  { %v3097_v59 = vrot.slane %v2689_v44, 3  ;;  %v3099_v60 = vrot.slane %v2690_v45, 2  ;;  %v3103_v61 = vrot.slane %v2693_v49, 7  ;;  %v3105_v63 = vrot.slane %v2694_v50, 6  ;;  %v2701_v2 = vld [vmem:[#allocation3 + $0x44] sm:$0x1] }
 0x341   :  { %v3090_v15 = vsel %vm2813_vm1, %v3089_v56, %v2684_v42  ;;  %v3107_v0 = vrot.slane %v2695_v51, 5  ;;  %v3109_v1 = vrot.slane %v2696_v52, 4  ;;  %v3101_v4 = vrot.slane %v2691_v46, 1  ;;  %v2700_v10 = vld [vmem:[#allocation3 + $0x40] sm:$0x1] }
 0x342   :  { %v3092_v3 = vsel %vm2816_vm2, %v3091_v57, %v3090_v15  ;;  %v3104_v5 = vsel %vm2813_vm1, %v3103_v61, %v2692_v47  ;;  %v3111_v6 = vrot.slane %v2697_v54, 3  ;;  %v3113_v9 = vrot.slane %v2698_v55, 2  ;;  %v2702_v17 = vld [vmem:[#allocation3 + $0x48] sm:$0x1]  ;;  %v2703_v18 = vld [vmem:[#allocation3 + $0x4c] sm:$0x1] }
 0x343   :  { %v3094_v7 = vsel %vm2819_vm3, %v3093_v11, %v3092_v3  ;;  %v3106_v8 = vsel %vm2816_vm2, %v3105_v63, %v3104_v5  ;;  %v3117_v12 = vrot.slane %v2701_v2, 7  ;;  %v3115_v16 = vrot.slane %v2699_v48, 1  ;;  %v2704_v22 = vld [vmem:[#allocation3 + $0x50] sm:$0x1]  ;;  %v2705_v39 = vld [vmem:[#allocation3 + $0x54] sm:$0x1] }
 0x344   :  { %9851 = vmatmul.mubr.f32.vlgmr.msra.gmra.mrb[14].mxu0 %v2619_v21  ;;  %v3096_v13 = vsel %vm2822_vm4, %v3095_v58, %v3094_v7  ;;  %v3108_v14 = vsel %vm2819_vm3, %v3107_v0, %v3106_v8  ;;  %v2706_v23 = vld [vmem:[#allocation3 + $0x58] sm:$0x1]  ;;  %v2707_v28 = vld [vmem:[#allocation3 + $0x5c] sm:$0x1]  ;;  %v2709_v29 = vld [vmem:[#allocation3 + $0x64] sm:$0x1] }
 0x345   :  { %9907 = vmatprep.mubr.msk.f32.mxu0 %vm10989_vm0, %v10990_v27  ;;  %v3098_v19 = vsel %vm2825_vm5, %v3097_v59, %v3096_v13  ;;  %v3110_v20 = vsel %vm2822_vm4, %v3109_v1, %v3108_v14  ;;  %v2710_v21 = vld [vmem:[#allocation3 + $0x68] sm:$0x1]  ;;  %v3118_v30 = vsel %vm2813_vm1, %v3117_v12, %v2700_v10  ;;  %v3121_v37 = vrot.slane %v2703_v18, 5  ;;  %v2708_v53 = vld [vmem:[#allocation3 + $0x60] sm:$0x1] }
 0x346   :  { %v3100_v24 = vsel %vm2828_vm6, %v3099_v60, %v3098_v19  ;;  %v3112_v26 = vsel %vm2825_vm5, %v3111_v6, %v3110_v20  ;;  %v2713_v40 = vld [vmem:[#allocation3 + $0x74] sm:$0x1]  ;;  %v3123_v41 = vrot.slane %v2704_v22, 4  ;;  %v3125_v42 = vrot.slane %v2705_v39, 3  ;;  %v2714_v44 = vld [vmem:[#allocation3 + $0x78] sm:$0x1] }
 0x347   :  { %v3102_v31 = vsel %vm2831_vm7, %v3101_v4, %v3100_v24  ;;  %v3127_v46 = vrot.slane %v2706_v23, 2  ;;  %v3131_v47 = vrot.slane %v2709_v29, 7  ;;  %v2715_v49 = vld [vmem:[#allocation3 + $0x7c] sm:$0x1]  ;;  %v3133_v51 = vrot.slane %v2710_v21, 6 }
 0x348   :  { %v3129_v56 = vrot.slane %v2707_v28, 1  ;;  %v3139_v11 = vrot.slane %v2713_v40, 3  ;;  %v3141_v59 = vrot.slane %v2714_v44, 2  ;;  %v3143_v15 = vrot.slane %v2715_v49, 1  ;;  %v2717_v10 = vld [vmem:[#allocation3 + $0x84] sm:$0x1] }
 0x349   :  { %v3132_v57 = vsel %vm2813_vm1, %v3131_v47, %v2708_v53  ;;  %v2725_v12 = vld [vmem:[#allocation3 + $0xa4] sm:$0x1]  ;;  %v2718_v13 = vld [vmem:[#allocation3 + $0x88] sm:$0x1]  ;;  %v2716_v18 = vld [vmem:[#allocation3 + $0x80] sm:$0x1] }
 0x34a   :  { %v3134_v58 = vsel %vm2816_vm2, %v3133_v51, %v3132_v57  ;;  %v2726_v14 = vld [vmem:[#allocation3 + $0xa8] sm:$0x1]  ;;  %v2719_v19 = vld [vmem:[#allocation3 + $0x8c] sm:$0x1]  ;;  %v2724_v20 = vld [vmem:[#allocation3 + $0xa0] sm:$0x1] }
 0x34b   :  { %v2720_v22 = vld [vmem:[#allocation3 + $0x90] sm:$0x1]  ;;  %v2727_v39 = vld [vmem:[#allocation3 + $0xac] sm:$0x1]  ;;  %v2721_v24 = vld [vmem:[#allocation3 + $0x94] sm:$0x1] }
 0x34c   :  { %v3147_v28 = vrot.slane %v2718_v13, 6  ;;  %v3149_v29 = vrot.slane %v2719_v19, 5  ;;  %v2722_v21 = vld [vmem:[#allocation3 + $0x98] sm:$0x1]  ;;  %v3161_v53 = vrot.slane %v2726_v14, 6 }
 0x34d   :  { %v2733_v49 = vld [vmem:[#allocation3 + $0xc4] sm:$0x1]  ;;  %v2745_v13 = vld [vmem:[#allocation3 + $0xf4] sm:$0x1] }
 0x417   :  { %v3005_v62 = vpop.f32.mrb[14].mxu0 }
 0x418   :  { %v3009_v33 = vmul.f32 0.088388346, %v3005_v62  ;;  %v9852_v34 = vpop.f32.mrb[15].mxu0  ;;  %v3114_v62 = vsel %vm2828_vm6, %v3113_v9, %v3112_v26  ;;  %v2729_v26 = vld [vmem:[#allocation3 + $0xb4] sm:$0x1] }
 0x419   :  { %v2712_v34 = vld [vmem:[#allocation3 + $0x70] sm:$0x1]  ;;  %v3116_v38 = vsel %vm2831_vm7, %v3115_v16, %v3114_v62  ;;  %v3145_v16 = vrot.slane %v2717_v10, 7  ;;  %v3153_v62 = vrot.slane %v2721_v24, 3 }
 0x41a   :  { %v11400_v35 = vsel %vm11394_vm8, %v3009_v33, -1e+30  ;;  %v2711_v33 = vld [vmem:[#allocation3 + $0x6c] sm:$0x1]  ;;  %v10295_v43 = vpack.c.bf16 %v3116_v38, %v3102_v31  ;;  %v3137_v54 = vrot.slane %v2712_v34, 4  ;;  %v3151_v31 = vrot.slane %v2720_v22, 4 }
 0x41b   :  { %v3014_v36 = vsel %vm3013_vm9, %v11400_v35, -inf  ;;  %v3135_v52 = vrot.slane %v2711_v33, 5  ;;  %v3146_v23 = vsel %vm2813_vm1, %v3145_v16, %v2716_v18  ;;  %v2723_v34 = vld [vmem:[#allocation3 + $0x9c] sm:$0x1]  ;;  %v3155_v38 = vrot.slane %v2722_v21, 2 }
 0x41c   :  { %3015 = vmax.xlane.f32.xlu0 %v3014_v36  ;;  %v3119_v36 = vrot.slane %v2702_v17, 6  ;;  %10296 = vmatpush3.bf16.msra.mxu1 %v10295_v43  ;;  %v3159_v17 = vrot.slane %v2725_v12, 7  ;;  %v2740_v12 = vld [vmem:[#allocation3 + $0xe0] sm:$0x1]  ;;  %v3195_v21 = vrot.slane %v2745_v13, 3 }
 0x41d   :  { %10297 = vmatprep.subr.bf16.mxu1 %v10988_v25  ;;  %v3136_v61 = vsel %vm2819_vm3, %v3135_v52, %v3134_v58  ;;  %v3297_v13 = vld [vmem:[#allocation2 + $0x19] sm:$0x1] }
 0x41e   :  { %v3120_v45 = vsel %vm2816_vm2, %v3119_v36, %v3118_v30  ;;  %v3138_v63 = vsel %vm2822_vm4, %v3137_v54, %v3136_v61  ;;  %v2730_v30 = vld [vmem:[#allocation3 + $0xb8] sm:$0x1]  ;;  %v3160_v33 = vsel %vm2813_vm1, %v3159_v17, %v2724_v20  ;;  %v2731_v36 = vld [vmem:[#allocation3 + $0xbc] sm:$0x1]  ;;  %v2732_v54 = vld [vmem:[#allocation3 + $0xc0] sm:$0x1] }
 0x41f   :  { %v3122_v50 = vsel %vm2819_vm3, %v3121_v37, %v3120_v45  ;;  %v3140_v1 = vsel %vm2825_vm5, %v3139_v11, %v3138_v63  ;;  %v3148_v37 = vsel %vm2816_vm2, %v3147_v28, %v3146_v23  ;;  %v3162_v45 = vsel %vm2816_vm2, %v3161_v53, %v3160_v33  ;;  %v2734_v11 = vld [vmem:[#allocation3 + $0xc8] sm:$0x1]  ;;  %v2737_v61 = vld [vmem:[#allocation3 + $0xd4] sm:$0x1]  ;;  %v2746_v17 = vld [vmem:[#allocation3 + $0xf8] sm:$0x1] }
 0x420   :  { %v3124_v55 = vsel %vm2822_vm4, %v3123_v41, %v3122_v50  ;;  %v3142_v2 = vsel %vm2828_vm6, %v3141_v59, %v3140_v1  ;;  %v3150_v40 = vsel %vm2819_vm3, %v3149_v29, %v3148_v37  ;;  %v3157_v41 = vrot.slane %v2723_v34, 1  ;;  %v2741_v1 = vld [vmem:[#allocation3 + $0xe4] sm:$0x1] }
 0x421   :  { %v3126_v48 = vsel %vm2825_vm5, %v3125_v42, %v3124_v55  ;;  %v3144_v3 = vsel %vm2831_vm7, %v3143_v15, %v3142_v2  ;;  %v3163_v42 = vrot.slane %v2727_v39, 5  ;;  %v3152_v44 = vsel %vm2822_vm4, %v3151_v31, %v3150_v40  ;;  %v2738_v15 = vld [vmem:[#allocation3 + $0xd8] sm:$0x1]  ;;  %v2742_v2 = vld [vmem:[#allocation3 + $0xe8] sm:$0x1] }
 0x422   :  { %v3128_v60 = vsel %vm2828_vm6, %v3127_v46, %v3126_v48  ;;  %v3167_v46 = vrot.slane %v2729_v26, 3  ;;  %v3169_v47 = vrot.slane %v2730_v30, 2  ;;  %v3154_v50 = vsel %vm2825_vm5, %v3153_v62, %v3152_v44  ;;  %v2735_v48 = vld [vmem:[#allocation3 + $0xcc] sm:$0x1]  ;;  %v2747_v39 = vld [vmem:[#allocation3 + $0xfc] sm:$0x1] }
 0x423   :  { %v3130_v0 = vsel %vm2831_vm7, %v3129_v56, %v3128_v60  ;;  %v3164_v51 = vsel %vm2819_vm3, %v3163_v42, %v3162_v45  ;;  %v3171_v52 = vrot.slane %v2731_v36, 1  ;;  %v3173_v55 = vrot.slane %v2733_v49, 7  ;;  %v2736_v60 = vld [vmem:[#allocation3 + $0xd0] sm:$0x1]  ;;  %v3300_v44 = vld [vmem:[#allocation2 + $0x25] sm:$0x1] }
 0x424   :  { %v10298_v4 = vpack.c.bf16 %v3144_v3, %v3130_v0  ;;  %v3156_v56 = vsel %vm2828_vm6, %v3155_v38, %v3154_v50  ;;  %v2739_v0 = vld [vmem:[#allocation3 + $0xdc] sm:$0x1]  ;;  %v3179_v14 = vrot.slane %v2736_v60, 4  ;;  %v3181_v16 = vrot.slane %v2737_v61, 3  ;;  %v3293_v45 = vld [vmem:[#allocation2 + $0x9] sm:$0x1] }
 0x425   :  { %v3158_v58 = vsel %vm2831_vm7, %v3157_v41, %v3156_v56  ;;  %v3174_v3 = vsel %vm2813_vm1, %v3173_v55, %v2732_v54  ;;  %v3183_v19 = vrot.slane %v2738_v15, 2  ;;  %v3187_v20 = vrot.slane %v2741_v1, 7  ;;  %v3291_v50 = vld [vmem:[#allocation2 + $0x1] sm:$0x1]  ;;  %v3302_v54 = vld [vmem:[#allocation2 + $0x2d] sm:$0x1] }
 0x426   :  { %10299 = vmatpush3.bf16.msra.mxu1 %v10298_v4  ;;  %v3189_v22 = vrot.slane %v2742_v2, 6  ;;  %v3185_v28 = vrot.slane %v2739_v0, 1  ;;  %v3197_v62 = vrot.slane %v2746_v17, 2  ;;  %v3199_v36 = vrot.slane %v2747_v39, 1  ;;  %v3303_v60 = vld [vmem:[#allocation2 + $0x31] sm:$0x1] }
 0x427   :  { %10300 = vmatprep.subr.bf16.mxu1 %v10988_v25  ;;  %v3188_v29 = vsel %vm2813_vm1, %v3187_v20, %v2740_v12  ;;  %v3497_v49 = vrot.slane %v3300_v44, 7  ;;  %v3485_v55 = vrot.slane %v3293_v45, 6  ;;  %v3501_v15 = vrot.slane %v3302_v54, 5  ;;  %v3304_v0 = vld [vmem:[#allocation2 + $0x35] sm:$0x1] }
 0x428   :  { %v3190_v31 = vsel %vm2816_vm2, %v3189_v22, %v3188_v29  ;;  %v3315_v12 = vld [vmem:[#allocation2 + $0x61] sm:$0x1]  ;;  %v3310_v17 = vld [vmem:[#allocation2 + $0x4d] sm:$0x1]  ;;  %v3305_v22 = vld [vmem:[#allocation2 + $0x39] sm:$0x1] }
 0x429   :  { %v3323_v54 = vld [vmem:[#allocation2 + $0x81] sm:$0x1] }
 0x4a9   :  { %v3016_v5 = vpop.xlane.xlu0 %3015 }
 0x4aa   :  { %v3017_v6 = vsub.f32 %v11400_v35, %v3016_v5  ;;  %v2728_v35 = vld [vmem:[#allocation3 + $0xb0] sm:$0x1]  ;;  %v2743_v5 = vld [vmem:[#allocation3 + $0xec] sm:$0x1] }
 0x4ab   :  { %v3165_v43 = vrot.slane %v2728_v35, 4  ;;  %v3191_v23 = vrot.slane %v2743_v5, 5 }
 0x4ac   :  { %v3018_v7 = vmul.f32 1.442695, %v3017_v6  ;;  %v2744_v6 = vld [vmem:[#allocation3 + $0xf0] sm:$0x1] }
 0x4ad   :  { %v3166_v57 = vsel %vm2822_vm4, %v3165_v43, %v3164_v51  ;;  %v3193_v24 = vrot.slane %v2744_v6, 4  ;;  %v3192_v34 = vsel %vm2819_vm3, %v3191_v23, %v3190_v31  ;;  %v3292_v43 = vld [vmem:[#allocation2 + $0x5] sm:$0x1]  ;;  %v3299_v51 = vld [vmem:[#allocation2 + $0x21] sm:$0x1] }
 0x4ae   :  { %10715 = vpow2.f32 %v3018_v7  ;;  %v3168_v59 = vsel %vm2825_vm5, %v3167_v46, %v3166_v57  ;;  %v3175_v7 = vrot.slane %v2734_v11, 6  ;;  %v3301_v46 = vld [vmem:[#allocation2 + $0x29] sm:$0x1]  ;;  %v3498_v11 = vsel %vm2813_vm1, %v3497_v49, %v3299_v51  ;;  %v3324_v31 = vld [vmem:[#allocation2 + $0x85] sm:$0x1] }
 0x4af   :  { %v3170_v63 = vsel %vm2828_vm6, %v3169_v47, %v3168_v59  ;;  %v3194_v37 = vsel %vm2822_vm4, %v3193_v24, %v3192_v34  ;;  %v3483_v47 = vrot.slane %v3292_v43, 7  ;;  %v3499_v56 = vrot.slane %v3301_v46, 6  ;;  %v3295_v59 = vld [vmem:[#allocation2 + $0x11] sm:$0x1]  ;;  %v3325_v46 = vld [vmem:[#allocation2 + $0x89] sm:$0x1] }
 0x4b0   :  { %v3172_v4 = vsel %vm2831_vm7, %v3171_v52, %v3170_v63  ;;  %v3176_v18 = vsel %vm2816_vm2, %v3175_v7, %v3174_v3  ;;  %v3196_v53 = vsel %vm2825_vm5, %v3195_v21, %v3194_v37  ;;  %v3294_v52 = vld [vmem:[#allocation2 + $0xd] sm:$0x1]  ;;  %v3296_v63 = vld [vmem:[#allocation2 + $0x15] sm:$0x1]  ;;  %v3309_v3 = vld [vmem:[#allocation2 + $0x49] sm:$0x1] }
 0x4b1   :  { %v10301_v10 = vpack.c.bf16 %v3172_v4, %v3158_v58  ;;  %v3198_v40 = vsel %vm2828_vm6, %v3197_v62, %v3196_v53  ;;  %v3484_v57 = vsel %vm2813_vm1, %v3483_v47, %v3291_v50  ;;  %v3316_v58 = vld [vmem:[#allocation2 + $0x65] sm:$0x1]  ;;  %v3487_v61 = vrot.slane %v3294_v52, 5  ;;  %v3317_v4 = vld [vmem:[#allocation2 + $0x69] sm:$0x1] }
 0x4b2   :  { %v3200_v41 = vsel %vm2831_vm7, %v3199_v36, %v3198_v40  ;;  %v3486_v1 = vsel %vm2816_vm2, %v3485_v55, %v3484_v57  ;;  %v3500_v2 = vsel %vm2816_vm2, %v3499_v56, %v3498_v11  ;;  %v3525_v6 = vrot.slane %v3316_v58, 7  ;;  %v3332_v62 = vld [vmem:[#allocation2 + $0xa5] sm:$0x1]  ;;  %v3311_v34 = vld [vmem:[#allocation2 + $0x51] sm:$0x1] }
 0x4b3   :  { %10302 = vmatpush3.bf16.msra.mxu1 %v10301_v10  ;;  %v3489_v7 = vrot.slane %v3295_v59, 4  ;;  %v3307_v10 = vld [vmem:[#allocation2 + $0x41] sm:$0x1]  ;;  %v3527_v20 = vrot.slane %v3317_v4, 6  ;;  %v3491_v39 = vrot.slane %v3296_v63, 3  ;;  %v3493_v21 = vrot.slane %v3297_v13, 2 }
 0x4b4   :  { %10303 = vmatprep.subr.bf16.mxu1 %v10988_v25  ;;  %v3526_v24 = vsel %vm2813_vm1, %v3525_v6, %v3315_v12  ;;  %v3319_v36 = vld [vmem:[#allocation2 + $0x71] sm:$0x1]  ;;  %v3515_v37 = vrot.slane %v3310_v17, 5  ;;  %v3507_v53 = vrot.slane %v3305_v22, 2  ;;  %v3312_v40 = vld [vmem:[#allocation2 + $0x55] sm:$0x1] }
 0x4b5   :  { %v3528_v43 = vsel %vm2816_vm2, %v3527_v20, %v3526_v24  ;;  %v3333_v47 = vld [vmem:[#allocation2 + $0xa9] sm:$0x1]  ;;  %v3539_v49 = vrot.slane %v3324_v31, 7  ;;  %v3553_v50 = vrot.slane %v3332_v62, 7  ;;  %v3517_v51 = vrot.slane %v3311_v34, 4 }
 0x4b6   :  { %v3531_v52 = vrot.slane %v3319_v36, 4  ;;  %v3331_v55 = vld [vmem:[#allocation2 + $0xa1] sm:$0x1]  ;;  %v3313_v11 = vld [vmem:[#allocation2 + $0x59] sm:$0x1]  ;;  %v3541_v63 = vrot.slane %v3325_v46, 6 }
 0x4b7   :  { %v3554_v6 = vsel %vm2813_vm1, %v3553_v50, %v3331_v55  ;;  %v3340_v13 = vld [vmem:[#allocation2 + $0xc5] sm:$0x1]  ;;  %v3336_v24 = vld [vmem:[#allocation2 + $0xb5] sm:$0x1]  ;;  %v3349_v31 = vld [vmem:[#allocation2 + $0xe9] sm:$0x1] }
 0x4b8   :  { %v11437_v8 = vpop.eup %10715  ;;  %v3567_v62 = vrot.slane %v3340_v13, 7 }
 0x4b9   :  { %v3020_v9 = vsel %vm3013_vm9, %v11437_v8, 0.0 }
 0x4ba   :  { %3021 = vadd.xlane.f32.xlu0 %v3020_v9  ;;  %v3177_v9 = vrot.slane %v2735_v48, 5  ;;  %v3308_v48 = vld [vmem:[#allocation2 + $0x45] sm:$0x1] }
 0x4bb   :  { %v3511_v5 = vrot.slane %v3308_v48, 7 }
 0x4bc   :  { %v3178_v35 = vsel %vm2819_vm3, %v3177_v9, %v3176_v18  ;;  %v3503_v9 = vrot.slane %v3303_v60, 4  ;;  %v3318_v18 = vld [vmem:[#allocation2 + $0x6d] sm:$0x1] }
 0x4bd   :  { %v3180_v26 = vsel %vm2822_vm4, %v3179_v14, %v3178_v35  ;;  %v3488_v14 = vsel %vm2819_vm3, %v3487_v61, %v3486_v1  ;;  %v3505_v35 = vrot.slane %v3304_v0, 3  ;;  %v3512_v23 = vsel %vm2813_vm1, %v3511_v5, %v3307_v10  ;;  %v3326_v61 = vld [vmem:[#allocation2 + $0x8d] sm:$0x1]  ;;  %v3314_v1 = vld [vmem:[#allocation2 + $0x5d] sm:$0x1] }
 0x4be   :  { %v3182_v30 = vsel %vm2825_vm5, %v3181_v16, %v3180_v26  ;;  %v3502_v16 = vsel %vm2819_vm3, %v3501_v15, %v3500_v2  ;;  %v3298_v26 = vld [vmem:[#allocation2 + $0x1d] sm:$0x1]  ;;  %v3490_v29 = vsel %vm2822_vm4, %v3489_v7, %v3488_v14  ;;  %v3334_v15 = vld [vmem:[#allocation2 + $0xad] sm:$0x1]  ;;  %v3555_v0 = vrot.slane %v3333_v47, 6 }
 0x4bf   :  { %v3184_v33 = vsel %vm2828_vm6, %v3183_v19, %v3182_v30  ;;  %v3513_v19 = vrot.slane %v3309_v3, 6  ;;  %v3504_v30 = vsel %vm2822_vm4, %v3503_v9, %v3502_v16  ;;  %v3492_v44 = vsel %vm2825_vm5, %v3491_v39, %v3490_v29  ;;  %v3321_v2 = vld [vmem:[#allocation2 + $0x79] sm:$0x1]  ;;  %v3322_v7 = vld [vmem:[#allocation2 + $0x7d] sm:$0x1] }
 0x4c0   :  { %v3186_v38 = vsel %vm2831_vm7, %v3185_v28, %v3184_v33  ;;  %v3306_v28 = vld [vmem:[#allocation2 + $0x3d] sm:$0x1]  ;;  %v3506_v45 = vsel %vm2825_vm5, %v3505_v35, %v3504_v30  ;;  %v3495_v56 = vrot.slane %v3298_v26, 1  ;;  %v3494_v59 = vsel %vm2828_vm6, %v3493_v21, %v3492_v44  ;;  %v3348_v14 = vld [vmem:[#allocation2 + $0xe5] sm:$0x1] }
 0x4c1   :  { %v10304_v42 = vpack.c.bf16 %v3200_v41, %v3186_v38  ;;  %v3529_v38 = vrot.slane %v3318_v18, 5  ;;  %v3320_v41 = vld [vmem:[#allocation2 + $0x75] sm:$0x1]  ;;  %v3509_v57 = vrot.slane %v3306_v28, 1  ;;  %v3508_v60 = vsel %vm2828_vm6, %v3507_v53, %v3506_v45  ;;  %v3327_v18 = vld [vmem:[#allocation2 + $0x91] sm:$0x1] }
 0x4c2   :  { %v3519_v3 = vrot.slane %v3312_v40, 3  ;;  %v3533_v4 = vrot.slane %v3320_v41, 3  ;;  %v3540_v5 = vsel %vm2813_vm1, %v3539_v49, %v3323_v54  ;;  %v3521_v10 = vrot.slane %v3313_v11, 2  ;;  %v3341_v30 = vld [vmem:[#allocation2 + $0xc9] sm:$0x1] }
 0x4c3   :  { %10305 = vmatpush3.bf16.msra.mxu1 %v10304_v42  ;;  %v3514_v42 = vsel %vm2816_vm2, %v3513_v19, %v3512_v23  ;;  %v3530_v58 = vsel %vm2819_vm3, %v3529_v38, %v3528_v43  ;;  %v3496_v16 = vsel %vm2831_vm7, %v3495_v56, %v3494_v59  ;;  %v3510_v17 = vsel %vm2831_vm7, %v3509_v57, %v3508_v60  ;;  %v3335_v19 = vld [vmem:[#allocation2 + $0xb1] sm:$0x1]  ;;  %v3328_v23 = vld [vmem:[#allocation2 + $0x95] sm:$0x1]  ;;  %v3339_v53 = vld [vmem:[#allocation2 + $0xc1] sm:$0x1] }
 0x4c4   :  { %10306 = vmatprep.subr.bf16.mxu1 %v10988_v25  ;;  %v3516_v48 = vsel %vm2819_vm3, %v3515_v37, %v3514_v42  ;;  %v3532_v12 = vsel %vm2822_vm4, %v3531_v52, %v3530_v58  ;;  %v3543_v20 = vrot.slane %v3326_v61, 5  ;;  %v3557_v22 = vrot.slane %v3334_v15, 5  ;;  %v3347_v40 = vld [vmem:[#allocation2 + $0xe1] sm:$0x1]  ;;  %v3342_v47 = vld [vmem:[#allocation2 + $0xcd] sm:$0x1] }
 0x4c5   :  { %v3518_v9 = vsel %vm2822_vm4, %v3517_v51, %v3516_v48  ;;  %v3523_v39 = vrot.slane %v3314_v1, 1  ;;  %v3535_v35 = vrot.slane %v3321_v2, 2  ;;  %v3542_v26 = vsel %vm2816_vm2, %v3541_v63, %v3540_v5  ;;  %v3350_v49 = vld [vmem:[#allocation2 + $0xed] sm:$0x1]  ;;  %v3329_v52 = vld [vmem:[#allocation2 + $0x99] sm:$0x1] }
 0x4c6   :  { %v3556_v28 = vsel %vm2816_vm2, %v3555_v0, %v3554_v6  ;;  %v3520_v29 = vsel %vm2825_vm5, %v3519_v3, %v3518_v9  ;;  %v3534_v21 = vsel %vm2825_vm5, %v3533_v4, %v3532_v12  ;;  %v10307_v36 = vpack.c.bf16 %v3510_v17, %v3496_v16  ;;  %v3337_v54 = vld [vmem:[#allocation2 + $0xb9] sm:$0x1]  ;;  %v3343_v60 = vld [vmem:[#allocation2 + $0xd1] sm:$0x1]  ;;  %v3330_v0 = vld [vmem:[#allocation2 + $0x9d] sm:$0x1] }
 0x4c7   :  { %v3545_v37 = vrot.slane %v3327_v18, 4  ;;  %v3559_v38 = vrot.slane %v3335_v19, 4  ;;  %v3537_v42 = vrot.slane %v3322_v7, 1  ;;  %v3544_v43 = vsel %vm2819_vm3, %v3543_v20, %v3542_v26  ;;  %v3351_v61 = vld [vmem:[#allocation2 + $0xf1] sm:$0x1] }
 0x4c8   :  { %v3558_v44 = vsel %vm2819_vm3, %v3557_v22, %v3556_v28  ;;  %v3522_v45 = vsel %vm2828_vm6, %v3521_v10, %v3520_v29  ;;  %v3536_v46 = vsel %vm2828_vm6, %v3535_v35, %v3534_v21  ;;  %v3569_v50 = vrot.slane %v3341_v30, 6  ;;  %v3338_v1 = vld [vmem:[#allocation2 + $0xbd] sm:$0x1]  ;;  %v3344_v10 = vld [vmem:[#allocation2 + $0xd5] sm:$0x1] }
 0x4c9   :  { %v3583_v51 = vrot.slane %v3349_v31, 6  ;;  %v3547_v55 = vrot.slane %v3328_v23, 3  ;;  %v3561_v56 = vrot.slane %v3336_v24, 3  ;;  %v3546_v11 = vsel %vm2822_vm4, %v3545_v37, %v3544_v43  ;;  %v3352_v12 = vld [vmem:[#allocation2 + $0xf5] sm:$0x1] }
 0x4ca   :  { %v3560_v48 = vsel %vm2822_vm4, %v3559_v38, %v3558_v44  ;;  %v3524_v58 = vsel %vm2831_vm7, %v3523_v39, %v3522_v45  ;;  %v3538_v59 = vsel %vm2831_vm7, %v3537_v42, %v3536_v46  ;;  %v3571_v15 = vrot.slane %v3342_v47, 5  ;;  %v3345_v39 = vld [vmem:[#allocation2 + $0xd9] sm:$0x1]  ;;  %v3346_v30 = vld [vmem:[#allocation2 + $0xdd] sm:$0x1] }
 0x4cb   :  { %v3585_v63 = vrot.slane %v3350_v49, 5  ;;  %v3549_v2 = vrot.slane %v3329_v52, 2  ;;  %v3563_v3 = vrot.slane %v3337_v54, 2  ;;  %v3548_v6 = vsel %vm2825_vm5, %v3547_v55, %v3546_v11  ;;  %v3353_v35 = vld [vmem:[#allocation2 + $0xf9] sm:$0x1] }
 0x4cc   :  { %v3562_v7 = vsel %vm2825_vm5, %v3561_v56, %v3560_v48  ;;  %v10310_v9 = vpack.c.bf16 %v3538_v59, %v3524_v58  ;;  %v3573_v13 = vrot.slane %v3343_v60, 4  ;;  %v3551_v16 = vrot.slane %v3330_v0, 1  ;;  %v3354_v31 = vld [vmem:[#allocation2 + $0xfd] sm:$0x1]  ;;  %v3290_v45 = vld [vmem:[#allocation4 + $0x4] sm:$0x3] }
 0x4cd   :  { %v3565_v17 = vrot.slane %v3338_v1, 1  ;;  %v3550_v20 = vsel %vm2828_vm6, %v3549_v2, %v3548_v6  ;;  %v3564_v22 = vsel %vm2828_vm6, %v3563_v3, %v3562_v7  ;;  %v3575_v23 = vrot.slane %v3344_v10, 3  ;;  %v3356_v56 = vld [vmem:[#allocation3 + $0x5] sm:$0x1]  ;;  %v3355_v11 = vld [vmem:[#allocation3 + $0x1] sm:$0x1] }
 0x4ce   :  { %v3589_v24 = vrot.slane %v3352_v12, 3  ;;  %v3552_v29 = vsel %vm2831_vm7, %v3551_v16, %v3550_v20  ;;  %v3579_v38 = vrot.slane %v3346_v30, 1  ;;  %v3359_v48 = vld [vmem:[#allocation3 + $0x11] sm:$0x1]  ;;  %v3360_v58 = vld [vmem:[#allocation3 + $0x15] sm:$0x1] }
 0x4cf   :  { %v3566_v21 = vsel %vm2831_vm7, %v3565_v17, %v3564_v22  ;;  %v3361_v59 = vld [vmem:[#allocation3 + $0x19] sm:$0x1]  ;;  %v3362_v60 = vld [vmem:[#allocation3 + $0x1d] sm:$0x1]  ;;  %v3366_v0 = vld [vmem:[#allocation3 + $0x2d] sm:$0x1] }
 0x4d0   :  { %v10313_v37 = vpack.c.bf16 %v3566_v21, %v3552_v29  ;;  %v3367_v1 = vld [vmem:[#allocation3 + $0x31] sm:$0x1]  ;;  %v3368_v2 = vld [vmem:[#allocation3 + $0x35] sm:$0x1]  ;;  %v3369_v3 = vld [vmem:[#allocation3 + $0x39] sm:$0x1] }
 0x4d1   :  { %v3370_v7 = vld [vmem:[#allocation3 + $0x3d] sm:$0x1]  ;;  %v3758_v10 = vrot.slane %v3360_v58, 3  ;;  %v3760_v12 = vrot.slane %v3361_v59, 2  ;;  %v3768_v17 = vrot.slane %v3366_v0, 5  ;;  %v3762_v22 = vrot.slane %v3362_v60, 1 }
 0x4d2   :  { %v3385_v58 = vld [vmem:[#allocation3 + $0x79] sm:$0x1] }
 0x547   :  { %v3022_v33 = vpop.xlane.xlu0 %3021 }
 0x548   :  { %10717 = vrcp.f32 %v3022_v33  ;;  %v3581_v33 = vrot.slane %v3348_v14, 7  ;;  %v3587_v14 = vrot.slane %v3351_v61, 4  ;;  %v3363_v61 = vld [vmem:[#allocation3 + $0x21] sm:$0x1] }
 0x54a   :  { %v3582_v57 = vsel %vm2813_vm1, %v3581_v33, %v3347_v40  ;;  %v3591_v33 = vrot.slane %v3353_v35, 2  ;;  %v3772_v35 = vrot.slane %v3368_v2, 3 }
 0x54b   :  { %v3584_v5 = vsel %vm2816_vm2, %v3583_v51, %v3582_v57  ;;  %v3358_v57 = vld [vmem:[#allocation3 + $0xd] sm:$0x1] }
 0x54c   :  { %v3586_v19 = vsel %vm2819_vm3, %v3585_v63, %v3584_v5  ;;  %v3365_v63 = vld [vmem:[#allocation3 + $0x29] sm:$0x1]  ;;  %v3754_v6 = vrot.slane %v3358_v57, 5 }
 0x54d   :  { %v3588_v28 = vsel %vm2822_vm4, %v3587_v14, %v3586_v19  ;;  %v3766_v16 = vrot.slane %v3365_v63, 6  ;;  %v3372_v19 = vld [vmem:[#allocation3 + $0x45] sm:$0x1] }
 0x54e   :  { %v3778_v29 = vrot.slane %v3372_v19, 7 }
 0x552   :  { %v10718_v34 = vpop.eup %10717 }
 0x553   :  { %v3024_v41 = vmul.f32 %v10718_v34, %v11437_v8  ;;  %v3568_v8 = vsel %vm2813_vm1, %v3567_v62, %v3339_v53  ;;  %v3577_v62 = vrot.slane %v3345_v39, 2  ;;  %v3593_v53 = vrot.slane %v3354_v31, 1 }
 0x554   :  { %v3570_v4 = vsel %vm2816_vm2, %v3569_v50, %v3568_v8  ;;  %v3357_v8 = vld [vmem:[#allocation3 + $0x9] sm:$0x1]  ;;  %v3776_v31 = vrot.slane %v3370_v7, 1 }
 0x555   :  { %9870 = vmatmul.mubr.msk.f32.vlgmr.msra.gmra.mrb[14].mxu1 %vm3209_vm10, %v3024_v41  ;;  %v3572_v18 = vsel %vm2819_vm3, %v3571_v15, %v3570_v4  ;;  %v3364_v15 = vld [vmem:[#allocation3 + $0x25] sm:$0x1]  ;;  %v3750_v4 = vrot.slane %v3356_v56, 7  ;;  %v3752_v5 = vrot.slane %v3357_v8, 6  ;;  %v3379_v56 = vld [vmem:[#allocation3 + $0x61] sm:$0x1] }
 0x556   :  { %10308 = vmatpush3.bf16.xpose.msra.mxu1 %v10307_v36  ;;  %9888 = vmatprep.mubr.msk.f32.mxu1 %vm10989_vm0, %v10990_v27  ;;  %v3574_v26 = vsel %vm2822_vm4, %v3573_v13, %v3572_v18  ;;  %v3590_v36 = vsel %vm2825_vm5, %v3589_v24, %v3588_v28  ;;  %v3764_v13 = vrot.slane %v3364_v15, 7  ;;  %v3770_v18 = vrot.slane %v3367_v1, 4  ;;  %v3371_v28 = vld [vmem:[#allocation3 + $0x41] sm:$0x1]  ;;  %v3384_v8 = vld [vmem:[#allocation3 + $0x75] sm:$0x1] }
 0x557   :  { %10309 = vmatprep.subr.bf16.mxu1 %v10988_v25  ;;  %v3576_v34 = vsel %vm2825_vm5, %v3575_v23, %v3574_v26  ;;  %v3592_v41 = vsel %vm2828_vm6, %v3591_v33, %v3590_v36  ;;  %v3751_v14 = vsel %vm2813_vm1, %v3750_v4, %v3355_v11  ;;  %v3774_v26 = vrot.slane %v3369_v3, 2  ;;  %v3374_v33 = vld [vmem:[#allocation3 + $0x4d] sm:$0x1]  ;;  %v3386_v15 = vld [vmem:[#allocation3 + $0x7d] sm:$0x1] }
 0x558   :  { %v3578_v40 = vsel %vm2828_vm6, %v3577_v62, %v3576_v34  ;;  %v3594_v43 = vsel %vm2831_vm7, %v3593_v53, %v3592_v41  ;;  %v3753_v20 = vsel %vm2816_vm2, %v3752_v5, %v3751_v14  ;;  %v3765_v39 = vsel %vm2813_vm1, %v3764_v13, %v3363_v61  ;;  %v3373_v62 = vld [vmem:[#allocation3 + $0x49] sm:$0x1]  ;;  %v3377_v53 = vld [vmem:[#allocation3 + $0x59] sm:$0x1] }
 0x559   :  { %v3580_v42 = vsel %vm2831_vm7, %v3579_v38, %v3578_v40  ;;  %v3755_v23 = vsel %vm2819_vm3, %v3754_v6, %v3753_v20  ;;  %v3767_v24 = vsel %vm2816_vm2, %v3766_v16, %v3765_v39  ;;  %v3376_v38 = vld [vmem:[#allocation3 + $0x55] sm:$0x1]  ;;  %v3788_v60 = vrot.slane %v3377_v53, 2 }
 0x55a   :  { %v10316_v44 = vpack.c.bf16 %v3594_v43, %v3580_v42  ;;  %v3769_v30 = vsel %vm2819_vm3, %v3768_v17, %v3767_v24  ;;  %v3378_v42 = vld [vmem:[#allocation3 + $0x5d] sm:$0x1]  ;;  %v3380_v43 = vld [vmem:[#allocation3 + $0x65] sm:$0x1]  ;;  %v3786_v11 = vrot.slane %v3376_v38, 3  ;;  %v3800_v6 = vrot.slane %v3384_v8, 3 }
 0x55b   :  { %v3771_v36 = vsel %vm2822_vm4, %v3770_v18, %v3769_v30  ;;  %v3792_v61 = vrot.slane %v3380_v43, 7  ;;  %v3790_v4 = vrot.slane %v3378_v42, 1  ;;  %v3804_v14 = vrot.slane %v3386_v15, 1  ;;  %v3397_v30 = vld [vmem:[#allocation3 + $0xa9] sm:$0x1] }
 0x55c   :  { %v3773_v41 = vsel %vm2825_vm5, %v3772_v35, %v3771_v36  ;;  %v3395_v36 = vld [vmem:[#allocation3 + $0xa1] sm:$0x1]  ;;  %v3398_v38 = vld [vmem:[#allocation3 + $0xad] sm:$0x1]  ;;  %v3404_v15 = vld [vmem:[#allocation3 + $0xc5] sm:$0x1] }
 0x55d   :  { %v3793_v5 = vsel %vm2813_vm1, %v3792_v61, %v3379_v56  ;;  %v3822_v56 = vrot.slane %v3397_v30, 6 }
 0x55e   :  { %10311 = vmatpush3.bf16.xpose.msra.mxu1 %v10310_v9  ;;  %v3756_v9 = vrot.slane %v3359_v48, 4 }
 0x55f   :  { %10312 = vmatprep.subr.bf16.mxu1 %v10988_v25 }
 0x560   :  { %v3757_v21 = vsel %vm2822_vm4, %v3756_v9, %v3755_v23 }
 0x561   :  { %v3759_v34 = vsel %vm2825_vm5, %v3758_v10, %v3757_v21  ;;  %v3802_v10 = vrot.slane %v3385_v58, 2  ;;  %v3389_v21 = vld [vmem:[#allocation3 + $0x89] sm:$0x1] }
 0x562   :  { %v3761_v40 = vsel %vm2828_vm6, %v3760_v12, %v3759_v34  ;;  %v3390_v34 = vld [vmem:[#allocation3 + $0x8d] sm:$0x1]  ;;  %v3808_v42 = vrot.slane %v3389_v21, 6  ;;  %v3416_v21 = vld [vmem:[#allocation3 + $0xf5] sm:$0x1] }
 0x563   :  { %v3810_v43 = vrot.slane %v3390_v34, 5 }
 0x566   :  { %10314 = vmatpush3.bf16.xpose.msra.mxu1 %v10313_v37  ;;  %v3375_v37 = vld [vmem:[#allocation3 + $0x51] sm:$0x1] }
 0x567   :  { %10315 = vmatprep.subr.bf16.mxu1 %v10988_v25  ;;  %v3784_v57 = vrot.slane %v3375_v37, 4  ;;  %v3391_v37 = vld [vmem:[#allocation3 + $0x91] sm:$0x1] }
 0x56e   :  { %10317 = vmatpush3.bf16.xpose.msra.mxu1 %v10316_v44  ;;  %v3381_v44 = vld [vmem:[#allocation3 + $0x69] sm:$0x1] }
 0x56f   :  { %10342 = vmatprep.subr.bf16.mxu1 %v10988_v25  ;;  %v3794_v0 = vrot.slane %v3381_v44, 6  ;;  %v3393_v44 = vld [vmem:[#allocation3 + $0x99] sm:$0x1] }
 0x571   :  { %v3795_v9 = vsel %vm2816_vm2, %v3794_v0, %v3793_v5 }
 0x575   :  { %9889 = vmatmul.mubr.f32.vlgmr.msra.gmra.mrb[16].mxu1 %v3290_v45  ;;  %v3779_v45 = vsel %vm2813_vm1, %v3778_v29, %v3371_v28  ;;  %v3388_v28 = vld [vmem:[#allocation3 + $0x85] sm:$0x1] }
 0x576   :  { %9945 = vmatprep.mubr.msk.f32.mxu1 %vm10989_vm0, %v10990_v27  ;;  %v3396_v29 = vld [vmem:[#allocation3 + $0xa5] sm:$0x1] }
 0x628   :  { %v3279_v46 = vpop.f32.mrb[14].mxu1 }
 0x629   :  { %3283 = vst [vmem:[#allocation7] sm:$0x1] %v3279_v46  ;;  %v9190_v47 = vrot.slane %v3279_v46, 9  ;;  %v9871_v49 = vpop.f32.mrb[15].mxu1  ;;  %v3763_v46 = vsel %vm2831_vm7, %v3762_v22, %v3761_v40  ;;  %v3392_v40 = vld [vmem:[#allocation3 + $0x95] sm:$0x1] }
 0x62a   :  { %v3382_v49 = vld [vmem:[#allocation3 + $0x6d] sm:$0x1] }
 0x62b   :  { %3288 = vst [vmem:[#allocation7 + $0x4] sm:$0x1] %v9190_v47  ;;  %v3775_v47 = vsel %vm2828_vm6, %v3774_v26, %v3773_v41  ;;  %v3796_v1 = vrot.slane %v3382_v49, 5  ;;  %v3400_v41 = vld [vmem:[#allocation3 + $0xb5] sm:$0x1] }
 0x62d   :  { %v3797_v13 = vsel %vm2819_vm3, %v3796_v1, %v3795_v9 }
 0x648   :  { %v3669_v50 = vpop.f32.mrb[16].mxu1 }
 0x649   :  { %v3673_v51 = vmul.f32 0.088388346, %v3669_v50  ;;  %v9890_v52 = vpop.f32.mrb[17].mxu1  ;;  %v3383_v50 = vld [vmem:[#allocation3 + $0x71] sm:$0x1] }
 0x64a   :  { %v3782_v52 = vrot.slane %v3374_v33, 5  ;;  %v3798_v2 = vrot.slane %v3383_v50, 4  ;;  %v3387_v33 = vld [vmem:[#allocation3 + $0x81] sm:$0x1]  ;;  %v3394_v50 = vld [vmem:[#allocation3 + $0x9d] sm:$0x1] }
 0x64b   :  { %v11539_v54 = vsel %vm11394_vm8, %v3673_v51, -1e+30  ;;  %v3780_v51 = vrot.slane %v3373_v62, 6  ;;  %v3820_v62 = vrot.slane %v3396_v29, 7  ;;  %v3411_v29 = vld [vmem:[#allocation3 + $0xe1] sm:$0x1] }
 0x64c   :  { %v3675_v55 = vsel %vm3013_vm9, %v11539_v54, -inf  ;;  %v3799_v16 = vsel %vm2822_vm4, %v3798_v2, %v3797_v13  ;;  %v3403_v2 = vld [vmem:[#allocation3 + $0xc1] sm:$0x1]  ;;  %v3408_v13 = vld [vmem:[#allocation3 + $0xd5] sm:$0x1] }
 0x64d   :  { %3676 = vmax.xlane.f32.xlu1 %v3675_v55  ;;  %v3777_v55 = vsel %vm2831_vm7, %v3776_v31, %v3775_v47  ;;  %v3781_v59 = vsel %vm2816_vm2, %v3780_v51, %v3779_v45  ;;  %v3801_v18 = vsel %vm2825_vm5, %v3800_v6, %v3799_v16  ;;  %v3806_v31 = vrot.slane %v3388_v28, 7  ;;  %v3401_v45 = vld [vmem:[#allocation3 + $0xb9] sm:$0x1]  ;;  %v3402_v51 = vld [vmem:[#allocation3 + $0xbd] sm:$0x1] }
 0x64e   :  { %v10319_v48 = vpack.c.bf16 %v3777_v55, %v3763_v46  ;;  %v3783_v63 = vsel %vm2819_vm3, %v3782_v52, %v3781_v59  ;;  %v3803_v19 = vsel %vm2828_vm6, %v3802_v10, %v3801_v18  ;;  %v3812_v46 = vrot.slane %v3391_v37, 4  ;;  %v3405_v6 = vld [vmem:[#allocation3 + $0xc9] sm:$0x1]  ;;  %v3412_v18 = vld [vmem:[#allocation3 + $0xe5] sm:$0x1] }
 0x64f   :  { %v3785_v3 = vsel %vm2822_vm4, %v3784_v57, %v3783_v63  ;;  %v3805_v20 = vsel %vm2831_vm7, %v3804_v14, %v3803_v19  ;;  %v3807_v53 = vsel %vm2813_vm1, %v3806_v31, %v3387_v33  ;;  %v3814_v47 = vrot.slane %v3392_v40, 3  ;;  %v3409_v14 = vld [vmem:[#allocation3 + $0xd9] sm:$0x1]  ;;  %v3413_v19 = vld [vmem:[#allocation3 + $0xe9] sm:$0x1] }
 0x650   :  { %10320 = vmatpush3.bf16.msra.mxu0 %v10319_v48  ;;  %v3787_v7 = vsel %vm2825_vm5, %v3786_v11, %v3785_v3  ;;  %v3821_v49 = vsel %vm2813_vm1, %v3820_v62, %v3395_v36  ;;  %v3809_v52 = vsel %vm2816_vm2, %v3808_v42, %v3807_v53  ;;  %v3816_v55 = vrot.slane %v3393_v44, 2  ;;  %v3417_v62 = vld [vmem:[#allocation3 + $0xf9] sm:$0x1] }
 0x651   :  { %10321 = vmatprep.subr.bf16.mxu0 %v10988_v25  ;;  %v3789_v12 = vsel %vm2828_vm6, %v3788_v60, %v3787_v7  ;;  %v3811_v8 = vsel %vm2819_vm3, %v3810_v43, %v3809_v52  ;;  %v3818_v57 = vrot.slane %v3394_v50, 1  ;;  %v3824_v11 = vrot.slane %v3398_v38, 5  ;;  %v3406_v7 = vld [vmem:[#allocation3 + $0xcd] sm:$0x1]  ;;  %v3418_v38 = vld [vmem:[#allocation3 + $0xfd] sm:$0x1] }
 0x652   :  { %v3791_v17 = vsel %vm2831_vm7, %v3790_v4, %v3789_v12  ;;  %v3813_v58 = vsel %vm2822_vm4, %v3812_v46, %v3811_v8  ;;  %v3823_v59 = vsel %vm2816_vm2, %v3822_v56, %v3821_v49  ;;  %v3828_v60 = vrot.slane %v3400_v41, 3  ;;  %v3407_v12 = vld [vmem:[#allocation3 + $0xd1] sm:$0x1] }
 0x653   :  { %v10322_v22 = vpack.c.bf16 %v3805_v20, %v3791_v17  ;;  %v3830_v61 = vrot.slane %v3401_v45, 2  ;;  %v3815_v63 = vsel %vm2825_vm5, %v3814_v47, %v3813_v58  ;;  %v3825_v0 = vsel %vm2819_vm3, %v3824_v11, %v3823_v59  ;;  %v3410_v17 = vld [vmem:[#allocation3 + $0xdd] sm:$0x1]  ;;  %v3960_v58 = vld [vmem:[#allocation2 + $0x26] sm:$0x1] }
 0x654   :  { %v3832_v1 = vrot.slane %v3402_v51, 1  ;;  %v3834_v3 = vrot.slane %v3404_v15, 7  ;;  %v3817_v4 = vsel %vm2828_vm6, %v3816_v55, %v3815_v63  ;;  %v3840_v30 = vrot.slane %v3407_v12, 4  ;;  %v3953_v59 = vld [vmem:[#allocation2 + $0xa] sm:$0x1] }
 0x655   :  { %10323 = vmatpush3.bf16.msra.mxu0 %v10322_v22  ;;  %v3819_v9 = vsel %vm2831_vm7, %v3818_v57, %v3817_v4  ;;  %v3842_v31 = vrot.slane %v3408_v13, 3  ;;  %v3844_v34 = vrot.slane %v3409_v14, 2  ;;  %v3848_v36 = vrot.slane %v3412_v18, 7  ;;  %v3951_v63 = vld [vmem:[#allocation2 + $0x2] sm:$0x1] }
 0x656   :  { %10324 = vmatprep.subr.bf16.mxu0 %v10988_v25  ;;  %v3835_v20 = vsel %vm2813_vm1, %v3834_v3, %v3403_v2  ;;  %v3850_v37 = vrot.slane %v3413_v19, 6  ;;  %v3846_v42 = vrot.slane %v3410_v17, 1  ;;  %v3856_v44 = vrot.slane %v3416_v21, 3  ;;  %v3962_v2 = vld [vmem:[#allocation2 + $0x2e] sm:$0x1] }
 0x657   :  { %v3849_v43 = vsel %vm2813_vm1, %v3848_v36, %v3411_v29  ;;  %v3858_v47 = vrot.slane %v3417_v62, 2  ;;  %v3860_v51 = vrot.slane %v3418_v38, 1  ;;  %v4157_v15 = vrot.slane %v3960_v58, 7  ;;  %v3963_v12 = vld [vmem:[#allocation2 + $0x32] sm:$0x1] }
 0x658   :  { %v3851_v46 = vsel %vm2816_vm2, %v3850_v37, %v3849_v43  ;;  %v4145_v3 = vrot.slane %v3953_v59, 6  ;;  %v4161_v14 = vrot.slane %v3962_v2, 5  ;;  %v3964_v17 = vld [vmem:[#allocation2 + $0x36] sm:$0x1]  ;;  %v3975_v29 = vld [vmem:[#allocation2 + $0x62] sm:$0x1] }
 0x659   :  { %v3957_v21 = vld [vmem:[#allocation2 + $0x1a] sm:$0x1]  ;;  %v3970_v62 = vld [vmem:[#allocation2 + $0x4e] sm:$0x1]  ;;  %v3983_v2 = vld [vmem:[#allocation2 + $0x82] sm:$0x1] }
 0x65a   :  { %v3965_v37 = vld [vmem:[#allocation2 + $0x3a] sm:$0x1] }
 0x6da   :  { %v3677_v39 = vpop.xlane.xlu1 %3676 }
 0x6db   :  { %v3678_v35 = vsub.f32 %v11539_v54, %v3677_v39  ;;  %v3399_v54 = vld [vmem:[#allocation3 + $0xb1] sm:$0x1]  ;;  %v3414_v39 = vld [vmem:[#allocation3 + $0xed] sm:$0x1] }
 0x6dc   :  { %v3826_v48 = vrot.slane %v3399_v54, 4  ;;  %v3852_v53 = vrot.slane %v3414_v39, 5 }
 0x6dd   :  { %v3679_v23 = vmul.f32 1.442695, %v3678_v35  ;;  %v3415_v35 = vld [vmem:[#allocation3 + $0xf1] sm:$0x1] }
 0x6de   :  { %v3827_v5 = vsel %vm2822_vm4, %v3826_v48, %v3825_v0  ;;  %v3854_v40 = vrot.slane %v3415_v35, 4  ;;  %v3853_v50 = vsel %vm2819_vm3, %v3852_v53, %v3851_v46  ;;  %v3952_v48 = vld [vmem:[#allocation2 + $0x6] sm:$0x1]  ;;  %v3959_v0 = vld [vmem:[#allocation2 + $0x22] sm:$0x1] }
 0x6df   :  { %10719 = vpow2.f32 %v3679_v23  ;;  %v3829_v10 = vsel %vm2825_vm5, %v3828_v60, %v3827_v5  ;;  %v3836_v23 = vrot.slane %v3405_v6, 6  ;;  %v3961_v60 = vld [vmem:[#allocation2 + $0x2a] sm:$0x1]  ;;  %v4158_v6 = vsel %vm2813_vm1, %v4157_v15, %v3959_v0  ;;  %v3984_v46 = vld [vmem:[#allocation2 + $0x86] sm:$0x1] }
 0x6e0   :  { %v3831_v16 = vsel %vm2828_vm6, %v3830_v61, %v3829_v10  ;;  %v3855_v52 = vsel %vm2822_vm4, %v3854_v40, %v3853_v50  ;;  %v4143_v61 = vrot.slane %v3952_v48, 7  ;;  %v4159_v4 = vrot.slane %v3961_v60, 6  ;;  %v3955_v10 = vld [vmem:[#allocation2 + $0x12] sm:$0x1]  ;;  %v3985_v60 = vld [vmem:[#allocation2 + $0x8a] sm:$0x1] }
 0x6e1   :  { %v3833_v22 = vsel %vm2831_vm7, %v3832_v1, %v3831_v16  ;;  %v3837_v33 = vsel %vm2816_vm2, %v3836_v23, %v3835_v20  ;;  %v3857_v56 = vsel %vm2825_vm5, %v3856_v44, %v3855_v52  ;;  %v3954_v1 = vld [vmem:[#allocation2 + $0xe] sm:$0x1]  ;;  %v3956_v16 = vld [vmem:[#allocation2 + $0x16] sm:$0x1]  ;;  %v3969_v20 = vld [vmem:[#allocation2 + $0x4a] sm:$0x1] }
 0x6e2   :  { %v10325_v28 = vpack.c.bf16 %v3833_v22, %v3819_v9  ;;  %v3859_v8 = vsel %vm2828_vm6, %v3858_v47, %v3857_v56  ;;  %v4144_v5 = vsel %vm2813_vm1, %v4143_v61, %v3951_v63  ;;  %v3976_v9 = vld [vmem:[#allocation2 + $0x66] sm:$0x1]  ;;  %v4147_v13 = vrot.slane %v3954_v1, 5  ;;  %v3977_v22 = vld [vmem:[#allocation2 + $0x6a] sm:$0x1] }
 0x6e3   :  { %v3861_v57 = vsel %vm2831_vm7, %v3860_v51, %v3859_v8  ;;  %v4146_v18 = vsel %vm2816_vm2, %v4145_v3, %v4144_v5  ;;  %v4160_v19 = vsel %vm2816_vm2, %v4159_v4, %v4158_v6  ;;  %v4185_v35 = vrot.slane %v3976_v9, 7  ;;  %v3992_v47 = vld [vmem:[#allocation2 + $0xa6] sm:$0x1]  ;;  %v3971_v50 = vld [vmem:[#allocation2 + $0x52] sm:$0x1] }
 0x6e4   :  { %10326 = vmatpush3.bf16.msra.mxu0 %v10325_v28  ;;  %v4149_v23 = vrot.slane %v3955_v10, 4  ;;  %v3967_v28 = vld [vmem:[#allocation2 + $0x42] sm:$0x1]  ;;  %v4187_v36 = vrot.slane %v3977_v22, 6  ;;  %v4151_v38 = vrot.slane %v3956_v16, 3  ;;  %v4153_v44 = vrot.slane %v3957_v21, 2 }
 0x6e5   :  { %10327 = vmatprep.subr.bf16.mxu0 %v10988_v25  ;;  %v4186_v40 = vsel %vm2813_vm1, %v4185_v35, %v3975_v29  ;;  %v3979_v51 = vld [vmem:[#allocation2 + $0x72] sm:$0x1]  ;;  %v4175_v52 = vrot.slane %v3970_v62, 5  ;;  %v4167_v56 = vrot.slane %v3965_v37, 2  ;;  %v3972_v8 = vld [vmem:[#allocation2 + $0x56] sm:$0x1] }
 0x6e6   :  { %v4188_v48 = vsel %vm2816_vm2, %v4187_v36, %v4186_v40  ;;  %v3993_v61 = vld [vmem:[#allocation2 + $0xaa] sm:$0x1]  ;;  %v4199_v15 = vrot.slane %v3984_v46, 7  ;;  %v4213_v63 = vrot.slane %v3992_v47, 7  ;;  %v4177_v0 = vrot.slane %v3971_v50, 4 }
 0x6e7   :  { %v4191_v1 = vrot.slane %v3979_v51, 4  ;;  %v3991_v3 = vld [vmem:[#allocation2 + $0xa2] sm:$0x1]  ;;  %v3973_v6 = vld [vmem:[#allocation2 + $0x5a] sm:$0x1]  ;;  %v4201_v16 = vrot.slane %v3985_v60, 6 }
 0x6e8   :  { %v4214_v35 = vsel %vm2813_vm1, %v4213_v63, %v3991_v3  ;;  %v4000_v21 = vld [vmem:[#allocation2 + $0xc6] sm:$0x1]  ;;  %v3996_v40 = vld [vmem:[#allocation2 + $0xb6] sm:$0x1]  ;;  %v4009_v46 = vld [vmem:[#allocation2 + $0xea] sm:$0x1] }
 0x6e9   :  { %v11574_v24 = vpop.eup %10719  ;;  %v4227_v47 = vrot.slane %v4000_v21, 7 }
 0x6ea   :  { %v3681_v26 = vsel %vm3013_vm9, %v11574_v24, 0.0 }
 0x6eb   :  { %3682 = vadd.xlane.f32.xlu1 %v3681_v26  ;;  %v3838_v26 = vrot.slane %v3406_v7, 5  ;;  %v3968_v7 = vld [vmem:[#allocation2 + $0x46] sm:$0x1] }
 0x6ec   :  { %v4171_v39 = vrot.slane %v3968_v7, 7 }
 0x6ed   :  { %v3839_v54 = vsel %vm2819_vm3, %v3838_v26, %v3837_v33  ;;  %v4163_v26 = vrot.slane %v3963_v12, 4  ;;  %v3978_v33 = vld [vmem:[#allocation2 + $0x6e] sm:$0x1] }
 0x6ee   :  { %v3841_v41 = vsel %vm2822_vm4, %v3840_v30, %v3839_v54  ;;  %v4148_v30 = vsel %vm2819_vm3, %v4147_v13, %v4146_v18  ;;  %v4165_v54 = vrot.slane %v3964_v17, 3  ;;  %v4172_v53 = vsel %vm2813_vm1, %v4171_v39, %v3967_v28  ;;  %v3986_v13 = vld [vmem:[#allocation2 + $0x8e] sm:$0x1]  ;;  %v3974_v18 = vld [vmem:[#allocation2 + $0x5e] sm:$0x1] }
 0x6ef   :  { %v3843_v45 = vsel %vm2825_vm5, %v3842_v31, %v3841_v41  ;;  %v4162_v31 = vsel %vm2819_vm3, %v4161_v14, %v4160_v19  ;;  %v3958_v41 = vld [vmem:[#allocation2 + $0x1e] sm:$0x1]  ;;  %v4150_v43 = vsel %vm2822_vm4, %v4149_v23, %v4148_v30  ;;  %v3994_v14 = vld [vmem:[#allocation2 + $0xae] sm:$0x1]  ;;  %v4215_v17 = vrot.slane %v3993_v61, 6 }
 0x6f0   :  { %v3845_v49 = vsel %vm2828_vm6, %v3844_v34, %v3843_v45  ;;  %v4173_v34 = vrot.slane %v3969_v20, 6  ;;  %v4164_v45 = vsel %vm2822_vm4, %v4163_v26, %v4162_v31  ;;  %v4152_v58 = vsel %vm2825_vm5, %v4151_v38, %v4150_v43  ;;  %v3981_v19 = vld [vmem:[#allocation2 + $0x7a] sm:$0x1]  ;;  %v3982_v23 = vld [vmem:[#allocation2 + $0x7e] sm:$0x1] }
 0x6f1   :  { %v3847_v55 = vsel %vm2831_vm7, %v3846_v42, %v3845_v49  ;;  %v3966_v42 = vld [vmem:[#allocation2 + $0x3e] sm:$0x1]  ;;  %v4166_v59 = vsel %vm2825_vm5, %v4165_v54, %v4164_v45  ;;  %v4155_v4 = vrot.slane %v3958_v41, 1  ;;  %v4154_v10 = vsel %vm2828_vm6, %v4153_v44, %v4152_v58  ;;  %v4008_v30 = vld [vmem:[#allocation2 + $0xe6] sm:$0x1] }
 0x6f2   :  { %v10328_v11 = vpack.c.bf16 %v3861_v57, %v3847_v55  ;;  %v4189_v55 = vrot.slane %v3978_v33, 5  ;;  %v3980_v57 = vld [vmem:[#allocation2 + $0x76] sm:$0x1]  ;;  %v4169_v5 = vrot.slane %v3966_v42, 1  ;;  %v4168_v12 = vsel %vm2828_vm6, %v4167_v56, %v4166_v59  ;;  %v3987_v33 = vld [vmem:[#allocation2 + $0x92] sm:$0x1] }
 0x6f3   :  { %v4179_v20 = vrot.slane %v3972_v8, 3  ;;  %v4193_v22 = vrot.slane %v3980_v57, 3  ;;  %v4200_v39 = vsel %vm2813_vm1, %v4199_v15, %v3983_v2  ;;  %v4181_v28 = vrot.slane %v3973_v6, 2  ;;  %v4001_v45 = vld [vmem:[#allocation2 + $0xca] sm:$0x1] }
 0x6f4   :  { %10329 = vmatpush3.bf16.msra.mxu0 %v10328_v11  ;;  %v4174_v11 = vsel %vm2816_vm2, %v4173_v34, %v4172_v53  ;;  %v4190_v9 = vsel %vm2819_vm3, %v4189_v55, %v4188_v48  ;;  %v4156_v31 = vsel %vm2831_vm7, %v4155_v4, %v4154_v10  ;;  %v4170_v62 = vsel %vm2831_vm7, %v4169_v5, %v4168_v12  ;;  %v3995_v34 = vld [vmem:[#allocation2 + $0xb2] sm:$0x1]  ;;  %v3988_v53 = vld [vmem:[#allocation2 + $0x96] sm:$0x1]  ;;  %v3999_v56 = vld [vmem:[#allocation2 + $0xc2] sm:$0x1] }
 0x6f5   :  { %10330 = vmatprep.subr.bf16.mxu0 %v10988_v25  ;;  %v4176_v7 = vsel %vm2819_vm3, %v4175_v52, %v4174_v11  ;;  %v4192_v29 = vsel %vm2822_vm4, %v4191_v1, %v4190_v9  ;;  %v4203_v36 = vrot.slane %v3986_v13, 5  ;;  %v4217_v37 = vrot.slane %v3994_v14, 5  ;;  %v4007_v8 = vld [vmem:[#allocation2 + $0xe2] sm:$0x1]  ;;  %v4002_v61 = vld [vmem:[#allocation2 + $0xce] sm:$0x1] }
 0x6f6   :  { %v4178_v26 = vsel %vm2822_vm4, %v4177_v0, %v4176_v7  ;;  %v4183_v38 = vrot.slane %v3974_v18, 1  ;;  %v4195_v54 = vrot.slane %v3981_v19, 2  ;;  %v4202_v41 = vsel %vm2816_vm2, %v4201_v16, %v4200_v39  ;;  %v4010_v15 = vld [vmem:[#allocation2 + $0xee] sm:$0x1]  ;;  %v3989_v1 = vld [vmem:[#allocation2 + $0x9a] sm:$0x1] }
 0x6f7   :  { %v4216_v42 = vsel %vm2816_vm2, %v4215_v17, %v4214_v35  ;;  %v4180_v43 = vsel %vm2825_vm5, %v4179_v20, %v4178_v26  ;;  %v4194_v44 = vsel %vm2825_vm5, %v4193_v22, %v4192_v29  ;;  %v10331_v51 = vpack.c.bf16 %v4170_v62, %v4156_v31  ;;  %v3997_v2 = vld [vmem:[#allocation2 + $0xba] sm:$0x1]  ;;  %v4003_v12 = vld [vmem:[#allocation2 + $0xd2] sm:$0x1]  ;;  %v3990_v17 = vld [vmem:[#allocation2 + $0x9e] sm:$0x1] }
 0x6f8   :  { %v4205_v52 = vrot.slane %v3987_v33, 4  ;;  %v4219_v55 = vrot.slane %v3995_v34, 4  ;;  %v4197_v11 = vrot.slane %v3982_v23, 1  ;;  %v4204_v48 = vsel %vm2819_vm3, %v4203_v36, %v4202_v41  ;;  %v4011_v13 = vld [vmem:[#allocation2 + $0xf2] sm:$0x1] }
 0x6f9   :  { %v4218_v58 = vsel %vm2819_vm3, %v4217_v37, %v4216_v42  ;;  %v4182_v59 = vsel %vm2828_vm6, %v4181_v28, %v4180_v43  ;;  %v4196_v60 = vsel %vm2828_vm6, %v4195_v54, %v4194_v44  ;;  %v4229_v63 = vrot.slane %v4001_v45, 6  ;;  %v3998_v18 = vld [vmem:[#allocation2 + $0xbe] sm:$0x1]  ;;  %v4004_v28 = vld [vmem:[#allocation2 + $0xd6] sm:$0x1] }
 0x6fa   :  { %v4243_v0 = vrot.slane %v4009_v46, 6  ;;  %v4207_v3 = vrot.slane %v3988_v53, 3  ;;  %v4221_v4 = vrot.slane %v3996_v40, 3  ;;  %v4206_v6 = vsel %vm2822_vm4, %v4205_v52, %v4204_v48  ;;  %v4012_v29 = vld [vmem:[#allocation2 + $0xf6] sm:$0x1] }
 0x6fb   :  { %v4220_v7 = vsel %vm2822_vm4, %v4219_v55, %v4218_v58  ;;  %v4184_v9 = vsel %vm2831_vm7, %v4183_v38, %v4182_v59  ;;  %v4198_v10 = vsel %vm2831_vm7, %v4197_v11, %v4196_v60  ;;  %v4231_v14 = vrot.slane %v4002_v61, 5  ;;  %v4005_v38 = vld [vmem:[#allocation2 + $0xda] sm:$0x1]  ;;  %v4006_v45 = vld [vmem:[#allocation2 + $0xde] sm:$0x1] }
 0x6fc   :  { %v4245_v16 = vrot.slane %v4010_v15, 5  ;;  %v4209_v19 = vrot.slane %v3989_v1, 2  ;;  %v4223_v20 = vrot.slane %v3997_v2, 2  ;;  %v4208_v35 = vsel %vm2825_vm5, %v4207_v3, %v4206_v6  ;;  %v4013_v54 = vld [vmem:[#allocation2 + $0xfa] sm:$0x1] }
 0x6fd   :  { %v4222_v23 = vsel %vm2825_vm5, %v4221_v4, %v4220_v7  ;;  %v10334_v26 = vpack.c.bf16 %v4198_v10, %v4184_v9  ;;  %v4233_v21 = vrot.slane %v4003_v12, 4  ;;  %v4211_v31 = vrot.slane %v3990_v17, 1  ;;  %v4014_v46 = vld [vmem:[#allocation2 + $0xfe] sm:$0x1]  ;;  %v3950_v59 = vld [vmem:[#allocation4 + $0x8] sm:$0x3] }
 0x6fe   :  { %v4225_v62 = vrot.slane %v3998_v18, 1  ;;  %v4210_v36 = vsel %vm2828_vm6, %v4209_v19, %v4208_v35  ;;  %v4224_v37 = vsel %vm2828_vm6, %v4223_v20, %v4222_v23  ;;  %v4235_v53 = vrot.slane %v4004_v28, 3  ;;  %v4016_v4 = vld [vmem:[#allocation3 + $0x6] sm:$0x1]  ;;  %v4015_v6 = vld [vmem:[#allocation3 + $0x2] sm:$0x1] }
 0x6ff   :  { %v4249_v40 = vrot.slane %v4012_v29, 3  ;;  %v4212_v43 = vsel %vm2831_vm7, %v4211_v31, %v4210_v36  ;;  %v4239_v55 = vrot.slane %v4006_v45, 1  ;;  %v4019_v7 = vld [vmem:[#allocation3 + $0x12] sm:$0x1]  ;;  %v4020_v9 = vld [vmem:[#allocation3 + $0x16] sm:$0x1] }
 0x700   :  { %v4226_v44 = vsel %vm2831_vm7, %v4225_v62, %v4224_v37  ;;  %v4021_v10 = vld [vmem:[#allocation3 + $0x1a] sm:$0x1]  ;;  %v4022_v12 = vld [vmem:[#allocation3 + $0x1e] sm:$0x1]  ;;  %v4026_v17 = vld [vmem:[#allocation3 + $0x2e] sm:$0x1] }
 0x701   :  { %v10337_v52 = vpack.c.bf16 %v4226_v44, %v4212_v43  ;;  %v4027_v18 = vld [vmem:[#allocation3 + $0x32] sm:$0x1]  ;;  %v4028_v19 = vld [vmem:[#allocation3 + $0x36] sm:$0x1]  ;;  %v4029_v20 = vld [vmem:[#allocation3 + $0x3a] sm:$0x1] }
 0x702   :  { %v4030_v23 = vld [vmem:[#allocation3 + $0x3e] sm:$0x1]  ;;  %v4418_v28 = vrot.slane %v4020_v9, 3  ;;  %v4420_v29 = vrot.slane %v4021_v10, 2  ;;  %v4428_v62 = vrot.slane %v4026_v17, 5  ;;  %v4422_v37 = vrot.slane %v4022_v12, 1 }
 0x703   :  { %v4045_v9 = vld [vmem:[#allocation3 + $0x7a] sm:$0x1] }
 0x778   :  { %v3683_v49 = vpop.xlane.xlu1 %3682 }
 0x779   :  { %10721 = vrcp.f32 %v3683_v49  ;;  %v4241_v49 = vrot.slane %v4008_v30, 7  ;;  %v4247_v30 = vrot.slane %v4011_v13, 4  ;;  %v4023_v13 = vld [vmem:[#allocation3 + $0x22] sm:$0x1] }
 0x77b   :  { %v4242_v5 = vsel %vm2813_vm1, %v4241_v49, %v4007_v8  ;;  %v4251_v49 = vrot.slane %v4013_v54, 2  ;;  %v4432_v54 = vrot.slane %v4028_v19, 3 }
 0x77c   :  { %v4244_v39 = vsel %vm2816_vm2, %v4243_v0, %v4242_v5  ;;  %v4018_v5 = vld [vmem:[#allocation3 + $0xe] sm:$0x1] }
 0x77d   :  { %v4246_v34 = vsel %vm2819_vm3, %v4245_v16, %v4244_v39  ;;  %v4025_v16 = vld [vmem:[#allocation3 + $0x2a] sm:$0x1]  ;;  %v4414_v35 = vrot.slane %v4018_v5, 5 }
 0x77e   :  { %v4248_v42 = vsel %vm2822_vm4, %v4247_v30, %v4246_v34  ;;  %v4426_v31 = vrot.slane %v4025_v16, 6  ;;  %v4032_v34 = vld [vmem:[#allocation3 + $0x46] sm:$0x1] }
 0x77f   :  { %v4438_v43 = vrot.slane %v4032_v34, 7 }
 0x783   :  { %v10722_v50 = vpop.eup %10721 }
 0x784   :  { %v3685_v57 = vmul.f32 %v10722_v50, %v11574_v24  ;;  %v4228_v24 = vsel %vm2813_vm1, %v4227_v47, %v3999_v56  ;;  %v4237_v47 = vrot.slane %v4005_v38, 2  ;;  %v4253_v56 = vrot.slane %v4014_v46, 1 }
 0x785   :  { %v4230_v22 = vsel %vm2816_vm2, %v4229_v63, %v4228_v24  ;;  %v4017_v24 = vld [vmem:[#allocation3 + $0xa] sm:$0x1]  ;;  %v4436_v46 = vrot.slane %v4030_v23, 1 }
 0x786   :  { %9908 = vmatmul.mubr.msk.f32.vlgmr.msra.gmra.mrb[16].mxu0 %vm3209_vm10, %v3685_v57  ;;  %v4232_v33 = vsel %vm2819_vm3, %v4231_v14, %v4230_v22  ;;  %v4024_v14 = vld [vmem:[#allocation3 + $0x26] sm:$0x1]  ;;  %v4410_v22 = vrot.slane %v4016_v4, 7  ;;  %v4412_v39 = vrot.slane %v4017_v24, 6  ;;  %v4039_v4 = vld [vmem:[#allocation3 + $0x62] sm:$0x1] }
 0x787   :  { %10332 = vmatpush3.bf16.xpose.msra.mxu0 %v10331_v51  ;;  %9926 = vmatprep.mubr.msk.f32.mxu0 %vm10989_vm0, %v10990_v27  ;;  %v4234_v41 = vsel %vm2822_vm4, %v4233_v21, %v4232_v33  ;;  %v4250_v51 = vsel %vm2825_vm5, %v4249_v40, %v4248_v42  ;;  %v4424_v21 = vrot.slane %v4024_v14, 7  ;;  %v4430_v33 = vrot.slane %v4027_v18, 4  ;;  %v4031_v42 = vld [vmem:[#allocation3 + $0x42] sm:$0x1]  ;;  %v4044_v24 = vld [vmem:[#allocation3 + $0x76] sm:$0x1] }
 0x788   :  { %10333 = vmatprep.subr.bf16.mxu0 %v10988_v25  ;;  %v4236_v50 = vsel %vm2825_vm5, %v4235_v53, %v4234_v41  ;;  %v4252_v57 = vsel %vm2828_vm6, %v4251_v49, %v4250_v51  ;;  %v4411_v30 = vsel %vm2813_vm1, %v4410_v22, %v4015_v6  ;;  %v4434_v41 = vrot.slane %v4029_v20, 2  ;;  %v4034_v49 = vld [vmem:[#allocation3 + $0x4e] sm:$0x1]  ;;  %v4046_v14 = vld [vmem:[#allocation3 + $0x7e] sm:$0x1] }
 0x789   :  { %v4238_v8 = vsel %vm2828_vm6, %v4237_v47, %v4236_v50  ;;  %v4254_v48 = vsel %vm2831_vm7, %v4253_v56, %v4252_v57  ;;  %v4413_v36 = vsel %vm2816_vm2, %v4412_v39, %v4411_v30  ;;  %v4425_v38 = vsel %vm2813_vm1, %v4424_v21, %v4023_v13  ;;  %v4033_v47 = vld [vmem:[#allocation3 + $0x4a] sm:$0x1]  ;;  %v4037_v56 = vld [vmem:[#allocation3 + $0x5a] sm:$0x1] }
 0x78a   :  { %v4240_v11 = vsel %vm2831_vm7, %v4239_v55, %v4238_v8  ;;  %v4415_v53 = vsel %vm2819_vm3, %v4414_v35, %v4413_v36  ;;  %v4427_v40 = vsel %vm2816_vm2, %v4426_v31, %v4425_v38  ;;  %v4036_v55 = vld [vmem:[#allocation3 + $0x56] sm:$0x1]  ;;  %v4448_v12 = vrot.slane %v4037_v56, 2 }
 0x78b   :  { %v10340_v58 = vpack.c.bf16 %v4254_v48, %v4240_v11  ;;  %v4429_v45 = vsel %vm2819_vm3, %v4428_v62, %v4427_v40  ;;  %v4038_v11 = vld [vmem:[#allocation3 + $0x5e] sm:$0x1]  ;;  %v4040_v48 = vld [vmem:[#allocation3 + $0x66] sm:$0x1]  ;;  %v4446_v6 = vrot.slane %v4036_v55, 3  ;;  %v4460_v35 = vrot.slane %v4044_v24, 3 }
 0x78c   :  { %v4431_v51 = vsel %vm2822_vm4, %v4430_v33, %v4429_v45  ;;  %v4452_v13 = vrot.slane %v4040_v48, 7  ;;  %v4450_v22 = vrot.slane %v4038_v11, 1  ;;  %v4464_v30 = vrot.slane %v4046_v14, 1  ;;  %v4057_v45 = vld [vmem:[#allocation3 + $0xaa] sm:$0x1] }
 0x78d   :  { %v4433_v57 = vsel %vm2825_vm5, %v4432_v54, %v4431_v51  ;;  %v4055_v51 = vld [vmem:[#allocation3 + $0xa2] sm:$0x1]  ;;  %v4058_v55 = vld [vmem:[#allocation3 + $0xae] sm:$0x1]  ;;  %v4064_v14 = vld [vmem:[#allocation3 + $0xc6] sm:$0x1] }
 0x78e   :  { %v4453_v39 = vsel %vm2813_vm1, %v4452_v13, %v4039_v4  ;;  %v4482_v4 = vrot.slane %v4057_v45, 6 }
 0x78f   :  { %10335 = vmatpush3.bf16.xpose.msra.mxu0 %v10334_v26  ;;  %v4416_v26 = vrot.slane %v4019_v7, 4 }
 0x790   :  { %10336 = vmatprep.subr.bf16.mxu0 %v10988_v25 }
 0x791   :  { %v4417_v44 = vsel %vm2822_vm4, %v4416_v26, %v4415_v53 }
 0x792   :  { %v4419_v50 = vsel %vm2825_vm5, %v4418_v28, %v4417_v44  ;;  %v4462_v28 = vrot.slane %v4045_v9, 2  ;;  %v4049_v44 = vld [vmem:[#allocation3 + $0x8a] sm:$0x1] }
 0x793   :  { %v4421_v8 = vsel %vm2828_vm6, %v4420_v29, %v4419_v50  ;;  %v4050_v50 = vld [vmem:[#allocation3 + $0x8e] sm:$0x1]  ;;  %v4468_v11 = vrot.slane %v4049_v44, 6  ;;  %v4076_v44 = vld [vmem:[#allocation3 + $0xf6] sm:$0x1] }
 0x794   :  { %v4470_v48 = vrot.slane %v4050_v50, 5 }
 0x797   :  { %10338 = vmatpush3.bf16.xpose.msra.mxu0 %v10337_v52  ;;  %v4035_v52 = vld [vmem:[#allocation3 + $0x52] sm:$0x1] }
 0x798   :  { %10339 = vmatprep.subr.bf16.mxu0 %v10988_v25  ;;  %v4444_v5 = vrot.slane %v4035_v52, 4  ;;  %v4051_v52 = vld [vmem:[#allocation3 + $0x92] sm:$0x1] }
 0x79f   :  { %10341 = vmatpush3.bf16.xpose.msra.mxu0 %v10340_v58  ;;  %v4041_v58 = vld [vmem:[#allocation3 + $0x6a] sm:$0x1] }
 0x7a0   :  { %10366 = vmatprep.subr.bf16.mxu0 %v10988_v25  ;;  %v4454_v17 = vrot.slane %v4041_v58, 6  ;;  %v4053_v58 = vld [vmem:[#allocation3 + $0x9a] sm:$0x1] }
 0x7a2   :  { %v4455_v26 = vsel %vm2816_vm2, %v4454_v17, %v4453_v39 }
 0x7a6   :  { %9927 = vmatmul.mubr.f32.vlgmr.msra.gmra.mrb[18].mxu0 %v3950_v59  ;;  %v4439_v59 = vsel %vm2813_vm1, %v4438_v43, %v4031_v42  ;;  %v4048_v42 = vld [vmem:[#allocation3 + $0x86] sm:$0x1] }
 0x7a7   :  { %9983 = vmatprep.mubr.msk.f32.mxu0 %vm10989_vm0, %v10990_v27  ;;  %v4056_v43 = vld [vmem:[#allocation3 + $0xa6] sm:$0x1] }
 0x859   :  { %v3939_v60 = vpop.f32.mrb[16].mxu0 }
 0x85a   :  { %3943 = vst [vmem:[#allocation7 + $0x1] sm:$0x1] %v3939_v60  ;;  %v9192_v61 = vrot.slane %v3939_v60, 9  ;;  %v9909_v15 = vpop.f32.mrb[17].mxu0  ;;  %v4423_v60 = vsel %vm2831_vm7, %v4422_v37, %v4421_v8  ;;  %v4052_v8 = vld [vmem:[#allocation3 + $0x96] sm:$0x1] }
 0x85b   :  { %v4042_v15 = vld [vmem:[#allocation3 + $0x6e] sm:$0x1] }
 0x85c   :  { %3948 = vst [vmem:[#allocation7 + $0x5] sm:$0x1] %v9192_v61  ;;  %v4435_v61 = vsel %vm2828_vm6, %v4434_v41, %v4433_v57  ;;  %v4456_v18 = vrot.slane %v4042_v15, 5  ;;  %v4060_v57 = vld [vmem:[#allocation3 + $0xb6] sm:$0x1] }
 0x85e   :  { %v4457_v21 = vsel %vm2819_vm3, %v4456_v18, %v4455_v26 }
 0x879   :  { %v4329_v63 = vpop.f32.mrb[18].mxu0 }
 0x87a   :  { %v4333_v0 = vmul.f32 0.088388346, %v4329_v63  ;;  %v9928_v1 = vpop.f32.mrb[19].mxu0  ;;  %v4043_v63 = vld [vmem:[#allocation3 + $0x72] sm:$0x1] }
 0x87b   :  { %v4442_v1 = vrot.slane %v4034_v49, 5  ;;  %v4458_v19 = vrot.slane %v4043_v63, 4  ;;  %v4047_v49 = vld [vmem:[#allocation3 + $0x82] sm:$0x1]  ;;  %v4054_v63 = vld [vmem:[#allocation3 + $0x9e] sm:$0x1] }
 0x87c   :  { %v11676_v2 = vsel %vm11394_vm8, %v4333_v0, -1e+30  ;;  %v4440_v0 = vrot.slane %v4033_v47, 6  ;;  %v4480_v47 = vrot.slane %v4056_v43, 7  ;;  %v4071_v43 = vld [vmem:[#allocation3 + $0xe2] sm:$0x1] }
 0x87d   :  { %v4335_v3 = vsel %vm3013_vm9, %v11676_v2, -inf  ;;  %v4459_v31 = vsel %vm2822_vm4, %v4458_v19, %v4457_v21  ;;  %v4063_v19 = vld [vmem:[#allocation3 + $0xc2] sm:$0x1]  ;;  %v4068_v21 = vld [vmem:[#allocation3 + $0xd6] sm:$0x1] }
 0x87e   :  { %4336 = vmax.xlane.f32.xlu0 %v4335_v3  ;;  %v4437_v3 = vsel %vm2831_vm7, %v4436_v46, %v4435_v61  ;;  %v4441_v10 = vsel %vm2816_vm2, %v4440_v0, %v4439_v59  ;;  %v4461_v33 = vsel %vm2825_vm5, %v4460_v35, %v4459_v31  ;;  %v4466_v46 = vrot.slane %v4048_v42, 7  ;;  %v4061_v59 = vld [vmem:[#allocation3 + $0xba] sm:$0x1]  ;;  %v4062_v0 = vld [vmem:[#allocation3 + $0xbe] sm:$0x1] }
 0x87f   :  { %v10343_v7 = vpack.c.bf16 %v4437_v3, %v4423_v60  ;;  %v4443_v16 = vsel %vm2819_vm3, %v4442_v1, %v4441_v10  ;;  %v4463_v34 = vsel %vm2828_vm6, %v4462_v28, %v4461_v33  ;;  %v4472_v60 = vrot.slane %v4051_v52, 4  ;;  %v4065_v35 = vld [vmem:[#allocation3 + $0xca] sm:$0x1]  ;;  %v4072_v33 = vld [vmem:[#allocation3 + $0xe6] sm:$0x1] }
 0x880   :  { %v4445_v20 = vsel %vm2822_vm4, %v4444_v5, %v4443_v16  ;;  %v4465_v36 = vsel %vm2831_vm7, %v4464_v30, %v4463_v34  ;;  %v4467_v56 = vsel %vm2813_vm1, %v4466_v46, %v4047_v49  ;;  %v4474_v61 = vrot.slane %v4052_v8, 3  ;;  %v4069_v30 = vld [vmem:[#allocation3 + $0xda] sm:$0x1]  ;;  %v4073_v34 = vld [vmem:[#allocation3 + $0xea] sm:$0x1] }
 0x881   :  { %10344 = vmatpush3.bf16.msra.mxu1 %v10343_v7  ;;  %v4447_v23 = vsel %vm2825_vm5, %v4446_v6, %v4445_v20  ;;  %v4481_v15 = vsel %vm2813_vm1, %v4480_v47, %v4055_v51  ;;  %v4469_v1 = vsel %vm2816_vm2, %v4468_v11, %v4467_v56  ;;  %v4476_v3 = vrot.slane %v4053_v58, 2  ;;  %v4077_v47 = vld [vmem:[#allocation3 + $0xfa] sm:$0x1] }
 0x882   :  { %10345 = vmatprep.subr.bf16.mxu1 %v10988_v25  ;;  %v4449_v29 = vsel %vm2828_vm6, %v4448_v12, %v4447_v23  ;;  %v4471_v24 = vsel %vm2819_vm3, %v4470_v48, %v4469_v1  ;;  %v4478_v5 = vrot.slane %v4054_v63, 1  ;;  %v4484_v6 = vrot.slane %v4058_v55, 5  ;;  %v4066_v23 = vld [vmem:[#allocation3 + $0xce] sm:$0x1]  ;;  %v4078_v55 = vld [vmem:[#allocation3 + $0xfe] sm:$0x1] }
 0x883   :  { %v4451_v62 = vsel %vm2831_vm7, %v4450_v22, %v4449_v29  ;;  %v4473_v9 = vsel %vm2822_vm4, %v4472_v60, %v4471_v24  ;;  %v4483_v10 = vsel %vm2816_vm2, %v4482_v4, %v4481_v15  ;;  %v4488_v12 = vrot.slane %v4060_v57, 3  ;;  %v4067_v29 = vld [vmem:[#allocation3 + $0xd2] sm:$0x1] }
 0x884   :  { %v10346_v37 = vpack.c.bf16 %v4465_v36, %v4451_v62  ;;  %v4490_v13 = vrot.slane %v4061_v59, 2  ;;  %v4475_v16 = vsel %vm2825_vm5, %v4474_v61, %v4473_v9  ;;  %v4485_v17 = vsel %vm2819_vm3, %v4484_v6, %v4483_v10  ;;  %v4070_v62 = vld [vmem:[#allocation3 + $0xde] sm:$0x1]  ;;  %v4620_v9 = vld [vmem:[#allocation2 + $0x27] sm:$0x1] }
 0x885   :  { %v4492_v18 = vrot.slane %v4062_v0, 1  ;;  %v4494_v20 = vrot.slane %v4064_v14, 7  ;;  %v4477_v22 = vsel %vm2828_vm6, %v4476_v3, %v4475_v16  ;;  %v4500_v45 = vrot.slane %v4067_v29, 4  ;;  %v4613_v10 = vld [vmem:[#allocation2 + $0xb] sm:$0x1] }
 0x886   :  { %10347 = vmatpush3.bf16.msra.mxu1 %v10346_v37  ;;  %v4479_v26 = vsel %vm2831_vm7, %v4478_v5, %v4477_v22  ;;  %v4502_v46 = vrot.slane %v4068_v21, 3  ;;  %v4504_v50 = vrot.slane %v4069_v30, 2  ;;  %v4508_v51 = vrot.slane %v4072_v33, 7  ;;  %v4611_v16 = vld [vmem:[#allocation2 + $0x3] sm:$0x1] }
 0x887   :  { %10348 = vmatprep.subr.bf16.mxu1 %v10988_v25  ;;  %v4495_v36 = vsel %vm2813_vm1, %v4494_v20, %v4063_v19  ;;  %v4510_v52 = vrot.slane %v4073_v34, 6  ;;  %v4506_v11 = vrot.slane %v4070_v62, 1  ;;  %v4516_v58 = vrot.slane %v4076_v44, 3  ;;  %v4622_v19 = vld [vmem:[#allocation2 + $0x2f] sm:$0x1] }
 0x888   :  { %v4509_v48 = vsel %vm2813_vm1, %v4508_v51, %v4071_v43  ;;  %v4518_v61 = vrot.slane %v4077_v47, 2  ;;  %v4520_v0 = vrot.slane %v4078_v55, 1  ;;  %v4817_v14 = vrot.slane %v4620_v9, 7  ;;  %v4623_v29 = vld [vmem:[#allocation2 + $0x33] sm:$0x1] }
 0x889   :  { %v4511_v60 = vsel %vm2816_vm2, %v4510_v52, %v4509_v48  ;;  %v4805_v20 = vrot.slane %v4613_v10, 6  ;;  %v4821_v30 = vrot.slane %v4622_v19, 5  ;;  %v4624_v62 = vld [vmem:[#allocation2 + $0x37] sm:$0x1]  ;;  %v4635_v43 = vld [vmem:[#allocation2 + $0x63] sm:$0x1] }
 0x88a   :  { %v4617_v44 = vld [vmem:[#allocation2 + $0x1b] sm:$0x1]  ;;  %v4630_v47 = vld [vmem:[#allocation2 + $0x4f] sm:$0x1]  ;;  %v4643_v19 = vld [vmem:[#allocation2 + $0x83] sm:$0x1] }
 0x88b   :  { %v4625_v52 = vld [vmem:[#allocation2 + $0x3b] sm:$0x1] }
 0x90b   :  { %v4337_v38 = vpop.xlane.xlu0 %4336 }
 0x90c   :  { %v4338_v54 = vsub.f32 %v11676_v2, %v4337_v38  ;;  %v4059_v2 = vld [vmem:[#allocation3 + $0xb2] sm:$0x1]  ;;  %v4074_v38 = vld [vmem:[#allocation3 + $0xee] sm:$0x1] }
 0x90d   :  { %v4486_v7 = vrot.slane %v4059_v2, 4  ;;  %v4512_v56 = vrot.slane %v4074_v38, 5 }
 0x90e   :  { %v4339_v53 = vmul.f32 1.442695, %v4338_v54  ;;  %v4075_v54 = vld [vmem:[#allocation3 + $0xf2] sm:$0x1] }
 0x90f   :  { %v4487_v39 = vsel %vm2822_vm4, %v4486_v7, %v4485_v17  ;;  %v4514_v8 = vrot.slane %v4075_v54, 4  ;;  %v4513_v63 = vsel %vm2819_vm3, %v4512_v56, %v4511_v60  ;;  %v4612_v7 = vld [vmem:[#allocation2 + $0x7] sm:$0x1]  ;;  %v4619_v17 = vld [vmem:[#allocation2 + $0x23] sm:$0x1] }
 0x910   :  { %10723 = vpow2.f32 %v4339_v53  ;;  %v4489_v28 = vsel %vm2825_vm5, %v4488_v12, %v4487_v39  ;;  %v4496_v53 = vrot.slane %v4065_v35, 6  ;;  %v4621_v12 = vld [vmem:[#allocation2 + $0x2b] sm:$0x1]  ;;  %v4818_v35 = vsel %vm2813_vm1, %v4817_v14, %v4619_v17  ;;  %v4644_v60 = vld [vmem:[#allocation2 + $0x87] sm:$0x1] }
 0x911   :  { %v4491_v31 = vsel %vm2828_vm6, %v4490_v13, %v4489_v28  ;;  %v4515_v1 = vsel %vm2822_vm4, %v4514_v8, %v4513_v63  ;;  %v4803_v13 = vrot.slane %v4612_v7, 7  ;;  %v4819_v22 = vrot.slane %v4621_v12, 6  ;;  %v4615_v28 = vld [vmem:[#allocation2 + $0x13] sm:$0x1]  ;;  %v4645_v12 = vld [vmem:[#allocation2 + $0x8b] sm:$0x1] }
 0x912   :  { %v4493_v37 = vsel %vm2831_vm7, %v4492_v18, %v4491_v31  ;;  %v4497_v49 = vsel %vm2816_vm2, %v4496_v53, %v4495_v36  ;;  %v4517_v4 = vsel %vm2825_vm5, %v4516_v58, %v4515_v1  ;;  %v4614_v18 = vld [vmem:[#allocation2 + $0xf] sm:$0x1]  ;;  %v4616_v31 = vld [vmem:[#allocation2 + $0x17] sm:$0x1]  ;;  %v4629_v36 = vld [vmem:[#allocation2 + $0x4b] sm:$0x1] }
 0x913   :  { %v10349_v42 = vpack.c.bf16 %v4493_v37, %v4479_v26  ;;  %v4519_v24 = vsel %vm2828_vm6, %v4518_v61, %v4517_v4  ;;  %v4804_v39 = vsel %vm2813_vm1, %v4803_v13, %v4611_v16  ;;  %v4636_v26 = vld [vmem:[#allocation2 + $0x67] sm:$0x1]  ;;  %v4807_v21 = vrot.slane %v4614_v18, 5  ;;  %v4637_v37 = vld [vmem:[#allocation2 + $0x6b] sm:$0x1] }
 0x914   :  { %v4521_v5 = vsel %vm2831_vm7, %v4520_v0, %v4519_v24  ;;  %v4806_v33 = vsel %vm2816_vm2, %v4805_v20, %v4804_v39  ;;  %v4820_v34 = vsel %vm2816_vm2, %v4819_v22, %v4818_v35  ;;  %v4845_v54 = vrot.slane %v4636_v26, 7  ;;  %v4652_v61 = vld [vmem:[#allocation2 + $0xa7] sm:$0x1]  ;;  %v4631_v63 = vld [vmem:[#allocation2 + $0x53] sm:$0x1] }
 0x915   :  { %10350 = vmatpush3.bf16.msra.mxu1 %v10349_v42  ;;  %v4809_v53 = vrot.slane %v4615_v28, 4  ;;  %v4627_v42 = vld [vmem:[#allocation2 + $0x43] sm:$0x1]  ;;  %v4847_v51 = vrot.slane %v4637_v37, 6  ;;  %v4811_v55 = vrot.slane %v4616_v31, 3  ;;  %v4813_v58 = vrot.slane %v4617_v44, 2 }
 0x916   :  { %10351 = vmatprep.subr.bf16.mxu1 %v10988_v25  ;;  %v4846_v8 = vsel %vm2813_vm1, %v4845_v54, %v4635_v43  ;;  %v4639_v0 = vld [vmem:[#allocation2 + $0x73] sm:$0x1]  ;;  %v4835_v1 = vrot.slane %v4630_v47, 5  ;;  %v4827_v4 = vrot.slane %v4625_v52, 2  ;;  %v4632_v24 = vld [vmem:[#allocation2 + $0x57] sm:$0x1] }
 0x917   :  { %v4848_v7 = vsel %vm2816_vm2, %v4847_v51, %v4846_v8  ;;  %v4653_v13 = vld [vmem:[#allocation2 + $0xab] sm:$0x1]  ;;  %v4859_v14 = vrot.slane %v4644_v60, 7  ;;  %v4873_v16 = vrot.slane %v4652_v61, 7  ;;  %v4837_v17 = vrot.slane %v4631_v63, 4 }
 0x918   :  { %v4851_v18 = vrot.slane %v4639_v0, 4  ;;  %v4651_v20 = vld [vmem:[#allocation2 + $0xa3] sm:$0x1]  ;;  %v4633_v35 = vld [vmem:[#allocation2 + $0x5b] sm:$0x1]  ;;  %v4861_v31 = vrot.slane %v4645_v12, 6 }
 0x919   :  { %v4874_v54 = vsel %vm2813_vm1, %v4873_v16, %v4651_v20  ;;  %v4660_v44 = vld [vmem:[#allocation2 + $0xc7] sm:$0x1]  ;;  %v4656_v8 = vld [vmem:[#allocation2 + $0xb7] sm:$0x1]  ;;  %v4669_v60 = vld [vmem:[#allocation2 + $0xeb] sm:$0x1] }
 0x91a   :  { %v11711_v40 = vpop.eup %10723  ;;  %v4887_v61 = vrot.slane %v4660_v44, 7 }
 0x91b   :  { %v4341_v41 = vsel %vm3013_vm9, %v11711_v40, 0.0 }
 0x91c   :  { %4342 = vadd.xlane.f32.xlu1 %v4341_v41  ;;  %v4498_v41 = vrot.slane %v4066_v23, 5  ;;  %v4628_v23 = vld [vmem:[#allocation2 + $0x47] sm:$0x1] }
 0x91d   :  { %v4831_v38 = vrot.slane %v4628_v23, 7 }
 0x91e   :  { %v4499_v2 = vsel %vm2819_vm3, %v4498_v41, %v4497_v49  ;;  %v4823_v41 = vrot.slane %v4623_v29, 4  ;;  %v4638_v49 = vld [vmem:[#allocation2 + $0x6f] sm:$0x1] }
 0x91f   :  { %v4501_v57 = vsel %vm2822_vm4, %v4500_v45, %v4499_v2  ;;  %v4808_v45 = vsel %vm2819_vm3, %v4807_v21, %v4806_v33  ;;  %v4825_v2 = vrot.slane %v4624_v62, 3  ;;  %v4832_v56 = vsel %vm2813_vm1, %v4831_v38, %v4627_v42  ;;  %v4646_v21 = vld [vmem:[#allocation2 + $0x8f] sm:$0x1]  ;;  %v4634_v33 = vld [vmem:[#allocation2 + $0x5f] sm:$0x1] }
 0x920   :  { %v4503_v59 = vsel %vm2825_vm5, %v4502_v46, %v4501_v57  ;;  %v4822_v46 = vsel %vm2819_vm3, %v4821_v30, %v4820_v34  ;;  %v4618_v57 = vld [vmem:[#allocation2 + $0x1f] sm:$0x1]  ;;  %v4810_v48 = vsel %vm2822_vm4, %v4809_v53, %v4808_v45  ;;  %v4654_v30 = vld [vmem:[#allocation2 + $0xaf] sm:$0x1]  ;;  %v4875_v62 = vrot.slane %v4653_v13, 6 }
 0x921   :  { %v4505_v15 = vsel %vm2828_vm6, %v4504_v50, %v4503_v59  ;;  %v4833_v50 = vrot.slane %v4629_v36, 6  ;;  %v4824_v59 = vsel %vm2822_vm4, %v4823_v41, %v4822_v46  ;;  %v4812_v9 = vsel %vm2825_vm5, %v4811_v55, %v4810_v48  ;;  %v4641_v34 = vld [vmem:[#allocation2 + $0x7b] sm:$0x1]  ;;  %v4642_v53 = vld [vmem:[#allocation2 + $0x7f] sm:$0x1] }
 0x922   :  { %v4507_v3 = vsel %vm2831_vm7, %v4506_v11, %v4505_v15  ;;  %v4626_v11 = vld [vmem:[#allocation2 + $0x3f] sm:$0x1]  ;;  %v4826_v10 = vsel %vm2825_vm5, %v4825_v2, %v4824_v59  ;;  %v4815_v22 = vrot.slane %v4618_v57, 1  ;;  %v4814_v28 = vsel %vm2828_vm6, %v4813_v58, %v4812_v9  ;;  %v4668_v45 = vld [vmem:[#allocation2 + $0xe7] sm:$0x1] }
 0x923   :  { %v10352_v6 = vpack.c.bf16 %v4521_v5, %v4507_v3  ;;  %v4849_v3 = vrot.slane %v4638_v49, 5  ;;  %v4640_v5 = vld [vmem:[#allocation2 + $0x77] sm:$0x1]  ;;  %v4829_v39 = vrot.slane %v4626_v11, 1  ;;  %v4828_v29 = vsel %vm2828_vm6, %v4827_v4, %v4826_v10  ;;  %v4647_v49 = vld [vmem:[#allocation2 + $0x93] sm:$0x1] }
 0x924   :  { %v4839_v36 = vrot.slane %v4632_v24, 3  ;;  %v4853_v37 = vrot.slane %v4640_v5, 3  ;;  %v4860_v38 = vsel %vm2813_vm1, %v4859_v14, %v4643_v19  ;;  %v4841_v42 = vrot.slane %v4633_v35, 2  ;;  %v4661_v59 = vld [vmem:[#allocation2 + $0xcb] sm:$0x1] }
 0x925   :  { %10353 = vmatpush3.bf16.msra.mxu1 %v10352_v6  ;;  %v4834_v6 = vsel %vm2816_vm2, %v4833_v50, %v4832_v56  ;;  %v4850_v26 = vsel %vm2819_vm3, %v4849_v3, %v4848_v7  ;;  %v4816_v46 = vsel %vm2831_vm7, %v4815_v22, %v4814_v28  ;;  %v4830_v47 = vsel %vm2831_vm7, %v4829_v39, %v4828_v29  ;;  %v4655_v50 = vld [vmem:[#allocation2 + $0xb3] sm:$0x1]  ;;  %v4648_v56 = vld [vmem:[#allocation2 + $0x97] sm:$0x1]  ;;  %v4659_v4 = vld [vmem:[#allocation2 + $0xc3] sm:$0x1] }
 0x926   :  { %10354 = vmatprep.subr.bf16.mxu1 %v10988_v25  ;;  %v4836_v23 = vsel %vm2819_vm3, %v4835_v1, %v4834_v6  ;;  %v4852_v43 = vsel %vm2822_vm4, %v4851_v18, %v4850_v26  ;;  %v4863_v51 = vrot.slane %v4646_v21, 5  ;;  %v4877_v52 = vrot.slane %v4654_v30, 5  ;;  %v4667_v24 = vld [vmem:[#allocation2 + $0xe3] sm:$0x1]  ;;  %v4662_v13 = vld [vmem:[#allocation2 + $0xcf] sm:$0x1] }
 0x927   :  { %v4838_v41 = vsel %vm2822_vm4, %v4837_v17, %v4836_v23  ;;  %v4843_v55 = vrot.slane %v4634_v33, 1  ;;  %v4855_v2 = vrot.slane %v4641_v34, 2  ;;  %v4862_v57 = vsel %vm2816_vm2, %v4861_v31, %v4860_v38  ;;  %v4670_v14 = vld [vmem:[#allocation2 + $0xef] sm:$0x1]  ;;  %v4649_v18 = vld [vmem:[#allocation2 + $0x9b] sm:$0x1] }
 0x928   :  { %v4876_v11 = vsel %vm2816_vm2, %v4875_v62, %v4874_v54  ;;  %v4840_v48 = vsel %vm2825_vm5, %v4839_v36, %v4838_v41  ;;  %v4854_v58 = vsel %vm2825_vm5, %v4853_v37, %v4852_v43  ;;  %v10355_v0 = vpack.c.bf16 %v4830_v47, %v4816_v46  ;;  %v4657_v19 = vld [vmem:[#allocation2 + $0xbb] sm:$0x1]  ;;  %v4663_v29 = vld [vmem:[#allocation2 + $0xd3] sm:$0x1]  ;;  %v4650_v62 = vld [vmem:[#allocation2 + $0x9f] sm:$0x1] }
 0x929   :  { %v4865_v1 = vrot.slane %v4647_v49, 4  ;;  %v4879_v3 = vrot.slane %v4655_v50, 4  ;;  %v4857_v6 = vrot.slane %v4642_v53, 1  ;;  %v4864_v7 = vsel %vm2819_vm3, %v4863_v51, %v4862_v57  ;;  %v4671_v21 = vld [vmem:[#allocation2 + $0xf3] sm:$0x1] }
 0x92a   :  { %v4878_v9 = vsel %vm2819_vm3, %v4877_v52, %v4876_v11  ;;  %v4842_v10 = vsel %vm2828_vm6, %v4841_v42, %v4840_v48  ;;  %v4856_v12 = vsel %vm2828_vm6, %v4855_v2, %v4854_v58  ;;  %v4889_v16 = vrot.slane %v4661_v59, 6  ;;  %v4658_v33 = vld [vmem:[#allocation2 + $0xbf] sm:$0x1]  ;;  %v4664_v42 = vld [vmem:[#allocation2 + $0xd7] sm:$0x1] }
 0x92b   :  { %v4903_v17 = vrot.slane %v4669_v60, 6  ;;  %v4867_v20 = vrot.slane %v4648_v56, 3  ;;  %v4881_v22 = vrot.slane %v4656_v8, 3  ;;  %v4866_v35 = vsel %vm2822_vm4, %v4865_v1, %v4864_v7  ;;  %v4672_v43 = vld [vmem:[#allocation2 + $0xf7] sm:$0x1] }
 0x92c   :  { %v4880_v23 = vsel %vm2822_vm4, %v4879_v3, %v4878_v9  ;;  %v4844_v26 = vsel %vm2831_vm7, %v4843_v55, %v4842_v10  ;;  %v4858_v28 = vsel %vm2831_vm7, %v4857_v6, %v4856_v12  ;;  %v4891_v30 = vrot.slane %v4662_v13, 5  ;;  %v4665_v55 = vld [vmem:[#allocation2 + $0xdb] sm:$0x1]  ;;  %v4666_v59 = vld [vmem:[#allocation2 + $0xdf] sm:$0x1] }
 0x92d   :  { %v4905_v31 = vrot.slane %v4670_v14, 5  ;;  %v4869_v34 = vrot.slane %v4649_v18, 2  ;;  %v4883_v36 = vrot.slane %v4657_v19, 2  ;;  %v4868_v54 = vsel %vm2825_vm5, %v4867_v20, %v4866_v35  ;;  %v4673_v2 = vld [vmem:[#allocation2 + $0xfb] sm:$0x1] }
 0x92e   :  { %v4882_v53 = vsel %vm2825_vm5, %v4881_v22, %v4880_v23  ;;  %v10358_v41 = vpack.c.bf16 %v4858_v28, %v4844_v26  ;;  %v4893_v44 = vrot.slane %v4663_v29, 4  ;;  %v4871_v46 = vrot.slane %v4650_v62, 1  ;;  %v4674_v60 = vld [vmem:[#allocation2 + $0xff] sm:$0x1]  ;;  %v4610_v10 = vld [vmem:[#allocation4 + $0xc] sm:$0x3] }
 0x92f   :  { %v4885_v47 = vrot.slane %v4658_v33, 1  ;;  %v4870_v51 = vsel %vm2828_vm6, %v4869_v34, %v4868_v54  ;;  %v4884_v52 = vsel %vm2828_vm6, %v4883_v36, %v4882_v53  ;;  %v4895_v56 = vrot.slane %v4664_v42, 3  ;;  %v4676_v22 = vld [vmem:[#allocation3 + $0x7] sm:$0x1]  ;;  %v4675_v35 = vld [vmem:[#allocation3 + $0x3] sm:$0x1] }
 0x930   :  { %v4909_v8 = vrot.slane %v4672_v43, 3  ;;  %v4872_v48 = vsel %vm2831_vm7, %v4871_v46, %v4870_v51  ;;  %v4899_v3 = vrot.slane %v4666_v59, 1  ;;  %v4679_v23 = vld [vmem:[#allocation3 + $0x13] sm:$0x1]  ;;  %v4680_v26 = vld [vmem:[#allocation3 + $0x17] sm:$0x1] }
 0x931   :  { %v4886_v58 = vsel %vm2831_vm7, %v4885_v47, %v4884_v52  ;;  %v4681_v28 = vld [vmem:[#allocation3 + $0x1b] sm:$0x1]  ;;  %v4682_v29 = vld [vmem:[#allocation3 + $0x1f] sm:$0x1]  ;;  %v4686_v62 = vld [vmem:[#allocation3 + $0x2f] sm:$0x1] }
 0x932   :  { %v10361_v1 = vpack.c.bf16 %v4886_v58, %v4872_v48  ;;  %v4687_v33 = vld [vmem:[#allocation3 + $0x33] sm:$0x1]  ;;  %v4688_v34 = vld [vmem:[#allocation3 + $0x37] sm:$0x1]  ;;  %v4689_v36 = vld [vmem:[#allocation3 + $0x3b] sm:$0x1] }
 0x933   :  { %v4690_v53 = vld [vmem:[#allocation3 + $0x3f] sm:$0x1]  ;;  %v5078_v42 = vrot.slane %v4680_v26, 3  ;;  %v5080_v43 = vrot.slane %v4681_v28, 2  ;;  %v5088_v47 = vrot.slane %v4686_v62, 5  ;;  %v5082_v52 = vrot.slane %v4682_v29, 1 }
 0x934   :  { %v4705_v26 = vld [vmem:[#allocation3 + $0x7b] sm:$0x1] }
 0x9a9   :  { %v4343_v15 = vpop.xlane.xlu1 %4342 }
 0x9aa   :  { %10725 = vrcp.f32 %v4343_v15  ;;  %v4901_v15 = vrot.slane %v4668_v45, 7  ;;  %v4907_v45 = vrot.slane %v4671_v21, 4  ;;  %v4683_v21 = vld [vmem:[#allocation3 + $0x23] sm:$0x1] }
 0x9ac   :  { %v4902_v39 = vsel %vm2813_vm1, %v4901_v15, %v4667_v24  ;;  %v4911_v15 = vrot.slane %v4673_v2, 2  ;;  %v5092_v2 = vrot.slane %v4688_v34, 3 }
 0x9ad   :  { %v4904_v38 = vsel %vm2816_vm2, %v4903_v17, %v4902_v39  ;;  %v4678_v39 = vld [vmem:[#allocation3 + $0xf] sm:$0x1] }
 0x9ae   :  { %v4906_v50 = vsel %vm2819_vm3, %v4905_v31, %v4904_v38  ;;  %v4685_v31 = vld [vmem:[#allocation3 + $0x2b] sm:$0x1]  ;;  %v5074_v54 = vrot.slane %v4678_v39, 5 }
 0x9af   :  { %v4908_v11 = vsel %vm2822_vm4, %v4907_v45, %v4906_v50  ;;  %v5086_v46 = vrot.slane %v4685_v31, 6  ;;  %v4692_v50 = vld [vmem:[#allocation3 + $0x47] sm:$0x1] }
 0x9b0   :  { %v5098_v48 = vrot.slane %v4692_v50, 7 }
 0x9b4   :  { %v10726_v63 = vpop.eup %10725 }
 0x9b5   :  { %v4345_v5 = vmul.f32 %v10726_v63, %v11711_v40  ;;  %v4888_v40 = vsel %vm2813_vm1, %v4887_v61, %v4659_v4  ;;  %v4897_v61 = vrot.slane %v4665_v55, 2  ;;  %v4913_v4 = vrot.slane %v4674_v60, 1 }
 0x9b6   :  { %v4890_v37 = vsel %vm2816_vm2, %v4889_v16, %v4888_v40  ;;  %v4677_v40 = vld [vmem:[#allocation3 + $0xb] sm:$0x1]  ;;  %v5096_v60 = vrot.slane %v4690_v53, 1 }
 0x9b7   :  { %9946 = vmatmul.mubr.msk.f32.vlgmr.msra.gmra.mrb[18].mxu1 %vm3209_vm10, %v4345_v5  ;;  %v4892_v49 = vsel %vm2819_vm3, %v4891_v30, %v4890_v37  ;;  %v4684_v30 = vld [vmem:[#allocation3 + $0x27] sm:$0x1]  ;;  %v5070_v37 = vrot.slane %v4676_v22, 7  ;;  %v5072_v38 = vrot.slane %v4677_v40, 6  ;;  %v4699_v22 = vld [vmem:[#allocation3 + $0x63] sm:$0x1] }
 0x9b8   :  { %10356 = vmatpush3.bf16.xpose.msra.mxu1 %v10355_v0  ;;  %9964 = vmatprep.mubr.msk.f32.mxu1 %vm10989_vm0, %v10990_v27  ;;  %v4894_v57 = vsel %vm2822_vm4, %v4893_v44, %v4892_v49  ;;  %v4910_v0 = vsel %vm2825_vm5, %v4909_v8, %v4908_v11  ;;  %v5084_v44 = vrot.slane %v4684_v30, 7  ;;  %v5090_v49 = vrot.slane %v4687_v33, 4  ;;  %v4691_v11 = vld [vmem:[#allocation3 + $0x43] sm:$0x1]  ;;  %v4704_v40 = vld [vmem:[#allocation3 + $0x77] sm:$0x1] }
 0x9b9   :  { %10357 = vmatprep.subr.bf16.mxu1 %v10988_v25  ;;  %v4896_v63 = vsel %vm2825_vm5, %v4895_v56, %v4894_v57  ;;  %v4912_v5 = vsel %vm2828_vm6, %v4911_v15, %v4910_v0  ;;  %v5071_v45 = vsel %vm2813_vm1, %v5070_v37, %v4675_v35  ;;  %v5094_v57 = vrot.slane %v4689_v36, 2  ;;  %v4694_v15 = vld [vmem:[#allocation3 + $0x4f] sm:$0x1]  ;;  %v4706_v30 = vld [vmem:[#allocation3 + $0x7f] sm:$0x1] }
 0x9ba   :  { %v4898_v24 = vsel %vm2828_vm6, %v4897_v61, %v4896_v63  ;;  %v4914_v7 = vsel %vm2831_vm7, %v4913_v4, %v4912_v5  ;;  %v5073_v51 = vsel %vm2816_vm2, %v5072_v38, %v5071_v45  ;;  %v5085_v55 = vsel %vm2813_vm1, %v5084_v44, %v4683_v21  ;;  %v4693_v61 = vld [vmem:[#allocation3 + $0x4b] sm:$0x1]  ;;  %v4697_v4 = vld [vmem:[#allocation3 + $0x5b] sm:$0x1] }
 0x9bb   :  { %v4900_v6 = vsel %vm2831_vm7, %v4899_v3, %v4898_v24  ;;  %v5075_v56 = vsel %vm2819_vm3, %v5074_v54, %v5073_v51  ;;  %v5087_v8 = vsel %vm2816_vm2, %v5086_v46, %v5085_v55  ;;  %v4696_v3 = vld [vmem:[#allocation3 + $0x57] sm:$0x1]  ;;  %v5108_v29 = vrot.slane %v4697_v4, 2 }
 0x9bc   :  { %v10364_v9 = vpack.c.bf16 %v4914_v7, %v4900_v6  ;;  %v5089_v59 = vsel %vm2819_vm3, %v5088_v47, %v5087_v8  ;;  %v4698_v6 = vld [vmem:[#allocation3 + $0x5f] sm:$0x1]  ;;  %v4700_v7 = vld [vmem:[#allocation3 + $0x67] sm:$0x1]  ;;  %v5106_v35 = vrot.slane %v4696_v3, 3  ;;  %v5120_v54 = vrot.slane %v4704_v40, 3 }
 0x9bd   :  { %v5091_v0 = vsel %vm2822_vm4, %v5090_v49, %v5089_v59  ;;  %v5112_v21 = vrot.slane %v4700_v7, 7  ;;  %v5110_v37 = vrot.slane %v4698_v6, 1  ;;  %v5124_v45 = vrot.slane %v4706_v30, 1  ;;  %v4717_v59 = vld [vmem:[#allocation3 + $0xab] sm:$0x1] }
 0x9be   :  { %v5093_v5 = vsel %vm2825_vm5, %v5092_v2, %v5091_v0  ;;  %v4715_v0 = vld [vmem:[#allocation3 + $0xa3] sm:$0x1]  ;;  %v4718_v3 = vld [vmem:[#allocation3 + $0xaf] sm:$0x1]  ;;  %v4724_v30 = vld [vmem:[#allocation3 + $0xc7] sm:$0x1] }
 0x9bf   :  { %v5113_v38 = vsel %vm2813_vm1, %v5112_v21, %v4699_v22  ;;  %v5142_v22 = vrot.slane %v4717_v59, 6 }
 0x9c0   :  { %10359 = vmatpush3.bf16.xpose.msra.mxu1 %v10358_v41  ;;  %v5076_v41 = vrot.slane %v4679_v23, 4 }
 0x9c1   :  { %10360 = vmatprep.subr.bf16.mxu1 %v10988_v25 }
 0x9c2   :  { %v5077_v58 = vsel %vm2822_vm4, %v5076_v41, %v5075_v56 }
 0x9c3   :  { %v5079_v63 = vsel %vm2825_vm5, %v5078_v42, %v5077_v58  ;;  %v5122_v42 = vrot.slane %v4705_v26, 2  ;;  %v4709_v58 = vld [vmem:[#allocation3 + $0x8b] sm:$0x1] }
 0x9c4   :  { %v5081_v24 = vsel %vm2828_vm6, %v5080_v43, %v5079_v63  ;;  %v4710_v63 = vld [vmem:[#allocation3 + $0x8f] sm:$0x1]  ;;  %v5128_v6 = vrot.slane %v4709_v58, 6  ;;  %v4736_v58 = vld [vmem:[#allocation3 + $0xf7] sm:$0x1] }
 0x9c5   :  { %v5130_v7 = vrot.slane %v4710_v63, 5 }
 0x9c8   :  { %10362 = vmatpush3.bf16.xpose.msra.mxu1 %v10361_v1  ;;  %v4695_v1 = vld [vmem:[#allocation3 + $0x53] sm:$0x1] }
 0x9c9   :  { %10363 = vmatprep.subr.bf16.mxu1 %v10988_v25  ;;  %v5104_v39 = vrot.slane %v4695_v1, 4  ;;  %v4711_v1 = vld [vmem:[#allocation3 + $0x93] sm:$0x1] }
 0x9d0   :  { %10365 = vmatpush3.bf16.xpose.msra.mxu1 %v10364_v9  ;;  %v4701_v9 = vld [vmem:[#allocation3 + $0x6b] sm:$0x1] }
 0x9d1   :  { %10390 = vmatprep.subr.bf16.mxu1 %v10988_v25  ;;  %v5114_v62 = vrot.slane %v4701_v9, 6  ;;  %v4713_v9 = vld [vmem:[#allocation3 + $0x9b] sm:$0x1] }
 0x9d3   :  { %v5115_v41 = vsel %vm2816_vm2, %v5114_v62, %v5113_v38 }
 0x9d7   :  { %9965 = vmatmul.mubr.f32.vlgmr.msra.gmra.mrb[20].mxu1 %v4610_v10  ;;  %v5099_v10 = vsel %vm2813_vm1, %v5098_v48, %v4691_v11  ;;  %v4708_v11 = vld [vmem:[#allocation3 + $0x87] sm:$0x1] }
 0x9d8   :  { %10021 = vmatprep.mubr.msk.f32.mxu1 %vm10989_vm0, %v10990_v27  ;;  %v4716_v48 = vld [vmem:[#allocation3 + $0xa7] sm:$0x1] }
 0xa8a   :  { %v4599_v12 = vpop.f32.mrb[18].mxu1 }
 0xa8b   :  { %4603 = vst [vmem:[#allocation7 + $0x2] sm:$0x1] %v4599_v12  ;;  %v9194_v13 = vrot.slane %v4599_v12, 9  ;;  %v9947_v14 = vpop.f32.mrb[19].mxu1  ;;  %v5083_v12 = vsel %vm2831_vm7, %v5082_v52, %v5081_v24  ;;  %v4712_v24 = vld [vmem:[#allocation3 + $0x97] sm:$0x1] }
 0xa8c   :  { %v4702_v14 = vld [vmem:[#allocation3 + $0x6f] sm:$0x1] }
 0xa8d   :  { %4608 = vst [vmem:[#allocation7 + $0x6] sm:$0x1] %v9194_v13  ;;  %v5095_v13 = vsel %vm2828_vm6, %v5094_v57, %v5093_v5  ;;  %v5116_v33 = vrot.slane %v4702_v14, 5  ;;  %v4720_v5 = vld [vmem:[#allocation3 + $0xb7] sm:$0x1] }
 0xa8f   :  { %v5117_v44 = vsel %vm2819_vm3, %v5116_v33, %v5115_v41 }
 0xaaa   :  { %v4989_v16 = vpop.f32.mrb[20].mxu1 }
 0xaab   :  { %v4993_v17 = vmul.f32 0.088388346, %v4989_v16  ;;  %v9966_v18 = vpop.f32.mrb[21].mxu1  ;;  %v4703_v16 = vld [vmem:[#allocation3 + $0x73] sm:$0x1] }
 0xaac   :  { %v5102_v18 = vrot.slane %v4694_v15, 5  ;;  %v5118_v34 = vrot.slane %v4703_v16, 4  ;;  %v4707_v15 = vld [vmem:[#allocation3 + $0x83] sm:$0x1]  ;;  %v4714_v16 = vld [vmem:[#allocation3 + $0x9f] sm:$0x1] }
 0xaad   :  { %v11813_v19 = vsel %vm11394_vm8, %v4993_v17, -1e+30  ;;  %v5100_v17 = vrot.slane %v4693_v61, 6  ;;  %v5140_v61 = vrot.slane %v4716_v48, 7  ;;  %v4731_v48 = vld [vmem:[#allocation3 + $0xe3] sm:$0x1] }
 0xaae   :  { %v4995_v20 = vsel %vm3013_vm9, %v11813_v19, -inf  ;;  %v5119_v46 = vsel %vm2822_vm4, %v5118_v34, %v5117_v44  ;;  %v4723_v34 = vld [vmem:[#allocation3 + $0xc3] sm:$0x1]  ;;  %v4728_v44 = vld [vmem:[#allocation3 + $0xd7] sm:$0x1] }
 0xaaf   :  { %4996 = vmax.xlane.f32.xlu0 %v4995_v20  ;;  %v5097_v20 = vsel %vm2831_vm7, %v5096_v60, %v5095_v13  ;;  %v5101_v28 = vsel %vm2816_vm2, %v5100_v17, %v5099_v10  ;;  %v5121_v49 = vsel %vm2825_vm5, %v5120_v54, %v5119_v46  ;;  %v5126_v60 = vrot.slane %v4708_v11, 7  ;;  %v4721_v10 = vld [vmem:[#allocation3 + $0xbb] sm:$0x1]  ;;  %v4722_v17 = vld [vmem:[#allocation3 + $0xbf] sm:$0x1] }
 0xab0   :  { %v10367_v23 = vpack.c.bf16 %v5097_v20, %v5083_v12  ;;  %v5103_v31 = vsel %vm2819_vm3, %v5102_v18, %v5101_v28  ;;  %v5123_v50 = vsel %vm2828_vm6, %v5122_v42, %v5121_v49  ;;  %v5132_v12 = vrot.slane %v4711_v1, 4  ;;  %v4725_v54 = vld [vmem:[#allocation3 + $0xcb] sm:$0x1]  ;;  %v4732_v49 = vld [vmem:[#allocation3 + $0xe7] sm:$0x1] }
 0xab1   :  { %v5105_v36 = vsel %vm2822_vm4, %v5104_v39, %v5103_v31  ;;  %v5125_v51 = vsel %vm2831_vm7, %v5124_v45, %v5123_v50  ;;  %v5127_v4 = vsel %vm2813_vm1, %v5126_v60, %v4707_v15  ;;  %v5134_v13 = vrot.slane %v4712_v24, 3  ;;  %v4729_v45 = vld [vmem:[#allocation3 + $0xdb] sm:$0x1]  ;;  %v4733_v50 = vld [vmem:[#allocation3 + $0xeb] sm:$0x1] }
 0xab2   :  { %10368 = vmatpush3.bf16.msra.mxu0 %v10367_v23  ;;  %v5107_v53 = vsel %vm2825_vm5, %v5106_v35, %v5105_v36  ;;  %v5141_v14 = vsel %vm2813_vm1, %v5140_v61, %v4715_v0  ;;  %v5129_v18 = vsel %vm2816_vm2, %v5128_v6, %v5127_v4  ;;  %v5136_v20 = vrot.slane %v4713_v9, 2  ;;  %v4737_v61 = vld [vmem:[#allocation3 + $0xfb] sm:$0x1] }
 0xab3   :  { %10369 = vmatprep.subr.bf16.mxu0 %v10988_v25  ;;  %v5109_v43 = vsel %vm2828_vm6, %v5108_v29, %v5107_v53  ;;  %v5131_v40 = vsel %vm2819_vm3, %v5130_v7, %v5129_v18  ;;  %v5138_v39 = vrot.slane %v4714_v16, 1  ;;  %v5144_v35 = vrot.slane %v4718_v3, 5  ;;  %v4726_v53 = vld [vmem:[#allocation3 + $0xcf] sm:$0x1]  ;;  %v4738_v3 = vld [vmem:[#allocation3 + $0xff] sm:$0x1] }
 0xab4   :  { %v5111_v47 = vsel %vm2831_vm7, %v5110_v37, %v5109_v43  ;;  %v5133_v26 = vsel %vm2822_vm4, %v5132_v12, %v5131_v40  ;;  %v5143_v28 = vsel %vm2816_vm2, %v5142_v22, %v5141_v14  ;;  %v5148_v29 = vrot.slane %v4720_v5, 3  ;;  %v4727_v43 = vld [vmem:[#allocation3 + $0xd3] sm:$0x1] }
 0xab5   :  { %v10370_v52 = vpack.c.bf16 %v5125_v51, %v5111_v47  ;;  %v5150_v21 = vrot.slane %v4721_v10, 2  ;;  %v5135_v31 = vsel %vm2825_vm5, %v5134_v13, %v5133_v26  ;;  %v5145_v62 = vsel %vm2819_vm3, %v5144_v35, %v5143_v28  ;;  %v4730_v47 = vld [vmem:[#allocation3 + $0xdf] sm:$0x1]  ;;  %v5280_v26 = vld [vmem:[#allocation2 + $0x124] sm:$0x1] }
 0xab6   :  { %v5152_v33 = vrot.slane %v4722_v17, 1  ;;  %v5154_v36 = vrot.slane %v4724_v30, 7  ;;  %v5137_v37 = vsel %vm2828_vm6, %v5136_v20, %v5135_v31  ;;  %v5160_v59 = vrot.slane %v4727_v43, 4  ;;  %v5273_v28 = vld [vmem:[#allocation2 + $0x108] sm:$0x1] }
 0xab7   :  { %10371 = vmatpush3.bf16.msra.mxu0 %v10370_v52  ;;  %v5139_v41 = vsel %vm2831_vm7, %v5138_v39, %v5137_v37  ;;  %v5162_v60 = vrot.slane %v4728_v44, 3  ;;  %v5164_v63 = vrot.slane %v4729_v45, 2  ;;  %v5168_v0 = vrot.slane %v4732_v49, 7  ;;  %v5271_v31 = vld [vmem:[#allocation2 + $0x100] sm:$0x1] }
 0xab8   :  { %10372 = vmatprep.subr.bf16.mxu0 %v10988_v25  ;;  %v5155_v51 = vsel %vm2813_vm1, %v5154_v36, %v4723_v34  ;;  %v5170_v1 = vrot.slane %v4733_v50, 6  ;;  %v5166_v6 = vrot.slane %v4730_v47, 1  ;;  %v5176_v9 = vrot.slane %v4736_v58, 3  ;;  %v5282_v34 = vld [vmem:[#allocation2 + $0x12c] sm:$0x1] }
 0xab9   :  { %v5169_v7 = vsel %vm2813_vm1, %v5168_v0, %v4731_v48  ;;  %v5178_v13 = vrot.slane %v4737_v61, 2  ;;  %v5180_v17 = vrot.slane %v4738_v3, 1  ;;  %v5478_v30 = vrot.slane %v5280_v26, 7  ;;  %v5283_v43 = vld [vmem:[#allocation2 + $0x130] sm:$0x1] }
 0xaba   :  { %v5171_v12 = vsel %vm2816_vm2, %v5170_v1, %v5169_v7  ;;  %v5466_v36 = vrot.slane %v5273_v28, 6  ;;  %v5482_v45 = vrot.slane %v5282_v34, 5  ;;  %v5284_v47 = vld [vmem:[#allocation2 + $0x134] sm:$0x1]  ;;  %v5295_v48 = vld [vmem:[#allocation2 + $0x160] sm:$0x1] }
 0xabb   :  { %v5277_v58 = vld [vmem:[#allocation2 + $0x118] sm:$0x1]  ;;  %v5290_v61 = vld [vmem:[#allocation2 + $0x14c] sm:$0x1]  ;;  %v5303_v34 = vld [vmem:[#allocation2 + $0x180] sm:$0x1] }
 0xabc   :  { %v5285_v1 = vld [vmem:[#allocation2 + $0x138] sm:$0x1] }
 0xb3c   :  { %v4997_v55 = vpop.xlane.xlu0 %4996 }
 0xb3d   :  { %v4998_v2 = vsub.f32 %v11813_v19, %v4997_v55  ;;  %v4719_v19 = vld [vmem:[#allocation3 + $0xb3] sm:$0x1]  ;;  %v4734_v55 = vld [vmem:[#allocation3 + $0xef] sm:$0x1] }
 0xb3e   :  { %v5146_v23 = vrot.slane %v4719_v19, 4  ;;  %v5172_v4 = vrot.slane %v4734_v55, 5 }
 0xb3f   :  { %v4999_v56 = vmul.f32 1.442695, %v4998_v2  ;;  %v4735_v2 = vld [vmem:[#allocation3 + $0xf3] sm:$0x1] }
 0xb40   :  { %v5147_v38 = vsel %vm2822_vm4, %v5146_v23, %v5145_v62  ;;  %v5174_v24 = vrot.slane %v4735_v2, 4  ;;  %v5173_v16 = vsel %vm2819_vm3, %v5172_v4, %v5171_v12  ;;  %v5272_v23 = vld [vmem:[#allocation2 + $0x104] sm:$0x1]  ;;  %v5279_v62 = vld [vmem:[#allocation2 + $0x120] sm:$0x1] }
 0xb41   :  { %10727 = vpow2.f32 %v4999_v56  ;;  %v5149_v42 = vsel %vm2825_vm5, %v5148_v29, %v5147_v38  ;;  %v5156_v56 = vrot.slane %v4725_v54, 6  ;;  %v5281_v29 = vld [vmem:[#allocation2 + $0x128] sm:$0x1]  ;;  %v5479_v54 = vsel %vm2813_vm1, %v5478_v30, %v5279_v62  ;;  %v5304_v12 = vld [vmem:[#allocation2 + $0x184] sm:$0x1] }
 0xb42   :  { %v5151_v46 = vsel %vm2828_vm6, %v5150_v21, %v5149_v42  ;;  %v5175_v18 = vsel %vm2822_vm4, %v5174_v24, %v5173_v16  ;;  %v5464_v21 = vrot.slane %v5272_v23, 7  ;;  %v5480_v37 = vrot.slane %v5281_v29, 6  ;;  %v5275_v42 = vld [vmem:[#allocation2 + $0x110] sm:$0x1]  ;;  %v5305_v29 = vld [vmem:[#allocation2 + $0x188] sm:$0x1] }
 0xb43   :  { %v5153_v52 = vsel %vm2831_vm7, %v5152_v33, %v5151_v46  ;;  %v5157_v15 = vsel %vm2816_vm2, %v5156_v56, %v5155_v51  ;;  %v5177_v22 = vsel %vm2825_vm5, %v5176_v9, %v5175_v18  ;;  %v5274_v33 = vld [vmem:[#allocation2 + $0x10c] sm:$0x1]  ;;  %v5276_v46 = vld [vmem:[#allocation2 + $0x114] sm:$0x1]  ;;  %v5289_v51 = vld [vmem:[#allocation2 + $0x148] sm:$0x1] }
 0xb44   :  { %v10373_v11 = vpack.c.bf16 %v5153_v52, %v5139_v41  ;;  %v5179_v40 = vsel %vm2828_vm6, %v5178_v13, %v5177_v22  ;;  %v5465_v38 = vsel %vm2813_vm1, %v5464_v21, %v5271_v31  ;;  %v5296_v41 = vld [vmem:[#allocation2 + $0x164] sm:$0x1]  ;;  %v5468_v44 = vrot.slane %v5274_v33, 5  ;;  %v5297_v52 = vld [vmem:[#allocation2 + $0x168] sm:$0x1] }
 0xb45   :  { %v5181_v39 = vsel %vm2831_vm7, %v5180_v17, %v5179_v40  ;;  %v5467_v49 = vsel %vm2816_vm2, %v5466_v36, %v5465_v38  ;;  %v5481_v50 = vsel %vm2816_vm2, %v5480_v37, %v5479_v54  ;;  %v5506_v2 = vrot.slane %v5296_v41, 7  ;;  %v5312_v13 = vld [vmem:[#allocation2 + $0x1a4] sm:$0x1]  ;;  %v5291_v16 = vld [vmem:[#allocation2 + $0x150] sm:$0x1] }
 0xb46   :  { %10374 = vmatpush3.bf16.msra.mxu0 %v10373_v11  ;;  %v5470_v56 = vrot.slane %v5275_v42, 4  ;;  %v5287_v11 = vld [vmem:[#allocation2 + $0x140] sm:$0x1]  ;;  %v5508_v0 = vrot.slane %v5297_v52, 6  ;;  %v5472_v3 = vrot.slane %v5276_v46, 3  ;;  %v5474_v9 = vrot.slane %v5277_v58, 2 }
 0xb47   :  { %10375 = vmatprep.subr.bf16.mxu0 %v10988_v25  ;;  %v5507_v24 = vsel %vm2813_vm1, %v5506_v2, %v5295_v48  ;;  %v5299_v17 = vld [vmem:[#allocation2 + $0x170] sm:$0x1]  ;;  %v5496_v18 = vrot.slane %v5290_v61, 5  ;;  %v5488_v22 = vrot.slane %v5285_v1, 2  ;;  %v5292_v40 = vld [vmem:[#allocation2 + $0x154] sm:$0x1] }
 0xb48   :  { %v5509_v23 = vsel %vm2816_vm2, %v5508_v0, %v5507_v24  ;;  %v5313_v21 = vld [vmem:[#allocation2 + $0x1a8] sm:$0x1]  ;;  %v5520_v30 = vrot.slane %v5304_v12, 7  ;;  %v5534_v31 = vrot.slane %v5312_v13, 7  ;;  %v5498_v62 = vrot.slane %v5291_v16, 4 }
 0xb49   :  { %v5512_v33 = vrot.slane %v5299_v17, 4  ;;  %v5311_v36 = vld [vmem:[#allocation2 + $0x1a0] sm:$0x1]  ;;  %v5293_v54 = vld [vmem:[#allocation2 + $0x158] sm:$0x1]  ;;  %v5522_v46 = vrot.slane %v5305_v29, 6 }
 0xb4a   :  { %v5535_v2 = vsel %vm2813_vm1, %v5534_v31, %v5311_v36  ;;  %v5320_v58 = vld [vmem:[#allocation2 + $0x1c4] sm:$0x1]  ;;  %v5316_v24 = vld [vmem:[#allocation2 + $0x1b4] sm:$0x1]  ;;  %v5329_v12 = vld [vmem:[#allocation2 + $0x1e8] sm:$0x1] }
 0xb4b   :  { %v11848_v8 = vpop.eup %10727  ;;  %v5548_v13 = vrot.slane %v5320_v58, 7 }
 0xb4c   :  { %v5001_v57 = vsel %vm3013_vm9, %v11848_v8, 0.0 }
 0xb4d   :  { %5002 = vadd.xlane.f32.xlu1 %v5001_v57  ;;  %v5158_v57 = vrot.slane %v4726_v53, 5  ;;  %v5288_v53 = vld [vmem:[#allocation2 + $0x144] sm:$0x1] }
 0xb4e   :  { %v5492_v55 = vrot.slane %v5288_v53, 7 }
 0xb4f   :  { %v5159_v19 = vsel %vm2819_vm3, %v5158_v57, %v5157_v15  ;;  %v5484_v57 = vrot.slane %v5283_v43, 4  ;;  %v5298_v15 = vld [vmem:[#allocation2 + $0x16c] sm:$0x1] }
 0xb50   :  { %v5161_v5 = vsel %vm2822_vm4, %v5160_v59, %v5159_v19  ;;  %v5469_v59 = vsel %vm2819_vm3, %v5468_v44, %v5467_v49  ;;  %v5486_v19 = vrot.slane %v5284_v47, 3  ;;  %v5493_v4 = vsel %vm2813_vm1, %v5492_v55, %v5287_v11  ;;  %v5306_v44 = vld [vmem:[#allocation2 + $0x18c] sm:$0x1]  ;;  %v5294_v49 = vld [vmem:[#allocation2 + $0x15c] sm:$0x1] }
 0xb51   :  { %v5163_v10 = vsel %vm2825_vm5, %v5162_v60, %v5161_v5  ;;  %v5483_v60 = vsel %vm2819_vm3, %v5482_v45, %v5481_v50  ;;  %v5278_v5 = vld [vmem:[#allocation2 + $0x11c] sm:$0x1]  ;;  %v5471_v7 = vsel %vm2822_vm4, %v5470_v56, %v5469_v59  ;;  %v5314_v45 = vld [vmem:[#allocation2 + $0x1ac] sm:$0x1]  ;;  %v5536_v47 = vrot.slane %v5313_v21, 6 }
 0xb52   :  { %v5165_v14 = vsel %vm2828_vm6, %v5164_v63, %v5163_v10  ;;  %v5494_v63 = vrot.slane %v5289_v51, 6  ;;  %v5485_v10 = vsel %vm2822_vm4, %v5484_v57, %v5483_v60  ;;  %v5473_v26 = vsel %vm2825_vm5, %v5472_v3, %v5471_v7  ;;  %v5301_v50 = vld [vmem:[#allocation2 + $0x178] sm:$0x1]  ;;  %v5302_v56 = vld [vmem:[#allocation2 + $0x17c] sm:$0x1] }
 0xb53   :  { %v5167_v20 = vsel %vm2831_vm7, %v5166_v6, %v5165_v14  ;;  %v5286_v6 = vld [vmem:[#allocation2 + $0x13c] sm:$0x1]  ;;  %v5487_v28 = vsel %vm2825_vm5, %v5486_v19, %v5485_v10  ;;  %v5476_v37 = vrot.slane %v5278_v5, 1  ;;  %v5475_v42 = vsel %vm2828_vm6, %v5474_v9, %v5473_v26  ;;  %v5328_v59 = vld [vmem:[#allocation2 + $0x1e4] sm:$0x1] }
 0xb54   :  { %v10376_v35 = vpack.c.bf16 %v5181_v39, %v5167_v20  ;;  %v5510_v20 = vrot.slane %v5298_v15, 5  ;;  %v5300_v39 = vld [vmem:[#allocation2 + $0x174] sm:$0x1]  ;;  %v5490_v38 = vrot.slane %v5286_v6, 1  ;;  %v5489_v43 = vsel %vm2828_vm6, %v5488_v22, %v5487_v28  ;;  %v5307_v15 = vld [vmem:[#allocation2 + $0x190] sm:$0x1] }
 0xb55   :  { %v5500_v51 = vrot.slane %v5292_v40, 3  ;;  %v5514_v52 = vrot.slane %v5300_v39, 3  ;;  %v5521_v55 = vsel %vm2813_vm1, %v5520_v30, %v5303_v34  ;;  %v5502_v11 = vrot.slane %v5293_v54, 2  ;;  %v5321_v10 = vld [vmem:[#allocation2 + $0x1c8] sm:$0x1] }
 0xb56   :  { %10377 = vmatpush3.bf16.msra.mxu0 %v10376_v35  ;;  %v5495_v35 = vsel %vm2816_vm2, %v5494_v63, %v5493_v4  ;;  %v5511_v41 = vsel %vm2819_vm3, %v5510_v20, %v5509_v23  ;;  %v5477_v60 = vsel %vm2831_vm7, %v5476_v37, %v5475_v42  ;;  %v5491_v61 = vsel %vm2831_vm7, %v5490_v38, %v5489_v43  ;;  %v5315_v63 = vld [vmem:[#allocation2 + $0x1b0] sm:$0x1]  ;;  %v5308_v4 = vld [vmem:[#allocation2 + $0x194] sm:$0x1]  ;;  %v5319_v22 = vld [vmem:[#allocation2 + $0x1c0] sm:$0x1] }
 0xb57   :  { %10378 = vmatprep.subr.bf16.mxu0 %v10988_v25  ;;  %v5497_v53 = vsel %vm2819_vm3, %v5496_v18, %v5495_v35  ;;  %v5513_v48 = vsel %vm2822_vm4, %v5512_v33, %v5511_v41  ;;  %v5524_v0 = vrot.slane %v5306_v44, 5  ;;  %v5538_v1 = vrot.slane %v5314_v45, 5  ;;  %v5327_v40 = vld [vmem:[#allocation2 + $0x1e0] sm:$0x1]  ;;  %v5322_v21 = vld [vmem:[#allocation2 + $0x1cc] sm:$0x1] }
 0xb58   :  { %v5499_v57 = vsel %vm2822_vm4, %v5498_v62, %v5497_v53  ;;  %v5504_v3 = vrot.slane %v5294_v49, 1  ;;  %v5516_v19 = vrot.slane %v5301_v50, 2  ;;  %v5523_v5 = vsel %vm2816_vm2, %v5522_v46, %v5521_v55  ;;  %v5330_v30 = vld [vmem:[#allocation2 + $0x1ec] sm:$0x1]  ;;  %v5309_v33 = vld [vmem:[#allocation2 + $0x198] sm:$0x1] }
 0xb59   :  { %v5537_v6 = vsel %vm2816_vm2, %v5536_v47, %v5535_v2  ;;  %v5501_v7 = vsel %vm2825_vm5, %v5500_v51, %v5499_v57  ;;  %v5515_v9 = vsel %vm2825_vm5, %v5514_v52, %v5513_v48  ;;  %v10379_v17 = vpack.c.bf16 %v5491_v61, %v5477_v60  ;;  %v5317_v34 = vld [vmem:[#allocation2 + $0x1b8] sm:$0x1]  ;;  %v5323_v43 = vld [vmem:[#allocation2 + $0x1d0] sm:$0x1]  ;;  %v5310_v47 = vld [vmem:[#allocation2 + $0x19c] sm:$0x1] }
 0xb5a   :  { %v5526_v18 = vrot.slane %v5307_v15, 4  ;;  %v5540_v20 = vrot.slane %v5315_v63, 4  ;;  %v5518_v35 = vrot.slane %v5302_v56, 1  ;;  %v5525_v23 = vsel %vm2819_vm3, %v5524_v0, %v5523_v5  ;;  %v5331_v44 = vld [vmem:[#allocation2 + $0x1f0] sm:$0x1] }
 0xb5b   :  { %v5539_v26 = vsel %vm2819_vm3, %v5538_v1, %v5537_v6  ;;  %v5503_v28 = vsel %vm2828_vm6, %v5502_v11, %v5501_v7  ;;  %v5517_v29 = vsel %vm2828_vm6, %v5516_v19, %v5515_v9  ;;  %v5550_v31 = vrot.slane %v5321_v10, 6  ;;  %v5318_v49 = vld [vmem:[#allocation2 + $0x1bc] sm:$0x1]  ;;  %v5324_v11 = vld [vmem:[#allocation2 + $0x1d4] sm:$0x1] }
 0xb5c   :  { %v5564_v62 = vrot.slane %v5329_v12, 6  ;;  %v5528_v36 = vrot.slane %v5308_v4, 3  ;;  %v5542_v37 = vrot.slane %v5316_v24, 3  ;;  %v5527_v54 = vsel %vm2822_vm4, %v5526_v18, %v5525_v23  ;;  %v5332_v48 = vld [vmem:[#allocation2 + $0x1f4] sm:$0x1] }
 0xb5d   :  { %v5541_v53 = vsel %vm2822_vm4, %v5540_v20, %v5539_v26  ;;  %v5505_v41 = vsel %vm2831_vm7, %v5504_v3, %v5503_v28  ;;  %v5519_v42 = vsel %vm2831_vm7, %v5518_v35, %v5517_v29  ;;  %v5552_v45 = vrot.slane %v5322_v21, 5  ;;  %v5325_v3 = vld [vmem:[#allocation2 + $0x1d8] sm:$0x1]  ;;  %v5326_v10 = vld [vmem:[#allocation2 + $0x1dc] sm:$0x1] }
 0xb5e   :  { %v5566_v46 = vrot.slane %v5330_v30, 5  ;;  %v5530_v50 = vrot.slane %v5309_v33, 2  ;;  %v5544_v51 = vrot.slane %v5317_v34, 2  ;;  %v5529_v2 = vsel %vm2825_vm5, %v5528_v36, %v5527_v54  ;;  %v5333_v19 = vld [vmem:[#allocation2 + $0x1f8] sm:$0x1] }
 0xb5f   :  { %v5543_v56 = vsel %vm2825_vm5, %v5542_v37, %v5541_v53  ;;  %v10382_v57 = vpack.c.bf16 %v5519_v42, %v5505_v41  ;;  %v5554_v58 = vrot.slane %v5323_v43, 4  ;;  %v5532_v60 = vrot.slane %v5310_v47, 1  ;;  %v5334_v12 = vld [vmem:[#allocation2 + $0x1fc] sm:$0x1]  ;;  %v5269_v28 = vld [vmem:[#allocation4 + $0x2] sm:$0x3] }
 0xb60   :  { %v5546_v61 = vrot.slane %v5318_v49, 1  ;;  %v5531_v0 = vsel %vm2828_vm6, %v5530_v50, %v5529_v2  ;;  %v5545_v1 = vsel %vm2828_vm6, %v5544_v51, %v5543_v56  ;;  %v5556_v4 = vrot.slane %v5324_v11, 3  ;;  %v5337_v37 = vld [vmem:[#allocation3 + $0x104] sm:$0x1]  ;;  %v5336_v54 = vld [vmem:[#allocation3 + $0x100] sm:$0x1] }
 0xb61   :  { %v5570_v24 = vrot.slane %v5332_v48, 3  ;;  %v5533_v7 = vsel %vm2831_vm7, %v5532_v60, %v5531_v0  ;;  %v5560_v20 = vrot.slane %v5326_v10, 1  ;;  %v5340_v53 = vld [vmem:[#allocation3 + $0x110] sm:$0x1]  ;;  %v5341_v41 = vld [vmem:[#allocation3 + $0x114] sm:$0x1] }
 0xb62   :  { %v5547_v9 = vsel %vm2831_vm7, %v5546_v61, %v5545_v1  ;;  %v5342_v42 = vld [vmem:[#allocation3 + $0x118] sm:$0x1]  ;;  %v5343_v43 = vld [vmem:[#allocation3 + $0x11c] sm:$0x1]  ;;  %v5347_v47 = vld [vmem:[#allocation3 + $0x12c] sm:$0x1] }
 0xb63   :  { %v10385_v18 = vpack.c.bf16 %v5547_v9, %v5533_v7  ;;  %v5348_v49 = vld [vmem:[#allocation3 + $0x130] sm:$0x1]  ;;  %v5349_v50 = vld [vmem:[#allocation3 + $0x134] sm:$0x1]  ;;  %v5350_v51 = vld [vmem:[#allocation3 + $0x138] sm:$0x1] }
 0xb64   :  { %v5351_v56 = vld [vmem:[#allocation3 + $0x13c] sm:$0x1]  ;;  %v5739_v11 = vrot.slane %v5341_v41, 3  ;;  %v5741_v48 = vrot.slane %v5342_v42, 2  ;;  %v5749_v61 = vrot.slane %v5347_v47, 5  ;;  %v5743_v1 = vrot.slane %v5343_v43, 1 }
 0xb65   :  { %v5366_v41 = vld [vmem:[#allocation3 + $0x178] sm:$0x1] }
 0xbda   :  { %v5003_v14 = vpop.xlane.xlu1 %5002 }
 0xbdb   :  { %10729 = vrcp.f32 %v5003_v14  ;;  %v5562_v14 = vrot.slane %v5328_v59, 7  ;;  %v5568_v59 = vrot.slane %v5331_v44, 4  ;;  %v5344_v44 = vld [vmem:[#allocation3 + $0x120] sm:$0x1] }
 0xbdd   :  { %v5563_v38 = vsel %vm2813_vm1, %v5562_v14, %v5327_v40  ;;  %v5572_v14 = vrot.slane %v5333_v19, 2  ;;  %v5753_v19 = vrot.slane %v5349_v50, 3 }
 0xbde   :  { %v5565_v55 = vsel %vm2816_vm2, %v5564_v62, %v5563_v38  ;;  %v5339_v38 = vld [vmem:[#allocation3 + $0x10c] sm:$0x1] }
 0xbdf   :  { %v5567_v63 = vsel %vm2819_vm3, %v5566_v46, %v5565_v55  ;;  %v5346_v46 = vld [vmem:[#allocation3 + $0x128] sm:$0x1]  ;;  %v5735_v2 = vrot.slane %v5339_v38, 5 }
 0xbe0   :  { %v5569_v6 = vsel %vm2822_vm4, %v5568_v59, %v5567_v63  ;;  %v5747_v60 = vrot.slane %v5346_v46, 6  ;;  %v5353_v63 = vld [vmem:[#allocation3 + $0x144] sm:$0x1] }
 0xbe1   :  { %v5759_v7 = vrot.slane %v5353_v63, 7 }
 0xbe5   :  { %v10730_v16 = vpop.eup %10729 }
 0xbe6   :  { %v5005_v39 = vmul.f32 %v10730_v16, %v11848_v8  ;;  %v5549_v8 = vsel %vm2813_vm1, %v5548_v13, %v5319_v22  ;;  %v5558_v13 = vrot.slane %v5325_v3, 2  ;;  %v5574_v22 = vrot.slane %v5334_v12, 1 }
 0xbe7   :  { %v5551_v52 = vsel %vm2816_vm2, %v5550_v31, %v5549_v8  ;;  %v5338_v8 = vld [vmem:[#allocation3 + $0x108] sm:$0x1]  ;;  %v5757_v12 = vrot.slane %v5351_v56, 1 }
 0xbe8   :  { %9984 = vmatmul.mubr.msk.f32.vlgmr.msra.gmra.mrb[20].mxu0 %vm3209_vm10, %v5005_v39  ;;  %v5553_v15 = vsel %vm2819_vm3, %v5552_v45, %v5551_v52  ;;  %v5345_v45 = vld [vmem:[#allocation3 + $0x124] sm:$0x1]  ;;  %v5731_v52 = vrot.slane %v5337_v37, 7  ;;  %v5733_v55 = vrot.slane %v5338_v8, 6  ;;  %v5360_v37 = vld [vmem:[#allocation3 + $0x160] sm:$0x1] }
 0xbe9   :  { %10380 = vmatpush3.bf16.xpose.msra.mxu0 %v10379_v17  ;;  %10002 = vmatprep.mubr.msk.f32.mxu0 %vm10989_vm0, %v10990_v27  ;;  %v5555_v5 = vsel %vm2822_vm4, %v5554_v58, %v5553_v15  ;;  %v5571_v17 = vsel %vm2825_vm5, %v5570_v24, %v5569_v6  ;;  %v5745_v58 = vrot.slane %v5345_v45, 7  ;;  %v5751_v15 = vrot.slane %v5348_v49, 4  ;;  %v5352_v6 = vld [vmem:[#allocation3 + $0x140] sm:$0x1]  ;;  %v5365_v8 = vld [vmem:[#allocation3 + $0x174] sm:$0x1] }
 0xbea   :  { %10381 = vmatprep.subr.bf16.mxu0 %v10988_v25  ;;  %v5557_v16 = vsel %vm2825_vm5, %v5556_v4, %v5555_v5  ;;  %v5573_v39 = vsel %vm2828_vm6, %v5572_v14, %v5571_v17  ;;  %v5732_v59 = vsel %vm2813_vm1, %v5731_v52, %v5336_v54  ;;  %v5755_v5 = vrot.slane %v5350_v51, 2  ;;  %v5355_v14 = vld [vmem:[#allocation3 + $0x14c] sm:$0x1]  ;;  %v5367_v45 = vld [vmem:[#allocation3 + $0x17c] sm:$0x1] }
 0xbeb   :  { %v5559_v40 = vsel %vm2828_vm6, %v5558_v13, %v5557_v16  ;;  %v5575_v23 = vsel %vm2831_vm7, %v5574_v22, %v5573_v39  ;;  %v5734_v0 = vsel %vm2816_vm2, %v5733_v55, %v5732_v59  ;;  %v5746_v3 = vsel %vm2813_vm1, %v5745_v58, %v5344_v44  ;;  %v5354_v13 = vld [vmem:[#allocation3 + $0x148] sm:$0x1]  ;;  %v5358_v22 = vld [vmem:[#allocation3 + $0x158] sm:$0x1] }
 0xbec   :  { %v5561_v35 = vsel %vm2831_vm7, %v5560_v20, %v5559_v40  ;;  %v5736_v4 = vsel %vm2819_vm3, %v5735_v2, %v5734_v0  ;;  %v5748_v24 = vsel %vm2816_vm2, %v5747_v60, %v5746_v3  ;;  %v5357_v20 = vld [vmem:[#allocation3 + $0x154] sm:$0x1]  ;;  %v5769_v43 = vrot.slane %v5358_v22, 2 }
 0xbed   :  { %v10388_v26 = vpack.c.bf16 %v5575_v23, %v5561_v35  ;;  %v5750_v10 = vsel %vm2819_vm3, %v5749_v61, %v5748_v24  ;;  %v5359_v35 = vld [vmem:[#allocation3 + $0x15c] sm:$0x1]  ;;  %v5361_v23 = vld [vmem:[#allocation3 + $0x164] sm:$0x1]  ;;  %v5767_v54 = vrot.slane %v5357_v20, 3  ;;  %v5781_v2 = vrot.slane %v5365_v8, 3 }
 0xbee   :  { %v5752_v17 = vsel %vm2822_vm4, %v5751_v15, %v5750_v10  ;;  %v5773_v44 = vrot.slane %v5361_v23, 7  ;;  %v5771_v52 = vrot.slane %v5359_v35, 1  ;;  %v5785_v59 = vrot.slane %v5367_v45, 1  ;;  %v5378_v10 = vld [vmem:[#allocation3 + $0x1a8] sm:$0x1] }
 0xbef   :  { %v5754_v39 = vsel %vm2825_vm5, %v5753_v19, %v5752_v17  ;;  %v5376_v17 = vld [vmem:[#allocation3 + $0x1a0] sm:$0x1]  ;;  %v5379_v20 = vld [vmem:[#allocation3 + $0x1ac] sm:$0x1]  ;;  %v5385_v45 = vld [vmem:[#allocation3 + $0x1c4] sm:$0x1] }
 0xbf0   :  { %v5774_v55 = vsel %vm2813_vm1, %v5773_v44, %v5360_v37  ;;  %v5803_v37 = vrot.slane %v5378_v10, 6 }
 0xbf1   :  { %10383 = vmatpush3.bf16.xpose.msra.mxu0 %v10382_v57  ;;  %v5737_v57 = vrot.slane %v5340_v53, 4 }
 0xbf2   :  { %10384 = vmatprep.subr.bf16.mxu0 %v10988_v25 }
 0xbf3   :  { %v5738_v9 = vsel %vm2822_vm4, %v5737_v57, %v5736_v4 }
 0xbf4   :  { %v5740_v16 = vsel %vm2825_vm5, %v5739_v11, %v5738_v9  ;;  %v5783_v11 = vrot.slane %v5366_v41, 2  ;;  %v5370_v9 = vld [vmem:[#allocation3 + $0x188] sm:$0x1] }
 0xbf5   :  { %v5742_v40 = vsel %vm2828_vm6, %v5741_v48, %v5740_v16  ;;  %v5371_v16 = vld [vmem:[#allocation3 + $0x18c] sm:$0x1]  ;;  %v5789_v35 = vrot.slane %v5370_v9, 6  ;;  %v5397_v9 = vld [vmem:[#allocation3 + $0x1f4] sm:$0x1] }
 0xbf6   :  { %v5791_v23 = vrot.slane %v5371_v16, 5 }
 0xbf9   :  { %10386 = vmatpush3.bf16.xpose.msra.mxu0 %v10385_v18  ;;  %v5356_v18 = vld [vmem:[#allocation3 + $0x150] sm:$0x1] }
 0xbfa   :  { %10387 = vmatprep.subr.bf16.mxu0 %v10988_v25  ;;  %v5765_v38 = vrot.slane %v5356_v18, 4  ;;  %v5372_v18 = vld [vmem:[#allocation3 + $0x190] sm:$0x1] }
 0xc01   :  { %10389 = vmatpush3.bf16.xpose.msra.mxu0 %v10388_v26  ;;  %v5362_v26 = vld [vmem:[#allocation3 + $0x168] sm:$0x1] }
 0xc02   :  { %10414 = vmatprep.subr.bf16.mxu0 %v10988_v25  ;;  %v5775_v47 = vrot.slane %v5362_v26, 6  ;;  %v5374_v26 = vld [vmem:[#allocation3 + $0x198] sm:$0x1] }
 0xc04   :  { %v5776_v57 = vsel %vm2816_vm2, %v5775_v47, %v5774_v55 }
 0xc08   :  { %10003 = vmatmul.mubr.f32.vlgmr.msra.gmra.mrb[22].mxu0 %v5269_v28  ;;  %v5760_v28 = vsel %vm2813_vm1, %v5759_v7, %v5352_v6  ;;  %v5369_v6 = vld [vmem:[#allocation3 + $0x184] sm:$0x1] }
 0xc09   :  { %10059 = vmatprep.mubr.msk.f32.mxu0 %vm10989_vm0, %v10990_v27  ;;  %v5377_v7 = vld [vmem:[#allocation3 + $0x1a4] sm:$0x1] }
 0xcbb   :  { %v5259_v29 = vpop.f32.mrb[20].mxu0 }
 0xcbc   :  { %5263 = vst [vmem:[#allocation7 + $0x3] sm:$0x1] %v5259_v29  ;;  %v9196_v21 = vrot.slane %v5259_v29, 9  ;;  %v9985_v30 = vpop.f32.mrb[21].mxu0  ;;  %v5744_v29 = vsel %vm2831_vm7, %v5743_v1, %v5742_v40  ;;  %v5373_v40 = vld [vmem:[#allocation3 + $0x194] sm:$0x1] }
 0xcbd   :  { %v5363_v30 = vld [vmem:[#allocation3 + $0x16c] sm:$0x1] }
 0xcbe   :  { %5268 = vst [vmem:[#allocation7 + $0x7] sm:$0x1] %v9196_v21  ;;  %v5756_v21 = vsel %vm2828_vm6, %v5755_v5, %v5754_v39  ;;  %v5777_v49 = vrot.slane %v5363_v30, 5  ;;  %v5381_v39 = vld [vmem:[#allocation3 + $0x1b4] sm:$0x1] }
 0xcc0   :  { %v5778_v58 = vsel %vm2819_vm3, %v5777_v49, %v5776_v57 }
 0xcdb   :  { %v5650_v31 = vpop.f32.mrb[22].mxu0 }
 0xcdc   :  { %v5654_v62 = vmul.f32 0.088388346, %v5650_v31  ;;  %v10004_v33 = vpop.f32.mrb[23].mxu0  ;;  %v5364_v31 = vld [vmem:[#allocation3 + $0x170] sm:$0x1] }
 0xcdd   :  { %v5763_v33 = vrot.slane %v5355_v14, 5  ;;  %v5779_v50 = vrot.slane %v5364_v31, 4  ;;  %v5368_v14 = vld [vmem:[#allocation3 + $0x180] sm:$0x1]  ;;  %v5375_v31 = vld [vmem:[#allocation3 + $0x19c] sm:$0x1] }
 0xcde   :  { %v11950_v34 = vsel %vm11394_vm8, %v5654_v62, -1e+30  ;;  %v5761_v62 = vrot.slane %v5354_v13, 6  ;;  %v5801_v13 = vrot.slane %v5377_v7, 7  ;;  %v5392_v7 = vld [vmem:[#allocation3 + $0x1e0] sm:$0x1] }
 0xcdf   :  { %v5656_v36 = vsel %vm3013_vm9, %v11950_v34, -inf  ;;  %v5780_v60 = vsel %vm2822_vm4, %v5779_v50, %v5778_v58  ;;  %v5384_v50 = vld [vmem:[#allocation3 + $0x1c0] sm:$0x1]  ;;  %v5389_v58 = vld [vmem:[#allocation3 + $0x1d4] sm:$0x1] }
 0xce0   :  { %5657 = vmax.xlane.f32.xlu0 %v5656_v36  ;;  %v5758_v36 = vsel %vm2831_vm7, %v5757_v12, %v5756_v21  ;;  %v5762_v42 = vsel %vm2816_vm2, %v5761_v62, %v5760_v28  ;;  %v5782_v15 = vsel %vm2825_vm5, %v5781_v2, %v5780_v60  ;;  %v5787_v12 = vrot.slane %v5369_v6, 7  ;;  %v5382_v28 = vld [vmem:[#allocation3 + $0x1b8] sm:$0x1]  ;;  %v5383_v62 = vld [vmem:[#allocation3 + $0x1bc] sm:$0x1] }
 0xce1   :  { %v10391_v53 = vpack.c.bf16 %v5758_v36, %v5744_v29  ;;  %v5764_v46 = vsel %vm2819_vm3, %v5763_v33, %v5762_v42  ;;  %v5784_v63 = vsel %vm2828_vm6, %v5783_v11, %v5782_v15  ;;  %v5793_v29 = vrot.slane %v5372_v18, 4  ;;  %v5386_v2 = vld [vmem:[#allocation3 + $0x1c8] sm:$0x1]  ;;  %v5393_v15 = vld [vmem:[#allocation3 + $0x1e4] sm:$0x1] }
 0xce2   :  { %v5766_v51 = vsel %vm2822_vm4, %v5765_v38, %v5764_v46  ;;  %v5786_v0 = vsel %vm2831_vm7, %v5785_v59, %v5784_v63  ;;  %v5788_v22 = vsel %vm2813_vm1, %v5787_v12, %v5368_v14  ;;  %v5795_v21 = vrot.slane %v5373_v40, 3  ;;  %v5390_v59 = vld [vmem:[#allocation3 + $0x1d8] sm:$0x1]  ;;  %v5394_v63 = vld [vmem:[#allocation3 + $0x1e8] sm:$0x1] }
 0xce3   :  { %10392 = vmatpush3.bf16.msra.mxu1 %v10391_v53  ;;  %v5768_v56 = vsel %vm2825_vm5, %v5767_v54, %v5766_v51  ;;  %v5802_v30 = vsel %vm2813_vm1, %v5801_v13, %v5376_v17  ;;  %v5790_v33 = vsel %vm2816_vm2, %v5789_v35, %v5788_v22  ;;  %v5797_v36 = vrot.slane %v5374_v26, 2  ;;  %v5398_v13 = vld [vmem:[#allocation3 + $0x1f8] sm:$0x1] }
 0xce4   :  { %10393 = vmatprep.subr.bf16.mxu1 %v10988_v25  ;;  %v5770_v48 = vsel %vm2828_vm6, %v5769_v43, %v5768_v56  ;;  %v5792_v8 = vsel %vm2819_vm3, %v5791_v23, %v5790_v33  ;;  %v5799_v38 = vrot.slane %v5375_v31, 1  ;;  %v5805_v54 = vrot.slane %v5379_v20, 5  ;;  %v5387_v56 = vld [vmem:[#allocation3 + $0x1cc] sm:$0x1]  ;;  %v5399_v20 = vld [vmem:[#allocation3 + $0x1fc] sm:$0x1] }
 0xce5   :  { %v5772_v61 = vsel %vm2831_vm7, %v5771_v52, %v5770_v48  ;;  %v5794_v41 = vsel %vm2822_vm4, %v5793_v29, %v5792_v8  ;;  %v5804_v42 = vsel %vm2816_vm2, %v5803_v37, %v5802_v30  ;;  %v5809_v43 = vrot.slane %v5381_v39, 3  ;;  %v5388_v48 = vld [vmem:[#allocation3 + $0x1d0] sm:$0x1] }
 0xce6   :  { %v10394_v1 = vpack.c.bf16 %v5786_v0, %v5772_v61  ;;  %v5811_v44 = vrot.slane %v5382_v28, 2  ;;  %v5796_v46 = vsel %vm2825_vm5, %v5795_v21, %v5794_v41  ;;  %v5806_v47 = vsel %vm2819_vm3, %v5805_v54, %v5804_v42  ;;  %v5391_v61 = vld [vmem:[#allocation3 + $0x1dc] sm:$0x1]  ;;  %v5940_v41 = vld [vmem:[#allocation2 + $0x125] sm:$0x1] }
 0xce7   :  { %v5813_v49 = vrot.slane %v5383_v62, 1  ;;  %v5815_v51 = vrot.slane %v5385_v45, 7  ;;  %v5798_v52 = vsel %vm2828_vm6, %v5797_v36, %v5796_v46  ;;  %v5821_v10 = vrot.slane %v5388_v48, 4  ;;  %v5933_v42 = vld [vmem:[#allocation2 + $0x109] sm:$0x1] }
 0xce8   :  { %10395 = vmatpush3.bf16.msra.mxu1 %v10394_v1  ;;  %v5800_v57 = vsel %vm2831_vm7, %v5799_v38, %v5798_v52  ;;  %v5823_v12 = vrot.slane %v5389_v58, 3  ;;  %v5825_v16 = vrot.slane %v5390_v59, 2  ;;  %v5829_v17 = vrot.slane %v5393_v15, 7  ;;  %v5931_v46 = vld [vmem:[#allocation2 + $0x101] sm:$0x1] }
 0xce9   :  { %10396 = vmatprep.subr.bf16.mxu1 %v10988_v25  ;;  %v5816_v0 = vsel %vm2813_vm1, %v5815_v51, %v5384_v50  ;;  %v5831_v18 = vrot.slane %v5394_v63, 6  ;;  %v5827_v35 = vrot.slane %v5391_v61, 1  ;;  %v5837_v26 = vrot.slane %v5397_v9, 3  ;;  %v5942_v50 = vld [vmem:[#allocation2 + $0x12d] sm:$0x1] }
 0xcea   :  { %v5830_v23 = vsel %vm2813_vm1, %v5829_v17, %v5392_v7  ;;  %v5839_v21 = vrot.slane %v5398_v13, 2  ;;  %v5841_v62 = vrot.slane %v5399_v20, 1  ;;  %v6137_v45 = vrot.slane %v5940_v41, 7  ;;  %v5943_v48 = vld [vmem:[#allocation2 + $0x131] sm:$0x1] }
 0xceb   :  { %v5832_v29 = vsel %vm2816_vm2, %v5831_v18, %v5830_v23  ;;  %v6125_v51 = vrot.slane %v5933_v42, 6  ;;  %v6141_v59 = vrot.slane %v5942_v50, 5  ;;  %v5944_v61 = vld [vmem:[#allocation2 + $0x135] sm:$0x1]  ;;  %v5955_v7 = vld [vmem:[#allocation2 + $0x161] sm:$0x1] }
 0xcec   :  { %v5937_v9 = vld [vmem:[#allocation2 + $0x119] sm:$0x1]  ;;  %v5950_v13 = vld [vmem:[#allocation2 + $0x14d] sm:$0x1]  ;;  %v5963_v50 = vld [vmem:[#allocation2 + $0x181] sm:$0x1] }
 0xced   :  { %v5945_v18 = vld [vmem:[#allocation2 + $0x139] sm:$0x1] }
 0xd6d   :  { %v5658_v3 = vpop.xlane.xlu0 %5657 }
 0xd6e   :  { %v5659_v19 = vsub.f32 %v11950_v34, %v5658_v3  ;;  %v5380_v34 = vld [vmem:[#allocation3 + $0x1b0] sm:$0x1]  ;;  %v5395_v3 = vld [vmem:[#allocation3 + $0x1ec] sm:$0x1] }
 0xd6f   :  { %v5807_v53 = vrot.slane %v5380_v34, 4  ;;  %v5833_v22 = vrot.slane %v5395_v3, 5 }
 0xd70   :  { %v5660_v4 = vmul.f32 1.442695, %v5659_v19  ;;  %v5396_v19 = vld [vmem:[#allocation3 + $0x1f0] sm:$0x1] }
 0xd71   :  { %v5808_v55 = vsel %vm2822_vm4, %v5807_v53, %v5806_v47  ;;  %v5835_v40 = vrot.slane %v5396_v19, 4  ;;  %v5834_v31 = vsel %vm2819_vm3, %v5833_v22, %v5832_v29  ;;  %v5932_v53 = vld [vmem:[#allocation2 + $0x105] sm:$0x1]  ;;  %v5939_v47 = vld [vmem:[#allocation2 + $0x121] sm:$0x1] }
 0xd72   :  { %10731 = vpow2.f32 %v5660_v4  ;;  %v5810_v11 = vsel %vm2825_vm5, %v5809_v43, %v5808_v55  ;;  %v5817_v4 = vrot.slane %v5386_v2, 6  ;;  %v5941_v43 = vld [vmem:[#allocation2 + $0x129] sm:$0x1]  ;;  %v6138_v2 = vsel %vm2813_vm1, %v6137_v45, %v5939_v47  ;;  %v5964_v29 = vld [vmem:[#allocation2 + $0x185] sm:$0x1] }
 0xd73   :  { %v5812_v60 = vsel %vm2828_vm6, %v5811_v44, %v5810_v11  ;;  %v5836_v33 = vsel %vm2822_vm4, %v5835_v40, %v5834_v31  ;;  %v6123_v44 = vrot.slane %v5932_v53, 7  ;;  %v6139_v52 = vrot.slane %v5941_v43, 6  ;;  %v5935_v11 = vld [vmem:[#allocation2 + $0x111] sm:$0x1]  ;;  %v5965_v43 = vld [vmem:[#allocation2 + $0x189] sm:$0x1] }
 0xd74   :  { %v5814_v1 = vsel %vm2831_vm7, %v5813_v49, %v5812_v60  ;;  %v5818_v14 = vsel %vm2816_vm2, %v5817_v4, %v5816_v0  ;;  %v5838_v37 = vsel %vm2825_vm5, %v5837_v26, %v5836_v33  ;;  %v5934_v49 = vld [vmem:[#allocation2 + $0x10d] sm:$0x1]  ;;  %v5936_v60 = vld [vmem:[#allocation2 + $0x115] sm:$0x1]  ;;  %v5949_v0 = vld [vmem:[#allocation2 + $0x149] sm:$0x1] }
 0xd75   :  { %v10397_v6 = vpack.c.bf16 %v5814_v1, %v5800_v57  ;;  %v5840_v8 = vsel %vm2828_vm6, %v5839_v21, %v5838_v37  ;;  %v6124_v55 = vsel %vm2813_vm1, %v6123_v44, %v5931_v46  ;;  %v5956_v57 = vld [vmem:[#allocation2 + $0x165] sm:$0x1]  ;;  %v6127_v58 = vrot.slane %v5934_v49, 5  ;;  %v5957_v1 = vld [vmem:[#allocation2 + $0x169] sm:$0x1] }
 0xd76   :  { %v5842_v38 = vsel %vm2831_vm7, %v5841_v62, %v5840_v8  ;;  %v6126_v15 = vsel %vm2816_vm2, %v6125_v51, %v6124_v55  ;;  %v6140_v63 = vsel %vm2816_vm2, %v6139_v52, %v6138_v2  ;;  %v6165_v19 = vrot.slane %v5956_v57, 7  ;;  %v5972_v21 = vld [vmem:[#allocation2 + $0x1a5] sm:$0x1]  ;;  %v5951_v31 = vld [vmem:[#allocation2 + $0x151] sm:$0x1] }
 0xd77   :  { %10398 = vmatpush3.bf16.msra.mxu1 %v10397_v6  ;;  %v6129_v4 = vrot.slane %v5935_v11, 4  ;;  %v5947_v6 = vld [vmem:[#allocation2 + $0x141] sm:$0x1]  ;;  %v6167_v17 = vrot.slane %v5957_v1, 6  ;;  %v6131_v20 = vrot.slane %v5936_v60, 3  ;;  %v6133_v26 = vrot.slane %v5937_v9, 2 }
 0xd78   :  { %10399 = vmatprep.subr.bf16.mxu1 %v10988_v25  ;;  %v6166_v40 = vsel %vm2813_vm1, %v6165_v19, %v5955_v7  ;;  %v5959_v62 = vld [vmem:[#allocation2 + $0x171] sm:$0x1]  ;;  %v6155_v33 = vrot.slane %v5950_v13, 5  ;;  %v6147_v37 = vrot.slane %v5945_v18, 2  ;;  %v5952_v8 = vld [vmem:[#allocation2 + $0x155] sm:$0x1] }
 0xd79   :  { %v6168_v53 = vsel %vm2816_vm2, %v6167_v17, %v6166_v40  ;;  %v5973_v44 = vld [vmem:[#allocation2 + $0x1a9] sm:$0x1]  ;;  %v6179_v45 = vrot.slane %v5964_v29, 7  ;;  %v6193_v46 = vrot.slane %v5972_v21, 7  ;;  %v6157_v47 = vrot.slane %v5951_v31, 4 }
 0xd7a   :  { %v6171_v49 = vrot.slane %v5959_v62, 4  ;;  %v5971_v51 = vld [vmem:[#allocation2 + $0x1a1] sm:$0x1]  ;;  %v5953_v2 = vld [vmem:[#allocation2 + $0x159] sm:$0x1]  ;;  %v6181_v60 = vrot.slane %v5965_v43, 6 }
 0xd7b   :  { %v6194_v19 = vsel %vm2813_vm1, %v6193_v46, %v5971_v51  ;;  %v5980_v9 = vld [vmem:[#allocation2 + $0x1c5] sm:$0x1]  ;;  %v5976_v40 = vld [vmem:[#allocation2 + $0x1b5] sm:$0x1]  ;;  %v5989_v29 = vld [vmem:[#allocation2 + $0x1e9] sm:$0x1] }
 0xd7c   :  { %v11985_v24 = vpop.eup %10731  ;;  %v6207_v21 = vrot.slane %v5980_v9, 7 }
 0xd7d   :  { %v5662_v5 = vsel %vm3013_vm9, %v11985_v24, 0.0 }
 0xd7e   :  { %5663 = vadd.xlane.f32.xlu1 %v5662_v5  ;;  %v5819_v5 = vrot.slane %v5387_v56, 5  ;;  %v5948_v56 = vld [vmem:[#allocation2 + $0x145] sm:$0x1] }
 0xd7f   :  { %v6151_v3 = vrot.slane %v5948_v56, 7 }
 0xd80   :  { %v5820_v34 = vsel %vm2819_vm3, %v5819_v5, %v5818_v14  ;;  %v6143_v5 = vrot.slane %v5943_v48, 4  ;;  %v5958_v14 = vld [vmem:[#allocation2 + $0x16d] sm:$0x1] }
 0xd81   :  { %v5822_v39 = vsel %vm2822_vm4, %v5821_v10, %v5820_v34  ;;  %v6128_v10 = vsel %vm2819_vm3, %v6127_v58, %v6126_v15  ;;  %v6145_v34 = vrot.slane %v5944_v61, 3  ;;  %v6152_v22 = vsel %vm2813_vm1, %v6151_v3, %v5947_v6  ;;  %v5966_v58 = vld [vmem:[#allocation2 + $0x18d] sm:$0x1]  ;;  %v5954_v15 = vld [vmem:[#allocation2 + $0x15d] sm:$0x1] }
 0xd82   :  { %v5824_v28 = vsel %vm2825_vm5, %v5823_v12, %v5822_v39  ;;  %v6142_v12 = vsel %vm2819_vm3, %v6141_v59, %v6140_v63  ;;  %v5938_v39 = vld [vmem:[#allocation2 + $0x11d] sm:$0x1]  ;;  %v6130_v23 = vsel %vm2822_vm4, %v6129_v4, %v6128_v10  ;;  %v5974_v59 = vld [vmem:[#allocation2 + $0x1ad] sm:$0x1]  ;;  %v6195_v61 = vrot.slane %v5973_v44, 6 }
 0xd83   :  { %v5826_v30 = vsel %vm2828_vm6, %v5825_v16, %v5824_v28  ;;  %v6153_v16 = vrot.slane %v5949_v0, 6  ;;  %v6144_v28 = vsel %vm2822_vm4, %v6143_v5, %v6142_v12  ;;  %v6132_v41 = vsel %vm2825_vm5, %v6131_v20, %v6130_v23  ;;  %v5961_v63 = vld [vmem:[#allocation2 + $0x179] sm:$0x1]  ;;  %v5962_v4 = vld [vmem:[#allocation2 + $0x17d] sm:$0x1] }
 0xd84   :  { %v5828_v36 = vsel %vm2831_vm7, %v5827_v35, %v5826_v30  ;;  %v5946_v35 = vld [vmem:[#allocation2 + $0x13d] sm:$0x1]  ;;  %v6146_v42 = vsel %vm2825_vm5, %v6145_v34, %v6144_v28  ;;  %v6135_v52 = vrot.slane %v5938_v39, 1  ;;  %v6134_v11 = vsel %vm2828_vm6, %v6133_v26, %v6132_v41  ;;  %v5988_v10 = vld [vmem:[#allocation2 + $0x1e5] sm:$0x1] }
 0xd85   :  { %v10400_v54 = vpack.c.bf16 %v5842_v38, %v5828_v36  ;;  %v6169_v36 = vrot.slane %v5958_v14, 5  ;;  %v5960_v38 = vld [vmem:[#allocation2 + $0x175] sm:$0x1]  ;;  %v6149_v55 = vrot.slane %v5946_v35, 1  ;;  %v6148_v48 = vsel %vm2828_vm6, %v6147_v37, %v6146_v42  ;;  %v5967_v14 = vld [vmem:[#allocation2 + $0x191] sm:$0x1] }
 0xd86   :  { %v6159_v0 = vrot.slane %v5952_v8, 3  ;;  %v6173_v1 = vrot.slane %v5960_v38, 3  ;;  %v6180_v3 = vsel %vm2813_vm1, %v6179_v45, %v5963_v50  ;;  %v6161_v6 = vrot.slane %v5953_v2, 2  ;;  %v5981_v28 = vld [vmem:[#allocation2 + $0x1c9] sm:$0x1] }
 0xd87   :  { %10401 = vmatpush3.bf16.msra.mxu1 %v10400_v54  ;;  %v6154_v54 = vsel %vm2816_vm2, %v6153_v16, %v6152_v22  ;;  %v6170_v57 = vsel %vm2819_vm3, %v6169_v36, %v6168_v53  ;;  %v6136_v12 = vsel %vm2831_vm7, %v6135_v52, %v6134_v11  ;;  %v6150_v13 = vsel %vm2831_vm7, %v6149_v55, %v6148_v48  ;;  %v5975_v16 = vld [vmem:[#allocation2 + $0x1b1] sm:$0x1]  ;;  %v5968_v22 = vld [vmem:[#allocation2 + $0x195] sm:$0x1]  ;;  %v5979_v37 = vld [vmem:[#allocation2 + $0x1c1] sm:$0x1] }
 0xd88   :  { %10402 = vmatprep.subr.bf16.mxu1 %v10988_v25  ;;  %v6156_v56 = vsel %vm2819_vm3, %v6155_v33, %v6154_v54  ;;  %v6172_v7 = vsel %vm2822_vm4, %v6171_v49, %v6170_v57  ;;  %v6183_v17 = vrot.slane %v5966_v58, 5  ;;  %v6197_v18 = vrot.slane %v5974_v59, 5  ;;  %v5987_v8 = vld [vmem:[#allocation2 + $0x1e1] sm:$0x1]  ;;  %v5982_v44 = vld [vmem:[#allocation2 + $0x1cd] sm:$0x1] }
 0xd89   :  { %v6158_v5 = vsel %vm2822_vm4, %v6157_v47, %v6156_v56  ;;  %v6163_v20 = vrot.slane %v5954_v15, 1  ;;  %v6175_v34 = vrot.slane %v5961_v63, 2  ;;  %v6182_v39 = vsel %vm2816_vm2, %v6181_v60, %v6180_v3  ;;  %v5990_v45 = vld [vmem:[#allocation2 + $0x1ed] sm:$0x1]  ;;  %v5969_v49 = vld [vmem:[#allocation2 + $0x199] sm:$0x1] }
 0xd8a   :  { %v6196_v35 = vsel %vm2816_vm2, %v6195_v61, %v6194_v19  ;;  %v6160_v23 = vsel %vm2825_vm5, %v6159_v0, %v6158_v5  ;;  %v6174_v26 = vsel %vm2825_vm5, %v6173_v1, %v6172_v7  ;;  %v10403_v62 = vpack.c.bf16 %v6150_v13, %v6136_v12  ;;  %v5977_v50 = vld [vmem:[#allocation2 + $0x1b9] sm:$0x1]  ;;  %v5983_v48 = vld [vmem:[#allocation2 + $0x1d1] sm:$0x1]  ;;  %v5970_v61 = vld [vmem:[#allocation2 + $0x19d] sm:$0x1] }
 0xd8b   :  { %v6185_v33 = vrot.slane %v5967_v14, 4  ;;  %v6199_v36 = vrot.slane %v5975_v16, 4  ;;  %v6177_v54 = vrot.slane %v5962_v4, 1  ;;  %v6184_v53 = vsel %vm2819_vm3, %v6183_v17, %v6182_v39  ;;  %v5991_v58 = vld [vmem:[#allocation2 + $0x1f1] sm:$0x1] }
 0xd8c   :  { %v6198_v41 = vsel %vm2819_vm3, %v6197_v18, %v6196_v35  ;;  %v6162_v42 = vsel %vm2828_vm6, %v6161_v6, %v6160_v23  ;;  %v6176_v43 = vsel %vm2828_vm6, %v6175_v34, %v6174_v26  ;;  %v6209_v46 = vrot.slane %v5981_v28, 6  ;;  %v5978_v15 = vld [vmem:[#allocation2 + $0x1bd] sm:$0x1]  ;;  %v5984_v6 = vld [vmem:[#allocation2 + $0x1d5] sm:$0x1] }
 0xd8d   :  { %v6223_v47 = vrot.slane %v5989_v29, 6  ;;  %v6187_v51 = vrot.slane %v5968_v22, 3  ;;  %v6201_v52 = vrot.slane %v5976_v40, 3  ;;  %v6186_v2 = vsel %vm2822_vm4, %v6185_v33, %v6184_v53  ;;  %v5992_v7 = vld [vmem:[#allocation2 + $0x1f5] sm:$0x1] }
 0xd8e   :  { %v6200_v56 = vsel %vm2822_vm4, %v6199_v36, %v6198_v41  ;;  %v6164_v57 = vsel %vm2831_vm7, %v6163_v20, %v6162_v42  ;;  %v6178_v11 = vsel %vm2831_vm7, %v6177_v54, %v6176_v43  ;;  %v6211_v59 = vrot.slane %v5982_v44, 5  ;;  %v5985_v20 = vld [vmem:[#allocation2 + $0x1d9] sm:$0x1]  ;;  %v5986_v28 = vld [vmem:[#allocation2 + $0x1dd] sm:$0x1] }
 0xd8f   :  { %v6225_v60 = vrot.slane %v5990_v45, 5  ;;  %v6189_v63 = vrot.slane %v5969_v49, 2  ;;  %v6203_v0 = vrot.slane %v5977_v50, 2  ;;  %v6188_v19 = vsel %vm2825_vm5, %v6187_v51, %v6186_v2  ;;  %v5993_v34 = vld [vmem:[#allocation2 + $0x1f9] sm:$0x1] }
 0xd90   :  { %v6202_v4 = vsel %vm2825_vm5, %v6201_v52, %v6200_v56  ;;  %v10406_v5 = vpack.c.bf16 %v6178_v11, %v6164_v57  ;;  %v6213_v9 = vrot.slane %v5983_v48, 4  ;;  %v6191_v12 = vrot.slane %v5970_v61, 1  ;;  %v5994_v29 = vld [vmem:[#allocation2 + $0x1fd] sm:$0x1]  ;;  %v5930_v42 = vld [vmem:[#allocation4 + $0x6] sm:$0x3] }
 0xd91   :  { %v6205_v13 = vrot.slane %v5978_v15, 1  ;;  %v6190_v17 = vsel %vm2828_vm6, %v6189_v63, %v6188_v19  ;;  %v6204_v18 = vsel %vm2828_vm6, %v6203_v0, %v6202_v4  ;;  %v6215_v22 = vrot.slane %v5984_v6, 3  ;;  %v5996_v52 = vld [vmem:[#allocation3 + $0x105] sm:$0x1]  ;;  %v5995_v2 = vld [vmem:[#allocation3 + $0x101] sm:$0x1] }
 0xd92   :  { %v6229_v40 = vrot.slane %v5992_v7, 3  ;;  %v6192_v23 = vsel %vm2831_vm7, %v6191_v12, %v6190_v17  ;;  %v6219_v36 = vrot.slane %v5986_v28, 1  ;;  %v5999_v56 = vld [vmem:[#allocation3 + $0x111] sm:$0x1]  ;;  %v6000_v57 = vld [vmem:[#allocation3 + $0x115] sm:$0x1] }
 0xd93   :  { %v6206_v26 = vsel %vm2831_vm7, %v6205_v13, %v6204_v18  ;;  %v6001_v11 = vld [vmem:[#allocation3 + $0x119] sm:$0x1]  ;;  %v6002_v48 = vld [vmem:[#allocation3 + $0x11d] sm:$0x1]  ;;  %v6006_v61 = vld [vmem:[#allocation3 + $0x12d] sm:$0x1] }
 0xd94   :  { %v10409_v33 = vpack.c.bf16 %v6206_v26, %v6192_v23  ;;  %v6007_v15 = vld [vmem:[#allocation3 + $0x131] sm:$0x1]  ;;  %v6008_v63 = vld [vmem:[#allocation3 + $0x135] sm:$0x1]  ;;  %v6009_v0 = vld [vmem:[#allocation3 + $0x139] sm:$0x1] }
 0xd95   :  { %v6010_v4 = vld [vmem:[#allocation3 + $0x13d] sm:$0x1]  ;;  %v6398_v6 = vrot.slane %v6000_v57, 3  ;;  %v6400_v7 = vrot.slane %v6001_v11, 2  ;;  %v6408_v13 = vrot.slane %v6006_v61, 5  ;;  %v6402_v18 = vrot.slane %v6002_v48, 1 }
 0xd96   :  { %v6025_v57 = vld [vmem:[#allocation3 + $0x179] sm:$0x1] }
 0xe0b   :  { %v5664_v30 = vpop.xlane.xlu1 %5663 }
 0xe0c   :  { %10733 = vrcp.f32 %v5664_v30  ;;  %v6221_v30 = vrot.slane %v5988_v10, 7  ;;  %v6227_v10 = vrot.slane %v5991_v58, 4  ;;  %v6003_v58 = vld [vmem:[#allocation3 + $0x121] sm:$0x1] }
 0xe0e   :  { %v6222_v55 = vsel %vm2813_vm1, %v6221_v30, %v5987_v8  ;;  %v6231_v30 = vrot.slane %v5993_v34, 2  ;;  %v6412_v34 = vrot.slane %v6008_v63, 3 }
 0xe0f   :  { %v6224_v3 = vsel %vm2816_vm2, %v6223_v47, %v6222_v55  ;;  %v5998_v55 = vld [vmem:[#allocation3 + $0x10d] sm:$0x1] }
 0xe10   :  { %v6226_v16 = vsel %vm2819_vm3, %v6225_v60, %v6224_v3  ;;  %v6005_v60 = vld [vmem:[#allocation3 + $0x129] sm:$0x1]  ;;  %v6394_v19 = vrot.slane %v5998_v55, 5 }
 0xe11   :  { %v6228_v35 = vsel %vm2822_vm4, %v6227_v10, %v6226_v16  ;;  %v6406_v12 = vrot.slane %v6005_v60, 6  ;;  %v6012_v16 = vld [vmem:[#allocation3 + $0x145] sm:$0x1] }
 0xe12   :  { %v6418_v23 = vrot.slane %v6012_v16, 7 }
 0xe16   :  { %v10734_v31 = vpop.eup %10733 }
 0xe17   :  { %v5666_v38 = vmul.f32 %v10734_v31, %v11985_v24  ;;  %v6208_v24 = vsel %vm2813_vm1, %v6207_v21, %v5979_v37  ;;  %v6217_v21 = vrot.slane %v5985_v20, 2  ;;  %v6233_v37 = vrot.slane %v5994_v29, 1 }
 0xe18   :  { %v6210_v1 = vsel %vm2816_vm2, %v6209_v46, %v6208_v24  ;;  %v5997_v24 = vld [vmem:[#allocation3 + $0x109] sm:$0x1]  ;;  %v6416_v29 = vrot.slane %v6010_v4, 1 }
 0xe19   :  { %10022 = vmatmul.mubr.msk.f32.vlgmr.msra.gmra.mrb[22].mxu1 %vm3209_vm10, %v5666_v38  ;;  %v6212_v14 = vsel %vm2819_vm3, %v6211_v59, %v6210_v1  ;;  %v6004_v59 = vld [vmem:[#allocation3 + $0x125] sm:$0x1]  ;;  %v6390_v1 = vrot.slane %v5996_v52, 7  ;;  %v6392_v3 = vrot.slane %v5997_v24, 6  ;;  %v6019_v52 = vld [vmem:[#allocation3 + $0x161] sm:$0x1] }
 0xe1a   :  { %10404 = vmatpush3.bf16.xpose.msra.mxu1 %v10403_v62  ;;  %10040 = vmatprep.mubr.msk.f32.mxu1 %vm10989_vm0, %v10990_v27  ;;  %v6214_v39 = vsel %vm2822_vm4, %v6213_v9, %v6212_v14  ;;  %v6230_v62 = vsel %vm2825_vm5, %v6229_v40, %v6228_v35  ;;  %v6404_v9 = vrot.slane %v6004_v59, 7  ;;  %v6410_v14 = vrot.slane %v6007_v15, 4  ;;  %v6011_v35 = vld [vmem:[#allocation3 + $0x141] sm:$0x1]  ;;  %v6024_v24 = vld [vmem:[#allocation3 + $0x175] sm:$0x1] }
 0xe1b   :  { %10405 = vmatprep.subr.bf16.mxu1 %v10988_v25  ;;  %v6216_v31 = vsel %vm2825_vm5, %v6215_v22, %v6214_v39  ;;  %v6232_v38 = vsel %vm2828_vm6, %v6231_v30, %v6230_v62  ;;  %v6391_v10 = vsel %vm2813_vm1, %v6390_v1, %v5995_v2  ;;  %v6414_v39 = vrot.slane %v6009_v0, 2  ;;  %v6014_v30 = vld [vmem:[#allocation3 + $0x14d] sm:$0x1]  ;;  %v6026_v59 = vld [vmem:[#allocation3 + $0x17d] sm:$0x1] }
 0xe1c   :  { %v6218_v8 = vsel %vm2828_vm6, %v6217_v21, %v6216_v31  ;;  %v6234_v53 = vsel %vm2831_vm7, %v6233_v37, %v6232_v38  ;;  %v6393_v17 = vsel %vm2816_vm2, %v6392_v3, %v6391_v10  ;;  %v6405_v20 = vsel %vm2813_vm1, %v6404_v9, %v6003_v58  ;;  %v6013_v21 = vld [vmem:[#allocation3 + $0x149] sm:$0x1]  ;;  %v6017_v37 = vld [vmem:[#allocation3 + $0x159] sm:$0x1] }
 0xe1d   :  { %v6220_v54 = vsel %vm2831_vm7, %v6219_v36, %v6218_v8  ;;  %v6395_v22 = vsel %vm2819_vm3, %v6394_v19, %v6393_v17  ;;  %v6407_v40 = vsel %vm2816_vm2, %v6406_v12, %v6405_v20  ;;  %v6016_v36 = vld [vmem:[#allocation3 + $0x155] sm:$0x1]  ;;  %v6428_v48 = vrot.slane %v6017_v37, 2 }
 0xe1e   :  { %v10412_v41 = vpack.c.bf16 %v6234_v53, %v6220_v54  ;;  %v6409_v28 = vsel %vm2819_vm3, %v6408_v13, %v6407_v40  ;;  %v6018_v54 = vld [vmem:[#allocation3 + $0x15d] sm:$0x1]  ;;  %v6020_v53 = vld [vmem:[#allocation3 + $0x165] sm:$0x1]  ;;  %v6426_v2 = vrot.slane %v6016_v36, 3  ;;  %v6440_v19 = vrot.slane %v6024_v24, 3 }
 0xe1f   :  { %v6411_v62 = vsel %vm2822_vm4, %v6410_v14, %v6409_v28  ;;  %v6432_v58 = vrot.slane %v6020_v53, 7  ;;  %v6430_v1 = vrot.slane %v6018_v54, 1  ;;  %v6444_v10 = vrot.slane %v6026_v59, 1  ;;  %v6037_v28 = vld [vmem:[#allocation3 + $0x1a9] sm:$0x1] }
 0xe20   :  { %v6413_v38 = vsel %vm2825_vm5, %v6412_v34, %v6411_v62  ;;  %v6035_v62 = vld [vmem:[#allocation3 + $0x1a1] sm:$0x1]  ;;  %v6038_v36 = vld [vmem:[#allocation3 + $0x1ad] sm:$0x1]  ;;  %v6044_v59 = vld [vmem:[#allocation3 + $0x1c5] sm:$0x1] }
 0xe21   :  { %v6433_v3 = vsel %vm2813_vm1, %v6432_v58, %v6019_v52  ;;  %v6462_v52 = vrot.slane %v6037_v28, 6 }
 0xe22   :  { %10407 = vmatpush3.bf16.xpose.msra.mxu1 %v10406_v5  ;;  %v6396_v5 = vrot.slane %v5999_v56, 4 }
 0xe23   :  { %10408 = vmatprep.subr.bf16.mxu1 %v10988_v25 }
 0xe24   :  { %v6397_v26 = vsel %vm2822_vm4, %v6396_v5, %v6395_v22 }
 0xe25   :  { %v6399_v31 = vsel %vm2825_vm5, %v6398_v6, %v6397_v26  ;;  %v6442_v6 = vrot.slane %v6025_v57, 2  ;;  %v6029_v26 = vld [vmem:[#allocation3 + $0x189] sm:$0x1] }
 0xe26   :  { %v6401_v8 = vsel %vm2828_vm6, %v6400_v7, %v6399_v31  ;;  %v6030_v31 = vld [vmem:[#allocation3 + $0x18d] sm:$0x1]  ;;  %v6448_v54 = vrot.slane %v6029_v26, 6  ;;  %v6056_v26 = vld [vmem:[#allocation3 + $0x1f5] sm:$0x1] }
 0xe27   :  { %v6450_v53 = vrot.slane %v6030_v31, 5 }
 0xe2a   :  { %10410 = vmatpush3.bf16.xpose.msra.mxu1 %v10409_v33  ;;  %v6015_v33 = vld [vmem:[#allocation3 + $0x151] sm:$0x1] }
 0xe2b   :  { %10411 = vmatprep.subr.bf16.mxu1 %v10988_v25  ;;  %v6424_v55 = vrot.slane %v6015_v33, 4  ;;  %v6031_v33 = vld [vmem:[#allocation3 + $0x191] sm:$0x1] }
 0xe32   :  { %10413 = vmatpush3.bf16.xpose.msra.mxu1 %v10412_v41  ;;  %v6021_v41 = vld [vmem:[#allocation3 + $0x169] sm:$0x1] }
 0xe33   :  { %10438 = vmatprep.subr.bf16.mxu1 %v10988_v25  ;;  %v6434_v61 = vrot.slane %v6021_v41, 6  ;;  %v6033_v41 = vld [vmem:[#allocation3 + $0x199] sm:$0x1] }
 0xe35   :  { %v6435_v5 = vsel %vm2816_vm2, %v6434_v61, %v6433_v3 }
 0xe39   :  { %10041 = vmatmul.mubr.f32.vlgmr.msra.gmra.mrb[24].mxu1 %v5930_v42  ;;  %v6419_v42 = vsel %vm2813_vm1, %v6418_v23, %v6011_v35  ;;  %v6028_v35 = vld [vmem:[#allocation3 + $0x185] sm:$0x1] }
 0xe3a   :  { %10097 = vmatprep.mubr.msk.f32.mxu1 %vm10989_vm0, %v10990_v27  ;;  %v6036_v23 = vld [vmem:[#allocation3 + $0x1a5] sm:$0x1] }
 0xeec   :  { %v5920_v43 = vpop.f32.mrb[22].mxu1 }
 0xeed   :  { %5924 = vst [vmem:[#allocation7 + $0x8] sm:$0x1] %v5920_v43  ;;  %v9198_v44 = vrot.slane %v5920_v43, 9  ;;  %v10023_v45 = vpop.f32.mrb[23].mxu1  ;;  %v6403_v43 = vsel %vm2831_vm7, %v6402_v18, %v6401_v8  ;;  %v6032_v8 = vld [vmem:[#allocation3 + $0x195] sm:$0x1] }
 0xeee   :  { %v6022_v45 = vld [vmem:[#allocation3 + $0x16d] sm:$0x1] }
 0xeef   :  { %5929 = vst [vmem:[#allocation7 + $0xc] sm:$0x1] %v9198_v44  ;;  %v6415_v44 = vsel %vm2828_vm6, %v6414_v39, %v6413_v38  ;;  %v6436_v15 = vrot.slane %v6022_v45, 5  ;;  %v6040_v38 = vld [vmem:[#allocation3 + $0x1b5] sm:$0x1] }
 0xef1   :  { %v6437_v9 = vsel %vm2819_vm3, %v6436_v15, %v6435_v5 }
 0xf0c   :  { %v6309_v46 = vpop.f32.mrb[24].mxu1 }
 0xf0d   :  { %v6313_v47 = vmul.f32 0.088388346, %v6309_v46  ;;  %v10042_v49 = vpop.f32.mrb[25].mxu1  ;;  %v6023_v46 = vld [vmem:[#allocation3 + $0x171] sm:$0x1] }
 0xf0e   :  { %v6422_v49 = vrot.slane %v6014_v30, 5  ;;  %v6438_v63 = vrot.slane %v6023_v46, 4  ;;  %v6027_v30 = vld [vmem:[#allocation3 + $0x181] sm:$0x1]  ;;  %v6034_v46 = vld [vmem:[#allocation3 + $0x19d] sm:$0x1] }
 0xf0f   :  { %v12087_v50 = vsel %vm11394_vm8, %v6313_v47, -1e+30  ;;  %v6420_v47 = vrot.slane %v6013_v21, 6  ;;  %v6460_v21 = vrot.slane %v6036_v23, 7  ;;  %v6051_v23 = vld [vmem:[#allocation3 + $0x1e1] sm:$0x1] }
 0xf10   :  { %v6315_v51 = vsel %vm3013_vm9, %v12087_v50, -inf  ;;  %v6439_v12 = vsel %vm2822_vm4, %v6438_v63, %v6437_v9  ;;  %v6043_v63 = vld [vmem:[#allocation3 + $0x1c1] sm:$0x1]  ;;  %v6048_v9 = vld [vmem:[#allocation3 + $0x1d5] sm:$0x1] }
 0xf11   :  { %6316 = vmax.xlane.f32.xlu0 %v6315_v51  ;;  %v6417_v51 = vsel %vm2831_vm7, %v6416_v29, %v6415_v44  ;;  %v6421_v11 = vsel %vm2816_vm2, %v6420_v47, %v6419_v42  ;;  %v6441_v14 = vsel %vm2825_vm5, %v6440_v19, %v6439_v12  ;;  %v6446_v29 = vrot.slane %v6028_v35, 7  ;;  %v6041_v42 = vld [vmem:[#allocation3 + $0x1b9] sm:$0x1]  ;;  %v6042_v47 = vld [vmem:[#allocation3 + $0x1bd] sm:$0x1] }
 0xf12   :  { %v10415_v56 = vpack.c.bf16 %v6417_v51, %v6403_v43  ;;  %v6423_v60 = vsel %vm2819_vm3, %v6422_v49, %v6421_v11  ;;  %v6443_v16 = vsel %vm2828_vm6, %v6442_v6, %v6441_v14  ;;  %v6452_v43 = vrot.slane %v6031_v33, 4  ;;  %v6045_v19 = vld [vmem:[#allocation3 + $0x1c9] sm:$0x1]  ;;  %v6052_v14 = vld [vmem:[#allocation3 + $0x1e5] sm:$0x1] }
 0xf13   :  { %v6425_v0 = vsel %vm2822_vm4, %v6424_v55, %v6423_v60  ;;  %v6445_v17 = vsel %vm2831_vm7, %v6444_v10, %v6443_v16  ;;  %v6447_v37 = vsel %vm2813_vm1, %v6446_v29, %v6027_v30  ;;  %v6454_v44 = vrot.slane %v6032_v8, 3  ;;  %v6049_v10 = vld [vmem:[#allocation3 + $0x1d9] sm:$0x1]  ;;  %v6053_v16 = vld [vmem:[#allocation3 + $0x1e9] sm:$0x1] }
 0xf14   :  { %10416 = vmatpush3.bf16.msra.mxu0 %v10415_v56  ;;  %v6427_v4 = vsel %vm2825_vm5, %v6426_v2, %v6425_v0  ;;  %v6461_v45 = vsel %vm2813_vm1, %v6460_v21, %v6035_v62  ;;  %v6449_v49 = vsel %vm2816_vm2, %v6448_v54, %v6447_v37  ;;  %v6456_v51 = vrot.slane %v6033_v41, 2  ;;  %v6057_v21 = vld [vmem:[#allocation3 + $0x1f9] sm:$0x1] }
 0xf15   :  { %10417 = vmatprep.subr.bf16.mxu0 %v10988_v25  ;;  %v6429_v7 = vsel %vm2828_vm6, %v6428_v48, %v6427_v4  ;;  %v6451_v24 = vsel %vm2819_vm3, %v6450_v53, %v6449_v49  ;;  %v6458_v55 = vrot.slane %v6034_v46, 1  ;;  %v6464_v2 = vrot.slane %v6038_v36, 5  ;;  %v6046_v4 = vld [vmem:[#allocation3 + $0x1cd] sm:$0x1]  ;;  %v6058_v36 = vld [vmem:[#allocation3 + $0x1fd] sm:$0x1] }
 0xf16   :  { %v6431_v13 = vsel %vm2831_vm7, %v6430_v1, %v6429_v7  ;;  %v6453_v57 = vsel %vm2822_vm4, %v6452_v43, %v6451_v24  ;;  %v6463_v11 = vsel %vm2816_vm2, %v6462_v52, %v6461_v45  ;;  %v6468_v48 = vrot.slane %v6040_v38, 3  ;;  %v6047_v7 = vld [vmem:[#allocation3 + $0x1d1] sm:$0x1] }
 0xf17   :  { %v10418_v18 = vpack.c.bf16 %v6445_v17, %v6431_v13  ;;  %v6470_v58 = vrot.slane %v6041_v42, 2  ;;  %v6455_v60 = vsel %vm2825_vm5, %v6454_v44, %v6453_v57  ;;  %v6465_v61 = vsel %vm2819_vm3, %v6464_v2, %v6463_v11  ;;  %v6050_v13 = vld [vmem:[#allocation3 + $0x1dd] sm:$0x1]  ;;  %v6599_v57 = vld [vmem:[#allocation2 + $0x126] sm:$0x1] }
 0xf18   :  { %v6472_v15 = vrot.slane %v6042_v47, 1  ;;  %v6474_v0 = vrot.slane %v6044_v59, 7  ;;  %v6457_v1 = vsel %vm2828_vm6, %v6456_v51, %v6455_v60  ;;  %v6480_v28 = vrot.slane %v6047_v7, 4  ;;  %v6592_v11 = vld [vmem:[#allocation2 + $0x10a] sm:$0x1] }
 0xf19   :  { %10419 = vmatpush3.bf16.msra.mxu0 %v10418_v18  ;;  %v6459_v5 = vsel %vm2831_vm7, %v6458_v55, %v6457_v1  ;;  %v6482_v29 = vrot.slane %v6048_v9, 3  ;;  %v6484_v31 = vrot.slane %v6049_v10, 2  ;;  %v6488_v62 = vrot.slane %v6052_v14, 7  ;;  %v6590_v60 = vld [vmem:[#allocation2 + $0x102] sm:$0x1] }
 0xf1a   :  { %10420 = vmatprep.subr.bf16.mxu0 %v10988_v25  ;;  %v6475_v17 = vsel %vm2813_vm1, %v6474_v0, %v6043_v63  ;;  %v6490_v33 = vrot.slane %v6053_v16, 6  ;;  %v6486_v54 = vrot.slane %v6050_v13, 1  ;;  %v6496_v41 = vrot.slane %v6056_v26, 3  ;;  %v6601_v63 = vld [vmem:[#allocation2 + $0x12e] sm:$0x1] }
 0xf1b   :  { %v6489_v53 = vsel %vm2813_vm1, %v6488_v62, %v6051_v23  ;;  %v6498_v44 = vrot.slane %v6057_v21, 2  ;;  %v6500_v47 = vrot.slane %v6058_v36, 1  ;;  %v6796_v59 = vrot.slane %v6599_v57, 7  ;;  %v6602_v7 = vld [vmem:[#allocation2 + $0x132] sm:$0x1] }
 0xf1c   :  { %v6491_v43 = vsel %vm2816_vm2, %v6490_v33, %v6489_v53  ;;  %v6784_v0 = vrot.slane %v6592_v11, 6  ;;  %v6800_v10 = vrot.slane %v6601_v63, 5  ;;  %v6603_v13 = vld [vmem:[#allocation2 + $0x136] sm:$0x1]  ;;  %v6614_v23 = vld [vmem:[#allocation2 + $0x162] sm:$0x1] }
 0xf1d   :  { %v6596_v26 = vld [vmem:[#allocation2 + $0x11a] sm:$0x1]  ;;  %v6609_v21 = vld [vmem:[#allocation2 + $0x14e] sm:$0x1]  ;;  %v6622_v63 = vld [vmem:[#allocation2 + $0x182] sm:$0x1] }
 0xf1e   :  { %v6604_v33 = vld [vmem:[#allocation2 + $0x13a] sm:$0x1] }
 0xf9e   :  { %v6317_v20 = vpop.xlane.xlu0 %6316 }
 0xf9f   :  { %v6318_v34 = vsub.f32 %v12087_v50, %v6317_v20  ;;  %v6039_v50 = vld [vmem:[#allocation3 + $0x1b1] sm:$0x1]  ;;  %v6054_v20 = vld [vmem:[#allocation3 + $0x1ed] sm:$0x1] }
 0xfa0   :  { %v6466_v56 = vrot.slane %v6039_v50, 4  ;;  %v6492_v37 = vrot.slane %v6054_v20, 5 }
 0xfa1   :  { %v6319_v22 = vmul.f32 1.442695, %v6318_v34  ;;  %v6055_v34 = vld [vmem:[#allocation3 + $0x1f1] sm:$0x1] }
 0xfa2   :  { %v6467_v3 = vsel %vm2822_vm4, %v6466_v56, %v6465_v61  ;;  %v6494_v8 = vrot.slane %v6055_v34, 4  ;;  %v6493_v46 = vsel %vm2819_vm3, %v6492_v37, %v6491_v43  ;;  %v6591_v56 = vld [vmem:[#allocation2 + $0x106] sm:$0x1]  ;;  %v6598_v61 = vld [vmem:[#allocation2 + $0x122] sm:$0x1] }
 0xfa3   :  { %10735 = vpow2.f32 %v6319_v22  ;;  %v6469_v6 = vsel %vm2825_vm5, %v6468_v48, %v6467_v3  ;;  %v6476_v22 = vrot.slane %v6045_v19, 6  ;;  %v6600_v48 = vld [vmem:[#allocation2 + $0x12a] sm:$0x1]  ;;  %v6797_v19 = vsel %vm2813_vm1, %v6796_v59, %v6598_v61  ;;  %v6623_v43 = vld [vmem:[#allocation2 + $0x186] sm:$0x1] }
 0xfa4   :  { %v6471_v12 = vsel %vm2828_vm6, %v6470_v58, %v6469_v6  ;;  %v6495_v49 = vsel %vm2822_vm4, %v6494_v8, %v6493_v46  ;;  %v6782_v58 = vrot.slane %v6591_v56, 7  ;;  %v6798_v1 = vrot.slane %v6600_v48, 6  ;;  %v6594_v6 = vld [vmem:[#allocation2 + $0x112] sm:$0x1]  ;;  %v6624_v48 = vld [vmem:[#allocation2 + $0x18a] sm:$0x1] }
 0xfa5   :  { %v6473_v18 = vsel %vm2831_vm7, %v6472_v15, %v6471_v12  ;;  %v6477_v30 = vsel %vm2816_vm2, %v6476_v22, %v6475_v17  ;;  %v6497_v52 = vsel %vm2825_vm5, %v6496_v41, %v6495_v49  ;;  %v6593_v15 = vld [vmem:[#allocation2 + $0x10e] sm:$0x1]  ;;  %v6595_v12 = vld [vmem:[#allocation2 + $0x116] sm:$0x1]  ;;  %v6608_v17 = vld [vmem:[#allocation2 + $0x14a] sm:$0x1] }
 0xfa6   :  { %v10421_v35 = vpack.c.bf16 %v6473_v18, %v6459_v5  ;;  %v6499_v24 = vsel %vm2828_vm6, %v6498_v44, %v6497_v52  ;;  %v6783_v3 = vsel %vm2813_vm1, %v6782_v58, %v6590_v60  ;;  %v6615_v5 = vld [vmem:[#allocation2 + $0x166] sm:$0x1]  ;;  %v6786_v9 = vrot.slane %v6593_v15, 5  ;;  %v6616_v18 = vld [vmem:[#allocation2 + $0x16a] sm:$0x1] }
 0xfa7   :  { %v6501_v55 = vsel %vm2831_vm7, %v6500_v47, %v6499_v24  ;;  %v6785_v14 = vsel %vm2816_vm2, %v6784_v0, %v6783_v3  ;;  %v6799_v16 = vsel %vm2816_vm2, %v6798_v1, %v6797_v19  ;;  %v6824_v34 = vrot.slane %v6615_v5, 7  ;;  %v6631_v44 = vld [vmem:[#allocation2 + $0x1a6] sm:$0x1]  ;;  %v6610_v46 = vld [vmem:[#allocation2 + $0x152] sm:$0x1] }
 0xfa8   :  { %10422 = vmatpush3.bf16.msra.mxu0 %v10421_v35  ;;  %v6788_v22 = vrot.slane %v6594_v6, 4  ;;  %v6606_v35 = vld [vmem:[#allocation2 + $0x142] sm:$0x1]  ;;  %v6826_v62 = vrot.slane %v6616_v18, 6  ;;  %v6790_v36 = vrot.slane %v6595_v12, 3  ;;  %v6792_v41 = vrot.slane %v6596_v26, 2 }
 0xfa9   :  { %10423 = vmatprep.subr.bf16.mxu0 %v10988_v25  ;;  %v6825_v8 = vsel %vm2813_vm1, %v6824_v34, %v6614_v23  ;;  %v6618_v47 = vld [vmem:[#allocation2 + $0x172] sm:$0x1]  ;;  %v6814_v49 = vrot.slane %v6609_v21, 5  ;;  %v6806_v52 = vrot.slane %v6604_v33, 2  ;;  %v6611_v24 = vld [vmem:[#allocation2 + $0x156] sm:$0x1] }
 0xfaa   :  { %v6827_v56 = vsel %vm2816_vm2, %v6826_v62, %v6825_v8  ;;  %v6632_v58 = vld [vmem:[#allocation2 + $0x1aa] sm:$0x1]  ;;  %v6838_v59 = vrot.slane %v6623_v43, 7  ;;  %v6852_v60 = vrot.slane %v6631_v44, 7  ;;  %v6816_v61 = vrot.slane %v6610_v46, 4 }
 0xfab   :  { %v6830_v15 = vrot.slane %v6618_v47, 4  ;;  %v6630_v0 = vld [vmem:[#allocation2 + $0x1a2] sm:$0x1]  ;;  %v6612_v19 = vld [vmem:[#allocation2 + $0x15a] sm:$0x1]  ;;  %v6840_v12 = vrot.slane %v6624_v48, 6 }
 0xfac   :  { %v6853_v34 = vsel %vm2813_vm1, %v6852_v60, %v6630_v0  ;;  %v6639_v26 = vld [vmem:[#allocation2 + $0x1c6] sm:$0x1]  ;;  %v6635_v8 = vld [vmem:[#allocation2 + $0x1b6] sm:$0x1]  ;;  %v6648_v43 = vld [vmem:[#allocation2 + $0x1ea] sm:$0x1] }
 0xfad   :  { %v12122_v40 = vpop.eup %10735  ;;  %v6866_v44 = vrot.slane %v6639_v26, 7 }
 0xfae   :  { %v6321_v39 = vsel %vm3013_vm9, %v12122_v40, 0.0 }
 0xfaf   :  { %6322 = vadd.xlane.f32.xlu1 %v6321_v39  ;;  %v6478_v39 = vrot.slane %v6046_v4, 5  ;;  %v6607_v4 = vld [vmem:[#allocation2 + $0x146] sm:$0x1] }
 0xfb0   :  { %v6810_v20 = vrot.slane %v6607_v4, 7 }
 0xfb1   :  { %v6479_v50 = vsel %vm2819_vm3, %v6478_v39, %v6477_v30  ;;  %v6802_v39 = vrot.slane %v6602_v7, 4  ;;  %v6617_v30 = vld [vmem:[#allocation2 + $0x16e] sm:$0x1] }
 0xfb2   :  { %v6481_v38 = vsel %vm2822_vm4, %v6480_v28, %v6479_v50  ;;  %v6787_v28 = vsel %vm2819_vm3, %v6786_v9, %v6785_v14  ;;  %v6804_v50 = vrot.slane %v6603_v13, 3  ;;  %v6811_v37 = vsel %vm2813_vm1, %v6810_v20, %v6606_v35  ;;  %v6625_v9 = vld [vmem:[#allocation2 + $0x18e] sm:$0x1]  ;;  %v6613_v14 = vld [vmem:[#allocation2 + $0x15e] sm:$0x1] }
 0xfb3   :  { %v6483_v42 = vsel %vm2825_vm5, %v6482_v29, %v6481_v38  ;;  %v6801_v29 = vsel %vm2819_vm3, %v6800_v10, %v6799_v16  ;;  %v6597_v38 = vld [vmem:[#allocation2 + $0x11e] sm:$0x1]  ;;  %v6789_v53 = vsel %vm2822_vm4, %v6788_v22, %v6787_v28  ;;  %v6633_v10 = vld [vmem:[#allocation2 + $0x1ae] sm:$0x1]  ;;  %v6854_v13 = vrot.slane %v6632_v58, 6 }
 0xfb4   :  { %v6485_v45 = vsel %vm2828_vm6, %v6484_v31, %v6483_v42  ;;  %v6812_v31 = vrot.slane %v6608_v17, 6  ;;  %v6803_v42 = vsel %vm2822_vm4, %v6802_v39, %v6801_v29  ;;  %v6791_v57 = vsel %vm2825_vm5, %v6790_v36, %v6789_v53  ;;  %v6620_v16 = vld [vmem:[#allocation2 + $0x17a] sm:$0x1]  ;;  %v6621_v22 = vld [vmem:[#allocation2 + $0x17e] sm:$0x1] }
 0xfb5   :  { %v6487_v51 = vsel %vm2831_vm7, %v6486_v54, %v6485_v45  ;;  %v6605_v54 = vld [vmem:[#allocation2 + $0x13e] sm:$0x1]  ;;  %v6805_v11 = vsel %vm2825_vm5, %v6804_v50, %v6803_v42  ;;  %v6794_v1 = vrot.slane %v6597_v38, 1  ;;  %v6793_v6 = vsel %vm2828_vm6, %v6792_v41, %v6791_v57  ;;  %v6647_v28 = vld [vmem:[#allocation2 + $0x1e6] sm:$0x1] }
 0xfb6   :  { %v10424_v2 = vpack.c.bf16 %v6501_v55, %v6487_v51  ;;  %v6828_v51 = vrot.slane %v6617_v30, 5  ;;  %v6619_v55 = vld [vmem:[#allocation2 + $0x176] sm:$0x1]  ;;  %v6808_v3 = vrot.slane %v6605_v54, 1  ;;  %v6807_v7 = vsel %vm2828_vm6, %v6806_v52, %v6805_v11  ;;  %v6626_v30 = vld [vmem:[#allocation2 + $0x192] sm:$0x1] }
 0xfb7   :  { %v6818_v17 = vrot.slane %v6611_v24, 3  ;;  %v6832_v18 = vrot.slane %v6619_v55, 3  ;;  %v6839_v20 = vsel %vm2813_vm1, %v6838_v59, %v6622_v63  ;;  %v6820_v35 = vrot.slane %v6612_v19, 2  ;;  %v6640_v42 = vld [vmem:[#allocation2 + $0x1ca] sm:$0x1] }
 0xfb8   :  { %10425 = vmatpush3.bf16.msra.mxu0 %v10424_v2  ;;  %v6813_v2 = vsel %vm2816_vm2, %v6812_v31, %v6811_v37  ;;  %v6829_v5 = vsel %vm2819_vm3, %v6828_v51, %v6827_v56  ;;  %v6795_v29 = vsel %vm2831_vm7, %v6794_v1, %v6793_v6  ;;  %v6809_v21 = vsel %vm2831_vm7, %v6808_v3, %v6807_v7  ;;  %v6634_v31 = vld [vmem:[#allocation2 + $0x1b2] sm:$0x1]  ;;  %v6627_v37 = vld [vmem:[#allocation2 + $0x196] sm:$0x1]  ;;  %v6638_v52 = vld [vmem:[#allocation2 + $0x1c2] sm:$0x1] }
 0xfb9   :  { %10426 = vmatprep.subr.bf16.mxu0 %v10988_v25  ;;  %v6815_v4 = vsel %vm2819_vm3, %v6814_v49, %v6813_v2  ;;  %v6831_v23 = vsel %vm2822_vm4, %v6830_v15, %v6829_v5  ;;  %v6842_v62 = vrot.slane %v6625_v9, 5  ;;  %v6856_v33 = vrot.slane %v6633_v10, 5  ;;  %v6646_v24 = vld [vmem:[#allocation2 + $0x1e2] sm:$0x1]  ;;  %v6641_v58 = vld [vmem:[#allocation2 + $0x1ce] sm:$0x1] }
 0xfba   :  { %v6817_v39 = vsel %vm2822_vm4, %v6816_v61, %v6815_v4  ;;  %v6822_v36 = vrot.slane %v6613_v14, 1  ;;  %v6834_v50 = vrot.slane %v6620_v16, 2  ;;  %v6841_v38 = vsel %vm2816_vm2, %v6840_v12, %v6839_v20  ;;  %v6649_v59 = vld [vmem:[#allocation2 + $0x1ee] sm:$0x1]  ;;  %v6628_v15 = vld [vmem:[#allocation2 + $0x19a] sm:$0x1] }
 0xfbb   :  { %v6855_v54 = vsel %vm2816_vm2, %v6854_v13, %v6853_v34  ;;  %v6819_v53 = vsel %vm2825_vm5, %v6818_v17, %v6817_v39  ;;  %v6833_v41 = vsel %vm2825_vm5, %v6832_v18, %v6831_v23  ;;  %v10427_v47 = vpack.c.bf16 %v6809_v21, %v6795_v29  ;;  %v6636_v63 = vld [vmem:[#allocation2 + $0x1ba] sm:$0x1]  ;;  %v6642_v7 = vld [vmem:[#allocation2 + $0x1d2] sm:$0x1]  ;;  %v6629_v13 = vld [vmem:[#allocation2 + $0x19e] sm:$0x1] }
 0xfbc   :  { %v6844_v49 = vrot.slane %v6626_v30, 4  ;;  %v6858_v51 = vrot.slane %v6634_v31, 4  ;;  %v6836_v2 = vrot.slane %v6621_v22, 1  ;;  %v6843_v56 = vsel %vm2819_vm3, %v6842_v62, %v6841_v38  ;;  %v6650_v9 = vld [vmem:[#allocation2 + $0x1f2] sm:$0x1] }
 0xfbd   :  { %v6857_v57 = vsel %vm2819_vm3, %v6856_v33, %v6855_v54  ;;  %v6821_v11 = vsel %vm2828_vm6, %v6820_v35, %v6819_v53  ;;  %v6835_v48 = vsel %vm2828_vm6, %v6834_v50, %v6833_v41  ;;  %v6868_v60 = vrot.slane %v6640_v42, 6  ;;  %v6637_v14 = vld [vmem:[#allocation2 + $0x1be] sm:$0x1]  ;;  %v6643_v35 = vld [vmem:[#allocation2 + $0x1d6] sm:$0x1] }
 0xfbe   :  { %v6882_v61 = vrot.slane %v6648_v43, 6  ;;  %v6846_v0 = vrot.slane %v6627_v37, 3  ;;  %v6860_v1 = vrot.slane %v6635_v8, 3  ;;  %v6845_v19 = vsel %vm2822_vm4, %v6844_v49, %v6843_v56  ;;  %v6651_v23 = vld [vmem:[#allocation2 + $0x1f6] sm:$0x1] }
 0xfbf   :  { %v6859_v4 = vsel %vm2822_vm4, %v6858_v51, %v6857_v57  ;;  %v6823_v5 = vsel %vm2831_vm7, %v6822_v36, %v6821_v11  ;;  %v6837_v6 = vsel %vm2831_vm7, %v6836_v2, %v6835_v48  ;;  %v6870_v10 = vrot.slane %v6641_v58, 5  ;;  %v6644_v36 = vld [vmem:[#allocation2 + $0x1da] sm:$0x1]  ;;  %v6645_v42 = vld [vmem:[#allocation2 + $0x1de] sm:$0x1] }
 0xfc0   :  { %v6884_v12 = vrot.slane %v6649_v59, 5  ;;  %v6848_v16 = vrot.slane %v6628_v15, 2  ;;  %v6862_v17 = vrot.slane %v6636_v63, 2  ;;  %v6847_v34 = vsel %vm2825_vm5, %v6846_v0, %v6845_v19  ;;  %v6652_v50 = vld [vmem:[#allocation2 + $0x1fa] sm:$0x1] }
 0xfc1   :  { %v6861_v22 = vsel %vm2825_vm5, %v6860_v1, %v6859_v4  ;;  %v10430_v39 = vpack.c.bf16 %v6837_v6, %v6823_v5  ;;  %v6872_v26 = vrot.slane %v6642_v7, 4  ;;  %v6850_v29 = vrot.slane %v6629_v13, 1  ;;  %v6653_v43 = vld [vmem:[#allocation2 + $0x1fe] sm:$0x1]  ;;  %v6589_v11 = vld [vmem:[#allocation4 + $0xa] sm:$0x3] }
 0xfc2   :  { %v6864_v21 = vrot.slane %v6637_v14, 1  ;;  %v6849_v62 = vsel %vm2828_vm6, %v6848_v16, %v6847_v34  ;;  %v6863_v33 = vsel %vm2828_vm6, %v6862_v17, %v6861_v22  ;;  %v6874_v37 = vrot.slane %v6643_v35, 3  ;;  %v6655_v1 = vld [vmem:[#allocation3 + $0x106] sm:$0x1]  ;;  %v6654_v19 = vld [vmem:[#allocation3 + $0x102] sm:$0x1] }
 0xfc3   :  { %v6888_v8 = vrot.slane %v6651_v23, 3  ;;  %v6851_v53 = vsel %vm2831_vm7, %v6850_v29, %v6849_v62  ;;  %v6878_v51 = vrot.slane %v6645_v42, 1  ;;  %v6658_v4 = vld [vmem:[#allocation3 + $0x112] sm:$0x1]  ;;  %v6659_v5 = vld [vmem:[#allocation3 + $0x116] sm:$0x1] }
 0xfc4   :  { %v6865_v41 = vsel %vm2831_vm7, %v6864_v21, %v6863_v33  ;;  %v6660_v6 = vld [vmem:[#allocation3 + $0x11a] sm:$0x1]  ;;  %v6661_v7 = vld [vmem:[#allocation3 + $0x11e] sm:$0x1]  ;;  %v6665_v13 = vld [vmem:[#allocation3 + $0x12e] sm:$0x1] }
 0xfc5   :  { %v10433_v49 = vpack.c.bf16 %v6865_v41, %v6851_v53  ;;  %v6666_v14 = vld [vmem:[#allocation3 + $0x132] sm:$0x1]  ;;  %v6667_v16 = vld [vmem:[#allocation3 + $0x136] sm:$0x1]  ;;  %v6668_v17 = vld [vmem:[#allocation3 + $0x13a] sm:$0x1] }
 0xfc6   :  { %v6669_v22 = vld [vmem:[#allocation3 + $0x13e] sm:$0x1]  ;;  %v7057_v35 = vrot.slane %v6659_v5, 3  ;;  %v7059_v23 = vrot.slane %v6660_v6, 2  ;;  %v7067_v21 = vrot.slane %v6665_v13, 5  ;;  %v7061_v33 = vrot.slane %v6661_v7, 1 }
 0xfc7   :  { %v6684_v5 = vld [vmem:[#allocation3 + $0x17a] sm:$0x1] }
0x103c   :  { %v6323_v45 = vpop.xlane.xlu1 %6322 }
0x103d   :  { %10737 = vrcp.f32 %v6323_v45  ;;  %v6880_v45 = vrot.slane %v6647_v28, 7  ;;  %v6886_v28 = vrot.slane %v6650_v9, 4  ;;  %v6662_v9 = vld [vmem:[#allocation3 + $0x122] sm:$0x1] }
0x103f   :  { %v6881_v3 = vsel %vm2813_vm1, %v6880_v45, %v6646_v24  ;;  %v6890_v45 = vrot.slane %v6652_v50, 2  ;;  %v7071_v50 = vrot.slane %v6667_v16, 3 }
0x1040   :  { %v6883_v20 = vsel %vm2816_vm2, %v6882_v61, %v6881_v3  ;;  %v6657_v3 = vld [vmem:[#allocation3 + $0x10e] sm:$0x1] }
0x1041   :  { %v6885_v31 = vsel %vm2819_vm3, %v6884_v12, %v6883_v20  ;;  %v6664_v12 = vld [vmem:[#allocation3 + $0x12a] sm:$0x1]  ;;  %v7053_v34 = vrot.slane %v6657_v3, 5 }
0x1042   :  { %v6887_v54 = vsel %vm2822_vm4, %v6886_v28, %v6885_v31  ;;  %v7065_v29 = vrot.slane %v6664_v12, 6  ;;  %v6671_v31 = vld [vmem:[#allocation3 + $0x146] sm:$0x1] }
0x1043   :  { %v7077_v53 = vrot.slane %v6671_v31, 7 }
0x1047   :  { %v10738_v46 = vpop.eup %10737 }
0x1048   :  { %v6325_v55 = vmul.f32 %v10738_v46, %v12122_v40  ;;  %v6867_v40 = vsel %vm2813_vm1, %v6866_v44, %v6638_v52  ;;  %v6876_v44 = vrot.slane %v6644_v36, 2  ;;  %v6892_v52 = vrot.slane %v6653_v43, 1 }
0x1049   :  { %v6869_v18 = vsel %vm2816_vm2, %v6868_v60, %v6867_v40  ;;  %v6656_v40 = vld [vmem:[#allocation3 + $0x10a] sm:$0x1]  ;;  %v7075_v43 = vrot.slane %v6669_v22, 1 }
0x104a   :  { %10060 = vmatmul.mubr.msk.f32.vlgmr.msra.gmra.mrb[24].mxu0 %vm3209_vm10, %v6325_v55  ;;  %v6871_v30 = vsel %vm2819_vm3, %v6870_v10, %v6869_v18  ;;  %v6663_v10 = vld [vmem:[#allocation3 + $0x126] sm:$0x1]  ;;  %v7049_v18 = vrot.slane %v6655_v1, 7  ;;  %v7051_v20 = vrot.slane %v6656_v40, 6  ;;  %v6678_v1 = vld [vmem:[#allocation3 + $0x162] sm:$0x1] }
0x104b   :  { %10428 = vmatpush3.bf16.xpose.msra.mxu0 %v10427_v47  ;;  %10078 = vmatprep.mubr.msk.f32.mxu0 %vm10989_vm0, %v10990_v27  ;;  %v6873_v38 = vsel %vm2822_vm4, %v6872_v26, %v6871_v30  ;;  %v6889_v47 = vsel %vm2825_vm5, %v6888_v8, %v6887_v54  ;;  %v7063_v26 = vrot.slane %v6663_v10, 7  ;;  %v7069_v30 = vrot.slane %v6666_v14, 4  ;;  %v6670_v54 = vld [vmem:[#allocation3 + $0x142] sm:$0x1]  ;;  %v6683_v40 = vld [vmem:[#allocation3 + $0x176] sm:$0x1] }
0x104c   :  { %10429 = vmatprep.subr.bf16.mxu0 %v10988_v25  ;;  %v6875_v46 = vsel %vm2825_vm5, %v6874_v37, %v6873_v38  ;;  %v6891_v55 = vsel %vm2828_vm6, %v6890_v45, %v6889_v47  ;;  %v7050_v28 = vsel %vm2813_vm1, %v7049_v18, %v6654_v19  ;;  %v7073_v38 = vrot.slane %v6668_v17, 2  ;;  %v6673_v45 = vld [vmem:[#allocation3 + $0x14e] sm:$0x1]  ;;  %v6685_v10 = vld [vmem:[#allocation3 + $0x17e] sm:$0x1] }
0x104d   :  { %v6877_v24 = vsel %vm2828_vm6, %v6876_v44, %v6875_v46  ;;  %v6893_v56 = vsel %vm2831_vm7, %v6892_v52, %v6891_v55  ;;  %v7052_v62 = vsel %vm2816_vm2, %v7051_v20, %v7050_v28  ;;  %v7064_v36 = vsel %vm2813_vm1, %v7063_v26, %v6662_v9  ;;  %v6672_v44 = vld [vmem:[#allocation3 + $0x14a] sm:$0x1]  ;;  %v6676_v52 = vld [vmem:[#allocation3 + $0x15a] sm:$0x1] }
0x104e   :  { %v6879_v2 = vsel %vm2831_vm7, %v6878_v51, %v6877_v24  ;;  %v7054_v37 = vsel %vm2819_vm3, %v7053_v34, %v7052_v62  ;;  %v7066_v8 = vsel %vm2816_vm2, %v7065_v29, %v7064_v36  ;;  %v6675_v51 = vld [vmem:[#allocation3 + $0x156] sm:$0x1]  ;;  %v7087_v7 = vrot.slane %v6676_v52, 2 }
0x104f   :  { %v10436_v57 = vpack.c.bf16 %v6893_v56, %v6879_v2  ;;  %v7068_v42 = vsel %vm2819_vm3, %v7067_v21, %v7066_v8  ;;  %v6677_v2 = vld [vmem:[#allocation3 + $0x15e] sm:$0x1]  ;;  %v6679_v56 = vld [vmem:[#allocation3 + $0x166] sm:$0x1]  ;;  %v7085_v19 = vrot.slane %v6675_v51, 3  ;;  %v7099_v34 = vrot.slane %v6683_v40, 3 }
0x1050   :  { %v7070_v47 = vsel %vm2822_vm4, %v7069_v30, %v7068_v42  ;;  %v7091_v9 = vrot.slane %v6679_v56, 7  ;;  %v7089_v18 = vrot.slane %v6677_v2, 1  ;;  %v7103_v28 = vrot.slane %v6685_v10, 1  ;;  %v6696_v42 = vld [vmem:[#allocation3 + $0x1aa] sm:$0x1] }
0x1051   :  { %v7072_v55 = vsel %vm2825_vm5, %v7071_v50, %v7070_v47  ;;  %v6694_v47 = vld [vmem:[#allocation3 + $0x1a2] sm:$0x1]  ;;  %v6697_v51 = vld [vmem:[#allocation3 + $0x1ae] sm:$0x1]  ;;  %v6703_v10 = vld [vmem:[#allocation3 + $0x1c6] sm:$0x1] }
0x1052   :  { %v7092_v20 = vsel %vm2813_vm1, %v7091_v9, %v6678_v1  ;;  %v7121_v1 = vrot.slane %v6696_v42, 6 }
0x1053   :  { %10431 = vmatpush3.bf16.xpose.msra.mxu0 %v10430_v39  ;;  %v7055_v39 = vrot.slane %v6658_v4, 4 }
0x1054   :  { %10432 = vmatprep.subr.bf16.mxu0 %v10988_v25 }
0x1055   :  { %v7056_v41 = vsel %vm2822_vm4, %v7055_v39, %v7054_v37 }
0x1056   :  { %v7058_v46 = vsel %vm2825_vm5, %v7057_v35, %v7056_v41  ;;  %v7101_v35 = vrot.slane %v6684_v5, 2  ;;  %v6688_v41 = vld [vmem:[#allocation3 + $0x18a] sm:$0x1] }
0x1057   :  { %v7060_v24 = vsel %vm2828_vm6, %v7059_v23, %v7058_v46  ;;  %v6689_v46 = vld [vmem:[#allocation3 + $0x18e] sm:$0x1]  ;;  %v7107_v2 = vrot.slane %v6688_v41, 6  ;;  %v6715_v41 = vld [vmem:[#allocation3 + $0x1f6] sm:$0x1] }
0x1058   :  { %v7109_v56 = vrot.slane %v6689_v46, 5 }
0x105b   :  { %10434 = vmatpush3.bf16.xpose.msra.mxu0 %v10433_v49  ;;  %v6674_v49 = vld [vmem:[#allocation3 + $0x152] sm:$0x1] }
0x105c   :  { %10435 = vmatprep.subr.bf16.mxu0 %v10988_v25  ;;  %v7083_v3 = vrot.slane %v6674_v49, 4  ;;  %v6690_v49 = vld [vmem:[#allocation3 + $0x192] sm:$0x1] }
0x1063   :  { %10437 = vmatpush3.bf16.xpose.msra.mxu0 %v10436_v57  ;;  %v6680_v57 = vld [vmem:[#allocation3 + $0x16a] sm:$0x1] }
0x1064   :  { %10462 = vmatprep.subr.bf16.mxu0 %v10988_v25  ;;  %v7093_v13 = vrot.slane %v6680_v57, 6  ;;  %v6692_v57 = vld [vmem:[#allocation3 + $0x19a] sm:$0x1] }
0x1066   :  { %v7094_v39 = vsel %vm2816_vm2, %v7093_v13, %v7092_v20 }
0x106a   :  { %10079 = vmatmul.mubr.f32.vlgmr.msra.gmra.mrb[26].mxu0 %v6589_v11  ;;  %v7078_v11 = vsel %vm2813_vm1, %v7077_v53, %v6670_v54  ;;  %v6687_v54 = vld [vmem:[#allocation3 + $0x186] sm:$0x1] }
0x106b   :  { %10135 = vmatprep.mubr.msk.f32.mxu0 %vm10989_vm0, %v10990_v27  ;;  %v6695_v53 = vld [vmem:[#allocation3 + $0x1a6] sm:$0x1] }
0x111d   :  { %v6579_v48 = vpop.f32.mrb[24].mxu0 }
0x111e   :  { %6583 = vst [vmem:[#allocation7 + $0x9] sm:$0x1] %v6579_v48  ;;  %v9200_v58 = vrot.slane %v6579_v48, 9  ;;  %v10061_v59 = vpop.f32.mrb[25].mxu0  ;;  %v7062_v48 = vsel %vm2831_vm7, %v7061_v33, %v7060_v24  ;;  %v6691_v24 = vld [vmem:[#allocation3 + $0x196] sm:$0x1] }
0x111f   :  { %v6681_v59 = vld [vmem:[#allocation3 + $0x16e] sm:$0x1] }
0x1120   :  { %6588 = vst [vmem:[#allocation7 + $0xd] sm:$0x1] %v9200_v58  ;;  %v7074_v58 = vsel %vm2828_vm6, %v7073_v38, %v7072_v55  ;;  %v7095_v14 = vrot.slane %v6681_v59, 5  ;;  %v6699_v55 = vld [vmem:[#allocation3 + $0x1b6] sm:$0x1] }
0x1122   :  { %v7096_v26 = vsel %vm2819_vm3, %v7095_v14, %v7094_v39 }
0x113d   :  { %v6968_v60 = vpop.f32.mrb[26].mxu0 }
0x113e   :  { %v6972_v61 = vmul.f32 0.088388346, %v6968_v60  ;;  %v10080_v15 = vpop.f32.mrb[27].mxu0  ;;  %v6682_v60 = vld [vmem:[#allocation3 + $0x172] sm:$0x1] }
0x113f   :  { %v7081_v15 = vrot.slane %v6673_v45, 5  ;;  %v7097_v16 = vrot.slane %v6682_v60, 4  ;;  %v6686_v45 = vld [vmem:[#allocation3 + $0x182] sm:$0x1]  ;;  %v6693_v60 = vld [vmem:[#allocation3 + $0x19e] sm:$0x1] }
0x1140   :  { %v12224_v63 = vsel %vm11394_vm8, %v6972_v61, -1e+30  ;;  %v7079_v61 = vrot.slane %v6672_v44, 6  ;;  %v7119_v44 = vrot.slane %v6695_v53, 7  ;;  %v6710_v53 = vld [vmem:[#allocation3 + $0x1e2] sm:$0x1] }
0x1141   :  { %v6974_v0 = vsel %vm3013_vm9, %v12224_v63, -inf  ;;  %v7098_v29 = vsel %vm2822_vm4, %v7097_v16, %v7096_v26  ;;  %v6702_v16 = vld [vmem:[#allocation3 + $0x1c2] sm:$0x1]  ;;  %v6707_v26 = vld [vmem:[#allocation3 + $0x1d6] sm:$0x1] }
0x1142   :  { %6975 = vmax.xlane.f32.xlu0 %v6974_v0  ;;  %v7076_v0 = vsel %vm2831_vm7, %v7075_v43, %v7074_v58  ;;  %v7080_v6 = vsel %vm2816_vm2, %v7079_v61, %v7078_v11  ;;  %v7100_v30 = vsel %vm2825_vm5, %v7099_v34, %v7098_v29  ;;  %v7105_v43 = vrot.slane %v6687_v54, 7  ;;  %v6700_v11 = vld [vmem:[#allocation3 + $0x1ba] sm:$0x1]  ;;  %v6701_v61 = vld [vmem:[#allocation3 + $0x1be] sm:$0x1] }
0x1143   :  { %v10439_v4 = vpack.c.bf16 %v7076_v0, %v7062_v48  ;;  %v7082_v12 = vsel %vm2819_vm3, %v7081_v15, %v7080_v6  ;;  %v7102_v31 = vsel %vm2828_vm6, %v7101_v35, %v7100_v30  ;;  %v7111_v48 = vrot.slane %v6690_v49, 4  ;;  %v6704_v34 = vld [vmem:[#allocation3 + $0x1ca] sm:$0x1]  ;;  %v6711_v30 = vld [vmem:[#allocation3 + $0x1e6] sm:$0x1] }
0x1144   :  { %v7084_v17 = vsel %vm2822_vm4, %v7083_v3, %v7082_v12  ;;  %v7104_v62 = vsel %vm2831_vm7, %v7103_v28, %v7102_v31  ;;  %v7106_v52 = vsel %vm2813_vm1, %v7105_v43, %v6686_v45  ;;  %v7113_v58 = vrot.slane %v6691_v24, 3  ;;  %v6708_v28 = vld [vmem:[#allocation3 + $0x1da] sm:$0x1]  ;;  %v6712_v31 = vld [vmem:[#allocation3 + $0x1ea] sm:$0x1] }
0x1145   :  { %10440 = vmatpush3.bf16.msra.mxu1 %v10439_v4  ;;  %v7086_v22 = vsel %vm2825_vm5, %v7085_v19, %v7084_v17  ;;  %v7120_v59 = vsel %vm2813_vm1, %v7119_v44, %v6694_v47  ;;  %v7108_v15 = vsel %vm2816_vm2, %v7107_v2, %v7106_v52  ;;  %v7115_v0 = vrot.slane %v6692_v57, 2  ;;  %v6716_v44 = vld [vmem:[#allocation3 + $0x1fa] sm:$0x1] }
0x1146   :  { %10441 = vmatprep.subr.bf16.mxu1 %v10988_v25  ;;  %v7088_v23 = vsel %vm2828_vm6, %v7087_v7, %v7086_v22  ;;  %v7110_v40 = vsel %vm2819_vm3, %v7109_v56, %v7108_v15  ;;  %v7117_v3 = vrot.slane %v6693_v60, 1  ;;  %v7123_v19 = vrot.slane %v6697_v51, 5  ;;  %v6705_v22 = vld [vmem:[#allocation3 + $0x1ce] sm:$0x1]  ;;  %v6717_v51 = vld [vmem:[#allocation3 + $0x1fe] sm:$0x1] }
0x1147   :  { %v7090_v21 = vsel %vm2831_vm7, %v7089_v18, %v7088_v23  ;;  %v7112_v5 = vsel %vm2822_vm4, %v7111_v48, %v7110_v40  ;;  %v7122_v6 = vsel %vm2816_vm2, %v7121_v1, %v7120_v59  ;;  %v7127_v7 = vrot.slane %v6699_v55, 3  ;;  %v6706_v23 = vld [vmem:[#allocation3 + $0x1d2] sm:$0x1] }
0x1148   :  { %v10442_v33 = vpack.c.bf16 %v7104_v62, %v7090_v21  ;;  %v7129_v9 = vrot.slane %v6700_v11, 2  ;;  %v7114_v12 = vsel %vm2825_vm5, %v7113_v58, %v7112_v5  ;;  %v7124_v13 = vsel %vm2819_vm3, %v7123_v19, %v7122_v6  ;;  %v6709_v21 = vld [vmem:[#allocation3 + $0x1de] sm:$0x1]  ;;  %v7258_v5 = vld [vmem:[#allocation2 + $0x127] sm:$0x1] }
0x1149   :  { %v7131_v14 = vrot.slane %v6701_v61, 1  ;;  %v7133_v17 = vrot.slane %v6703_v10, 7  ;;  %v7116_v18 = vsel %vm2828_vm6, %v7115_v0, %v7114_v12  ;;  %v7139_v42 = vrot.slane %v6706_v23, 4  ;;  %v7251_v6 = vld [vmem:[#allocation2 + $0x10b] sm:$0x1] }
0x114a   :  { %10443 = vmatpush3.bf16.msra.mxu1 %v10442_v33  ;;  %v7118_v39 = vsel %vm2831_vm7, %v7117_v3, %v7116_v18  ;;  %v7141_v43 = vrot.slane %v6707_v26, 3  ;;  %v7143_v46 = vrot.slane %v6708_v28, 2  ;;  %v7147_v47 = vrot.slane %v6711_v30, 7  ;;  %v7249_v12 = vld [vmem:[#allocation2 + $0x103] sm:$0x1] }
0x114b   :  { %10444 = vmatprep.subr.bf16.mxu1 %v10988_v25  ;;  %v7134_v62 = vsel %vm2813_vm1, %v7133_v17, %v6702_v16  ;;  %v7149_v49 = vrot.slane %v6712_v31, 6  ;;  %v7145_v2 = vrot.slane %v6709_v21, 1  ;;  %v7155_v57 = vrot.slane %v6715_v41, 3  ;;  %v7260_v16 = vld [vmem:[#allocation2 + $0x12f] sm:$0x1] }
0x114c   :  { %v7148_v56 = vsel %vm2813_vm1, %v7147_v47, %v6710_v53  ;;  %v7157_v58 = vrot.slane %v6716_v44, 2  ;;  %v7159_v61 = vrot.slane %v6717_v51, 1  ;;  %v7455_v10 = vrot.slane %v7258_v5, 7  ;;  %v7261_v23 = vld [vmem:[#allocation2 + $0x133] sm:$0x1] }
0x114d   :  { %v7150_v48 = vsel %vm2816_vm2, %v7149_v49, %v7148_v56  ;;  %v7443_v17 = vrot.slane %v7251_v6, 6  ;;  %v7459_v28 = vrot.slane %v7260_v16, 5  ;;  %v7262_v21 = vld [vmem:[#allocation2 + $0x137] sm:$0x1]  ;;  %v7273_v53 = vld [vmem:[#allocation2 + $0x163] sm:$0x1] }
0x114e   :  { %v7255_v41 = vld [vmem:[#allocation2 + $0x11b] sm:$0x1]  ;;  %v7268_v44 = vld [vmem:[#allocation2 + $0x14f] sm:$0x1]  ;;  %v7281_v16 = vld [vmem:[#allocation2 + $0x183] sm:$0x1] }
0x114f   :  { %v7263_v49 = vld [vmem:[#allocation2 + $0x13b] sm:$0x1] }
0x11cf   :  { %v6976_v36 = vpop.xlane.xlu0 %6975 }
0x11d0   :  { %v6977_v50 = vsub.f32 %v12224_v63, %v6976_v36  ;;  %v6698_v63 = vld [vmem:[#allocation3 + $0x1b2] sm:$0x1]  ;;  %v6713_v36 = vld [vmem:[#allocation3 + $0x1ee] sm:$0x1] }
0x11d1   :  { %v7125_v4 = vrot.slane %v6698_v63, 4  ;;  %v7151_v52 = vrot.slane %v6713_v36, 5 }
0x11d2   :  { %v6978_v37 = vmul.f32 1.442695, %v6977_v50  ;;  %v6714_v50 = vld [vmem:[#allocation3 + $0x1f2] sm:$0x1] }
0x11d3   :  { %v7126_v20 = vsel %vm2822_vm4, %v7125_v4, %v7124_v13  ;;  %v7153_v24 = vrot.slane %v6714_v50, 4  ;;  %v7152_v60 = vsel %vm2819_vm3, %v7151_v52, %v7150_v48  ;;  %v7250_v4 = vld [vmem:[#allocation2 + $0x107] sm:$0x1]  ;;  %v7257_v13 = vld [vmem:[#allocation2 + $0x123] sm:$0x1] }
0x11d4   :  { %10739 = vpow2.f32 %v6978_v37  ;;  %v7128_v35 = vsel %vm2825_vm5, %v7127_v7, %v7126_v20  ;;  %v7135_v37 = vrot.slane %v6704_v34, 6  ;;  %v7259_v7 = vld [vmem:[#allocation2 + $0x12b] sm:$0x1]  ;;  %v7456_v34 = vsel %vm2813_vm1, %v7455_v10, %v7257_v13  ;;  %v7282_v48 = vld [vmem:[#allocation2 + $0x187] sm:$0x1] }
0x11d5   :  { %v7130_v29 = vsel %vm2828_vm6, %v7129_v9, %v7128_v35  ;;  %v7154_v15 = vsel %vm2822_vm4, %v7153_v24, %v7152_v60  ;;  %v7441_v9 = vrot.slane %v7250_v4, 7  ;;  %v7457_v18 = vrot.slane %v7259_v7, 6  ;;  %v7253_v35 = vld [vmem:[#allocation2 + $0x113] sm:$0x1]  ;;  %v7283_v7 = vld [vmem:[#allocation2 + $0x18b] sm:$0x1] }
0x11d6   :  { %v7132_v33 = vsel %vm2831_vm7, %v7131_v14, %v7130_v29  ;;  %v7136_v45 = vsel %vm2816_vm2, %v7135_v37, %v7134_v62  ;;  %v7156_v1 = vsel %vm2825_vm5, %v7155_v57, %v7154_v15  ;;  %v7252_v14 = vld [vmem:[#allocation2 + $0x10f] sm:$0x1]  ;;  %v7254_v29 = vld [vmem:[#allocation2 + $0x117] sm:$0x1]  ;;  %v7267_v62 = vld [vmem:[#allocation2 + $0x14b] sm:$0x1] }
0x11d7   :  { %v10445_v54 = vpack.c.bf16 %v7132_v33, %v7118_v39  ;;  %v7158_v40 = vsel %vm2828_vm6, %v7157_v58, %v7156_v1  ;;  %v7442_v20 = vsel %vm2813_vm1, %v7441_v9, %v7249_v12  ;;  %v7274_v39 = vld [vmem:[#allocation2 + $0x167] sm:$0x1]  ;;  %v7445_v26 = vrot.slane %v7252_v14, 5  ;;  %v7275_v33 = vld [vmem:[#allocation2 + $0x16b] sm:$0x1] }
0x11d8   :  { %v7160_v3 = vsel %vm2831_vm7, %v7159_v61, %v7158_v40  ;;  %v7444_v30 = vsel %vm2816_vm2, %v7443_v17, %v7442_v20  ;;  %v7458_v31 = vsel %vm2816_vm2, %v7457_v18, %v7456_v34  ;;  %v7483_v50 = vrot.slane %v7274_v39, 7  ;;  %v7290_v58 = vld [vmem:[#allocation2 + $0x1a7] sm:$0x1]  ;;  %v7269_v60 = vld [vmem:[#allocation2 + $0x153] sm:$0x1] }
0x11d9   :  { %10446 = vmatpush3.bf16.msra.mxu1 %v10445_v54  ;;  %v7447_v37 = vrot.slane %v7253_v35, 4  ;;  %v7265_v54 = vld [vmem:[#allocation2 + $0x143] sm:$0x1]  ;;  %v7485_v47 = vrot.slane %v7275_v33, 6  ;;  %v7449_v51 = vrot.slane %v7254_v29, 3  ;;  %v7451_v57 = vrot.slane %v7255_v41, 2 }
0x11da   :  { %10447 = vmatprep.subr.bf16.mxu1 %v10988_v25  ;;  %v7484_v24 = vsel %vm2813_vm1, %v7483_v50, %v7273_v53  ;;  %v7277_v61 = vld [vmem:[#allocation2 + $0x173] sm:$0x1]  ;;  %v7473_v15 = vrot.slane %v7268_v44, 5  ;;  %v7465_v1 = vrot.slane %v7263_v49, 2  ;;  %v7270_v40 = vld [vmem:[#allocation2 + $0x157] sm:$0x1] }
0x11db   :  { %v7486_v4 = vsel %vm2816_vm2, %v7485_v47, %v7484_v24  ;;  %v7291_v9 = vld [vmem:[#allocation2 + $0x1ab] sm:$0x1]  ;;  %v7497_v10 = vrot.slane %v7282_v48, 7  ;;  %v7511_v12 = vrot.slane %v7290_v58, 7  ;;  %v7475_v13 = vrot.slane %v7269_v60, 4 }
0x11dc   :  { %v7489_v14 = vrot.slane %v7277_v61, 4  ;;  %v7289_v17 = vld [vmem:[#allocation2 + $0x1a3] sm:$0x1]  ;;  %v7271_v34 = vld [vmem:[#allocation2 + $0x15b] sm:$0x1]  ;;  %v7499_v29 = vrot.slane %v7283_v7, 6 }
0x11dd   :  { %v7512_v50 = vsel %vm2813_vm1, %v7511_v12, %v7289_v17  ;;  %v7298_v41 = vld [vmem:[#allocation2 + $0x1c7] sm:$0x1]  ;;  %v7294_v24 = vld [vmem:[#allocation2 + $0x1b7] sm:$0x1]  ;;  %v7307_v48 = vld [vmem:[#allocation2 + $0x1eb] sm:$0x1] }
0x11de   :  { %v12259_v8 = vpop.eup %10739  ;;  %v7525_v58 = vrot.slane %v7298_v41, 7 }
0x11df   :  { %v6980_v38 = vsel %vm3013_vm9, %v12259_v8, 0.0 }
0x11e0   :  { %6981 = vadd.xlane.f32.xlu1 %v6980_v38  ;;  %v7137_v38 = vrot.slane %v6705_v22, 5  ;;  %v7266_v22 = vld [vmem:[#allocation2 + $0x147] sm:$0x1] }
0x11e1   :  { %v7469_v36 = vrot.slane %v7266_v22, 7 }
0x11e2   :  { %v7138_v63 = vsel %vm2819_vm3, %v7137_v38, %v7136_v45  ;;  %v7461_v38 = vrot.slane %v7261_v23, 4  ;;  %v7276_v45 = vld [vmem:[#allocation2 + $0x16f] sm:$0x1] }
0x11e3   :  { %v7140_v55 = vsel %vm2822_vm4, %v7139_v42, %v7138_v63  ;;  %v7446_v42 = vsel %vm2819_vm3, %v7445_v26, %v7444_v30  ;;  %v7463_v63 = vrot.slane %v7262_v21, 3  ;;  %v7470_v52 = vsel %vm2813_vm1, %v7469_v36, %v7265_v54  ;;  %v7284_v26 = vld [vmem:[#allocation2 + $0x18f] sm:$0x1]  ;;  %v7272_v30 = vld [vmem:[#allocation2 + $0x15f] sm:$0x1] }
0x11e4   :  { %v7142_v11 = vsel %vm2825_vm5, %v7141_v43, %v7140_v55  ;;  %v7460_v43 = vsel %vm2819_vm3, %v7459_v28, %v7458_v31  ;;  %v7256_v55 = vld [vmem:[#allocation2 + $0x11f] sm:$0x1]  ;;  %v7448_v56 = vsel %vm2822_vm4, %v7447_v37, %v7446_v42  ;;  %v7292_v28 = vld [vmem:[#allocation2 + $0x1af] sm:$0x1]  ;;  %v7513_v21 = vrot.slane %v7291_v9, 6 }
0x11e5   :  { %v7144_v59 = vsel %vm2828_vm6, %v7143_v46, %v7142_v11  ;;  %v7471_v46 = vrot.slane %v7267_v62, 6  ;;  %v7462_v11 = vsel %vm2822_vm4, %v7461_v38, %v7460_v43  ;;  %v7450_v5 = vsel %vm2825_vm5, %v7449_v51, %v7448_v56  ;;  %v7279_v31 = vld [vmem:[#allocation2 + $0x17b] sm:$0x1]  ;;  %v7280_v37 = vld [vmem:[#allocation2 + $0x17f] sm:$0x1] }
0x11e6   :  { %v7146_v0 = vsel %vm2831_vm7, %v7145_v2, %v7144_v59  ;;  %v7264_v2 = vld [vmem:[#allocation2 + $0x13f] sm:$0x1]  ;;  %v7464_v6 = vsel %vm2825_vm5, %v7463_v63, %v7462_v11  ;;  %v7453_v18 = vrot.slane %v7256_v55, 1  ;;  %v7452_v35 = vsel %vm2828_vm6, %v7451_v57, %v7450_v5  ;;  %v7306_v42 = vld [vmem:[#allocation2 + $0x1e7] sm:$0x1] }
0x11e7   :  { %v10448_v19 = vpack.c.bf16 %v7160_v3, %v7146_v0  ;;  %v7487_v0 = vrot.slane %v7276_v45, 5  ;;  %v7278_v3 = vld [vmem:[#allocation2 + $0x177] sm:$0x1]  ;;  %v7467_v20 = vrot.slane %v7264_v2, 1  ;;  %v7466_v23 = vsel %vm2828_vm6, %v7465_v1, %v7464_v6  ;;  %v7285_v45 = vld [vmem:[#allocation2 + $0x193] sm:$0x1] }
0x11e8   :  { %v7477_v62 = vrot.slane %v7270_v40, 3  ;;  %v7491_v33 = vrot.slane %v7278_v3, 3  ;;  %v7498_v36 = vsel %vm2813_vm1, %v7497_v10, %v7281_v16  ;;  %v7479_v54 = vrot.slane %v7271_v34, 2  ;;  %v7299_v11 = vld [vmem:[#allocation2 + $0x1cb] sm:$0x1] }
0x11e9   :  { %10449 = vmatpush3.bf16.msra.mxu1 %v10448_v19  ;;  %v7472_v19 = vsel %vm2816_vm2, %v7471_v46, %v7470_v52  ;;  %v7488_v39 = vsel %vm2819_vm3, %v7487_v0, %v7486_v4  ;;  %v7454_v43 = vsel %vm2831_vm7, %v7453_v18, %v7452_v35  ;;  %v7468_v44 = vsel %vm2831_vm7, %v7467_v20, %v7466_v23  ;;  %v7293_v46 = vld [vmem:[#allocation2 + $0x1b3] sm:$0x1]  ;;  %v7286_v52 = vld [vmem:[#allocation2 + $0x197] sm:$0x1]  ;;  %v7297_v1 = vld [vmem:[#allocation2 + $0x1c3] sm:$0x1] }
0x11ea   :  { %10450 = vmatprep.subr.bf16.mxu1 %v10988_v25  ;;  %v7474_v22 = vsel %vm2819_vm3, %v7473_v15, %v7472_v19  ;;  %v7490_v53 = vsel %vm2822_vm4, %v7489_v14, %v7488_v39  ;;  %v7501_v47 = vrot.slane %v7284_v26, 5  ;;  %v7515_v49 = vrot.slane %v7292_v28, 5  ;;  %v7305_v40 = vld [vmem:[#allocation2 + $0x1e3] sm:$0x1]  ;;  %v7300_v9 = vld [vmem:[#allocation2 + $0x1cf] sm:$0x1] }
0x11eb   :  { %v7476_v38 = vsel %vm2822_vm4, %v7475_v13, %v7474_v22  ;;  %v7481_v51 = vrot.slane %v7272_v30, 1  ;;  %v7493_v63 = vrot.slane %v7279_v31, 2  ;;  %v7500_v55 = vsel %vm2816_vm2, %v7499_v29, %v7498_v36  ;;  %v7308_v10 = vld [vmem:[#allocation2 + $0x1ef] sm:$0x1]  ;;  %v7287_v14 = vld [vmem:[#allocation2 + $0x19b] sm:$0x1] }
0x11ec   :  { %v7514_v2 = vsel %vm2816_vm2, %v7513_v21, %v7512_v50  ;;  %v7478_v56 = vsel %vm2825_vm5, %v7477_v62, %v7476_v38  ;;  %v7492_v57 = vsel %vm2825_vm5, %v7491_v33, %v7490_v53  ;;  %v10451_v61 = vpack.c.bf16 %v7468_v44, %v7454_v43  ;;  %v7295_v16 = vld [vmem:[#allocation2 + $0x1bb] sm:$0x1]  ;;  %v7301_v23 = vld [vmem:[#allocation2 + $0x1d3] sm:$0x1]  ;;  %v7288_v21 = vld [vmem:[#allocation2 + $0x19f] sm:$0x1] }
0x11ed   :  { %v7503_v15 = vrot.slane %v7285_v45, 4  ;;  %v7517_v0 = vrot.slane %v7293_v46, 4  ;;  %v7495_v19 = vrot.slane %v7280_v37, 1  ;;  %v7502_v4 = vsel %vm2819_vm3, %v7501_v47, %v7500_v55  ;;  %v7309_v26 = vld [vmem:[#allocation2 + $0x1f3] sm:$0x1] }
0x11ee   :  { %v7516_v5 = vsel %vm2819_vm3, %v7515_v49, %v7514_v2  ;;  %v7480_v6 = vsel %vm2828_vm6, %v7479_v54, %v7478_v56  ;;  %v7494_v7 = vsel %vm2828_vm6, %v7493_v63, %v7492_v57  ;;  %v7527_v12 = vrot.slane %v7299_v11, 6  ;;  %v7296_v30 = vld [vmem:[#allocation2 + $0x1bf] sm:$0x1]  ;;  %v7302_v38 = vld [vmem:[#allocation2 + $0x1d7] sm:$0x1] }
0x11ef   :  { %v7541_v13 = vrot.slane %v7307_v48, 6  ;;  %v7505_v17 = vrot.slane %v7286_v52, 3  ;;  %v7519_v18 = vrot.slane %v7294_v24, 3  ;;  %v7504_v34 = vsel %vm2822_vm4, %v7503_v15, %v7502_v4  ;;  %v7310_v54 = vld [vmem:[#allocation2 + $0x1f7] sm:$0x1] }
0x11f0   :  { %v7518_v22 = vsel %vm2822_vm4, %v7517_v0, %v7516_v5  ;;  %v7482_v39 = vsel %vm2831_vm7, %v7481_v51, %v7480_v6  ;;  %v7496_v35 = vsel %vm2831_vm7, %v7495_v19, %v7494_v7  ;;  %v7529_v28 = vrot.slane %v7300_v9, 5  ;;  %v7303_v49 = vld [vmem:[#allocation2 + $0x1db] sm:$0x1]  ;;  %v7304_v57 = vld [vmem:[#allocation2 + $0x1df] sm:$0x1]  ;;  %v12356_v6 = vld [vmem:[#allocation7] sm:$0xff] }
0x11f1   :  { %v7543_v29 = vrot.slane %v7308_v10, 5  ;;  %v7507_v31 = vrot.slane %v7287_v14, 2  ;;  %v7521_v62 = vrot.slane %v7295_v16, 2  ;;  %v7520_v50 = vsel %vm2825_vm5, %v7519_v18, %v7518_v22  ;;  %v7311_v51 = vld [vmem:[#allocation2 + $0x1fb] sm:$0x1] }
0x11f2   :  { %v10454_v37 = vpack.c.bf16 %v7496_v35, %v7482_v39  ;;  %v7531_v53 = vrot.slane %v7301_v23, 4  ;;  %v7545_v41 = vrot.slane %v7309_v26, 4  ;;  %v7523_v43 = vrot.slane %v7296_v30, 1  ;;  %v7312_v11 = vld [vmem:[#allocation2 + $0x1ff] sm:$0x1] }
0x11f3   :  { %v7522_v47 = vsel %vm2828_vm6, %v7521_v62, %v7520_v50  ;;  %v7533_v63 = vrot.slane %v7302_v38, 3  ;;  %v7547_v52 = vrot.slane %v7310_v54, 3  ;;  %v7535_v48 = vrot.slane %v7303_v49, 2  ;;  %v10523_v5 = vld [vmem:[#allocation17 + $0xc] ss:$16 sps:$4 sm:$0xff]  }
0x11f4   :  { %v7524_v56 = vsel %vm2831_vm7, %v7523_v43, %v7522_v47  ;;  %v7537_v15 = vrot.slane %v7304_v57, 1  ;;  %v7551_v0 = vrot.slane %v7312_v11, 1  ;;  %v7911_v7 = vcombine.high %v12356_v6, %v12356_v6  ;;  %v7248_v9 = vld [vmem:[#allocation4 + $0xe] sm:$0x3]  ;;  %v10521_v10 = vld [vmem:[#allocation17 + $0x8] ss:$16 sps:$4 sm:$0xff]  }
0x11f5   :  { %v10525_v14 = vld [vmem:[#allocation17 + $0x28] ss:$16 sps:$4 sm:$0xff]   ;;  %v10530_v16 = vld [vmem:[#allocation17 + $0x4c] ss:$16 sps:$4 sm:$0xff]   ;;  %v7317_v11 = vld [vmem:[#allocation3 + $0x113] sm:$0x1] }
0x11f6   :  { %v10533_v18 = vld [vmem:[#allocation17 + $0x6c] ss:$16 sps:$4 sm:$0xff]   ;;  %v10537_v39 = vld [vmem:[#allocation17 + $0xa8] ss:$16 sps:$4 sm:$0xff]  }
0x11f7   :  { %v10539_v22 = vld [vmem:[#allocation17 + $0xac] ss:$16 sps:$4 sm:$0xff]   ;;  %v10540_v23 = vld [vmem:[#allocation17 + $0xc8] ss:$16 sps:$4 sm:$0xff]  }
0x11f8   :  { %v10542_v35 = vld [vmem:[#allocation17 + $0xcc] ss:$16 sps:$4 sm:$0xff]   ;;  %v10561_v54 = vld [vmem:[#allocation17 + $0x1a8] ss:$16 sps:$4 sm:$0xff]  }
0x11f9   :  { %v10545_v26 = vld [vmem:[#allocation17 + $0xec] ss:$16 sps:$4 sm:$0xff]   ;;  %v10567_v43 = vld [vmem:[#allocation17 + $0x1e8] ss:$16 sps:$4 sm:$0xff]  }
0x11fa   :  { %v10551_v30 = vld [vmem:[#allocation17 + $0x12c] ss:$16 sps:$4 sm:$0xff]  }
0x11fb   :  { %v10554_v62 = vld [vmem:[#allocation17 + $0x14c] ss:$16 sps:$4 sm:$0xff]  }
0x11fc   :  { %v10560_v50 = vld [vmem:[#allocation17 + $0x18c] ss:$16 sps:$4 sm:$0xff]  }
0x11fd   :  { %v10563_v38 = vld [vmem:[#allocation17 + $0x1ac] ss:$16 sps:$4 sm:$0xff]  }
0x11fe   :  { %v7316_v57 = vld [vmem:[#allocation3 + $0x10f] sm:$0x1] }
0x126d   :  { %v6982_v59 = vpop.xlane.xlu1 %6981 }
0x126e   :  { %10741 = vrcp.f32 %v6982_v59  ;;  %v7539_v59 = vrot.slane %v7306_v42, 7  ;;  %v7509_v42 = vrot.slane %v7288_v21, 1  ;;  %v10546_v21 = vld [vmem:[#allocation17 + $0x108] ss:$16 sps:$4 sm:$0xff]  }
0x1270   :  { %v7540_v20 = vsel %vm2813_vm1, %v7539_v59, %v7305_v40 }
0x1271   :  { %v7542_v36 = vsel %vm2816_vm2, %v7541_v13, %v7540_v20  ;;  %v12360_v13 = vpack.c.bf16 %v7911_v7, %v7911_v7  ;;  %v10536_v20 = vld [vmem:[#allocation17 + $0x8c] ss:$16 sps:$4 sm:$0xff]  }
0x1272   :  { %v7544_v45 = vsel %vm2819_vm3, %v7543_v29, %v7542_v36  ;;  %v10548_v29 = vld [vmem:[#allocation17 + $0x10c] ss:$16 sps:$4 sm:$0xff]  }
0x1273   :  { %v7546_v55 = vsel %vm2822_vm4, %v7545_v41, %v7544_v45  ;;  %v10557_v36 = vld [vmem:[#allocation17 + $0x16c] ss:$16 sps:$4 sm:$0xff]   ;;  %v10564_v41 = vld [vmem:[#allocation17 + $0x1c8] ss:$16 sps:$4 sm:$0xff]  }
0x1278   :  { %v10742_v60 = vpop.eup %10741 }
0x1279   :  { %v6984_v3 = vmul.f32 %v10742_v60, %v12259_v8  ;;  %v7526_v8 = vsel %vm2813_vm1, %v7525_v58, %v7297_v1  ;;  %v7549_v58 = vrot.slane %v7311_v51, 2  ;;  %v7548_v60 = vsel %vm2825_vm5, %v7547_v52, %v7546_v55  ;;  %v7314_v55 = vld [vmem:[#allocation3 + $0x107] sm:$0x1] }
0x127a   :  { %v7528_v33 = vsel %vm2816_vm2, %v7527_v12, %v7526_v8  ;;  %v10527_v12 = vld [vmem:[#allocation17 + $0x2c] ss:$16 sps:$4 sm:$0xff]   ;;  %v10531_v8 = vld [vmem:[#allocation17 + $0x68] ss:$16 sps:$4 sm:$0xff]  }
0x127b   :  { %10098 = vmatmul.mubr.msk.f32.vlgmr.msra.gmra.mrb[26].mxu1 %vm3209_vm10, %v6984_v3  ;;  %v7530_v44 = vsel %vm2819_vm3, %v7529_v28, %v7528_v33  ;;  %v7550_v40 = vsel %vm2828_vm6, %v7549_v58, %v7548_v60  ;;  %v10543_v28 = vld [vmem:[#allocation17 + $0xe8] ss:$16 sps:$4 sm:$0xff]   ;;  %v7322_v60 = vld [vmem:[#allocation3 + $0x127] sm:$0x1] }
0x127c   :  { %10452 = vmatpush3.bf16.xpose.msra.mxu1 %v10451_v61  ;;  %10116 = vmatprep.mubr.msk.f32.mxu1 %vm10989_vm0, %v10990_v27  ;;  %v7506_v27 = vsel %vm2825_vm5, %v7505_v17, %v7504_v34  ;;  %v7532_v24 = vsel %vm2822_vm4, %v7531_v53, %v7530_v44  ;;  %v7552_v19 = vsel %vm2831_vm7, %v7551_v0, %v7550_v40  ;;  %v10528_v17 = vld [vmem:[#allocation17 + $0x48] ss:$16 sps:$4 sm:$0xff]   ;;  %v10566_v53 = vld [vmem:[#allocation17 + $0x1cc] ss:$16 sps:$4 sm:$0xff]   ;;  %v7326_v40 = vld [vmem:[#allocation3 + $0x137] sm:$0x1] }
0x127d   :  { %10453 = vmatprep.subr.bf16.mxu1 %v10988_v25  ;;  %v7508_v46 = vsel %vm2828_vm6, %v7507_v31, %v7506_v27  ;;  %v7534_v59 = vsel %vm2825_vm5, %v7533_v63, %v7532_v24  ;;  %v10534_v34 = vld [vmem:[#allocation17 + $0x88] ss:$16 sps:$4 sm:$0xff]   ;;  %v12365_v44 = vpack.c.bf16 %v12356_v6, %v12356_v6  ;;  %v7324_v0 = vld [vmem:[#allocation3 + $0x12f] sm:$0x1]  ;;  %v7722_v7 = vrot.slane %v7322_v60, 7 }
0x127e   :  { %v7510_v2 = vsel %vm2831_vm7, %v7509_v42, %v7508_v46  ;;  %v7536_v1 = vsel %vm2828_vm6, %v7535_v48, %v7534_v59  ;;  %v10549_v31 = vld [vmem:[#allocation17 + $0x128] ss:$16 sps:$4 sm:$0xff]   ;;  %v10569_v42 = vld [vmem:[#allocation17 + $0x1ec] ss:$16 sps:$4 sm:$0xff]   ;;  %v7318_v48 = vld [vmem:[#allocation3 + $0x117] sm:$0x1] }
0x127f   :  { %v10457_v61 = vpack.c.bf16 %v7524_v56, %v7510_v2  ;;  %v7538_v3 = vsel %vm2831_vm7, %v7537_v15, %v7536_v1  ;;  %v10552_v33 = vld [vmem:[#allocation17 + $0x148] ss:$16 sps:$4 sm:$0xff]   ;;  %v7313_v56 = vld [vmem:[#allocation3 + $0x103] sm:$0x1]  ;;  %v7325_v1 = vld [vmem:[#allocation3 + $0x133] sm:$0x1] }
0x1280   :  { %v10460_v4 = vpack.c.bf16 %v7552_v19, %v7538_v3  ;;  %v10555_v27 = vld [vmem:[#allocation17 + $0x168] ss:$16 sps:$4 sm:$0xff]   ;;  %v7321_v59 = vld [vmem:[#allocation3 + $0x123] sm:$0x1]  ;;  %v7708_v3 = vrot.slane %v7314_v55, 7  ;;  %v7712_v19 = vrot.slane %v7316_v57, 5 }
0x1281   :  { %v7315_v2 = vld [vmem:[#allocation3 + $0x10b] sm:$0x1]  ;;  %v7319_v58 = vld [vmem:[#allocation3 + $0x11b] sm:$0x1]  ;;  %v7716_v6 = vrot.slane %v7318_v48, 3 }
0x1282   :  { %v7323_v15 = vld [vmem:[#allocation3 + $0x12b] sm:$0x1]  ;;  %v7710_v32 = vrot.slane %v7315_v2, 6  ;;  %v7340_v55 = vld [vmem:[#allocation3 + $0x16f] sm:$0x1] }
0x1283   :  { %v7342_v57 = vld [vmem:[#allocation3 + $0x177] sm:$0x1] }
0x1284   :  { %10455 = vmatpush3.bf16.xpose.msra.mxu1 %v10454_v37  ;;  %v10558_v37 = vld [vmem:[#allocation17 + $0x188] ss:$16 sps:$4 sm:$0xff]  }
0x1285   :  { %10456 = vmatprep.subr.bf16.mxu1 %v10988_v25 }
0x128c   :  { %10458 = vmatpush3.bf16.xpose.msra.mxu1 %v10457_v61  ;;  %v7320_v61 = vld [vmem:[#allocation3 + $0x11f] sm:$0x1] }
0x128d   :  { %10459 = vmatprep.subr.bf16.mxu1 %v10988_v25 }
0x1294   :  { %10461 = vmatpush3.bf16.xpose.msra.mxu1 %v10460_v4  ;;  %v7327_v4 = vld [vmem:[#allocation3 + $0x13b] sm:$0x1] }
0x1295   :  { %8769 = vmatprep.subr.bf16.mxu1 %v10523_v5  ;;  %v7714_v5 = vrot.slane %v7317_v11, 4 }
0x129b   :  { %10117 = vmatmul.mubr.f32.vlgmr.msra.gmra.mrb[28].mxu1 %v7248_v9  ;;  %v7328_v9 = vld [vmem:[#allocation3 + $0x13f] sm:$0x1] }
0x129c   :  { %8770 = vmatpush1.bf16.msra.mxu1 %v10521_v10  ;;  %8801 = vmatprep.mubr.bf16.mxu1 %v12360_v13  ;;  %v7709_v10 = vsel %vm2813_vm1, %v7708_v3, %v7313_v56  ;;  %v7334_v56 = vld [vmem:[#allocation3 + $0x157] sm:$0x1] }
0x129d   :  { %8771 = vmatprep.subr.bf16.mxu1 %v10527_v12  ;;  %v7724_v12 = vrot.slane %v7323_v15, 6 }
0x12a0   :  { %8772 = vmatpush1.bf16.msra.mxu1 %v10525_v14  ;;  %v7726_v14 = vrot.slane %v7324_v0, 5  ;;  %v7336_v0 = vld [vmem:[#allocation3 + $0x15f] sm:$0x1] }
0x12a1   :  { %8773 = vmatprep.subr.bf16.mxu1 %v10530_v16  ;;  %v7728_v16 = vrot.slane %v7325_v1, 4  ;;  %v7344_v1 = vld [vmem:[#allocation3 + $0x17f] sm:$0x1] }
0x12a4   :  { %8774 = vmatpush1.bf16.msra.mxu1 %v10528_v17  ;;  %v7711_v17 = vsel %vm2816_vm2, %v7710_v32, %v7709_v10  ;;  %v7758_v10 = vrot.slane %v7342_v57, 3 }
0x12a5   :  { %8775 = vmatprep.subr.bf16.mxu1 %v10533_v18  ;;  %v7718_v18 = vrot.slane %v7319_v58, 2  ;;  %v7335_v58 = vld [vmem:[#allocation3 + $0x15b] sm:$0x1] }
0x12a6   :  { %v7746_v3 = vrot.slane %v7335_v58, 2 }
0x12a8   :  { %8776 = vmatpush1.bf16.msra.mxu1 %v10531_v8  ;;  %v7723_v8 = vsel %vm2813_vm1, %v7722_v7, %v7321_v59  ;;  %v7343_v59 = vld [vmem:[#allocation3 + $0x17b] sm:$0x1] }
0x12a9   :  { %8777 = vmatprep.subr.bf16.mxu1 %v10536_v20  ;;  %v7730_v20 = vrot.slane %v7326_v40, 3 }
0x12ac   :  { %8778 = vmatpush1.bf16.msra.mxu1 %v10534_v34  ;;  %v7713_v34 = vsel %vm2819_vm3, %v7712_v19, %v7711_v17 }
0x12ad   :  { %8779 = vmatprep.subr.bf16.mxu1 %v10539_v22  ;;  %v7720_v22 = vrot.slane %v7320_v61, 1  ;;  %v7744_v61 = vrot.slane %v7334_v56, 3 }
0x12b0   :  { %8780 = vmatpush1.bf16.msra.mxu1 %v10537_v39  ;;  %v7725_v39 = vsel %vm2816_vm2, %v7724_v12, %v7723_v8  ;;  %v7760_v12 = vrot.slane %v7343_v59, 2  ;;  %v7345_v8 = vld [vmem:[#allocation3 + $0x183] sm:$0x1] }
0x12b1   :  { %8781 = vmatprep.subr.bf16.mxu1 %v10542_v35  ;;  %v7732_v35 = vrot.slane %v7327_v4, 2  ;;  %v7748_v4 = vrot.slane %v7336_v0, 1  ;;  %v7363_v0 = vld [vmem:[#allocation3 + $0x1cb] sm:$0x1] }
0x12b4   :  { %8782 = vmatpush1.bf16.msra.mxu1 %v10540_v23  ;;  %v7715_v23 = vsel %vm2822_vm4, %v7714_v5, %v7713_v34  ;;  %v7754_v5 = vrot.slane %v7340_v55, 5  ;;  %v7360_v55 = vld [vmem:[#allocation3 + $0x1bf] sm:$0x1] }
0x12b5   :  { %8783 = vmatprep.subr.bf16.mxu1 %v10545_v26  ;;  %v7727_v26 = vsel %vm2819_vm3, %v7726_v14, %v7725_v39  ;;  %v7346_v14 = vld [vmem:[#allocation3 + $0x187] sm:$0x1]  ;;  %v7347_v39 = vld [vmem:[#allocation3 + $0x18b] sm:$0x1] }
0x12b8   :  { %8784 = vmatpush1.bf16.msra.mxu1 %v10543_v28  ;;  %v7734_v28 = vrot.slane %v7328_v9, 1 }
0x12b9   :  { %8785 = vmatprep.subr.bf16.mxu1 %v10548_v29  ;;  %v7717_v29 = vsel %vm2825_vm5, %v7716_v6, %v7715_v23 }
0x12bc   :  { %8786 = vmatpush1.bf16.msra.mxu1 %v10546_v21  ;;  %v7729_v21 = vsel %vm2822_vm4, %v7728_v16, %v7727_v26 }
0x12bd   :  { %8787 = vmatprep.subr.bf16.mxu1 %v10551_v30  ;;  %v7719_v30 = vsel %vm2828_vm6, %v7718_v18, %v7717_v29  ;;  %v7762_v18 = vrot.slane %v7344_v1, 1  ;;  %v7350_v29 = vld [vmem:[#allocation3 + $0x197] sm:$0x1] }
0x12c0   :  { %8788 = vmatpush1.bf16.msra.mxu1 %v10549_v31  ;;  %v7731_v31 = vsel %vm2825_vm5, %v7730_v20, %v7729_v21  ;;  %v7764_v20 = vrot.slane %v7346_v14, 7  ;;  %v7351_v21 = vld [vmem:[#allocation3 + $0x19b] sm:$0x1]  ;;  %v7370_v14 = vld [vmem:[#allocation3 + $0x1e7] sm:$0x1] }
0x12c1   :  { %8789 = vmatprep.subr.bf16.mxu1 %v10554_v62  ;;  %v7721_v62 = vsel %vm2831_vm7, %v7720_v22, %v7719_v30 }
0x12c4   :  { %8790 = vmatpush1.bf16.msra.mxu1 %v10552_v33  ;;  %v7733_v33 = vsel %vm2828_vm6, %v7732_v35, %v7731_v31  ;;  %v7348_v35 = vld [vmem:[#allocation3 + $0x18f] sm:$0x1]  ;;  %v7352_v31 = vld [vmem:[#allocation3 + $0x19f] sm:$0x1] }
0x12c5   :  { %8791 = vmatprep.subr.bf16.mxu1 %v10557_v36  ;;  %v7735_v36 = vsel %vm2831_vm7, %v7734_v28, %v7733_v33  ;;  %v7349_v28 = vld [vmem:[#allocation3 + $0x193] sm:$0x1]  ;;  %v7355_v33 = vld [vmem:[#allocation3 + $0x1ab] sm:$0x1] }
0x12c8   :  { %8792 = vmatpush1.bf16.msra.mxu1 %v10555_v27  ;;  %v10463_v27 = vpack.c.bf16 %v7735_v36, %v7721_v62  ;;  %v7354_v62 = vld [vmem:[#allocation3 + $0x1a7] sm:$0x1]  ;;  %v7765_v36 = vsel %vm2813_vm1, %v7764_v20, %v7345_v8  ;;  %v7372_v20 = vld [vmem:[#allocation3 + $0x1ef] sm:$0x1] }
0x12c9   :  { %8793 = vmatprep.subr.bf16.mxu1 %v10560_v50 }
0x12ca   :  { %10464 = vmatpush3.bf16.msra.mxu0 %v10463_v27 }
0x12cb   :  { %10465 = vmatprep.subr.bf16.mxu0 %v10988_v25 }
0x12cc   :  { %8794 = vmatpush1.bf16.msra.mxu1 %v10558_v37 }
0x12cd   :  { %8795 = vmatprep.subr.bf16.mxu1 %v10563_v38 }
0x12d0   :  { %8796 = vmatpush1.bf16.msra.mxu1 %v10561_v54 }
0x12d1   :  { %8797 = vmatprep.subr.bf16.mxu1 %v10566_v53 }
0x12d4   :  { %8798 = vmatpush1.bf16.msra.mxu1 %v10564_v41  ;;  %v7330_v41 = vld [vmem:[#allocation3 + $0x147] sm:$0x1] }
0x12d5   :  { %8799 = vmatprep.subr.bf16.mxu1 %v10569_v42  ;;  %v7338_v42 = vld [vmem:[#allocation3 + $0x167] sm:$0x1] }
0x12d8   :  { %8800 = vmatpush1.bf16.msra.mxu1 %v10567_v43  ;;  %v7331_v43 = vld [vmem:[#allocation3 + $0x14b] sm:$0x1] }
0x12d9   :  { %v7738_v11 = vrot.slane %v7331_v43, 6  ;;  %v7358_v43 = vld [vmem:[#allocation3 + $0x1b7] sm:$0x1] }
0x12da   :  { %v7786_v58 = vrot.slane %v7358_v43, 3 }
0x12db   :  { %8802 = vmatmul.mubr.bf16.vlgmr.msra.gmra.mrb[32].mxu1 %v12365_v44 }
0x134e   :  { %v7238_v45 = vpop.f32.mrb[26].mxu1 }
0x134f   :  { %7242 = vst [vmem:[#allocation7 + $0xa] sm:$0x1] %v7238_v45  ;;  %v9202_v46 = vrot.slane %v7238_v45, 9  ;;  %v10099_v47 = vpop.f32.mrb[27].mxu1  ;;  %v7339_v45 = vld [vmem:[#allocation3 + $0x16b] sm:$0x1] }
0x1350   :  { %v7750_v47 = vrot.slane %v7338_v42, 7  ;;  %v7752_v32 = vrot.slane %v7339_v45, 6  ;;  %v7353_v42 = vld [vmem:[#allocation3 + $0x1a3] sm:$0x1]  ;;  %v7770_v45 = vrot.slane %v7349_v28, 4 }
0x1351   :  { %7247 = vst [vmem:[#allocation7 + $0xe] sm:$0x1] %v9202_v46  ;;  %v7736_v46 = vrot.slane %v7330_v41, 7 }
0x136e   :  { %v7627_v49 = vpop.f32.mrb[28].mxu1 }
0x136f   :  { %v7631_v51 = vmul.f32 0.088388346, %v7627_v49  ;;  %v10118_v63 = vpop.f32.mrb[29].mxu1  ;;  %v7329_v49 = vld [vmem:[#allocation3 + $0x143] sm:$0x1] }
0x1370   :  { %v7337_v63 = vld [vmem:[#allocation3 + $0x163] sm:$0x1]  ;;  %v7737_v2 = vsel %vm2813_vm1, %v7736_v46, %v7329_v49  ;;  %v7772_v46 = vrot.slane %v7350_v29, 3 }
0x1371   :  { %v7632_v52 = vsel %vm11394_vm8, %v7631_v51, -1e+30  ;;  %v7332_v51 = vld [vmem:[#allocation3 + $0x14f] sm:$0x1]  ;;  %v7751_v15 = vsel %vm2813_vm1, %v7750_v47, %v7337_v63  ;;  %v7739_v40 = vsel %vm2816_vm2, %v7738_v11, %v7737_v2  ;;  %v7359_v47 = vld [vmem:[#allocation3 + $0x1bb] sm:$0x1] }
0x1372   :  { %v7633_v24 = vsel %vm3013_vm9, %v7632_v52, -inf  ;;  %v7740_v48 = vrot.slane %v7332_v51, 5  ;;  %v7753_v9 = vsel %vm2816_vm2, %v7752_v32, %v7751_v15  ;;  %v7774_v51 = vrot.slane %v7351_v21, 2  ;;  %v7362_v15 = vld [vmem:[#allocation3 + $0x1c7] sm:$0x1] }
0x1373   :  { %7634 = vmax.xlane.f32.xlu0 %v7633_v24  ;;  %v7333_v24 = vld [vmem:[#allocation3 + $0x153] sm:$0x1]  ;;  %v7755_v17 = vsel %vm2819_vm3, %v7754_v5, %v7753_v9  ;;  %v7778_v63 = vrot.slane %v7354_v62, 7  ;;  %v7776_v11 = vrot.slane %v7352_v31, 1  ;;  %v7364_v32 = vld [vmem:[#allocation3 + $0x1cf] sm:$0x1] }
0x1374   :  { %v7742_v60 = vrot.slane %v7333_v24, 4  ;;  %v7741_v19 = vsel %vm2819_vm3, %v7740_v48, %v7739_v40  ;;  %v7780_v24 = vrot.slane %v7355_v33, 6  ;;  %v7361_v5 = vld [vmem:[#allocation3 + $0x1c3] sm:$0x1]  ;;  %v7375_v31 = vld [vmem:[#allocation3 + $0x1fb] sm:$0x1] }
0x1375   :  { %v7779_v48 = vsel %vm2813_vm1, %v7778_v63, %v7353_v42  ;;  %v7806_v33 = vrot.slane %v7370_v14, 7  ;;  %v10683_v14 = vld [vmem:[#allocation17 + $0x34c] ss:$16 sps:$4 sm:$0xff]  }
0x1376   :  { %v7743_v7 = vsel %vm2822_vm4, %v7742_v60, %v7741_v19  ;;  %v7781_v60 = vsel %vm2816_vm2, %v7780_v24, %v7779_v48  ;;  %v7365_v19 = vld [vmem:[#allocation3 + $0x1d3] sm:$0x1]  ;;  %v10623_v48 = vld [vmem:[#allocation17 + $0x20c] ss:$16 sps:$4 sm:$0xff]  }
0x1377   :  { %v7745_v16 = vsel %vm2825_vm5, %v7744_v61, %v7743_v7  ;;  %v7788_v61 = vrot.slane %v7359_v47, 2  ;;  %v7367_v7 = vld [vmem:[#allocation3 + $0x1db] sm:$0x1]  ;;  %v7816_v47 = vrot.slane %v7375_v31, 2  ;;  %8810 = vmatprep.subr.bf16.mxu1 %v10623_v48  ;;  %v10585_v31 = vld [vmem:[#allocation17 + $0xa0] ss:$16 sps:$4 sm:$0xff]  }
0x1378   :  { %v7747_v34 = vsel %vm2828_vm6, %v7746_v3, %v7745_v16  ;;  %v7790_v3 = vrot.slane %v7360_v55, 1  ;;  %v7371_v16 = vld [vmem:[#allocation3 + $0x1eb] sm:$0x1]  ;;  %v7802_v21 = vrot.slane %v7367_v7, 2  ;;  %v10671_v7 = vld [vmem:[#allocation17 + $0x30c] ss:$16 sps:$4 sm:$0xff]  }
0x1379   :  { %v7749_v23 = vsel %vm2831_vm7, %v7748_v4, %v7747_v34  ;;  %v7373_v34 = vld [vmem:[#allocation3 + $0x1f3] sm:$0x1]  ;;  %v10638_v48 = vld [vmem:[#allocation17 + $0x264] ss:$16 sps:$4 sm:$0xff]  }
0x1400   :  { %v7635_v50 = vpop.xlane.xlu0 %7634 }
0x1401   :  { %v7636_v37 = vsub.f32 %v7632_v52, %v7635_v50  ;;  %v7341_v52 = vld [vmem:[#allocation3 + $0x173] sm:$0x1]  ;;  %v7356_v50 = vld [vmem:[#allocation3 + $0x1af] sm:$0x1] }
0x1402   :  { %v7756_v6 = vrot.slane %v7341_v52, 4  ;;  %v7782_v2 = vrot.slane %v7356_v50, 5 }
0x1403   :  { %v7637_v38 = vmul.f32 1.442695, %v7636_v37  ;;  %v7357_v37 = vld [vmem:[#allocation3 + $0x1b3] sm:$0x1] }
0x1404   :  { %v7757_v22 = vsel %vm2822_vm4, %v7756_v6, %v7755_v17  ;;  %v7784_v56 = vrot.slane %v7357_v37, 4  ;;  %v7783_v40 = vsel %vm2819_vm3, %v7782_v2, %v7781_v60  ;;  %v7366_v6 = vld [vmem:[#allocation3 + $0x1d7] sm:$0x1]  ;;  %v7792_v17 = vrot.slane %v7362_v15, 7  ;;  %v10635_v60 = vld [vmem:[#allocation17 + $0x24c] ss:$16 sps:$4 sm:$0xff]  }
0x1405   :  { %10743 = vpow2.f32 %v7637_v38  ;;  %v7759_v26 = vsel %vm2825_vm5, %v7758_v10, %v7757_v22  ;;  %v7766_v38 = vrot.slane %v7347_v39, 6  ;;  %v7796_v22 = vrot.slane %v7364_v32, 5  ;;  %v10641_v15 = vld [vmem:[#allocation17 + $0x26c] ss:$16 sps:$4 sm:$0xff]   ;;  %v10651_v32 = vld [vmem:[#allocation17 + $0x2a8] ss:$16 sps:$4 sm:$0xff]  }
0x1406   :  { %v7761_v30 = vsel %vm2828_vm6, %v7760_v12, %v7759_v26  ;;  %v7785_v4 = vsel %vm2822_vm4, %v7784_v56, %v7783_v40  ;;  %v7368_v12 = vld [vmem:[#allocation3 + $0x1df] sm:$0x1]  ;;  %v7798_v39 = vrot.slane %v7365_v19, 4  ;;  %v7374_v26 = vld [vmem:[#allocation3 + $0x1f7] sm:$0x1]  ;;  %v7793_v28 = vsel %vm2813_vm1, %v7792_v17, %v7361_v5 }
0x1407   :  { %v7763_v27 = vsel %vm2831_vm7, %v7762_v18, %v7761_v30  ;;  %v7767_v49 = vsel %vm2816_vm2, %v7766_v38, %v7765_v36  ;;  %v7787_v10 = vsel %vm2825_vm5, %v7786_v58, %v7785_v4  ;;  %v7794_v18 = vrot.slane %v7363_v0, 6  ;;  %v10572_v56 = vld [vmem:[#allocation17 + $0x4] ss:$16 sps:$4 sm:$0xff]   ;;  %v10629_v58 = vld [vmem:[#allocation17 + $0x22c] ss:$16 sps:$4 sm:$0xff]  }
0x1408   :  { %v10466_v41 = vpack.c.bf16 %v7763_v27, %v7749_v23  ;;  %v7789_v8 = vsel %vm2828_vm6, %v7788_v61, %v7787_v10  ;;  %v7369_v23 = vld [vmem:[#allocation3 + $0x1e3] sm:$0x1]  ;;  %v7800_v29 = vrot.slane %v7366_v6, 3  ;;  %v7808_v36 = vrot.slane %v7371_v16, 6  ;;  %v7376_v27 = vld [vmem:[#allocation3 + $0x1ff] sm:$0x1] }
0x1409   :  { %v7795_v62 = vsel %vm2816_vm2, %v7794_v18, %v7793_v28  ;;  %v7810_v37 = vrot.slane %v7372_v20, 5  ;;  %v7812_v38 = vrot.slane %v7373_v34, 4  ;;  %v7807_v42 = vsel %vm2813_vm1, %v7806_v33, %v7369_v23  ;;  %v10633_v61 = vld [vmem:[#allocation17 + $0x248] ss:$16 sps:$4 sm:$0xff]   ;;  %v10659_v19 = vld [vmem:[#allocation17 + $0x2cc] ss:$16 sps:$4 sm:$0xff]  }
0x140a   :  { %10467 = vmatpush3.bf16.msra.mxu0 %v10466_v41  ;;  %v7797_v50 = vsel %vm2819_vm3, %v7796_v22, %v7795_v62  ;;  %v7804_v41 = vrot.slane %v7368_v12, 1  ;;  %v7814_v43 = vrot.slane %v7374_v26, 3  ;;  %v7818_v63 = vrot.slane %v7376_v27, 1  ;;  %v10639_v0 = vld [vmem:[#allocation17 + $0x268] ss:$16 sps:$4 sm:$0xff]  }
0x140b   :  { %10468 = vmatprep.subr.bf16.mxu0 %v10988_v25  ;;  %v10645_v40 = vld [vmem:[#allocation17 + $0x288] ss:$16 sps:$4 sm:$0xff]   ;;  %v10665_v5 = vld [vmem:[#allocation17 + $0x2ec] ss:$16 sps:$4 sm:$0xff]   ;;  %v10570_v34 = vld [vmem:[#allocation17] ss:$16 sps:$4 sm:$0xff]  }
0x140c   :  { %v10657_v4 = vld [vmem:[#allocation17 + $0x2c8] ss:$16 sps:$4 sm:$0xff]   ;;  %v10677_v10 = vld [vmem:[#allocation17 + $0x32c] ss:$16 sps:$4 sm:$0xff]   ;;  %v10578_v23 = vld [vmem:[#allocation17 + $0x44] ss:$16 sps:$4 sm:$0xff]  }
0x140d   :  { %v10663_v6 = vld [vmem:[#allocation17 + $0x2e8] ss:$16 sps:$4 sm:$0xff]   ;;  %v10689_v17 = vld [vmem:[#allocation17 + $0x36c] ss:$16 sps:$4 sm:$0xff]   ;;  %v10576_v26 = vld [vmem:[#allocation17 + $0x40] ss:$16 sps:$4 sm:$0xff]  }
0x140e   :  { %v10675_v12 = vld [vmem:[#allocation17 + $0x328] ss:$16 sps:$4 sm:$0xff]   ;;  %v10581_v28 = vld [vmem:[#allocation17 + $0x64] ss:$16 sps:$4 sm:$0xff]  }
0x140f   :  { %v12386_v54 = vpop.eup %10743  ;;  %v10681_v16 = vld [vmem:[#allocation17 + $0x348] ss:$16 sps:$4 sm:$0xff]   ;;  %v10590_v62 = vld [vmem:[#allocation17 + $0xc4] ss:$16 sps:$4 sm:$0xff]  }
0x1410   :  { %v7639_v53 = vsel %vm3013_vm9, %v12386_v54, 0.0  ;;  %v10687_v18 = vld [vmem:[#allocation17 + $0x368] ss:$16 sps:$4 sm:$0xff]   ;;  %v10593_v33 = vld [vmem:[#allocation17 + $0xe4] ss:$16 sps:$4 sm:$0xff]  }
0x1411   :  { %7640 = vadd.xlane.f32.xlu1 %v7639_v53  ;;  %v7768_v53 = vrot.slane %v7348_v35, 5  ;;  %v7791_v35 = vsel %vm2831_vm7, %v7790_v3, %v7789_v8  ;;  %v10653_v3 = vld [vmem:[#allocation17 + $0x2ac] ss:$16 sps:$4 sm:$0xff]   ;;  %v10596_v27 = vld [vmem:[#allocation17 + $0x104] ss:$16 sps:$4 sm:$0xff]  }
0x1413   :  { %v7769_v52 = vsel %vm2819_vm3, %v7768_v53, %v7767_v49  ;;  %v7799_v53 = vsel %vm2822_vm4, %v7798_v39, %v7797_v50  ;;  %v10575_v39 = vld [vmem:[#allocation17 + $0x24] ss:$16 sps:$4 sm:$0xff]   ;;  %v10594_v50 = vld [vmem:[#allocation17 + $0x100] ss:$16 sps:$4 sm:$0xff]  }
0x1414   :  { %v7771_v57 = vsel %vm2822_vm4, %v7770_v45, %v7769_v52  ;;  %v7801_v45 = vsel %vm2825_vm5, %v7800_v29, %v7799_v53  ;;  %v10579_v29 = vld [vmem:[#allocation17 + $0x60] ss:$16 sps:$4 sm:$0xff]   ;;  %v10602_v53 = vld [vmem:[#allocation17 + $0x144] ss:$16 sps:$4 sm:$0xff]  }
0x1415   :  { %v7773_v59 = vsel %vm2825_vm5, %v7772_v46, %v7771_v57  ;;  %v7809_v46 = vsel %vm2816_vm2, %v7808_v36, %v7807_v42  ;;  %v7803_v49 = vsel %vm2828_vm6, %v7802_v21, %v7801_v45  ;;  %v10584_v21 = vld [vmem:[#allocation17 + $0x84] ss:$16 sps:$4 sm:$0xff]   ;;  %v10591_v36 = vld [vmem:[#allocation17 + $0xe0] ss:$16 sps:$4 sm:$0xff]  }
0x1416   :  { %v7775_v1 = vsel %vm2828_vm6, %v7774_v51, %v7773_v59  ;;  %v7811_v51 = vsel %vm2819_vm3, %v7810_v37, %v7809_v46  ;;  %v7805_v55 = vsel %vm2831_vm7, %v7804_v41, %v7803_v49  ;;  %v10627_v59 = vld [vmem:[#allocation17 + $0x228] ss:$16 sps:$4 sm:$0xff]   ;;  %v10599_v37 = vld [vmem:[#allocation17 + $0x124] ss:$16 sps:$4 sm:$0xff]   ;;  %v10600_v41 = vld [vmem:[#allocation17 + $0x140] ss:$16 sps:$4 sm:$0xff]  }
0x1417   :  { %v7777_v9 = vsel %vm2831_vm7, %v7776_v11, %v7775_v1  ;;  %v7813_v24 = vsel %vm2822_vm4, %v7812_v38, %v7811_v51  ;;  %v10621_v11 = vld [vmem:[#allocation17 + $0x208] ss:$16 sps:$4 sm:$0xff]   ;;  %v10647_v1 = vld [vmem:[#allocation17 + $0x28c] ss:$16 sps:$4 sm:$0xff]   ;;  %v10597_v38 = vld [vmem:[#allocation17 + $0x120] ss:$16 sps:$4 sm:$0xff]  }
0x1418   :  { %v10469_v30 = vpack.c.bf16 %v7791_v35, %v7777_v9  ;;  %v7815_v52 = vsel %vm2825_vm5, %v7814_v43, %v7813_v24  ;;  %8811 = vmatpush1.bf16.msra.mxu1 %v10621_v11  ;;  %v10669_v9 = vld [vmem:[#allocation17 + $0x308] ss:$16 sps:$4 sm:$0xff]   ;;  %v10573_v35 = vld [vmem:[#allocation17 + $0x20] ss:$16 sps:$4 sm:$0xff]   ;;  %v10605_v42 = vld [vmem:[#allocation17 + $0x164] ss:$16 sps:$4 sm:$0xff]  }
0x1419   :  { %v7817_v2 = vsel %vm2828_vm6, %v7816_v47, %v7815_v52  ;;  %8812 = vmatprep.subr.bf16.mxu1 %v10629_v58  ;;  %v10603_v43 = vld [vmem:[#allocation17 + $0x160] ss:$16 sps:$4 sm:$0xff]   ;;  %v10608_v45 = vld [vmem:[#allocation17 + $0x184] ss:$16 sps:$4 sm:$0xff]  }
0x141a   :  { %10470 = vmatpush3.bf16.msra.mxu0 %v10469_v30  ;;  %v10582_v30 = vld [vmem:[#allocation17 + $0x80] ss:$16 sps:$4 sm:$0xff]   ;;  %v10611_v47 = vld [vmem:[#allocation17 + $0x1a4] ss:$16 sps:$4 sm:$0xff]  }
0x141b   :  { %10471 = vmatprep.subr.bf16.mxu0 %v10988_v25  ;;  %v7819_v25 = vsel %vm2831_vm7, %v7818_v63, %v7817_v2  ;;  %v10606_v46 = vld [vmem:[#allocation17 + $0x180] ss:$16 sps:$4 sm:$0xff]   ;;  %v10614_v51 = vld [vmem:[#allocation17 + $0x1c4] ss:$16 sps:$4 sm:$0xff]  }
0x141c   :  { %v10472_v57 = vpack.c.bf16 %v7819_v25, %v7805_v55  ;;  %8813 = vmatpush1.bf16.msra.mxu1 %v10627_v59  ;;  %v10609_v49 = vld [vmem:[#allocation17 + $0x1a0] ss:$16 sps:$4 sm:$0xff]   ;;  %v10617_v24 = vld [vmem:[#allocation17 + $0x1e4] ss:$16 sps:$4 sm:$0xff]  }
0x141d   :  { %8814 = vmatprep.subr.bf16.mxu1 %v10635_v60  ;;  %v10612_v63 = vld [vmem:[#allocation17 + $0x1c0] ss:$16 sps:$4 sm:$0xff]   ;;  %v10620_v52 = vld [vmem:[#allocation17 + $0x204] ss:$16 sps:$4 sm:$0xff]  }
0x141e   :  { %10473 = vmatpush3.bf16.msra.mxu0 %v10472_v57  ;;  %v10615_v55 = vld [vmem:[#allocation17 + $0x1e0] ss:$16 sps:$4 sm:$0xff]   ;;  %v10626_v25 = vld [vmem:[#allocation17 + $0x224] ss:$16 sps:$4 sm:$0xff]  }
0x141f   :  { %8687 = vmatprep.subr.bf16.mxu0 %v10572_v56  ;;  %v10618_v2 = vld [vmem:[#allocation17 + $0x200] ss:$16 sps:$4 sm:$0xff]   ;;  %v10632_v57 = vld [vmem:[#allocation17 + $0x244] ss:$16 sps:$4 sm:$0xff]  }
0x1420   :  { %8815 = vmatpush1.bf16.msra.mxu1 %v10633_v61  ;;  %v10624_v56 = vld [vmem:[#allocation17 + $0x220] ss:$16 sps:$4 sm:$0xff]   ;;  %v10644_v59 = vld [vmem:[#allocation17 + $0x284] ss:$16 sps:$4 sm:$0xff]  }
0x1421   :  { %8816 = vmatprep.subr.bf16.mxu1 %v10641_v15  ;;  %v10630_v11 = vld [vmem:[#allocation17 + $0x240] ss:$16 sps:$4 sm:$0xff]   ;;  %v10650_v61 = vld [vmem:[#allocation17 + $0x2a4] ss:$16 sps:$4 sm:$0xff]  }
0x1422   :  { %v10636_v58 = vld [vmem:[#allocation17 + $0x260] ss:$16 sps:$4 sm:$0xff]  }
0x1423   :  { %v10642_v60 = vld [vmem:[#allocation17 + $0x280] ss:$16 sps:$4 sm:$0xff]  }
0x1424   :  { %8817 = vmatpush1.bf16.msra.mxu1 %v10639_v0  ;;  %v10648_v15 = vld [vmem:[#allocation17 + $0x2a0] ss:$16 sps:$4 sm:$0xff]   ;;  %v10695_v0 = vld [vmem:[#allocation17 + $0x38c] ss:$16 sps:$4 sm:$0xff]  }
0x1425   :  { %8818 = vmatprep.subr.bf16.mxu1 %v10647_v1  ;;  %v10693_v1 = vld [vmem:[#allocation17 + $0x388] ss:$16 sps:$4 sm:$0xff]  }
0x1428   :  { %8819 = vmatpush1.bf16.msra.mxu1 %v10645_v40  ;;  %v10654_v40 = vld [vmem:[#allocation17 + $0x2c0] ss:$16 sps:$4 sm:$0xff]  }
0x1429   :  { %8820 = vmatprep.subr.bf16.mxu1 %v10653_v3  ;;  %v10662_v3 = vld [vmem:[#allocation17 + $0x2e4] ss:$16 sps:$4 sm:$0xff]  }
0x142c   :  { %8821 = vmatpush1.bf16.msra.mxu1 %v10651_v32  ;;  %v10699_v32 = vld [vmem:[#allocation17 + $0x3a8] ss:$16 sps:$4 sm:$0xff]  }
0x142d   :  { %8822 = vmatprep.subr.bf16.mxu1 %v10659_v19  ;;  %v10701_v19 = vld [vmem:[#allocation17 + $0x3ac] ss:$16 sps:$4 sm:$0xff]  }
0x1430   :  { %8823 = vmatpush1.bf16.msra.mxu1 %v10657_v4  ;;  %v10707_v4 = vld [vmem:[#allocation17 + $0x3cc] ss:$16 sps:$4 sm:$0xff]  }
0x1431   :  { %8824 = vmatprep.subr.bf16.mxu1 %v10665_v5  ;;  %v10660_v5 = vld [vmem:[#allocation17 + $0x2e0] ss:$16 sps:$4 sm:$0xff]  }
0x1434   :  { %8825 = vmatpush1.bf16.msra.mxu1 %v10663_v6  ;;  %v10668_v6 = vld [vmem:[#allocation17 + $0x304] ss:$16 sps:$4 sm:$0xff]  }
0x1435   :  { %8826 = vmatprep.subr.bf16.mxu1 %v10671_v7  ;;  %v10705_v7 = vld [vmem:[#allocation17 + $0x3c8] ss:$16 sps:$4 sm:$0xff]  }
0x1438   :  { %8827 = vmatpush1.bf16.msra.mxu1 %v10669_v9  ;;  %v10713_v9 = vld [vmem:[#allocation17 + $0x3ec] ss:$16 sps:$4 sm:$0xff]  }
0x1439   :  { %8828 = vmatprep.subr.bf16.mxu1 %v10677_v10  ;;  %v10666_v10 = vld [vmem:[#allocation17 + $0x300] ss:$16 sps:$4 sm:$0xff]  }
0x143c   :  { %8829 = vmatpush1.bf16.msra.mxu1 %v10675_v12  ;;  %v10674_v12 = vld [vmem:[#allocation17 + $0x324] ss:$16 sps:$4 sm:$0xff]  }
0x143d   :  { %8830 = vmatprep.subr.bf16.mxu1 %v10683_v14  ;;  %v10711_v14 = vld [vmem:[#allocation17 + $0x3e8] ss:$16 sps:$4 sm:$0xff]  }
0x1440   :  { %8831 = vmatpush1.bf16.msra.mxu1 %v10681_v16  ;;  %v10672_v16 = vld [vmem:[#allocation17 + $0x320] ss:$16 sps:$4 sm:$0xff]  }
0x1441   :  { %8832 = vmatprep.subr.bf16.mxu1 %v10689_v17  ;;  %v10680_v17 = vld [vmem:[#allocation17 + $0x344] ss:$16 sps:$4 sm:$0xff]  }
0x1444   :  { %8833 = vmatpush1.bf16.msra.mxu1 %v10687_v18  ;;  %v10678_v18 = vld [vmem:[#allocation17 + $0x340] ss:$16 sps:$4 sm:$0xff]  }
0x1445   :  { %8834 = vmatprep.subr.bf16.mxu1 %v10695_v0 }
0x1448   :  { %8835 = vmatpush1.bf16.msra.mxu1 %v10693_v1 }
0x1449   :  { %8836 = vmatprep.subr.bf16.mxu1 %v10701_v19 }
0x144c   :  { %8837 = vmatpush1.bf16.msra.mxu1 %v10699_v32 }
0x144d   :  { %8838 = vmatprep.subr.bf16.mxu1 %v10707_v4 }
0x1450   :  { %8839 = vmatpush1.bf16.msra.mxu1 %v10705_v7 }
0x1451   :  { %8840 = vmatprep.subr.bf16.mxu1 %v10713_v9 }
0x1454   :  { %8841 = vmatpush1.bf16.msra.mxu1 %v10711_v14 }
0x149e   :  { %v7641_v8 = vpop.xlane.xlu1 %7640 }
0x149f   :  { %10745 = vrcp.f32 %v7641_v8  ;;  %v10686_v8 = vld [vmem:[#allocation17 + $0x364] ss:$16 sps:$4 sm:$0xff]  }
0x14a9   :  { %v10746_v20 = vpop.eup %10745 }
0x14aa   :  { %v7643_v22 = vmul.f32 %v10746_v20, %v12386_v54  ;;  %v10587_v54 = vld [vmem:[#allocation17 + $0xa4] ss:$16 sps:$4 sm:$0xff]   ;;  %v10684_v20 = vld [vmem:[#allocation17 + $0x360] ss:$16 sps:$4 sm:$0xff]  }
0x14ac   :  { %10136 = vmatmul.mubr.msk.f32.vlgmr.msra.gmra.mrb[28].mxu0 %vm3209_vm10, %v7643_v22  ;;  %v10690_v22 = vld [vmem:[#allocation17 + $0x380] ss:$16 sps:$4 sm:$0xff]  }
0x14ad   :  { %8688 = vmatpush1.bf16.msra.mxu0 %v10570_v34  ;;  %8719 = vmatprep.mubr.bf16.mxu0 %v12360_v13  ;;  %v10588_v13 = vld [vmem:[#allocation17 + $0xc0] ss:$16 sps:$4 sm:$0xff]   ;;  %v10692_v34 = vld [vmem:[#allocation17 + $0x384] ss:$16 sps:$4 sm:$0xff]  }
0x14ae   :  { %8689 = vmatprep.subr.bf16.mxu0 %v10575_v39  ;;  %v10698_v39 = vld [vmem:[#allocation17 + $0x3a4] ss:$16 sps:$4 sm:$0xff]  }
0x14b1   :  { %8690 = vmatpush1.bf16.msra.mxu0 %v10573_v35  ;;  %v10696_v35 = vld [vmem:[#allocation17 + $0x3a0] ss:$16 sps:$4 sm:$0xff]  }
0x14b2   :  { %8691 = vmatprep.subr.bf16.mxu0 %v10578_v23  ;;  %v10704_v23 = vld [vmem:[#allocation17 + $0x3c4] ss:$16 sps:$4 sm:$0xff]  }
0x14b5   :  { %8692 = vmatpush1.bf16.msra.mxu0 %v10576_v26  ;;  %v10702_v26 = vld [vmem:[#allocation17 + $0x3c0] ss:$16 sps:$4 sm:$0xff]  }
0x14b6   :  { %8693 = vmatprep.subr.bf16.mxu0 %v10581_v28  ;;  %v10710_v28 = vld [vmem:[#allocation17 + $0x3e4] ss:$16 sps:$4 sm:$0xff]  }
0x14b9   :  { %8694 = vmatpush1.bf16.msra.mxu0 %v10579_v29  ;;  %v10708_v29 = vld [vmem:[#allocation17 + $0x3e0] ss:$16 sps:$4 sm:$0xff]  }
0x14ba   :  { %8695 = vmatprep.subr.bf16.mxu0 %v10584_v21 }
0x14bd   :  { %8696 = vmatpush1.bf16.msra.mxu0 %v10582_v30 }
0x14be   :  { %8697 = vmatprep.subr.bf16.mxu0 %v10587_v54 }
0x14c1   :  { %8698 = vmatpush1.bf16.msra.mxu0 %v10585_v31 }
0x14c2   :  { %8699 = vmatprep.subr.bf16.mxu0 %v10590_v62 }
0x14c5   :  { %8700 = vmatpush1.bf16.msra.mxu0 %v10588_v13 }
0x14c6   :  { %8701 = vmatprep.subr.bf16.mxu0 %v10593_v33 }
0x14c9   :  { %8702 = vmatpush1.bf16.msra.mxu0 %v10591_v36 }
0x14ca   :  { %8703 = vmatprep.subr.bf16.mxu0 %v10596_v27 }
0x14cd   :  { %8704 = vmatpush1.bf16.msra.mxu0 %v10594_v50 }
0x14ce   :  { %8705 = vmatprep.subr.bf16.mxu0 %v10599_v37 }
0x14d1   :  { %8706 = vmatpush1.bf16.msra.mxu0 %v10597_v38 }
0x14d2   :  { %8707 = vmatprep.subr.bf16.mxu0 %v10602_v53 }
0x14d5   :  { %8708 = vmatpush1.bf16.msra.mxu0 %v10600_v41 }
0x14d6   :  { %8709 = vmatprep.subr.bf16.mxu0 %v10605_v42 }
0x14d9   :  { %8710 = vmatpush1.bf16.msra.mxu0 %v10603_v43 }
0x14da   :  { %8711 = vmatprep.subr.bf16.mxu0 %v10608_v45 }
0x14dd   :  { %8712 = vmatpush1.bf16.msra.mxu0 %v10606_v46 }
0x14de   :  { %8713 = vmatprep.subr.bf16.mxu0 %v10611_v47 }
0x14e1   :  { %8714 = vmatpush1.bf16.msra.mxu0 %v10609_v49 }
0x14e2   :  { %8715 = vmatprep.subr.bf16.mxu0 %v10614_v51 }
0x14e5   :  { %8716 = vmatpush1.bf16.msra.mxu0 %v10612_v63 }
0x14e6   :  { %8717 = vmatprep.subr.bf16.mxu0 %v10617_v24 }
0x14e9   :  { %8718 = vmatpush1.bf16.msra.mxu0 %v10615_v55 }
0x14ea   :  { %8728 = vmatprep.subr.bf16.mxu0 %v10620_v52 }
0x14ec   :  { %8720 = vmatmul.mubr.bf16.vlgmr.msra.gmra.mrb[32].mxu0 %v12365_v44  ;;  %v10656_v44 = vld [vmem:[#allocation17 + $0x2c4] ss:$16 sps:$4 sm:$0xff]  }
0x14ed   :  { %8729 = vmatpush1.bf16.msra.mxu0 %v10618_v2 }
0x14ee   :  { %8730 = vmatprep.subr.bf16.mxu0 %v10626_v25 }
0x14f1   :  { %8731 = vmatpush1.bf16.msra.mxu0 %v10624_v56 }
0x14f2   :  { %8732 = vmatprep.subr.bf16.mxu0 %v10632_v57 }
0x14f5   :  { %8733 = vmatpush1.bf16.msra.mxu0 %v10630_v11 }
0x14f6   :  { %8734 = vmatprep.subr.bf16.mxu0 %v10638_v48 }
0x14f9   :  { %8735 = vmatpush1.bf16.msra.mxu0 %v10636_v58 }
0x14fa   :  { %8736 = vmatprep.subr.bf16.mxu0 %v10644_v59 }
0x14fd   :  { %8737 = vmatpush1.bf16.msra.mxu0 %v10642_v60 }
0x14fe   :  { %8738 = vmatprep.subr.bf16.mxu0 %v10650_v61 }
0x1501   :  { %8739 = vmatpush1.bf16.msra.mxu0 %v10648_v15 }
0x1502   :  { %8740 = vmatprep.subr.bf16.mxu0 %v10656_v44 }
0x1505   :  { %8741 = vmatpush1.bf16.msra.mxu0 %v10654_v40 }
0x1506   :  { %8742 = vmatprep.subr.bf16.mxu0 %v10662_v3 }
0x1509   :  { %8743 = vmatpush1.bf16.msra.mxu0 %v10660_v5 }
0x150a   :  { %8744 = vmatprep.subr.bf16.mxu0 %v10668_v6 }
0x150d   :  { %8745 = vmatpush1.bf16.msra.mxu0 %v10666_v10 }
0x150e   :  { %8746 = vmatprep.subr.bf16.mxu0 %v10674_v12 }
0x1511   :  { %8747 = vmatpush1.bf16.msra.mxu0 %v10672_v16 }
0x1512   :  { %8748 = vmatprep.subr.bf16.mxu0 %v10680_v17 }
0x1515   :  { %8749 = vmatpush1.bf16.msra.mxu0 %v10678_v18 }
0x1516   :  { %8750 = vmatprep.subr.bf16.mxu0 %v10686_v8 }
0x1519   :  { %8751 = vmatpush1.bf16.msra.mxu0 %v10684_v20 }
0x151a   :  { %8752 = vmatprep.subr.bf16.mxu0 %v10692_v34 }
0x151d   :  { %8753 = vmatpush1.bf16.msra.mxu0 %v10690_v22 }
0x151e   :  { %8754 = vmatprep.subr.bf16.mxu0 %v10698_v39 }
0x1521   :  { %8755 = vmatpush1.bf16.msra.mxu0 %v10696_v35 }
0x1522   :  { %8756 = vmatprep.subr.bf16.mxu0 %v10704_v23 }
0x1525   :  { %8757 = vmatpush1.bf16.msra.mxu0 %v10702_v26 }
0x1526   :  { %8758 = vmatprep.subr.bf16.mxu0 %v10710_v28 }
0x1529   :  { %8759 = vmatpush1.bf16.msra.mxu0 %v10708_v29 }
0x157f   :  { %v7897_v21 = vpop.f32.mrb[28].mxu0 }
0x1580   :  { %7901 = vst [vmem:[#allocation7 + $0xb] sm:$0x1] %v7897_v21  ;;  %v9204_v30 = vrot.slane %v7897_v21, 9  ;;  %v10137_v54 = vpop.f32.mrb[29].mxu0 }
0x1582   :  { %7906 = vst [vmem:[#allocation7 + $0xf] sm:$0x1] %v9204_v30 }
0x1589   :  { %v7908_v31 = vld [vmem:[#allocation7 + $0x8] sm:$0xff] }
0x158a   :  { %v7912_v62 = vcombine.high %v7908_v31, %v7908_v31  ;;  %v7917_v33 = vpack.c.bf16 %v7908_v31, %v7908_v31 }
0x158c   :  { %v7918_v13 = vpack.c.bf16 %v7912_v62, %v7912_v62 }
0x158e   :  { %8760 = vmatprep.mubr.bf16.mxu0 %v7918_v13  ;;  %8842 = vmatprep.mubr.bf16.mxu1 %v7918_v13 }
0x158f   :  { %8761 = vmatmul.mubr.bf16.vlgmr.msra.gmra.mrb[32].mxu0 %v7917_v33  ;;  %8843 = vmatmul.mubr.bf16.vlgmr.msra.gmra.mrb[32].mxu1 %v7917_v33 }
0x1590   :  { %10900 = shalt.err (!%p10897_p13)  }
0x1591   :  { %s10901_s15 = scalar_lea.hbm %s2600_s10, 128  ;;  %s10903_s28 = scalar_lea.hbm %s12481_s8, 8192 }
0x1592   :  { %p10902_p0 = scmp.ne.s32.totalorder %s2600_s10, %s10901_s15  ;;  %p10904_p1 = scmp.lt.u32.totalorder %s2600_s10, %s12481_s8 }
0x1593   :  { %p10905_p2 = scmp.lt.u32.totalorder %s10903_s28, %s10901_s15  ;;  %p10907_p4 = scmp.lt.u32.totalorder %s10901_s15, %s2600_s10 }
0x1595   :  { %p10906_p3 = por %p10905_p2, %p10904_p1 }
0x1597   :  { %p10908_p5 = por %p10907_p4, %p10906_p3 }
0x1599   :  { %p10909_p6 = pnand %p10908_p5, %p10902_p0 }
0x159b   :  { %10912 = shalt.err (!%p10909_p6)  }
0x159c   :  { %s10995_s20 = smov 4096   ;;  %s2608_s22 = scalar_lea.hbm %s12482_s9, %s9337_s27 }
0x159d   :  { %2606 = dma.vmem_to_hbm [thread:$0]  %s2604_s30, 128, %s2600_s10, [#allocation8 + $0x2], %s10983_s1, %s10995_s20, %s10984_s12 }
0x159e   :  { %s10996_s3 = smov [#allocation6]  }
0x159f   :  { %s2611_s14 = sshll.u32 %s10996_s3, 4  ;;  %s2612_s14 = int_to_ptr.vmem [resolvable:$true] %s2611_s14 }
0x15a0   :  { %s10913_s23 = scalar_lea.vmem %s2612_s14, 128  ;;  %p10918_p8 = scmp.lt.s32.totalorder %s2612_s14, %s2612_s14 }
0x15a1   :  { %p10914_p7 = scmp.ne.s32.totalorder %s2612_s14, %s10913_s23  ;;  %p10919_p9 = scmp.lt.s32.totalorder %s10913_s23, %s10913_s23 }
0x15a3   :  { %p10920_p10 = por %p10919_p9, %p10918_p8 }
0x15a5   :  { %p10921_p11 = pnand %p10920_p10, %p10914_p7 }
0x15a7   :  { %10924 = shalt.err (!%p10921_p11)  }
0x15a8   :  { %s10925_s8 = scalar_lea.hbm %s2608_s22, 128  ;;  %s10927_s4 = scalar_lea.hbm %s12482_s9, 8192 }
0x15a9   :  { %p10926_p12 = scmp.ne.s32.totalorder %s2608_s22, %s10925_s8  ;;  %p10928_p13 = scmp.lt.u32.totalorder %s2608_s22, %s12482_s9 }
0x15aa   :  { %p10929_p0 = scmp.lt.u32.totalorder %s10927_s4, %s10925_s8  ;;  %p10931_p2 = scmp.lt.u32.totalorder %s10925_s8, %s2608_s22 }
0x15ac   :  { %p10930_p1 = por %p10929_p0, %p10928_p13 }
0x15ae   :  { %p10932_p3 = por %p10931_p2, %p10930_p1 }
0x15b0   :  { %p10933_p4 = pnand %p10932_p3, %p10926_p12 }
0x15b2   :  { %10936 = shalt.err (!%p10933_p4)  }
0x15b3   :  { %2614 = dma.vmem_to_hbm [thread:$0]  %s2612_s14, 128, %s2608_s22, [#allocation8 + $0x3], %s10983_s1, %s10995_s20, %s10984_s12 }
0x1662   :  { %v8762_v36 = vpop.f32.mrb[32].mxu0  ;;  %v8844_v27 = vpop.f32.mrb[32].mxu1 }
0x1663   :  { %v8764_v50 = vpop.f32.mrb[33].mxu0  ;;  %v8846_v37 = vpop.f32.mrb[33].mxu1 }
0x1664   :  { %v8855_v38 = vcombine.low %v8762_v36, %v8764_v50  ;;  %v8856_v53 = vcombine.low %v8844_v27, %v8846_v37  ;;  %v8766_v41 = vpop.f32.mrb[34].mxu0  ;;  %v8848_v42 = vpop.f32.mrb[34].mxu1 }
0x1665   :  { %v8767_v43 = vpop.f32.mrb[35].mxu0  ;;  %v8849_v45 = vpop.f32.mrb[35].mxu1 }
0x1666   :  { %8859 = vst [vmem:[#allocation19] sm:$0xff] %v8855_v38  ;;  %8860 = vst [vmem:[#allocation19 + $0x8] sm:$0xff] %v8856_v53 }
0x1667   :  { %10971 = dma.done.wait [#allocation8 + $0x2], 128 }
0x1668   :  { %10972 = vsyncadd [#allocation8 + $0x2], 4294967168 }
0x1669   :  { %10973 = dma.done.wait [#allocation8 + $0x3], 128 }
0x166a   :  { %10974 = vsyncadd [#allocation8 + $0x3], 4294967168  ;;  %s10997_s9 = smov [#allocation19]  }
0x166b   :  { %s8874_s26 = sshll.u32 %s10997_s9, 4  ;;  %s8875_s26 = int_to_ptr.vmem [resolvable:$true] %s8874_s26 }
0x166c   :  { %s10937_s1 = scalar_lea.vmem %s8875_s26, 256  ;;  %p10942_p6 = scmp.lt.s32.totalorder %s8875_s26, %s8875_s26 }
0x166d   :  { %p10938_p5 = scmp.ne.s32.totalorder %s8875_s26, %s10937_s1  ;;  %p10943_p7 = scmp.lt.s32.totalorder %s10937_s1, %s10937_s1 }
0x166f   :  { %p10944_p8 = por %p10943_p7, %p10942_p6 }
0x1671   :  { %p10945_p9 = pnand %p10944_p8, %p10938_p5 }
0x1673   :  { %10948 = shalt.err (!%p10945_p9)
}
0x1674   :  { %s10949_s29 = scalar_lea.hbm %s12480_s7, 256 }
0x1675   :  { %p10950_p10 = scmp.ne.s32.totalorder %s12480_s7, %s10949_s29  ;;  %p10953_p11 = scmp.lt.u32.totalorder %s10949_s29, %s12480_s7 }
0x1677   :  { %p10955_p12 = pnand %p10953_p11, %p10950_p10 }
0x1679   :  { %10958 = shalt.err (!%p10955_p12)
}
0x167a   :  { %8877 = dma.vmem_to_hbm [thread:$0]  %s8875_s26, 256, %s12480_s7, [#allocation11]  }
0x167b   :  { %10975 = dma.done.wait [#allocation11], 256  }
0x167c   :  { %10976 = vsyncadd [#allocation11], 4294967040 }
0x167d   :  { %8881 = vsyncpa [#allocation10], 1 }
0x167e   :  { %8882 = vsyncpa [#allocation15], 1 }
0x167f   :  { %8883 = vsyncpa [#allocation18], 1 }
0x1680   :  { %8884 = vsyncpa [#allocation11], 1 }
0x1681   :  { %8885 = vsyncpa [#allocation12], 1 }
0x1682   :  { %8886 = vsyncmov [#allocation8] }
0x1685   :  { %s8887_s16 = vpop.sfrf %8886 }
0x1686   :  { %p9333_p13 = scmp.ne.s32.totalorder %s8887_s16, 0 }
0x1688   :  { %8891 = shalt.err (%p9333_p13)  }
0x1689   :  { %8893 = vsyncmov [#allocation8 + $0x1] }
0x168c   :  { %s8894_s17 = vpop.sfrf %8893 }
0x168d   :  { %p9334_p0 = scmp.ne.s32.totalorder %s8894_s17, 0 }
0x168f   :  { %8898 = shalt.err (%p9334_p0)  }
0x1690   :  { %8900 = vsyncmov [#allocation8 + $0x2] }
0x1693   :  { %s8901_s28 = vpop.sfrf %8900 }
0x1694   :  { %p9335_p1 = scmp.ne.s32.totalorder %s8901_s28, 0 }
0x1696   :  { %8905 = shalt.err (%p9335_p1)  }
0x1697   :  { %8907 = vsyncmov [#allocation8 + $0x3] }
0x169a   :  { %s8908_s7 = vpop.sfrf %8907 }
0x169b   :  { %p9336_p2 = scmp.ne.s32.totalorder %s8908_s7, 0 }
0x169d   :  { %8912 = shalt.err (%p9336_p2)  }

</bundles_post_ra>
